<compile_context>
chip_gen: v6e
topology: v6e:2x2x1
jax: 0.10.0
libtpu: 0.0.40
codegen_flags: <defaults>
</compile_context>

<pallas_src>
import jax
import jax.numpy as jnp
import numpy as np
from jax.experimental import pallas as pl
from jax.experimental.pallas import tpu as pltpu

EPS = 1e-5  # PyTorch GroupNorm default eps


# ----------------------------------------------------------------------------
# Fused ShareNet kernel (one batch element per grid step)
# ----------------------------------------------------------------------------
def _sharenet_kernel(x_ref, w_ref, g_ref, b_ref, o_ref, act_ref):
    # x_ref:   (H, W*C)             packed input sample, element [h, w*C + c]
    # w_ref:   (22, 3, W*C, W*C)    banded conv weights, one (3, WC, WC) entry
    #                               per (layer, concat-source) pair
    # g_ref:   (2, 1, W*C)          GroupNorm gamma per Dense block (tiled W times)
    # b_ref:   (2, 1, W*C)          GroupNorm beta  per Dense block (tiled W times)
    # o_ref:   (H, W*C)             packed output sample
    # act_ref: (5, H+2, W*C)        VMEM scratch: row-padded packed activations
    #                               slot 0 = block input, slots 1..4 = x1_2..x1_5
    H, WC = o_ref.shape

    def conv(src_slots, w_base):
        # 3x3 conv (padding=1, no bias) over the (possibly concatenated) sources.
        acc = jnp.zeros((H, WC), jnp.float32)
        for si, slot in enumerate(src_slots):
            for dy in range(3):
                acc = acc + jnp.dot(
                    act_ref[slot, dy:dy + H, :],        # (H, WC) row-shifted slab
                    w_ref[w_base + si, dy],             # (WC, WC) banded weights
                    preferred_element_type=jnp.float32,
                )
        return acc

    def gn_relu(y, blk):
        # GroupNorm(num_groups=1): normalize over all (C, H, W) of this sample.
        mean = jnp.mean(y)
        var = jnp.mean((y - mean) ** 2)
        inv = jax.lax.rsqrt(var + EPS)
        out = (y - mean) * inv * g_ref[blk] + b_ref[blk]
        return jnp.maximum(out, 0.0)

    def dense_block(blk, w_base):
        # Slot 0 already holds the (row-padded) block input.
        x2 = gn_relu(conv([0], w_base + 0), blk)
        act_ref[1, 1:H + 1, :] = x2
        x3 = gn_relu(conv([1], w_base + 1), blk)
        act_ref[2, 1:H + 1, :] = x3
        x4 = gn_relu(conv([1, 2], w_base + 2), blk)          # cat(x1_2, x1_3)
        act_ref[3, 1:H + 1, :] = x4
        x5 = gn_relu(conv([1, 2, 3], w_base + 4), blk)       # cat(x1_2..x1_4)
        act_ref[4, 1:H + 1, :] = x5
        x6 = gn_relu(conv([1, 2, 3, 4], w_base + 7), blk)    # cat(x1_2..x1_5)
        return x6

    # Zero the scratch once: rows 0 and H+1 of every slot stay zero (the
    # H-direction conv halo); rows 1..H are always fully overwritten.
    act_ref[...] = jnp.zeros_like(act_ref)

    x_in = x_ref[...].astype(jnp.float32)
    act_ref[0, 1:H + 1, :] = x_in

    share1 = dense_block(0, 0)                 # Dense s1
    act_ref[0, 1:H + 1, :] = share1 + x_in     # residual -> input of s2
    share2 = dense_block(1, 11)                # Dense s2

    o_ref[...] = share2.astype(o_ref.dtype)


# ----------------------------------------------------------------------------
# Host-side weight preprocessing: conv taps -> block-banded lane matrices
# ----------------------------------------------------------------------------
def _build_banded_part(w9_part, W):
    """w9_part: (9, Cin_part, Cout), tap index = dy*3 + dx.

    Returns (3, W*Cin_part, W*Cout) where, for each kernel row dy,
      B[dy][u*Cin + ci, w*Cout + co] = w9_part[dy*3 + dx, ci, co]  with
      dx = u - w + 1 (and 0 outside the band) — i.e. the dx taps and the
      W-direction zero padding are baked into a banded matrix, so the conv
      becomes  out[h] = sum_dy  x_rows[h+dy] @ B[dy]  on packed (h, w*C) data.
    """
    c_in, c_out = w9_part.shape[1], w9_part.shape[2]
    mats = []
    for dy in range(3):
        m = jnp.zeros((W, c_in, W, c_out), jnp.float32)
        for dx in range(3):
            # e[u, w] = 1  iff  u = w + dx - 1
            e = jnp.eye(W, W, k=1 - dx, dtype=jnp.float32)
            m = m + jnp.einsum("uw,io->uiwo", e, w9_part[dy * 3 + dx])
        mats.append(m.reshape(W * c_in, W * c_out))
    return jnp.stack(mats)


def _build_dense_banded(p, W):
    """One Dense block -> (11, 3, W*C, W*C): one banded tensor per
    (layer, concat-source) pair, so concatenation never has to materialize."""
    C = p["w1"].shape[1]
    parts = [_build_banded_part(p["w1"], W),
             _build_banded_part(p["w2"], W)]
    for layer_w, n_src in ((p["w3"], 2), (p["w4"], 3), (p["w5"], 4)):
        for s in range(n_src):
            parts.append(_build_banded_part(layer_w[:, s * C:(s + 1) * C, :], W))
    return jnp.stack(parts)


# ----------------------------------------------------------------------------
# Public forward (NCHW in / NCHW out, matching the PyTorch module)
# ----------------------------------------------------------------------------
def sharenet_forward(x_nchw, params):
    B, C, H, W = x_nchw.shape
    WC = W * C

    # NCHW -> packed (B, H, W*C)
    x_packed = jnp.transpose(x_nchw, (0, 2, 3, 1)).reshape(B, H, WC)

    w_banded = jnp.concatenate(
        [_build_dense_banded(params["s1"], W),
         _build_dense_banded(params["s2"], W)], axis=0)          # (22, 3, WC, WC)
    n_parts = w_banded.shape[0]

    g_packed = jnp.stack([jnp.tile(params["s1"]["gamma"], W),
                          jnp.tile(params["s2"]["gamma"], W)])[:, None, :]
    b_packed = jnp.stack([jnp.tile(params["s1"]["beta"], W),
                          jnp.tile(params["s2"]["beta"], W)])[:, None, :]

    out_packed = pl.pallas_call(
        _sharenet_kernel,
        out_shape=jax.ShapeDtypeStruct((B, H, WC), x_nchw.dtype),
        grid=(B,),
        in_specs=[
            pl.BlockSpec((None, H, WC), lambda b: (b, 0, 0)),
            pl.BlockSpec((n_parts, 3, WC, WC), lambda b: (0, 0, 0, 0)),
            pl.BlockSpec((2, 1, WC), lambda b: (0, 0, 0)),
            pl.BlockSpec((2, 1, WC), lambda b: (0, 0, 0)),
        ],
        out_specs=pl.BlockSpec((None, H, WC), lambda b: (b, 0, 0)),
        scratch_shapes=[pltpu.VMEM((5, H + 2, WC), jnp.float32)],
        compiler_params=pltpu.CompilerParams(
            dimension_semantics=("parallel",),     # batch elems independent -> 2 TCs on v7x
            vmem_limit_bytes=32 * 1024 * 1024,
        ),
    )(x_packed, w_banded, g_packed, b_packed)

    return jnp.transpose(out_packed.reshape(B, H, W, C), (0, 3, 1, 2))


# ----------------------------------------------------------------------------
# Pure-JAX / XLA reference (correctness check only)
# ----------------------------------------------------------------------------
def _ref_conv_gn_relu(x_nhwc, w, gamma, beta):
    cin, cout = w.shape[1], w.shape[2]
    w_hwio = w.reshape(3, 3, cin, cout)
    y = jax.lax.conv_general_dilated(
        x_nhwc, w_hwio, window_strides=(1, 1), padding="SAME",
        dimension_numbers=("NHWC", "HWIO", "NHWC"))
    mean = jnp.mean(y, axis=(1, 2, 3), keepdims=True)
    var = jnp.mean((y - mean) ** 2, axis=(1, 2, 3), keepdims=True)
    y = (y - mean) * jax.lax.rsqrt(var + EPS) * gamma + beta
    return jnp.maximum(y, 0.0)


def _ref_dense(x, p):
    g, b = p["gamma"], p["beta"]
    x2 = _ref_conv_gn_relu(x, p["w1"], g, b)
    x3 = _ref_conv_gn_relu(x2, p["w2"], g, b)
    x4 = _ref_conv_gn_relu(jnp.concatenate([x2, x3], -1), p["w3"], g, b)
    x5 = _ref_conv_gn_relu(jnp.concatenate([x2, x3, x4], -1), p["w4"], g, b)
    x6 = _ref_conv_gn_relu(jnp.concatenate([x2, x3, x4, x5], -1), p["w5"], g, b)
    return x6


def sharenet_forward_ref(x_nchw, params):
    x = jnp.transpose(x_nchw, (0, 2, 3, 1))
    s1 = _ref_dense(x, params["s1"])
    s2 = _ref_dense(s1 + x, params["s2"])
    return jnp.transpose(s2, (0, 3, 1, 2))


# ----------------------------------------------------------------------------
# Parameter init (deterministic, kaiming-style)
# ----------------------------------------------------------------------------
def init_dense_params(key, C):
    ks = jax.random.split(key, 5)

    def w_init(k, cin, cout):
        std = (2.0 / (cin * 9)) ** 0.5
        return std * jax.random.normal(k, (9, cin, cout), jnp.float32)

    return dict(
        w1=w_init(ks[0], C, C),
        w2=w_init(ks[1], C, C),
        w3=w_init(ks[2], 2 * C, C),
        w4=w_init(ks[3], 3 * C, C),
        w5=w_init(ks[4], 4 * C, C),
        gamma=jnp.ones((C,), jnp.float32),   # PyTorch GroupNorm default init
        beta=jnp.zeros((C,), jnp.float32),
    )


def init_sharenet_params(key, channel):
    C = channel * 8
    k1, k2 = jax.random.split(key)
    return {"s1": init_dense_params(k1, C), "s2": init_dense_params(k2, C)}


# ----------------------------------------------------------------------------
if __name__ == "__main__":
    channel = 1                 # ShareNet(channel) -> Dense(channel * 8) = 8 ch
    B, C, H, W = 2, channel * 8, 16, 16

    key = jax.random.PRNGKey(0)
    kx, kp = jax.random.split(key)
    x = jax.random.normal(kx, (B, C, H, W), jnp.float32)   # NCHW, like PyTorch
    params = init_sharenet_params(kp, channel)

    fwd = jax.jit(sharenet_forward)
    out = jax.block_until_ready(fwd(x, params))

    # Sanity check against a pure-JAX/XLA reference.
    ref = sharenet_forward_ref(x, params)
    np.testing.assert_allclose(np.asarray(out), np.asarray(ref),
                               rtol=5e-4, atol=5e-4)

    print("KERNEL_OK")
</pallas_src>

<mosaic_0001>
module attributes {stable_mosaic.version = 11 : i64} {
  func.func @_sharenet_kernel(%arg0: i32, %arg1: memref<1x16x128xf32, #tpu.memory_space<vmem>>, %arg2: memref<22x3x128x128xf32, #tpu.memory_space<vmem>>, %arg3: memref<2x1x128xf32, #tpu.memory_space<vmem>>, %arg4: memref<2x1x128xf32, #tpu.memory_space<vmem>>, %arg5: memref<1x16x128xf32, #tpu.memory_space<vmem>>, %arg6: memref<5x18x128xf32, #tpu.memory_space<vmem>>) attributes {dimension_semantics = [#tpu.dimension_semantics<parallel>], iteration_bounds = array<i64: 2>, scalar_prefetch = 0 : i64, scratch_operands = 1 : i64, tpu.core_type = #tpu.core_type<tc>, window_params = [{transform_indices = @transform_0, window_bounds = array<i64: 1, 16, 128>}, {pipeline_mode = #tpu.pipeline_mode<synchronous>, transform_indices = @transform_1, window_bounds = array<i64: 22, 3, 128, 128>}, {pipeline_mode = #tpu.pipeline_mode<synchronous>, transform_indices = @transform_2, window_bounds = array<i64: 2, 1, 128>}, {pipeline_mode = #tpu.pipeline_mode<synchronous>, transform_indices = @transform_3, window_bounds = array<i64: 2, 1, 128>}, {transform_indices = @transform_4, window_bounds = array<i64: 1, 16, 128>}]} {
    %cst = arith.constant 0.000000e+00 : f32
    %0 = vector.broadcast %cst : f32 to vector<5x18x128xf32>
    %c0 = arith.constant 0 : index
    %c0_0 = arith.constant 0 : index
    %c0_1 = arith.constant 0 : index
    %1 = vector.load %arg6[%c0, %c0_0, %c0_1] : memref<5x18x128xf32, #tpu.memory_space<vmem>>, vector<5x18x128xf32>
    tpu.vector_store %arg6[%c0, %c0_0, %c0_1], %0 {strides = array<i32>} : memref<5x18x128xf32, #tpu.memory_space<vmem>>, vector<5x18x128xf32>,
    %c0_2 = arith.constant 0 : index
    %c0_3 = arith.constant 0 : index
    %c0_4 = arith.constant 0 : index
    %2 = vector.load %arg1[%c0_2, %c0_3, %c0_4] : memref<1x16x128xf32, #tpu.memory_space<vmem>>, vector<1x16x128xf32>
    %3 = vector.shape_cast %2 : vector<1x16x128xf32> to vector<16x128xf32>
    %c0_5 = arith.constant 0 : index
    %c1 = arith.constant 1 : index
    %c0_6 = arith.constant 0 : index
    %4 = vector.load %arg6[%c0_5, %c1, %c0_6] : memref<5x18x128xf32, #tpu.memory_space<vmem>>, vector<1x16x128xf32>
    %5 = vector.shape_cast %4 : vector<1x16x128xf32> to vector<16x128xf32>
    %6 = vector.shape_cast %3 : vector<16x128xf32> to vector<1x16x128xf32>
    tpu.vector_store %arg6[%c0_5, %c1, %c0_6], %6 {strides = array<i32>} : memref<5x18x128xf32, #tpu.memory_space<vmem>>, vector<1x16x128xf32>,
    %cst_7 = arith.constant 0.000000e+00 : f32
    %7 = vector.broadcast %cst_7 : f32 to vector<16x128xf32>
    %c0_8 = arith.constant 0 : index
    %c0_9 = arith.constant 0 : index
    %c0_10 = arith.constant 0 : index
    %8 = vector.load %arg6[%c0_8, %c0_9, %c0_10] : memref<5x18x128xf32, #tpu.memory_space<vmem>>, vector<1x16x128xf32>
    %9 = vector.shape_cast %8 : vector<1x16x128xf32> to vector<16x128xf32>
    %c0_11 = arith.constant 0 : index
    %c0_12 = arith.constant 0 : index
    %c0_13 = arith.constant 0 : index
    %c0_14 = arith.constant 0 : index
    %10 = vector.load %arg2[%c0_11, %c0_12, %c0_13, %c0_14] : memref<22x3x128x128xf32, #tpu.memory_space<vmem>>, vector<1x1x128x128xf32>
    %11 = vector.shape_cast %10 : vector<1x1x128x128xf32> to vector<128x128xf32>
    %cst_15 = arith.constant dense<0.000000e+00> : vector<16x128xf32>
    %12 = tpu.matmul %9, %11, %cst_15 {dimension_numbers = #tpu.dot_dimension_numbers<[1], [0], [0], [1], [0, 0, 1, 1], [], []>} : vector<16x128xf32>, vector<128x128xf32>, vector<16x128xf32> -> vector<16x128xf32>
    %13 = arith.addf %7, %12 : vector<16x128xf32>
    %c0_16 = arith.constant 0 : index
    %c1_17 = arith.constant 1 : index
    %c0_18 = arith.constant 0 : index
    %14 = vector.load %arg6[%c0_16, %c1_17, %c0_18] : memref<5x18x128xf32, #tpu.memory_space<vmem>>, vector<1x16x128xf32>
    %15 = vector.shape_cast %14 : vector<1x16x128xf32> to vector<16x128xf32>
    %c0_19 = arith.constant 0 : index
    %c1_20 = arith.constant 1 : index
    %c0_21 = arith.constant 0 : index
    %c0_22 = arith.constant 0 : index
    %16 = vector.load %arg2[%c0_19, %c1_20, %c0_21, %c0_22] : memref<22x3x128x128xf32, #tpu.memory_space<vmem>>, vector<1x1x128x128xf32>
    %17 = vector.shape_cast %16 : vector<1x1x128x128xf32> to vector<128x128xf32>
    %cst_23 = arith.constant dense<0.000000e+00> : vector<16x128xf32>
    %18 = tpu.matmul %15, %17, %cst_23 {dimension_numbers = #tpu.dot_dimension_numbers<[1], [0], [0], [1], [0, 0, 1, 1], [], []>} : vector<16x128xf32>, vector<128x128xf32>, vector<16x128xf32> -> vector<16x128xf32>
    %19 = arith.addf %13, %18 : vector<16x128xf32>
    %c0_24 = arith.constant 0 : index
    %c2 = arith.constant 2 : index
    %c0_25 = arith.constant 0 : index
    %20 = vector.load %arg6[%c0_24, %c2, %c0_25] : memref<5x18x128xf32, #tpu.memory_space<vmem>>, vector<1x16x128xf32>
    %21 = vector.shape_cast %20 : vector<1x16x128xf32> to vector<16x128xf32>
    %c0_26 = arith.constant 0 : index
    %c2_27 = arith.constant 2 : index
    %c0_28 = arith.constant 0 : index
    %c0_29 = arith.constant 0 : index
    %22 = vector.load %arg2[%c0_26, %c2_27, %c0_28, %c0_29] : memref<22x3x128x128xf32, #tpu.memory_space<vmem>>, vector<1x1x128x128xf32>
    %23 = vector.shape_cast %22 : vector<1x1x128x128xf32> to vector<128x128xf32>
    %cst_30 = arith.constant dense<0.000000e+00> : vector<16x128xf32>
    %24 = tpu.matmul %21, %23, %cst_30 {dimension_numbers = #tpu.dot_dimension_numbers<[1], [0], [0], [1], [0, 0, 1, 1], [], []>} : vector<16x128xf32>, vector<128x128xf32>, vector<16x128xf32> -> vector<16x128xf32>
    %25 = arith.addf %19, %24 : vector<16x128xf32>
    %26 = vector.shape_cast %25 : vector<16x128xf32> to vector<1x16x128xf32>
    %cst_31 = arith.constant dense<0.000000e+00> : vector<1xf32>
    %27 = vector.multi_reduction <add>, %26, %cst_31 [1, 2] : vector<1x16x128xf32> to vector<1xf32>
    %28 = vector.shape_cast %27 : vector<1xf32> to vector<1x1x1xf32>
    %29 = vector.extract %28[0, 0, 0] : f32 from vector<1x1x1xf32>
    %cst_32 = arith.constant 2.048000e+03 : f32
    %30 = arith.divf %29, %cst_32 : f32
    %31 = vector.broadcast %30 : f32 to vector<16x128xf32>
    %32 = arith.subf %25, %31 : vector<16x128xf32>
    %33 = arith.mulf %32, %32 : vector<16x128xf32>
    %34 = vector.shape_cast %33 : vector<16x128xf32> to vector<1x16x128xf32>
    %cst_33 = arith.constant dense<0.000000e+00> : vector<1xf32>
    %35 = vector.multi_reduction <add>, %34, %cst_33 [1, 2] : vector<1x16x128xf32> to vector<1xf32>
    %36 = vector.shape_cast %35 : vector<1xf32> to vector<1x1x1xf32>
    %37 = vector.extract %36[0, 0, 0] : f32 from vector<1x1x1xf32>
    %cst_34 = arith.constant 2.048000e+03 : f32
    %38 = arith.divf %37, %cst_34 : f32
    %cst_35 = arith.constant 9.99999974E-6 : f32
    %39 = arith.addf %38, %cst_35 : f32
    %40 = math.rsqrt %39 : f32
    %41 = vector.broadcast %30 : f32 to vector<16x128xf32>
    %42 = arith.subf %25, %41 : vector<16x128xf32>
    %43 = vector.broadcast %40 : f32 to vector<16x128xf32>
    %44 = arith.mulf %42, %43 : vector<16x128xf32>
    %c0_36 = arith.constant 0 : index
    %c0_37 = arith.constant 0 : index
    %c0_38 = arith.constant 0 : index
    %45 = vector.load %arg3[%c0_36, %c0_37, %c0_38] : memref<2x1x128xf32, #tpu.memory_space<vmem>>, vector<1x1x128xf32>
    %46 = vector.shape_cast %45 : vector<1x1x128xf32> to vector<1x128xf32>
    %47 = vector.broadcast %46 : vector<1x128xf32> to vector<16x128xf32>
    %48 = arith.mulf %44, %47 : vector<16x128xf32>
    %c0_39 = arith.constant 0 : index
    %c0_40 = arith.constant 0 : index
    %c0_41 = arith.constant 0 : index
    %49 = vector.load %arg4[%c0_39, %c0_40, %c0_41] : memref<2x1x128xf32, #tpu.memory_space<vmem>>, vector<1x1x128xf32>
    %50 = vector.shape_cast %49 : vector<1x1x128xf32> to vector<1x128xf32>
    %51 = vector.broadcast %50 : vector<1x128xf32> to vector<16x128xf32>
    %52 = arith.addf %48, %51 : vector<16x128xf32>
    %cst_42 = arith.constant 0.000000e+00 : f32
    %53 = vector.broadcast %cst_42 : f32 to vector<16x128xf32>
    %54 = arith.maximumf %52, %53 : vector<16x128xf32>
    %c1_43 = arith.constant 1 : index
    %c1_44 = arith.constant 1 : index
    %c0_45 = arith.constant 0 : index
    %55 = vector.load %arg6[%c1_43, %c1_44, %c0_45] : memref<5x18x128xf32, #tpu.memory_space<vmem>>, vector<1x16x128xf32>
    %56 = vector.shape_cast %55 : vector<1x16x128xf32> to vector<16x128xf32>
    %57 = vector.shape_cast %54 : vector<16x128xf32> to vector<1x16x128xf32>
    tpu.vector_store %arg6[%c1_43, %c1_44, %c0_45], %57 {strides = array<i32>} : memref<5x18x128xf32, #tpu.memory_space<vmem>>, vector<1x16x128xf32>,
    %cst_46 = arith.constant 0.000000e+00 : f32
    %58 = vector.broadcast %cst_46 : f32 to vector<16x128xf32>
    %c1_47 = arith.constant 1 : index
    %c0_48 = arith.constant 0 : index
    %c0_49 = arith.constant 0 : index
    %59 = vector.load %arg6[%c1_47, %c0_48, %c0_49] : memref<5x18x128xf32, #tpu.memory_space<vmem>>, vector<1x16x128xf32>
    %60 = vector.shape_cast %59 : vector<1x16x128xf32> to vector<16x128xf32>
    %c1_50 = arith.constant 1 : index
    %c0_51 = arith.constant 0 : index
    %c0_52 = arith.constant 0 : index
    %c0_53 = arith.constant 0 : index
    %61 = vector.load %arg2[%c1_50, %c0_51, %c0_52, %c0_53] : memref<22x3x128x128xf32, #tpu.memory_space<vmem>>, vector<1x1x128x128xf32>
    %62 = vector.shape_cast %61 : vector<1x1x128x128xf32> to vector<128x128xf32>
    %cst_54 = arith.constant dense<0.000000e+00> : vector<16x128xf32>
    %63 = tpu.matmul %60, %62, %cst_54 {dimension_numbers = #tpu.dot_dimension_numbers<[1], [0], [0], [1], [0, 0, 1, 1], [], []>} : vector<16x128xf32>, vector<128x128xf32>, vector<16x128xf32> -> vector<16x128xf32>
    %64 = arith.addf %58, %63 : vector<16x128xf32>
    %c1_55 = arith.constant 1 : index
    %c1_56 = arith.constant 1 : index
    %c0_57 = arith.constant 0 : index
    %65 = vector.load %arg6[%c1_55, %c1_56, %c0_57] : memref<5x18x128xf32, #tpu.memory_space<vmem>>, vector<1x16x128xf32>
    %66 = vector.shape_cast %65 : vector<1x16x128xf32> to vector<16x128xf32>
    %c1_58 = arith.constant 1 : index
    %c1_59 = arith.constant 1 : index
    %c0_60 = arith.constant 0 : index
    %c0_61 = arith.constant 0 : index
    %67 = vector.load %arg2[%c1_58, %c1_59, %c0_60, %c0_61] : memref<22x3x128x128xf32, #tpu.memory_space<vmem>>, vector<1x1x128x128xf32>
    %68 = vector.shape_cast %67 : vector<1x1x128x128xf32> to vector<128x128xf32>
    %cst_62 = arith.constant dense<0.000000e+00> : vector<16x128xf32>
    %69 = tpu.matmul %66, %68, %cst_62 {dimension_numbers = #tpu.dot_dimension_numbers<[1], [0], [0], [1], [0, 0, 1, 1], [], []>} : vector<16x128xf32>, vector<128x128xf32>, vector<16x128xf32> -> vector<16x128xf32>
    %70 = arith.addf %64, %69 : vector<16x128xf32>
    %c1_63 = arith.constant 1 : index
    %c2_64 = arith.constant 2 : index
    %c0_65 = arith.constant 0 : index
    %71 = vector.load %arg6[%c1_63, %c2_64, %c0_65] : memref<5x18x128xf32, #tpu.memory_space<vmem>>, vector<1x16x128xf32>
    %72 = vector.shape_cast %71 : vector<1x16x128xf32> to vector<16x128xf32>
    %c1_66 = arith.constant 1 : index
    %c2_67 = arith.constant 2 : index
    %c0_68 = arith.constant 0 : index
    %c0_69 = arith.constant 0 : index
    %73 = vector.load %arg2[%c1_66, %c2_67, %c0_68, %c0_69] : memref<22x3x128x128xf32, #tpu.memory_space<vmem>>, vector<1x1x128x128xf32>
    %74 = vector.shape_cast %73 : vector<1x1x128x128xf32> to vector<128x128xf32>
    %cst_70 = arith.constant dense<0.000000e+00> : vector<16x128xf32>
    %75 = tpu.matmul %72, %74, %cst_70 {dimension_numbers = #tpu.dot_dimension_numbers<[1], [0], [0], [1], [0, 0, 1, 1], [], []>} : vector<16x128xf32>, vector<128x128xf32>, vector<16x128xf32> -> vector<16x128xf32>
    %76 = arith.addf %70, %75 : vector<16x128xf32>
    %77 = vector.shape_cast %76 : vector<16x128xf32> to vector<1x16x128xf32>
    %cst_71 = arith.constant dense<0.000000e+00> : vector<1xf32>
    %78 = vector.multi_reduction <add>, %77, %cst_71 [1, 2] : vector<1x16x128xf32> to vector<1xf32>
    %79 = vector.shape_cast %78 : vector<1xf32> to vector<1x1x1xf32>
    %80 = vector.extract %79[0, 0, 0] : f32 from vector<1x1x1xf32>
    %cst_72 = arith.constant 2.048000e+03 : f32
    %81 = arith.divf %80, %cst_72 : f32
    %82 = vector.broadcast %81 : f32 to vector<16x128xf32>
    %83 = arith.subf %76, %82 : vector<16x128xf32>
    %84 = arith.mulf %83, %83 : vector<16x128xf32>
    %85 = vector.shape_cast %84 : vector<16x128xf32> to vector<1x16x128xf32>
    %cst_73 = arith.constant dense<0.000000e+00> : vector<1xf32>
    %86 = vector.multi_reduction <add>, %85, %cst_73 [1, 2] : vector<1x16x128xf32> to vector<1xf32>
    %87 = vector.shape_cast %86 : vector<1xf32> to vector<1x1x1xf32>
    %88 = vector.extract %87[0, 0, 0] : f32 from vector<1x1x1xf32>
    %cst_74 = arith.constant 2.048000e+03 : f32
    %89 = arith.divf %88, %cst_74 : f32
    %cst_75 = arith.constant 9.99999974E-6 : f32
    %90 = arith.addf %89, %cst_75 : f32
    %91 = math.rsqrt %90 : f32
    %92 = vector.broadcast %81 : f32 to vector<16x128xf32>
    %93 = arith.subf %76, %92 : vector<16x128xf32>
    %94 = vector.broadcast %91 : f32 to vector<16x128xf32>
    %95 = arith.mulf %93, %94 : vector<16x128xf32>
    %c0_76 = arith.constant 0 : index
    %c0_77 = arith.constant 0 : index
    %c0_78 = arith.constant 0 : index
    %96 = vector.load %arg3[%c0_76, %c0_77, %c0_78] : memref<2x1x128xf32, #tpu.memory_space<vmem>>, vector<1x1x128xf32>
    %97 = vector.shape_cast %96 : vector<1x1x128xf32> to vector<1x128xf32>
    %98 = vector.broadcast %97 : vector<1x128xf32> to vector<16x128xf32>
    %99 = arith.mulf %95, %98 : vector<16x128xf32>
    %c0_79 = arith.constant 0 : index
    %c0_80 = arith.constant 0 : index
    %c0_81 = arith.constant 0 : index
    %100 = vector.load %arg4[%c0_79, %c0_80, %c0_81] : memref<2x1x128xf32, #tpu.memory_space<vmem>>, vector<1x1x128xf32>
    %101 = vector.shape_cast %100 : vector<1x1x128xf32> to vector<1x128xf32>
    %102 = vector.broadcast %101 : vector<1x128xf32> to vector<16x128xf32>
    %103 = arith.addf %99, %102 : vector<16x128xf32>
    %cst_82 = arith.constant 0.000000e+00 : f32
    %104 = vector.broadcast %cst_82 : f32 to vector<16x128xf32>
    %105 = arith.maximumf %103, %104 : vector<16x128xf32>
    %c2_83 = arith.constant 2 : index
    %c1_84 = arith.constant 1 : index
    %c0_85 = arith.constant 0 : index
    %106 = vector.load %arg6[%c2_83, %c1_84, %c0_85] : memref<5x18x128xf32, #tpu.memory_space<vmem>>, vector<1x16x128xf32>
    %107 = vector.shape_cast %106 : vector<1x16x128xf32> to vector<16x128xf32>
    %108 = vector.shape_cast %105 : vector<16x128xf32> to vector<1x16x128xf32>
    tpu.vector_store %arg6[%c2_83, %c1_84, %c0_85], %108 {strides = array<i32>} : memref<5x18x128xf32, #tpu.memory_space<vmem>>, vector<1x16x128xf32>,
    %cst_86 = arith.constant 0.000000e+00 : f32
    %109 = vector.broadcast %cst_86 : f32 to vector<16x128xf32>
    %c1_87 = arith.constant 1 : index
    %c0_88 = arith.constant 0 : index
    %c0_89 = arith.constant 0 : index
    %110 = vector.load %arg6[%c1_87, %c0_88, %c0_89] : memref<5x18x128xf32, #tpu.memory_space<vmem>>, vector<1x16x128xf32>
    %111 = vector.shape_cast %110 : vector<1x16x128xf32> to vector<16x128xf32>
    %c2_90 = arith.constant 2 : index
    %c0_91 = arith.constant 0 : index
    %c0_92 = arith.constant 0 : index
    %c0_93 = arith.constant 0 : index
    %112 = vector.load %arg2[%c2_90, %c0_91, %c0_92, %c0_93] : memref<22x3x128x128xf32, #tpu.memory_space<vmem>>, vector<1x1x128x128xf32>
    %113 = vector.shape_cast %112 : vector<1x1x128x128xf32> to vector<128x128xf32>
    %cst_94 = arith.constant dense<0.000000e+00> : vector<16x128xf32>
    %114 = tpu.matmul %111, %113, %cst_94 {dimension_numbers = #tpu.dot_dimension_numbers<[1], [0], [0], [1], [0, 0, 1, 1], [], []>} : vector<16x128xf32>, vector<128x128xf32>, vector<16x128xf32> -> vector<16x128xf32>
    %115 = arith.addf %109, %114 : vector<16x128xf32>
    %c1_95 = arith.constant 1 : index
    %c1_96 = arith.constant 1 : index
    %c0_97 = arith.constant 0 : index
    %116 = vector.load %arg6[%c1_95, %c1_96, %c0_97] : memref<5x18x128xf32, #tpu.memory_space<vmem>>, vector<1x16x128xf32>
    %117 = vector.shape_cast %116 : vector<1x16x128xf32> to vector<16x128xf32>
    %c2_98 = arith.constant 2 : index
    %c1_99 = arith.constant 1 : index
    %c0_100 = arith.constant 0 : index
    %c0_101 = arith.constant 0 : index
    %118 = vector.load %arg2[%c2_98, %c1_99, %c0_100, %c0_101] : memref<22x3x128x128xf32, #tpu.memory_space<vmem>>, vector<1x1x128x128xf32>
    %119 = vector.shape_cast %118 : vector<1x1x128x128xf32> to vector<128x128xf32>
    %cst_102 = arith.constant dense<0.000000e+00> : vector<16x128xf32>
    %120 = tpu.matmul %117, %119, %cst_102 {dimension_numbers = #tpu.dot_dimension_numbers<[1], [0], [0], [1], [0, 0, 1, 1], [], []>} : vector<16x128xf32>, vector<128x128xf32>, vector<16x128xf32> -> vector<16x128xf32>
    %121 = arith.addf %115, %120 : vector<16x128xf32>
    %c1_103 = arith.constant 1 : index
    %c2_104 = arith.constant 2 : index
    %c0_105 = arith.constant 0 : index
    %122 = vector.load %arg6[%c1_103, %c2_104, %c0_105] : memref<5x18x128xf32, #tpu.memory_space<vmem>>, vector<1x16x128xf32>
    %123 = vector.shape_cast %122 : vector<1x16x128xf32> to vector<16x128xf32>
    %c2_106 = arith.constant 2 : index
    %c2_107 = arith.constant 2 : index
    %c0_108 = arith.constant 0 : index
    %c0_109 = arith.constant 0 : index
    %124 = vector.load %arg2[%c2_106, %c2_107, %c0_108, %c0_109] : memref<22x3x128x128xf32, #tpu.memory_space<vmem>>, vector<1x1x128x128xf32>
    %125 = vector.shape_cast %124 : vector<1x1x128x128xf32> to vector<128x128xf32>
    %cst_110 = arith.constant dense<0.000000e+00> : vector<16x128xf32>
    %126 = tpu.matmul %123, %125, %cst_110 {dimension_numbers = #tpu.dot_dimension_numbers<[1], [0], [0], [1], [0, 0, 1, 1], [], []>} : vector<16x128xf32>, vector<128x128xf32>, vector<16x128xf32> -> vector<16x128xf32>
    %127 = arith.addf %121, %126 : vector<16x128xf32>
    %c2_111 = arith.constant 2 : index
    %c0_112 = arith.constant 0 : index
    %c0_113 = arith.constant 0 : index
    %128 = vector.load %arg6[%c2_111, %c0_112, %c0_113] : memref<5x18x128xf32, #tpu.memory_space<vmem>>, vector<1x16x128xf32>
    %129 = vector.shape_cast %128 : vector<1x16x128xf32> to vector<16x128xf32>
    %c3 = arith.constant 3 : index
    %c0_114 = arith.constant 0 : index
    %c0_115 = arith.constant 0 : index
    %c0_116 = arith.constant 0 : index
    %130 = vector.load %arg2[%c3, %c0_114, %c0_115, %c0_116] : memref<22x3x128x128xf32, #tpu.memory_space<vmem>>, vector<1x1x128x128xf32>
    %131 = vector.shape_cast %130 : vector<1x1x128x128xf32> to vector<128x128xf32>
    %cst_117 = arith.constant dense<0.000000e+00> : vector<16x128xf32>
    %132 = tpu.matmul %129, %131, %cst_117 {dimension_numbers = #tpu.dot_dimension_numbers<[1], [0], [0], [1], [0, 0, 1, 1], [], []>} : vector<16x128xf32>, vector<128x128xf32>, vector<16x128xf32> -> vector<16x128xf32>
    %133 = arith.addf %127, %132 : vector<16x128xf32>
    %c2_118 = arith.constant 2 : index
    %c1_119 = arith.constant 1 : index
    %c0_120 = arith.constant 0 : index
    %134 = vector.load %arg6[%c2_118, %c1_119, %c0_120] : memref<5x18x128xf32, #tpu.memory_space<vmem>>, vector<1x16x128xf32>
    %135 = vector.shape_cast %134 : vector<1x16x128xf32> to vector<16x128xf32>
    %c3_121 = arith.constant 3 : index
    %c1_122 = arith.constant 1 : index
    %c0_123 = arith.constant 0 : index
    %c0_124 = arith.constant 0 : index
    %136 = vector.load %arg2[%c3_121, %c1_122, %c0_123, %c0_124] : memref<22x3x128x128xf32, #tpu.memory_space<vmem>>, vector<1x1x128x128xf32>
    %137 = vector.shape_cast %136 : vector<1x1x128x128xf32> to vector<128x128xf32>
    %cst_125 = arith.constant dense<0.000000e+00> : vector<16x128xf32>
    %138 = tpu.matmul %135, %137, %cst_125 {dimension_numbers = #tpu.dot_dimension_numbers<[1], [0], [0], [1], [0, 0, 1, 1], [], []>} : vector<16x128xf32>, vector<128x128xf32>, vector<16x128xf32> -> vector<16x128xf32>
    %139 = arith.addf %133, %138 : vector<16x128xf32>
    %c2_126 = arith.constant 2 : index
    %c2_127 = arith.constant 2 : index
    %c0_128 = arith.constant 0 : index
    %140 = vector.load %arg6[%c2_126, %c2_127, %c0_128] : memref<5x18x128xf32, #tpu.memory_space<vmem>>, vector<1x16x128xf32>
    %141 = vector.shape_cast %140 : vector<1x16x128xf32> to vector<16x128xf32>
    %c3_129 = arith.constant 3 : index
    %c2_130 = arith.constant 2 : index
    %c0_131 = arith.constant 0 : index
    %c0_132 = arith.constant 0 : index
    %142 = vector.load %arg2[%c3_129, %c2_130, %c0_131, %c0_132] : memref<22x3x128x128xf32, #tpu.memory_space<vmem>>, vector<1x1x128x128xf32>
    %143 = vector.shape_cast %142 : vector<1x1x128x128xf32> to vector<128x128xf32>
    %cst_133 = arith.constant dense<0.000000e+00> : vector<16x128xf32>
    %144 = tpu.matmul %141, %143, %cst_133 {dimension_numbers = #tpu.dot_dimension_numbers<[1], [0], [0], [1], [0, 0, 1, 1], [], []>} : vector<16x128xf32>, vector<128x128xf32>, vector<16x128xf32> -> vector<16x128xf32>
    %145 = arith.addf %139, %144 : vector<16x128xf32>
    %146 = vector.shape_cast %145 : vector<16x128xf32> to vector<1x16x128xf32>
    %cst_134 = arith.constant dense<0.000000e+00> : vector<1xf32>
    %147 = vector.multi_reduction <add>, %146, %cst_134 [1, 2] : vector<1x16x128xf32> to vector<1xf32>
    %148 = vector.shape_cast %147 : vector<1xf32> to vector<1x1x1xf32>
    %149 = vector.extract %148[0, 0, 0] : f32 from vector<1x1x1xf32>
    %cst_135 = arith.constant 2.048000e+03 : f32
    %150 = arith.divf %149, %cst_135 : f32
    %151 = vector.broadcast %150 : f32 to vector<16x128xf32>
    %152 = arith.subf %145, %151 : vector<16x128xf32>
    %153 = arith.mulf %152, %152 : vector<16x128xf32>
    %154 = vector.shape_cast %153 : vector<16x128xf32> to vector<1x16x128xf32>
    %cst_136 = arith.constant dense<0.000000e+00> : vector<1xf32>
    %155 = vector.multi_reduction <add>, %154, %cst_136 [1, 2] : vector<1x16x128xf32> to vector<1xf32>
    %156 = vector.shape_cast %155 : vector<1xf32> to vector<1x1x1xf32>
    %157 = vector.extract %156[0, 0, 0] : f32 from vector<1x1x1xf32>
    %cst_137 = arith.constant 2.048000e+03 : f32
    %158 = arith.divf %157, %cst_137 : f32
    %cst_138 = arith.constant 9.99999974E-6 : f32
    %159 = arith.addf %158, %cst_138 : f32
    %160 = math.rsqrt %159 : f32
    %161 = vector.broadcast %150 : f32 to vector<16x128xf32>
    %162 = arith.subf %145, %161 : vector<16x128xf32>
    %163 = vector.broadcast %160 : f32 to vector<16x128xf32>
    %164 = arith.mulf %162, %163 : vector<16x128xf32>
    %c0_139 = arith.constant 0 : index
    %c0_140 = arith.constant 0 : index
    %c0_141 = arith.constant 0 : index
    %165 = vector.load %arg3[%c0_139, %c0_140, %c0_141] : memref<2x1x128xf32, #tpu.memory_space<vmem>>, vector<1x1x128xf32>
    %166 = vector.shape_cast %165 : vector<1x1x128xf32> to vector<1x128xf32>
    %167 = vector.broadcast %166 : vector<1x128xf32> to vector<16x128xf32>
    %168 = arith.mulf %164, %167 : vector<16x128xf32>
    %c0_142 = arith.constant 0 : index
    %c0_143 = arith.constant 0 : index
    %c0_144 = arith.constant 0 : index
    %169 = vector.load %arg4[%c0_142, %c0_143, %c0_144] : memref<2x1x128xf32, #tpu.memory_space<vmem>>, vector<1x1x128xf32>
    %170 = vector.shape_cast %169 : vector<1x1x128xf32> to vector<1x128xf32>
    %171 = vector.broadcast %170 : vector<1x128xf32> to vector<16x128xf32>
    %172 = arith.addf %168, %171 : vector<16x128xf32>
    %cst_145 = arith.constant 0.000000e+00 : f32
    %173 = vector.broadcast %cst_145 : f32 to vector<16x128xf32>
    %174 = arith.maximumf %172, %173 : vector<16x128xf32>
    %c3_146 = arith.constant 3 : index
    %c1_147 = arith.constant 1 : index
    %c0_148 = arith.constant 0 : index
    %175 = vector.load %arg6[%c3_146, %c1_147, %c0_148] : memref<5x18x128xf32, #tpu.memory_space<vmem>>, vector<1x16x128xf32>
    %176 = vector.shape_cast %175 : vector<1x16x128xf32> to vector<16x128xf32>
    %177 = vector.shape_cast %174 : vector<16x128xf32> to vector<1x16x128xf32>
    tpu.vector_store %arg6[%c3_146, %c1_147, %c0_148], %177 {strides = array<i32>} : memref<5x18x128xf32, #tpu.memory_space<vmem>>, vector<1x16x128xf32>,
    %cst_149 = arith.constant 0.000000e+00 : f32
    %178 = vector.broadcast %cst_149 : f32 to vector<16x128xf32>
    %c1_150 = arith.constant 1 : index
    %c0_151 = arith.constant 0 : index
    %c0_152 = arith.constant 0 : index
    %179 = vector.load %arg6[%c1_150, %c0_151, %c0_152] : memref<5x18x128xf32, #tpu.memory_space<vmem>>, vector<1x16x128xf32>
    %180 = vector.shape_cast %179 : vector<1x16x128xf32> to vector<16x128xf32>
    %c4 = arith.constant 4 : index
    %c0_153 = arith.constant 0 : index
    %c0_154 = arith.constant 0 : index
    %c0_155 = arith.constant 0 : index
    %181 = vector.load %arg2[%c4, %c0_153, %c0_154, %c0_155] : memref<22x3x128x128xf32, #tpu.memory_space<vmem>>, vector<1x1x128x128xf32>
    %182 = vector.shape_cast %181 : vector<1x1x128x128xf32> to vector<128x128xf32>
    %cst_156 = arith.constant dense<0.000000e+00> : vector<16x128xf32>
    %183 = tpu.matmul %180, %182, %cst_156 {dimension_numbers = #tpu.dot_dimension_numbers<[1], [0], [0], [1], [0, 0, 1, 1], [], []>} : vector<16x128xf32>, vector<128x128xf32>, vector<16x128xf32> -> vector<16x128xf32>
    %184 = arith.addf %178, %183 : vector<16x128xf32>
    %c1_157 = arith.constant 1 : index
    %c1_158 = arith.constant 1 : index
    %c0_159 = arith.constant 0 : index
    %185 = vector.load %arg6[%c1_157, %c1_158, %c0_159] : memref<5x18x128xf32, #tpu.memory_space<vmem>>, vector<1x16x128xf32>
    %186 = vector.shape_cast %185 : vector<1x16x128xf32> to vector<16x128xf32>
    %c4_160 = arith.constant 4 : index
    %c1_161 = arith.constant 1 : index
    %c0_162 = arith.constant 0 : index
    %c0_163 = arith.constant 0 : index
    %187 = vector.load %arg2[%c4_160, %c1_161, %c0_162, %c0_163] : memref<22x3x128x128xf32, #tpu.memory_space<vmem>>, vector<1x1x128x128xf32>
    %188 = vector.shape_cast %187 : vector<1x1x128x128xf32> to vector<128x128xf32>
    %cst_164 = arith.constant dense<0.000000e+00> : vector<16x128xf32>
    %189 = tpu.matmul %186, %188, %cst_164 {dimension_numbers = #tpu.dot_dimension_numbers<[1], [0], [0], [1], [0, 0, 1, 1], [], []>} : vector<16x128xf32>, vector<128x128xf32>, vector<16x128xf32> -> vector<16x128xf32>
    %190 = arith.addf %184, %189 : vector<16x128xf32>
    %c1_165 = arith.constant 1 : index
    %c2_166 = arith.constant 2 : index
    %c0_167 = arith.constant 0 : index
    %191 = vector.load %arg6[%c1_165, %c2_166, %c0_167] : memref<5x18x128xf32, #tpu.memory_space<vmem>>, vector<1x16x128xf32>
    %192 = vector.shape_cast %191 : vector<1x16x128xf32> to vector<16x128xf32>
    %c4_168 = arith.constant 4 : index
    %c2_169 = arith.constant 2 : index
    %c0_170 = arith.constant 0 : index
    %c0_171 = arith.constant 0 : index
    %193 = vector.load %arg2[%c4_168, %c2_169, %c0_170, %c0_171] : memref<22x3x128x128xf32, #tpu.memory_space<vmem>>, vector<1x1x128x128xf32>
    %194 = vector.shape_cast %193 : vector<1x1x128x128xf32> to vector<128x128xf32>
    %cst_172 = arith.constant dense<0.000000e+00> : vector<16x128xf32>
    %195 = tpu.matmul %192, %194, %cst_172 {dimension_numbers = #tpu.dot_dimension_numbers<[1], [0], [0], [1], [0, 0, 1, 1], [], []>} : vector<16x128xf32>, vector<128x128xf32>, vector<16x128xf32> -> vector<16x128xf32>
    %196 = arith.addf %190, %195 : vector<16x128xf32>
    %c2_173 = arith.constant 2 : index
    %c0_174 = arith.constant 0 : index
    %c0_175 = arith.constant 0 : index
    %197 = vector.load %arg6[%c2_173, %c0_174, %c0_175] : memref<5x18x128xf32, #tpu.memory_space<vmem>>, vector<1x16x128xf32>
    %198 = vector.shape_cast %197 : vector<1x16x128xf32> to vector<16x128xf32>
    %c5 = arith.constant 5 : index
    %c0_176 = arith.constant 0 : index
    %c0_177 = arith.constant 0 : index
    %c0_178 = arith.constant 0 : index
    %199 = vector.load %arg2[%c5, %c0_176, %c0_177, %c0_178] : memref<22x3x128x128xf32, #tpu.memory_space<vmem>>, vector<1x1x128x128xf32>
    %200 = vector.shape_cast %199 : vector<1x1x128x128xf32> to vector<128x128xf32>
    %cst_179 = arith.constant dense<0.000000e+00> : vector<16x128xf32>
    %201 = tpu.matmul %198, %200, %cst_179 {dimension_numbers = #tpu.dot_dimension_numbers<[1], [0], [0], [1], [0, 0, 1, 1], [], []>} : vector<16x128xf32>, vector<128x128xf32>, vector<16x128xf32> -> vector<16x128xf32>
    %202 = arith.addf %196, %201 : vector<16x128xf32>
    %c2_180 = arith.constant 2 : index
    %c1_181 = arith.constant 1 : index
    %c0_182 = arith.constant 0 : index
    %203 = vector.load %arg6[%c2_180, %c1_181, %c0_182] : memref<5x18x128xf32, #tpu.memory_space<vmem>>, vector<1x16x128xf32>
    %204 = vector.shape_cast %203 : vector<1x16x128xf32> to vector<16x128xf32>
    %c5_183 = arith.constant 5 : index
    %c1_184 = arith.constant 1 : index
    %c0_185 = arith.constant 0 : index
    %c0_186 = arith.constant 0 : index
    %205 = vector.load %arg2[%c5_183, %c1_184, %c0_185, %c0_186] : memref<22x3x128x128xf32, #tpu.memory_space<vmem>>, vector<1x1x128x128xf32>
    %206 = vector.shape_cast %205 : vector<1x1x128x128xf32> to vector<128x128xf32>
    %cst_187 = arith.constant dense<0.000000e+00> : vector<16x128xf32>
    %207 = tpu.matmul %204, %206, %cst_187 {dimension_numbers = #tpu.dot_dimension_numbers<[1], [0], [0], [1], [0, 0, 1, 1], [], []>} : vector<16x128xf32>, vector<128x128xf32>, vector<16x128xf32> -> vector<16x128xf32>
    %208 = arith.addf %202, %207 : vector<16x128xf32>
    %c2_188 = arith.constant 2 : index
    %c2_189 = arith.constant 2 : index
    %c0_190 = arith.constant 0 : index
    %209 = vector.load %arg6[%c2_188, %c2_189, %c0_190] : memref<5x18x128xf32, #tpu.memory_space<vmem>>, vector<1x16x128xf32>
    %210 = vector.shape_cast %209 : vector<1x16x128xf32> to vector<16x128xf32>
    %c5_191 = arith.constant 5 : index
    %c2_192 = arith.constant 2 : index
    %c0_193 = arith.constant 0 : index
    %c0_194 = arith.constant 0 : index
    %211 = vector.load %arg2[%c5_191, %c2_192, %c0_193, %c0_194] : memref<22x3x128x128xf32, #tpu.memory_space<vmem>>, vector<1x1x128x128xf32>
    %212 = vector.shape_cast %211 : vector<1x1x128x128xf32> to vector<128x128xf32>
    %cst_195 = arith.constant dense<0.000000e+00> : vector<16x128xf32>
    %213 = tpu.matmul %210, %212, %cst_195 {dimension_numbers = #tpu.dot_dimension_numbers<[1], [0], [0], [1], [0, 0, 1, 1], [], []>} : vector<16x128xf32>, vector<128x128xf32>, vector<16x128xf32> -> vector<16x128xf32>
    %214 = arith.addf %208, %213 : vector<16x128xf32>
    %c3_196 = arith.constant 3 : index
    %c0_197 = arith.constant 0 : index
    %c0_198 = arith.constant 0 : index
    %215 = vector.load %arg6[%c3_196, %c0_197, %c0_198] : memref<5x18x128xf32, #tpu.memory_space<vmem>>, vector<1x16x128xf32>
    %216 = vector.shape_cast %215 : vector<1x16x128xf32> to vector<16x128xf32>
    %c6 = arith.constant 6 : index
    %c0_199 = arith.constant 0 : index
    %c0_200 = arith.constant 0 : index
    %c0_201 = arith.constant 0 : index
    %217 = vector.load %arg2[%c6, %c0_199, %c0_200, %c0_201] : memref<22x3x128x128xf32, #tpu.memory_space<vmem>>, vector<1x1x128x128xf32>
    %218 = vector.shape_cast %217 : vector<1x1x128x128xf32> to vector<128x128xf32>
    %cst_202 = arith.constant dense<0.000000e+00> : vector<16x128xf32>
    %219 = tpu.matmul %216, %218, %cst_202 {dimension_numbers = #tpu.dot_dimension_numbers<[1], [0], [0], [1], [0, 0, 1, 1], [], []>} : vector<16x128xf32>, vector<128x128xf32>, vector<16x128xf32> -> vector<16x128xf32>
    %220 = arith.addf %214, %219 : vector<16x128xf32>
    %c3_203 = arith.constant 3 : index
    %c1_204 = arith.constant 1 : index
    %c0_205 = arith.constant 0 : index
    %221 = vector.load %arg6[%c3_203, %c1_204, %c0_205] : memref<5x18x128xf32, #tpu.memory_space<vmem>>, vector<1x16x128xf32>
    %222 = vector.shape_cast %221 : vector<1x16x128xf32> to vector<16x128xf32>
    %c6_206 = arith.constant 6 : index
    %c1_207 = arith.constant 1 : index
    %c0_208 = arith.constant 0 : index
    %c0_209 = arith.constant 0 : index
    %223 = vector.load %arg2[%c6_206, %c1_207, %c0_208, %c0_209] : memref<22x3x128x128xf32, #tpu.memory_space<vmem>>, vector<1x1x128x128xf32>
    %224 = vector.shape_cast %223 : vector<1x1x128x128xf32> to vector<128x128xf32>
    %cst_210 = arith.constant dense<0.000000e+00> : vector<16x128xf32>
    %225 = tpu.matmul %222, %224, %cst_210 {dimension_numbers = #tpu.dot_dimension_numbers<[1], [0], [0], [1], [0, 0, 1, 1], [], []>} : vector<16x128xf32>, vector<128x128xf32>, vector<16x128xf32> -> vector<16x128xf32>
    %226 = arith.addf %220, %225 : vector<16x128xf32>
    %c3_211 = arith.constant 3 : index
    %c2_212 = arith.constant 2 : index
    %c0_213 = arith.constant 0 : index
    %227 = vector.load %arg6[%c3_211, %c2_212, %c0_213] : memref<5x18x128xf32, #tpu.memory_space<vmem>>, vector<1x16x128xf32>
    %228 = vector.shape_cast %227 : vector<1x16x128xf32> to vector<16x128xf32>
    %c6_214 = arith.constant 6 : index
    %c2_215 = arith.constant 2 : index
    %c0_216 = arith.constant 0 : index
    %c0_217 = arith.constant 0 : index
    %229 = vector.load %arg2[%c6_214, %c2_215, %c0_216, %c0_217] : memref<22x3x128x128xf32, #tpu.memory_space<vmem>>, vector<1x1x128x128xf32>
    %230 = vector.shape_cast %229 : vector<1x1x128x128xf32> to vector<128x128xf32>
    %cst_218 = arith.constant dense<0.000000e+00> : vector<16x128xf32>
    %231 = tpu.matmul %228, %230, %cst_218 {dimension_numbers = #tpu.dot_dimension_numbers<[1], [0], [0], [1], [0, 0, 1, 1], [], []>} : vector<16x128xf32>, vector<128x128xf32>, vector<16x128xf32> -> vector<16x128xf32>
    %232 = arith.addf %226, %231 : vector<16x128xf32>
    %233 = vector.shape_cast %232 : vector<16x128xf32> to vector<1x16x128xf32>
    %cst_219 = arith.constant dense<0.000000e+00> : vector<1xf32>
    %234 = vector.multi_reduction <add>, %233, %cst_219 [1, 2] : vector<1x16x128xf32> to vector<1xf32>
    %235 = vector.shape_cast %234 : vector<1xf32> to vector<1x1x1xf32>
    %236 = vector.extract %235[0, 0, 0] : f32 from vector<1x1x1xf32>
    %cst_220 = arith.constant 2.048000e+03 : f32
    %237 = arith.divf %236, %cst_220 : f32
    %238 = vector.broadcast %237 : f32 to vector<16x128xf32>
    %239 = arith.subf %232, %238 : vector<16x128xf32>
    %240 = arith.mulf %239, %239 : vector<16x128xf32>
    %241 = vector.shape_cast %240 : vector<16x128xf32> to vector<1x16x128xf32>
    %cst_221 = arith.constant dense<0.000000e+00> : vector<1xf32>
    %242 = vector.multi_reduction <add>, %241, %cst_221 [1, 2] : vector<1x16x128xf32> to vector<1xf32>
    %243 = vector.shape_cast %242 : vector<1xf32> to vector<1x1x1xf32>
    %244 = vector.extract %243[0, 0, 0] : f32 from vector<1x1x1xf32>
    %cst_222 = arith.constant 2.048000e+03 : f32
    %245 = arith.divf %244, %cst_222 : f32
    %cst_223 = arith.constant 9.99999974E-6 : f32
    %246 = arith.addf %245, %cst_223 : f32
    %247 = math.rsqrt %246 : f32
    %248 = vector.broadcast %237 : f32 to vector<16x128xf32>
    %249 = arith.subf %232, %248 : vector<16x128xf32>
    %250 = vector.broadcast %247 : f32 to vector<16x128xf32>
    %251 = arith.mulf %249, %250 : vector<16x128xf32>
    %c0_224 = arith.constant 0 : index
    %c0_225 = arith.constant 0 : index
    %c0_226 = arith.constant 0 : index
    %252 = vector.load %arg3[%c0_224, %c0_225, %c0_226] : memref<2x1x128xf32, #tpu.memory_space<vmem>>, vector<1x1x128xf32>
    %253 = vector.shape_cast %252 : vector<1x1x128xf32> to vector<1x128xf32>
    %254 = vector.broadcast %253 : vector<1x128xf32> to vector<16x128xf32>
    %255 = arith.mulf %251, %254 : vector<16x128xf32>
    %c0_227 = arith.constant 0 : index
    %c0_228 = arith.constant 0 : index
    %c0_229 = arith.constant 0 : index
    %256 = vector.load %arg4[%c0_227, %c0_228, %c0_229] : memref<2x1x128xf32, #tpu.memory_space<vmem>>, vector<1x1x128xf32>
    %257 = vector.shape_cast %256 : vector<1x1x128xf32> to vector<1x128xf32>
    %258 = vector.broadcast %257 : vector<1x128xf32> to vector<16x128xf32>
    %259 = arith.addf %255, %258 : vector<16x128xf32>
    %cst_230 = arith.constant 0.000000e+00 : f32
    %260 = vector.broadcast %cst_230 : f32 to vector<16x128xf32>
    %261 = arith.maximumf %259, %260 : vector<16x128xf32>
    %c4_231 = arith.constant 4 : index
    %c1_232 = arith.constant 1 : index
    %c0_233 = arith.constant 0 : index
    %262 = vector.load %arg6[%c4_231, %c1_232, %c0_233] : memref<5x18x128xf32, #tpu.memory_space<vmem>>, vector<1x16x128xf32>
    %263 = vector.shape_cast %262 : vector<1x16x128xf32> to vector<16x128xf32>
    %264 = vector.shape_cast %261 : vector<16x128xf32> to vector<1x16x128xf32>
    tpu.vector_store %arg6[%c4_231, %c1_232, %c0_233], %264 {strides = array<i32>} : memref<5x18x128xf32, #tpu.memory_space<vmem>>, vector<1x16x128xf32>,
    %cst_234 = arith.constant 0.000000e+00 : f32
    %265 = vector.broadcast %cst_234 : f32 to vector<16x128xf32>
    %c1_235 = arith.constant 1 : index
    %c0_236 = arith.constant 0 : index
    %c0_237 = arith.constant 0 : index
    %266 = vector.load %arg6[%c1_235, %c0_236, %c0_237] : memref<5x18x128xf32, #tpu.memory_space<vmem>>, vector<1x16x128xf32>
    %267 = vector.shape_cast %266 : vector<1x16x128xf32> to vector<16x128xf32>
    %c7 = arith.constant 7 : index
    %c0_238 = arith.constant 0 : index
    %c0_239 = arith.constant 0 : index
    %c0_240 = arith.constant 0 : index
    %268 = vector.load %arg2[%c7, %c0_238, %c0_239, %c0_240] : memref<22x3x128x128xf32, #tpu.memory_space<vmem>>, vector<1x1x128x128xf32>
    %269 = vector.shape_cast %268 : vector<1x1x128x128xf32> to vector<128x128xf32>
    %cst_241 = arith.constant dense<0.000000e+00> : vector<16x128xf32>
    %270 = tpu.matmul %267, %269, %cst_241 {dimension_numbers = #tpu.dot_dimension_numbers<[1], [0], [0], [1], [0, 0, 1, 1], [], []>} : vector<16x128xf32>, vector<128x128xf32>, vector<16x128xf32> -> vector<16x128xf32>
    %271 = arith.addf %265, %270 : vector<16x128xf32>
    %c1_242 = arith.constant 1 : index
    %c1_243 = arith.constant 1 : index
    %c0_244 = arith.constant 0 : index
    %272 = vector.load %arg6[%c1_242, %c1_243, %c0_244] : memref<5x18x128xf32, #tpu.memory_space<vmem>>, vector<1x16x128xf32>
    %273 = vector.shape_cast %272 : vector<1x16x128xf32> to vector<16x128xf32>
    %c7_245 = arith.constant 7 : index
    %c1_246 = arith.constant 1 : index
    %c0_247 = arith.constant 0 : index
    %c0_248 = arith.constant 0 : index
    %274 = vector.load %arg2[%c7_245, %c1_246, %c0_247, %c0_248] : memref<22x3x128x128xf32, #tpu.memory_space<vmem>>, vector<1x1x128x128xf32>
    %275 = vector.shape_cast %274 : vector<1x1x128x128xf32> to vector<128x128xf32>
    %cst_249 = arith.constant dense<0.000000e+00> : vector<16x128xf32>
    %276 = tpu.matmul %273, %275, %cst_249 {dimension_numbers = #tpu.dot_dimension_numbers<[1], [0], [0], [1], [0, 0, 1, 1], [], []>} : vector<16x128xf32>, vector<128x128xf32>, vector<16x128xf32> -> vector<16x128xf32>
    %277 = arith.addf %271, %276 : vector<16x128xf32>
    %c1_250 = arith.constant 1 : index
    %c2_251 = arith.constant 2 : index
    %c0_252 = arith.constant 0 : index
    %278 = vector.load %arg6[%c1_250, %c2_251, %c0_252] : memref<5x18x128xf32, #tpu.memory_space<vmem>>, vector<1x16x128xf32>
    %279 = vector.shape_cast %278 : vector<1x16x128xf32> to vector<16x128xf32>
    %c7_253 = arith.constant 7 : index
    %c2_254 = arith.constant 2 : index
    %c0_255 = arith.constant 0 : index
    %c0_256 = arith.constant 0 : index
    %280 = vector.load %arg2[%c7_253, %c2_254, %c0_255, %c0_256] : memref<22x3x128x128xf32, #tpu.memory_space<vmem>>, vector<1x1x128x128xf32>
    %281 = vector.shape_cast %280 : vector<1x1x128x128xf32> to vector<128x128xf32>
    %cst_257 = arith.constant dense<0.000000e+00> : vector<16x128xf32>
    %282 = tpu.matmul %279, %281, %cst_257 {dimension_numbers = #tpu.dot_dimension_numbers<[1], [0], [0], [1], [0, 0, 1, 1], [], []>} : vector<16x128xf32>, vector<128x128xf32>, vector<16x128xf32> -> vector<16x128xf32>
    %283 = arith.addf %277, %282 : vector<16x128xf32>
    %c2_258 = arith.constant 2 : index
    %c0_259 = arith.constant 0 : index
    %c0_260 = arith.constant 0 : index
    %284 = vector.load %arg6[%c2_258, %c0_259, %c0_260] : memref<5x18x128xf32, #tpu.memory_space<vmem>>, vector<1x16x128xf32>
    %285 = vector.shape_cast %284 : vector<1x16x128xf32> to vector<16x128xf32>
    %c8 = arith.constant 8 : index
    %c0_261 = arith.constant 0 : index
    %c0_262 = arith.constant 0 : index
    %c0_263 = arith.constant 0 : index
    %286 = vector.load %arg2[%c8, %c0_261, %c0_262, %c0_263] : memref<22x3x128x128xf32, #tpu.memory_space<vmem>>, vector<1x1x128x128xf32>
    %287 = vector.shape_cast %286 : vector<1x1x128x128xf32> to vector<128x128xf32>
    %cst_264 = arith.constant dense<0.000000e+00> : vector<16x128xf32>
    %288 = tpu.matmul %285, %287, %cst_264 {dimension_numbers = #tpu.dot_dimension_numbers<[1], [0], [0], [1], [0, 0, 1, 1], [], []>} : vector<16x128xf32>, vector<128x128xf32>, vector<16x128xf32> -> vector<16x128xf32>
    %289 = arith.addf %283, %288 : vector<16x128xf32>
    %c2_265 = arith.constant 2 : index
    %c1_266 = arith.constant 1 : index
    %c0_267 = arith.constant 0 : index
    %290 = vector.load %arg6[%c2_265, %c1_266, %c0_267] : memref<5x18x128xf32, #tpu.memory_space<vmem>>, vector<1x16x128xf32>
    %291 = vector.shape_cast %290 : vector<1x16x128xf32> to vector<16x128xf32>
    %c8_268 = arith.constant 8 : index
    %c1_269 = arith.constant 1 : index
    %c0_270 = arith.constant 0 : index
    %c0_271 = arith.constant 0 : index
    %292 = vector.load %arg2[%c8_268, %c1_269, %c0_270, %c0_271] : memref<22x3x128x128xf32, #tpu.memory_space<vmem>>, vector<1x1x128x128xf32>
    %293 = vector.shape_cast %292 : vector<1x1x128x128xf32> to vector<128x128xf32>
    %cst_272 = arith.constant dense<0.000000e+00> : vector<16x128xf32>
    %294 = tpu.matmul %291, %293, %cst_272 {dimension_numbers = #tpu.dot_dimension_numbers<[1], [0], [0], [1], [0, 0, 1, 1], [], []>} : vector<16x128xf32>, vector<128x128xf32>, vector<16x128xf32> -> vector<16x128xf32>
    %295 = arith.addf %289, %294 : vector<16x128xf32>
    %c2_273 = arith.constant 2 : index
    %c2_274 = arith.constant 2 : index
    %c0_275 = arith.constant 0 : index
    %296 = vector.load %arg6[%c2_273, %c2_274, %c0_275] : memref<5x18x128xf32, #tpu.memory_space<vmem>>, vector<1x16x128xf32>
    %297 = vector.shape_cast %296 : vector<1x16x128xf32> to vector<16x128xf32>
    %c8_276 = arith.constant 8 : index
    %c2_277 = arith.constant 2 : index
    %c0_278 = arith.constant 0 : index
    %c0_279 = arith.constant 0 : index
    %298 = vector.load %arg2[%c8_276, %c2_277, %c0_278, %c0_279] : memref<22x3x128x128xf32, #tpu.memory_space<vmem>>, vector<1x1x128x128xf32>
    %299 = vector.shape_cast %298 : vector<1x1x128x128xf32> to vector<128x128xf32>
    %cst_280 = arith.constant dense<0.000000e+00> : vector<16x128xf32>
    %300 = tpu.matmul %297, %299, %cst_280 {dimension_numbers = #tpu.dot_dimension_numbers<[1], [0], [0], [1], [0, 0, 1, 1], [], []>} : vector<16x128xf32>, vector<128x128xf32>, vector<16x128xf32> -> vector<16x128xf32>
    %301 = arith.addf %295, %300 : vector<16x128xf32>
    %c3_281 = arith.constant 3 : index
    %c0_282 = arith.constant 0 : index
    %c0_283 = arith.constant 0 : index
    %302 = vector.load %arg6[%c3_281, %c0_282, %c0_283] : memref<5x18x128xf32, #tpu.memory_space<vmem>>, vector<1x16x128xf32>
    %303 = vector.shape_cast %302 : vector<1x16x128xf32> to vector<16x128xf32>
    %c9 = arith.constant 9 : index
    %c0_284 = arith.constant 0 : index
    %c0_285 = arith.constant 0 : index
    %c0_286 = arith.constant 0 : index
    %304 = vector.load %arg2[%c9, %c0_284, %c0_285, %c0_286] : memref<22x3x128x128xf32, #tpu.memory_space<vmem>>, vector<1x1x128x128xf32>
    %305 = vector.shape_cast %304 : vector<1x1x128x128xf32> to vector<128x128xf32>
    %cst_287 = arith.constant dense<0.000000e+00> : vector<16x128xf32>
    %306 = tpu.matmul %303, %305, %cst_287 {dimension_numbers = #tpu.dot_dimension_numbers<[1], [0], [0], [1], [0, 0, 1, 1], [], []>} : vector<16x128xf32>, vector<128x128xf32>, vector<16x128xf32> -> vector<16x128xf32>
    %307 = arith.addf %301, %306 : vector<16x128xf32>
    %c3_288 = arith.constant 3 : index
    %c1_289 = arith.constant 1 : index
    %c0_290 = arith.constant 0 : index
    %308 = vector.load %arg6[%c3_288, %c1_289, %c0_290] : memref<5x18x128xf32, #tpu.memory_space<vmem>>, vector<1x16x128xf32>
    %309 = vector.shape_cast %308 : vector<1x16x128xf32> to vector<16x128xf32>
    %c9_291 = arith.constant 9 : index
    %c1_292 = arith.constant 1 : index
    %c0_293 = arith.constant 0 : index
    %c0_294 = arith.constant 0 : index
    %310 = vector.load %arg2[%c9_291, %c1_292, %c0_293, %c0_294] : memref<22x3x128x128xf32, #tpu.memory_space<vmem>>, vector<1x1x128x128xf32>
    %311 = vector.shape_cast %310 : vector<1x1x128x128xf32> to vector<128x128xf32>
    %cst_295 = arith.constant dense<0.000000e+00> : vector<16x128xf32>
    %312 = tpu.matmul %309, %311, %cst_295 {dimension_numbers = #tpu.dot_dimension_numbers<[1], [0], [0], [1], [0, 0, 1, 1], [], []>} : vector<16x128xf32>, vector<128x128xf32>, vector<16x128xf32> -> vector<16x128xf32>
    %313 = arith.addf %307, %312 : vector<16x128xf32>
    %c3_296 = arith.constant 3 : index
    %c2_297 = arith.constant 2 : index
    %c0_298 = arith.constant 0 : index
    %314 = vector.load %arg6[%c3_296, %c2_297, %c0_298] : memref<5x18x128xf32, #tpu.memory_space<vmem>>, vector<1x16x128xf32>
    %315 = vector.shape_cast %314 : vector<1x16x128xf32> to vector<16x128xf32>
    %c9_299 = arith.constant 9 : index
    %c2_300 = arith.constant 2 : index
    %c0_301 = arith.constant 0 : index
    %c0_302 = arith.constant 0 : index
    %316 = vector.load %arg2[%c9_299, %c2_300, %c0_301, %c0_302] : memref<22x3x128x128xf32, #tpu.memory_space<vmem>>, vector<1x1x128x128xf32>
    %317 = vector.shape_cast %316 : vector<1x1x128x128xf32> to vector<128x128xf32>
    %cst_303 = arith.constant dense<0.000000e+00> : vector<16x128xf32>
    %318 = tpu.matmul %315, %317, %cst_303 {dimension_numbers = #tpu.dot_dimension_numbers<[1], [0], [0], [1], [0, 0, 1, 1], [], []>} : vector<16x128xf32>, vector<128x128xf32>, vector<16x128xf32> -> vector<16x128xf32>
    %319 = arith.addf %313, %318 : vector<16x128xf32>
    %c4_304 = arith.constant 4 : index
    %c0_305 = arith.constant 0 : index
    %c0_306 = arith.constant 0 : index
    %320 = vector.load %arg6[%c4_304, %c0_305, %c0_306] : memref<5x18x128xf32, #tpu.memory_space<vmem>>, vector<1x16x128xf32>
    %321 = vector.shape_cast %320 : vector<1x16x128xf32> to vector<16x128xf32>
    %c10 = arith.constant 10 : index
    %c0_307 = arith.constant 0 : index
    %c0_308 = arith.constant 0 : index
    %c0_309 = arith.constant 0 : index
    %322 = vector.load %arg2[%c10, %c0_307, %c0_308, %c0_309] : memref<22x3x128x128xf32, #tpu.memory_space<vmem>>, vector<1x1x128x128xf32>
    %323 = vector.shape_cast %322 : vector<1x1x128x128xf32> to vector<128x128xf32>
    %cst_310 = arith.constant dense<0.000000e+00> : vector<16x128xf32>
    %324 = tpu.matmul %321, %323, %cst_310 {dimension_numbers = #tpu.dot_dimension_numbers<[1], [0], [0], [1], [0, 0, 1, 1], [], []>} : vector<16x128xf32>, vector<128x128xf32>, vector<16x128xf32> -> vector<16x128xf32>
    %325 = arith.addf %319, %324 : vector<16x128xf32>
    %c4_311 = arith.constant 4 : index
    %c1_312 = arith.constant 1 : index
    %c0_313 = arith.constant 0 : index
    %326 = vector.load %arg6[%c4_311, %c1_312, %c0_313] : memref<5x18x128xf32, #tpu.memory_space<vmem>>, vector<1x16x128xf32>
    %327 = vector.shape_cast %326 : vector<1x16x128xf32> to vector<16x128xf32>
    %c10_314 = arith.constant 10 : index
    %c1_315 = arith.constant 1 : index
    %c0_316 = arith.constant 0 : index
    %c0_317 = arith.constant 0 : index
    %328 = vector.load %arg2[%c10_314, %c1_315, %c0_316, %c0_317] : memref<22x3x128x128xf32, #tpu.memory_space<vmem>>, vector<1x1x128x128xf32>
    %329 = vector.shape_cast %328 : vector<1x1x128x128xf32> to vector<128x128xf32>
    %cst_318 = arith.constant dense<0.000000e+00> : vector<16x128xf32>
    %330 = tpu.matmul %327, %329, %cst_318 {dimension_numbers = #tpu.dot_dimension_numbers<[1], [0], [0], [1], [0, 0, 1, 1], [], []>} : vector<16x128xf32>, vector<128x128xf32>, vector<16x128xf32> -> vector<16x128xf32>
    %331 = arith.addf %325, %330 : vector<16x128xf32>
    %c4_319 = arith.constant 4 : index
    %c2_320 = arith.constant 2 : index
    %c0_321 = arith.constant 0 : index
    %332 = vector.load %arg6[%c4_319, %c2_320, %c0_321] : memref<5x18x128xf32, #tpu.memory_space<vmem>>, vector<1x16x128xf32>
    %333 = vector.shape_cast %332 : vector<1x16x128xf32> to vector<16x128xf32>
    %c10_322 = arith.constant 10 : index
    %c2_323 = arith.constant 2 : index
    %c0_324 = arith.constant 0 : index
    %c0_325 = arith.constant 0 : index
    %334 = vector.load %arg2[%c10_322, %c2_323, %c0_324, %c0_325] : memref<22x3x128x128xf32, #tpu.memory_space<vmem>>, vector<1x1x128x128xf32>
    %335 = vector.shape_cast %334 : vector<1x1x128x128xf32> to vector<128x128xf32>
    %cst_326 = arith.constant dense<0.000000e+00> : vector<16x128xf32>
    %336 = tpu.matmul %333, %335, %cst_326 {dimension_numbers = #tpu.dot_dimension_numbers<[1], [0], [0], [1], [0, 0, 1, 1], [], []>} : vector<16x128xf32>, vector<128x128xf32>, vector<16x128xf32> -> vector<16x128xf32>
    %337 = arith.addf %331, %336 : vector<16x128xf32>
    %338 = vector.shape_cast %337 : vector<16x128xf32> to vector<1x16x128xf32>
    %cst_327 = arith.constant dense<0.000000e+00> : vector<1xf32>
    %339 = vector.multi_reduction <add>, %338, %cst_327 [1, 2] : vector<1x16x128xf32> to vector<1xf32>
    %340 = vector.shape_cast %339 : vector<1xf32> to vector<1x1x1xf32>
    %341 = vector.extract %340[0, 0, 0] : f32 from vector<1x1x1xf32>
    %cst_328 = arith.constant 2.048000e+03 : f32
    %342 = arith.divf %341, %cst_328 : f32
    %343 = vector.broadcast %342 : f32 to vector<16x128xf32>
    %344 = arith.subf %337, %343 : vector<16x128xf32>
    %345 = arith.mulf %344, %344 : vector<16x128xf32>
    %346 = vector.shape_cast %345 : vector<16x128xf32> to vector<1x16x128xf32>
    %cst_329 = arith.constant dense<0.000000e+00> : vector<1xf32>
    %347 = vector.multi_reduction <add>, %346, %cst_329 [1, 2] : vector<1x16x128xf32> to vector<1xf32>
    %348 = vector.shape_cast %347 : vector<1xf32> to vector<1x1x1xf32>
    %349 = vector.extract %348[0, 0, 0] : f32 from vector<1x1x1xf32>
    %cst_330 = arith.constant 2.048000e+03 : f32
    %350 = arith.divf %349, %cst_330 : f32
    %cst_331 = arith.constant 9.99999974E-6 : f32
    %351 = arith.addf %350, %cst_331 : f32
    %352 = math.rsqrt %351 : f32
    %353 = vector.broadcast %342 : f32 to vector<16x128xf32>
    %354 = arith.subf %337, %353 : vector<16x128xf32>
    %355 = vector.broadcast %352 : f32 to vector<16x128xf32>
    %356 = arith.mulf %354, %355 : vector<16x128xf32>
    %c0_332 = arith.constant 0 : index
    %c0_333 = arith.constant 0 : index
    %c0_334 = arith.constant 0 : index
    %357 = vector.load %arg3[%c0_332, %c0_333, %c0_334] : memref<2x1x128xf32, #tpu.memory_space<vmem>>, vector<1x1x128xf32>
    %358 = vector.shape_cast %357 : vector<1x1x128xf32> to vector<1x128xf32>
    %359 = vector.broadcast %358 : vector<1x128xf32> to vector<16x128xf32>
    %360 = arith.mulf %356, %359 : vector<16x128xf32>
    %c0_335 = arith.constant 0 : index
    %c0_336 = arith.constant 0 : index
    %c0_337 = arith.constant 0 : index
    %361 = vector.load %arg4[%c0_335, %c0_336, %c0_337] : memref<2x1x128xf32, #tpu.memory_space<vmem>>, vector<1x1x128xf32>
    %362 = vector.shape_cast %361 : vector<1x1x128xf32> to vector<1x128xf32>
    %363 = vector.broadcast %362 : vector<1x128xf32> to vector<16x128xf32>
    %364 = arith.addf %360, %363 : vector<16x128xf32>
    %cst_338 = arith.constant 0.000000e+00 : f32
    %365 = vector.broadcast %cst_338 : f32 to vector<16x128xf32>
    %366 = arith.maximumf %364, %365 : vector<16x128xf32>
    %367 = arith.addf %366, %3 : vector<16x128xf32>
    %c0_339 = arith.constant 0 : index
    %c1_340 = arith.constant 1 : index
    %c0_341 = arith.constant 0 : index
    %368 = vector.load %arg6[%c0_339, %c1_340, %c0_341] : memref<5x18x128xf32, #tpu.memory_space<vmem>>, vector<1x16x128xf32>
    %369 = vector.shape_cast %368 : vector<1x16x128xf32> to vector<16x128xf32>
    %370 = vector.shape_cast %367 : vector<16x128xf32> to vector<1x16x128xf32>
    tpu.vector_store %arg6[%c0_339, %c1_340, %c0_341], %370 {strides = array<i32>} : memref<5x18x128xf32, #tpu.memory_space<vmem>>, vector<1x16x128xf32>,
    %cst_342 = arith.constant 0.000000e+00 : f32
    %371 = vector.broadcast %cst_342 : f32 to vector<16x128xf32>
    %c0_343 = arith.constant 0 : index
    %c0_344 = arith.constant 0 : index
    %c0_345 = arith.constant 0 : index
    %372 = vector.load %arg6[%c0_343, %c0_344, %c0_345] : memref<5x18x128xf32, #tpu.memory_space<vmem>>, vector<1x16x128xf32>
    %373 = vector.shape_cast %372 : vector<1x16x128xf32> to vector<16x128xf32>
    %c11 = arith.constant 11 : index
    %c0_346 = arith.constant 0 : index
    %c0_347 = arith.constant 0 : index
    %c0_348 = arith.constant 0 : index
    %374 = vector.load %arg2[%c11, %c0_346, %c0_347, %c0_348] : memref<22x3x128x128xf32, #tpu.memory_space<vmem>>, vector<1x1x128x128xf32>
    %375 = vector.shape_cast %374 : vector<1x1x128x128xf32> to vector<128x128xf32>
    %cst_349 = arith.constant dense<0.000000e+00> : vector<16x128xf32>
    %376 = tpu.matmul %373, %375, %cst_349 {dimension_numbers = #tpu.dot_dimension_numbers<[1], [0], [0], [1], [0, 0, 1, 1], [], []>} : vector<16x128xf32>, vector<128x128xf32>, vector<16x128xf32> -> vector<16x128xf32>
    %377 = arith.addf %371, %376 : vector<16x128xf32>
    %c0_350 = arith.constant 0 : index
    %c1_351 = arith.constant 1 : index
    %c0_352 = arith.constant 0 : index
    %378 = vector.load %arg6[%c0_350, %c1_351, %c0_352] : memref<5x18x128xf32, #tpu.memory_space<vmem>>, vector<1x16x128xf32>
    %379 = vector.shape_cast %378 : vector<1x16x128xf32> to vector<16x128xf32>
    %c11_353 = arith.constant 11 : index
    %c1_354 = arith.constant 1 : index
    %c0_355 = arith.constant 0 : index
    %c0_356 = arith.constant 0 : index
    %380 = vector.load %arg2[%c11_353, %c1_354, %c0_355, %c0_356] : memref<22x3x128x128xf32, #tpu.memory_space<vmem>>, vector<1x1x128x128xf32>
    %381 = vector.shape_cast %380 : vector<1x1x128x128xf32> to vector<128x128xf32>
    %cst_357 = arith.constant dense<0.000000e+00> : vector<16x128xf32>
    %382 = tpu.matmul %379, %381, %cst_357 {dimension_numbers = #tpu.dot_dimension_numbers<[1], [0], [0], [1], [0, 0, 1, 1], [], []>} : vector<16x128xf32>, vector<128x128xf32>, vector<16x128xf32> -> vector<16x128xf32>
    %383 = arith.addf %377, %382 : vector<16x128xf32>
    %c0_358 = arith.constant 0 : index
    %c2_359 = arith.constant 2 : index
    %c0_360 = arith.constant 0 : index
    %384 = vector.load %arg6[%c0_358, %c2_359, %c0_360] : memref<5x18x128xf32, #tpu.memory_space<vmem>>, vector<1x16x128xf32>
    %385 = vector.shape_cast %384 : vector<1x16x128xf32> to vector<16x128xf32>
    %c11_361 = arith.constant 11 : index
    %c2_362 = arith.constant 2 : index
    %c0_363 = arith.constant 0 : index
    %c0_364 = arith.constant 0 : index
    %386 = vector.load %arg2[%c11_361, %c2_362, %c0_363, %c0_364] : memref<22x3x128x128xf32, #tpu.memory_space<vmem>>, vector<1x1x128x128xf32>
    %387 = vector.shape_cast %386 : vector<1x1x128x128xf32> to vector<128x128xf32>
    %cst_365 = arith.constant dense<0.000000e+00> : vector<16x128xf32>
    %388 = tpu.matmul %385, %387, %cst_365 {dimension_numbers = #tpu.dot_dimension_numbers<[1], [0], [0], [1], [0, 0, 1, 1], [], []>} : vector<16x128xf32>, vector<128x128xf32>, vector<16x128xf32> -> vector<16x128xf32>
    %389 = arith.addf %383, %388 : vector<16x128xf32>
    %390 = vector.shape_cast %389 : vector<16x128xf32> to vector<1x16x128xf32>
    %cst_366 = arith.constant dense<0.000000e+00> : vector<1xf32>
    %391 = vector.multi_reduction <add>, %390, %cst_366 [1, 2] : vector<1x16x128xf32> to vector<1xf32>
    %392 = vector.shape_cast %391 : vector<1xf32> to vector<1x1x1xf32>
    %393 = vector.extract %392[0, 0, 0] : f32 from vector<1x1x1xf32>
    %cst_367 = arith.constant 2.048000e+03 : f32
    %394 = arith.divf %393, %cst_367 : f32
    %395 = vector.broadcast %394 : f32 to vector<16x128xf32>
    %396 = arith.subf %389, %395 : vector<16x128xf32>
    %397 = arith.mulf %396, %396 : vector<16x128xf32>
    %398 = vector.shape_cast %397 : vector<16x128xf32> to vector<1x16x128xf32>
    %cst_368 = arith.constant dense<0.000000e+00> : vector<1xf32>
    %399 = vector.multi_reduction <add>, %398, %cst_368 [1, 2] : vector<1x16x128xf32> to vector<1xf32>
    %400 = vector.shape_cast %399 : vector<1xf32> to vector<1x1x1xf32>
    %401 = vector.extract %400[0, 0, 0] : f32 from vector<1x1x1xf32>
    %cst_369 = arith.constant 2.048000e+03 : f32
    %402 = arith.divf %401, %cst_369 : f32
    %cst_370 = arith.constant 9.99999974E-6 : f32
    %403 = arith.addf %402, %cst_370 : f32
    %404 = math.rsqrt %403 : f32
    %405 = vector.broadcast %394 : f32 to vector<16x128xf32>
    %406 = arith.subf %389, %405 : vector<16x128xf32>
    %407 = vector.broadcast %404 : f32 to vector<16x128xf32>
    %408 = arith.mulf %406, %407 : vector<16x128xf32>
    %c1_371 = arith.constant 1 : index
    %c0_372 = arith.constant 0 : index
    %c0_373 = arith.constant 0 : index
    %409 = vector.load %arg3[%c1_371, %c0_372, %c0_373] : memref<2x1x128xf32, #tpu.memory_space<vmem>>, vector<1x1x128xf32>
    %410 = vector.shape_cast %409 : vector<1x1x128xf32> to vector<1x128xf32>
    %411 = vector.broadcast %410 : vector<1x128xf32> to vector<16x128xf32>
    %412 = arith.mulf %408, %411 : vector<16x128xf32>
    %c1_374 = arith.constant 1 : index
    %c0_375 = arith.constant 0 : index
    %c0_376 = arith.constant 0 : index
    %413 = vector.load %arg4[%c1_374, %c0_375, %c0_376] : memref<2x1x128xf32, #tpu.memory_space<vmem>>, vector<1x1x128xf32>
    %414 = vector.shape_cast %413 : vector<1x1x128xf32> to vector<1x128xf32>
    %415 = vector.broadcast %414 : vector<1x128xf32> to vector<16x128xf32>
    %416 = arith.addf %412, %415 : vector<16x128xf32>
    %cst_377 = arith.constant 0.000000e+00 : f32
    %417 = vector.broadcast %cst_377 : f32 to vector<16x128xf32>
    %418 = arith.maximumf %416, %417 : vector<16x128xf32>
    %c1_378 = arith.constant 1 : index
    %c1_379 = arith.constant 1 : index
    %c0_380 = arith.constant 0 : index
    %419 = vector.load %arg6[%c1_378, %c1_379, %c0_380] : memref<5x18x128xf32, #tpu.memory_space<vmem>>, vector<1x16x128xf32>
    %420 = vector.shape_cast %419 : vector<1x16x128xf32> to vector<16x128xf32>
    %421 = vector.shape_cast %418 : vector<16x128xf32> to vector<1x16x128xf32>
    tpu.vector_store %arg6[%c1_378, %c1_379, %c0_380], %421 {strides = array<i32>} : memref<5x18x128xf32, #tpu.memory_space<vmem>>, vector<1x16x128xf32>,
    %cst_381 = arith.constant 0.000000e+00 : f32
    %422 = vector.broadcast %cst_381 : f32 to vector<16x128xf32>
    %c1_382 = arith.constant 1 : index
    %c0_383 = arith.constant 0 : index
    %c0_384 = arith.constant 0 : index
    %423 = vector.load %arg6[%c1_382, %c0_383, %c0_384] : memref<5x18x128xf32, #tpu.memory_space<vmem>>, vector<1x16x128xf32>
    %424 = vector.shape_cast %423 : vector<1x16x128xf32> to vector<16x128xf32>
    %c12 = arith.constant 12 : index
    %c0_385 = arith.constant 0 : index
    %c0_386 = arith.constant 0 : index
    %c0_387 = arith.constant 0 : index
    %425 = vector.load %arg2[%c12, %c0_385, %c0_386, %c0_387] : memref<22x3x128x128xf32, #tpu.memory_space<vmem>>, vector<1x1x128x128xf32>
    %426 = vector.shape_cast %425 : vector<1x1x128x128xf32> to vector<128x128xf32>
    %cst_388 = arith.constant dense<0.000000e+00> : vector<16x128xf32>
    %427 = tpu.matmul %424, %426, %cst_388 {dimension_numbers = #tpu.dot_dimension_numbers<[1], [0], [0], [1], [0, 0, 1, 1], [], []>} : vector<16x128xf32>, vector<128x128xf32>, vector<16x128xf32> -> vector<16x128xf32>
    %428 = arith.addf %422, %427 : vector<16x128xf32>
    %c1_389 = arith.constant 1 : index
    %c1_390 = arith.constant 1 : index
    %c0_391 = arith.constant 0 : index
    %429 = vector.load %arg6[%c1_389, %c1_390, %c0_391] : memref<5x18x128xf32, #tpu.memory_space<vmem>>, vector<1x16x128xf32>
    %430 = vector.shape_cast %429 : vector<1x16x128xf32> to vector<16x128xf32>
    %c12_392 = arith.constant 12 : index
    %c1_393 = arith.constant 1 : index
    %c0_394 = arith.constant 0 : index
    %c0_395 = arith.constant 0 : index
    %431 = vector.load %arg2[%c12_392, %c1_393, %c0_394, %c0_395] : memref<22x3x128x128xf32, #tpu.memory_space<vmem>>, vector<1x1x128x128xf32>
    %432 = vector.shape_cast %431 : vector<1x1x128x128xf32> to vector<128x128xf32>
    %cst_396 = arith.constant dense<0.000000e+00> : vector<16x128xf32>
    %433 = tpu.matmul %430, %432, %cst_396 {dimension_numbers = #tpu.dot_dimension_numbers<[1], [0], [0], [1], [0, 0, 1, 1], [], []>} : vector<16x128xf32>, vector<128x128xf32>, vector<16x128xf32> -> vector<16x128xf32>
    %434 = arith.addf %428, %433 : vector<16x128xf32>
    %c1_397 = arith.constant 1 : index
    %c2_398 = arith.constant 2 : index
    %c0_399 = arith.constant 0 : index
    %435 = vector.load %arg6[%c1_397, %c2_398, %c0_399] : memref<5x18x128xf32, #tpu.memory_space<vmem>>, vector<1x16x128xf32>
    %436 = vector.shape_cast %435 : vector<1x16x128xf32> to vector<16x128xf32>
    %c12_400 = arith.constant 12 : index
    %c2_401 = arith.constant 2 : index
    %c0_402 = arith.constant 0 : index
    %c0_403 = arith.constant 0 : index
    %437 = vector.load %arg2[%c12_400, %c2_401, %c0_402, %c0_403] : memref<22x3x128x128xf32, #tpu.memory_space<vmem>>, vector<1x1x128x128xf32>
    %438 = vector.shape_cast %437 : vector<1x1x128x128xf32> to vector<128x128xf32>
    %cst_404 = arith.constant dense<0.000000e+00> : vector<16x128xf32>
    %439 = tpu.matmul %436, %438, %cst_404 {dimension_numbers = #tpu.dot_dimension_numbers<[1], [0], [0], [1], [0, 0, 1, 1], [], []>} : vector<16x128xf32>, vector<128x128xf32>, vector<16x128xf32> -> vector<16x128xf32>
    %440 = arith.addf %434, %439 : vector<16x128xf32>
    %441 = vector.shape_cast %440 : vector<16x128xf32> to vector<1x16x128xf32>
    %cst_405 = arith.constant dense<0.000000e+00> : vector<1xf32>
    %442 = vector.multi_reduction <add>, %441, %cst_405 [1, 2] : vector<1x16x128xf32> to vector<1xf32>
    %443 = vector.shape_cast %442 : vector<1xf32> to vector<1x1x1xf32>
    %444 = vector.extract %443[0, 0, 0] : f32 from vector<1x1x1xf32>
    %cst_406 = arith.constant 2.048000e+03 : f32
    %445 = arith.divf %444, %cst_406 : f32
    %446 = vector.broadcast %445 : f32 to vector<16x128xf32>
    %447 = arith.subf %440, %446 : vector<16x128xf32>
    %448 = arith.mulf %447, %447 : vector<16x128xf32>
    %449 = vector.shape_cast %448 : vector<16x128xf32> to vector<1x16x128xf32>
    %cst_407 = arith.constant dense<0.000000e+00> : vector<1xf32>
    %450 = vector.multi_reduction <add>, %449, %cst_407 [1, 2] : vector<1x16x128xf32> to vector<1xf32>
    %451 = vector.shape_cast %450 : vector<1xf32> to vector<1x1x1xf32>
    %452 = vector.extract %451[0, 0, 0] : f32 from vector<1x1x1xf32>
    %cst_408 = arith.constant 2.048000e+03 : f32
    %453 = arith.divf %452, %cst_408 : f32
    %cst_409 = arith.constant 9.99999974E-6 : f32
    %454 = arith.addf %453, %cst_409 : f32
    %455 = math.rsqrt %454 : f32
    %456 = vector.broadcast %445 : f32 to vector<16x128xf32>
    %457 = arith.subf %440, %456 : vector<16x128xf32>
    %458 = vector.broadcast %455 : f32 to vector<16x128xf32>
    %459 = arith.mulf %457, %458 : vector<16x128xf32>
    %c1_410 = arith.constant 1 : index
    %c0_411 = arith.constant 0 : index
    %c0_412 = arith.constant 0 : index
    %460 = vector.load %arg3[%c1_410, %c0_411, %c0_412] : memref<2x1x128xf32, #tpu.memory_space<vmem>>, vector<1x1x128xf32>
    %461 = vector.shape_cast %460 : vector<1x1x128xf32> to vector<1x128xf32>
    %462 = vector.broadcast %461 : vector<1x128xf32> to vector<16x128xf32>
    %463 = arith.mulf %459, %462 : vector<16x128xf32>
    %c1_413 = arith.constant 1 : index
    %c0_414 = arith.constant 0 : index
    %c0_415 = arith.constant 0 : index
    %464 = vector.load %arg4[%c1_413, %c0_414, %c0_415] : memref<2x1x128xf32, #tpu.memory_space<vmem>>, vector<1x1x128xf32>
    %465 = vector.shape_cast %464 : vector<1x1x128xf32> to vector<1x128xf32>
    %466 = vector.broadcast %465 : vector<1x128xf32> to vector<16x128xf32>
    %467 = arith.addf %463, %466 : vector<16x128xf32>
    %cst_416 = arith.constant 0.000000e+00 : f32
    %468 = vector.broadcast %cst_416 : f32 to vector<16x128xf32>
    %469 = arith.maximumf %467, %468 : vector<16x128xf32>
    %c2_417 = arith.constant 2 : index
    %c1_418 = arith.constant 1 : index
    %c0_419 = arith.constant 0 : index
    %470 = vector.load %arg6[%c2_417, %c1_418, %c0_419] : memref<5x18x128xf32, #tpu.memory_space<vmem>>, vector<1x16x128xf32>
    %471 = vector.shape_cast %470 : vector<1x16x128xf32> to vector<16x128xf32>
    %472 = vector.shape_cast %469 : vector<16x128xf32> to vector<1x16x128xf32>
    tpu.vector_store %arg6[%c2_417, %c1_418, %c0_419], %472 {strides = array<i32>} : memref<5x18x128xf32, #tpu.memory_space<vmem>>, vector<1x16x128xf32>,
    %cst_420 = arith.constant 0.000000e+00 : f32
    %473 = vector.broadcast %cst_420 : f32 to vector<16x128xf32>
    %c1_421 = arith.constant 1 : index
    %c0_422 = arith.constant 0 : index
    %c0_423 = arith.constant 0 : index
    %474 = vector.load %arg6[%c1_421, %c0_422, %c0_423] : memref<5x18x128xf32, #tpu.memory_space<vmem>>, vector<1x16x128xf32>
    %475 = vector.shape_cast %474 : vector<1x16x128xf32> to vector<16x128xf32>
    %c13 = arith.constant 13 : index
    %c0_424 = arith.constant 0 : index
    %c0_425 = arith.constant 0 : index
    %c0_426 = arith.constant 0 : index
    %476 = vector.load %arg2[%c13, %c0_424, %c0_425, %c0_426] : memref<22x3x128x128xf32, #tpu.memory_space<vmem>>, vector<1x1x128x128xf32>
    %477 = vector.shape_cast %476 : vector<1x1x128x128xf32> to vector<128x128xf32>
    %cst_427 = arith.constant dense<0.000000e+00> : vector<16x128xf32>
    %478 = tpu.matmul %475, %477, %cst_427 {dimension_numbers = #tpu.dot_dimension_numbers<[1], [0], [0], [1], [0, 0, 1, 1], [], []>} : vector<16x128xf32>, vector<128x128xf32>, vector<16x128xf32> -> vector<16x128xf32>
    %479 = arith.addf %473, %478 : vector<16x128xf32>
    %c1_428 = arith.constant 1 : index
    %c1_429 = arith.constant 1 : index
    %c0_430 = arith.constant 0 : index
    %480 = vector.load %arg6[%c1_428, %c1_429, %c0_430] : memref<5x18x128xf32, #tpu.memory_space<vmem>>, vector<1x16x128xf32>
    %481 = vector.shape_cast %480 : vector<1x16x128xf32> to vector<16x128xf32>
    %c13_431 = arith.constant 13 : index
    %c1_432 = arith.constant 1 : index
    %c0_433 = arith.constant 0 : index
    %c0_434 = arith.constant 0 : index
    %482 = vector.load %arg2[%c13_431, %c1_432, %c0_433, %c0_434] : memref<22x3x128x128xf32, #tpu.memory_space<vmem>>, vector<1x1x128x128xf32>
    %483 = vector.shape_cast %482 : vector<1x1x128x128xf32> to vector<128x128xf32>
    %cst_435 = arith.constant dense<0.000000e+00> : vector<16x128xf32>
    %484 = tpu.matmul %481, %483, %cst_435 {dimension_numbers = #tpu.dot_dimension_numbers<[1], [0], [0], [1], [0, 0, 1, 1], [], []>} : vector<16x128xf32>, vector<128x128xf32>, vector<16x128xf32> -> vector<16x128xf32>
    %485 = arith.addf %479, %484 : vector<16x128xf32>
    %c1_436 = arith.constant 1 : index
    %c2_437 = arith.constant 2 : index
    %c0_438 = arith.constant 0 : index
    %486 = vector.load %arg6[%c1_436, %c2_437, %c0_438] : memref<5x18x128xf32, #tpu.memory_space<vmem>>, vector<1x16x128xf32>
    %487 = vector.shape_cast %486 : vector<1x16x128xf32> to vector<16x128xf32>
    %c13_439 = arith.constant 13 : index
    %c2_440 = arith.constant 2 : index
    %c0_441 = arith.constant 0 : index
    %c0_442 = arith.constant 0 : index
    %488 = vector.load %arg2[%c13_439, %c2_440, %c0_441, %c0_442] : memref<22x3x128x128xf32, #tpu.memory_space<vmem>>, vector<1x1x128x128xf32>
    %489 = vector.shape_cast %488 : vector<1x1x128x128xf32> to vector<128x128xf32>
    %cst_443 = arith.constant dense<0.000000e+00> : vector<16x128xf32>
    %490 = tpu.matmul %487, %489, %cst_443 {dimension_numbers = #tpu.dot_dimension_numbers<[1], [0], [0], [1], [0, 0, 1, 1], [], []>} : vector<16x128xf32>, vector<128x128xf32>, vector<16x128xf32> -> vector<16x128xf32>
    %491 = arith.addf %485, %490 : vector<16x128xf32>
    %c2_444 = arith.constant 2 : index
    %c0_445 = arith.constant 0 : index
    %c0_446 = arith.constant 0 : index
    %492 = vector.load %arg6[%c2_444, %c0_445, %c0_446] : memref<5x18x128xf32, #tpu.memory_space<vmem>>, vector<1x16x128xf32>
    %493 = vector.shape_cast %492 : vector<1x16x128xf32> to vector<16x128xf32>
    %c14 = arith.constant 14 : index
    %c0_447 = arith.constant 0 : index
    %c0_448 = arith.constant 0 : index
    %c0_449 = arith.constant 0 : index
    %494 = vector.load %arg2[%c14, %c0_447, %c0_448, %c0_449] : memref<22x3x128x128xf32, #tpu.memory_space<vmem>>, vector<1x1x128x128xf32>
    %495 = vector.shape_cast %494 : vector<1x1x128x128xf32> to vector<128x128xf32>
    %cst_450 = arith.constant dense<0.000000e+00> : vector<16x128xf32>
    %496 = tpu.matmul %493, %495, %cst_450 {dimension_numbers = #tpu.dot_dimension_numbers<[1], [0], [0], [1], [0, 0, 1, 1], [], []>} : vector<16x128xf32>, vector<128x128xf32>, vector<16x128xf32> -> vector<16x128xf32>
    %497 = arith.addf %491, %496 : vector<16x128xf32>
    %c2_451 = arith.constant 2 : index
    %c1_452 = arith.constant 1 : index
    %c0_453 = arith.constant 0 : index
    %498 = vector.load %arg6[%c2_451, %c1_452, %c0_453] : memref<5x18x128xf32, #tpu.memory_space<vmem>>, vector<1x16x128xf32>
    %499 = vector.shape_cast %498 : vector<1x16x128xf32> to vector<16x128xf32>
    %c14_454 = arith.constant 14 : index
    %c1_455 = arith.constant 1 : index
    %c0_456 = arith.constant 0 : index
    %c0_457 = arith.constant 0 : index
    %500 = vector.load %arg2[%c14_454, %c1_455, %c0_456, %c0_457] : memref<22x3x128x128xf32, #tpu.memory_space<vmem>>, vector<1x1x128x128xf32>
    %501 = vector.shape_cast %500 : vector<1x1x128x128xf32> to vector<128x128xf32>
    %cst_458 = arith.constant dense<0.000000e+00> : vector<16x128xf32>
    %502 = tpu.matmul %499, %501, %cst_458 {dimension_numbers = #tpu.dot_dimension_numbers<[1], [0], [0], [1], [0, 0, 1, 1], [], []>} : vector<16x128xf32>, vector<128x128xf32>, vector<16x128xf32> -> vector<16x128xf32>
    %503 = arith.addf %497, %502 : vector<16x128xf32>
    %c2_459 = arith.constant 2 : index
    %c2_460 = arith.constant 2 : index
    %c0_461 = arith.constant 0 : index
    %504 = vector.load %arg6[%c2_459, %c2_460, %c0_461] : memref<5x18x128xf32, #tpu.memory_space<vmem>>, vector<1x16x128xf32>
    %505 = vector.shape_cast %504 : vector<1x16x128xf32> to vector<16x128xf32>
    %c14_462 = arith.constant 14 : index
    %c2_463 = arith.constant 2 : index
    %c0_464 = arith.constant 0 : index
    %c0_465 = arith.constant 0 : index
    %506 = vector.load %arg2[%c14_462, %c2_463, %c0_464, %c0_465] : memref<22x3x128x128xf32, #tpu.memory_space<vmem>>, vector<1x1x128x128xf32>
    %507 = vector.shape_cast %506 : vector<1x1x128x128xf32> to vector<128x128xf32>
    %cst_466 = arith.constant dense<0.000000e+00> : vector<16x128xf32>
    %508 = tpu.matmul %505, %507, %cst_466 {dimension_numbers = #tpu.dot_dimension_numbers<[1], [0], [0], [1], [0, 0, 1, 1], [], []>} : vector<16x128xf32>, vector<128x128xf32>, vector<16x128xf32> -> vector<16x128xf32>
    %509 = arith.addf %503, %508 : vector<16x128xf32>
    %510 = vector.shape_cast %509 : vector<16x128xf32> to vector<1x16x128xf32>
    %cst_467 = arith.constant dense<0.000000e+00> : vector<1xf32>
    %511 = vector.multi_reduction <add>, %510, %cst_467 [1, 2] : vector<1x16x128xf32> to vector<1xf32>
    %512 = vector.shape_cast %511 : vector<1xf32> to vector<1x1x1xf32>
    %513 = vector.extract %512[0, 0, 0] : f32 from vector<1x1x1xf32>
    %cst_468 = arith.constant 2.048000e+03 : f32
    %514 = arith.divf %513, %cst_468 : f32
    %515 = vector.broadcast %514 : f32 to vector<16x128xf32>
    %516 = arith.subf %509, %515 : vector<16x128xf32>
    %517 = arith.mulf %516, %516 : vector<16x128xf32>
    %518 = vector.shape_cast %517 : vector<16x128xf32> to vector<1x16x128xf32>
    %cst_469 = arith.constant dense<0.000000e+00> : vector<1xf32>
    %519 = vector.multi_reduction <add>, %518, %cst_469 [1, 2] : vector<1x16x128xf32> to vector<1xf32>
    %520 = vector.shape_cast %519 : vector<1xf32> to vector<1x1x1xf32>
    %521 = vector.extract %520[0, 0, 0] : f32 from vector<1x1x1xf32>
    %cst_470 = arith.constant 2.048000e+03 : f32
    %522 = arith.divf %521, %cst_470 : f32
    %cst_471 = arith.constant 9.99999974E-6 : f32
    %523 = arith.addf %522, %cst_471 : f32
    %524 = math.rsqrt %523 : f32
    %525 = vector.broadcast %514 : f32 to vector<16x128xf32>
    %526 = arith.subf %509, %525 : vector<16x128xf32>
    %527 = vector.broadcast %524 : f32 to vector<16x128xf32>
    %528 = arith.mulf %526, %527 : vector<16x128xf32>
    %c1_472 = arith.constant 1 : index
    %c0_473 = arith.constant 0 : index
    %c0_474 = arith.constant 0 : index
    %529 = vector.load %arg3[%c1_472, %c0_473, %c0_474] : memref<2x1x128xf32, #tpu.memory_space<vmem>>, vector<1x1x128xf32>
    %530 = vector.shape_cast %529 : vector<1x1x128xf32> to vector<1x128xf32>
    %531 = vector.broadcast %530 : vector<1x128xf32> to vector<16x128xf32>
    %532 = arith.mulf %528, %531 : vector<16x128xf32>
    %c1_475 = arith.constant 1 : index
    %c0_476 = arith.constant 0 : index
    %c0_477 = arith.constant 0 : index
    %533 = vector.load %arg4[%c1_475, %c0_476, %c0_477] : memref<2x1x128xf32, #tpu.memory_space<vmem>>, vector<1x1x128xf32>
    %534 = vector.shape_cast %533 : vector<1x1x128xf32> to vector<1x128xf32>
    %535 = vector.broadcast %534 : vector<1x128xf32> to vector<16x128xf32>
    %536 = arith.addf %532, %535 : vector<16x128xf32>
    %cst_478 = arith.constant 0.000000e+00 : f32
    %537 = vector.broadcast %cst_478 : f32 to vector<16x128xf32>
    %538 = arith.maximumf %536, %537 : vector<16x128xf32>
    %c3_479 = arith.constant 3 : index
    %c1_480 = arith.constant 1 : index
    %c0_481 = arith.constant 0 : index
    %539 = vector.load %arg6[%c3_479, %c1_480, %c0_481] : memref<5x18x128xf32, #tpu.memory_space<vmem>>, vector<1x16x128xf32>
    %540 = vector.shape_cast %539 : vector<1x16x128xf32> to vector<16x128xf32>
    %541 = vector.shape_cast %538 : vector<16x128xf32> to vector<1x16x128xf32>
    tpu.vector_store %arg6[%c3_479, %c1_480, %c0_481], %541 {strides = array<i32>} : memref<5x18x128xf32, #tpu.memory_space<vmem>>, vector<1x16x128xf32>,
    %cst_482 = arith.constant 0.000000e+00 : f32
    %542 = vector.broadcast %cst_482 : f32 to vector<16x128xf32>
    %c1_483 = arith.constant 1 : index
    %c0_484 = arith.constant 0 : index
    %c0_485 = arith.constant 0 : index
    %543 = vector.load %arg6[%c1_483, %c0_484, %c0_485] : memref<5x18x128xf32, #tpu.memory_space<vmem>>, vector<1x16x128xf32>
    %544 = vector.shape_cast %543 : vector<1x16x128xf32> to vector<16x128xf32>
    %c15 = arith.constant 15 : index
    %c0_486 = arith.constant 0 : index
    %c0_487 = arith.constant 0 : index
    %c0_488 = arith.constant 0 : index
    %545 = vector.load %arg2[%c15, %c0_486, %c0_487, %c0_488] : memref<22x3x128x128xf32, #tpu.memory_space<vmem>>, vector<1x1x128x128xf32>
    %546 = vector.shape_cast %545 : vector<1x1x128x128xf32> to vector<128x128xf32>
    %cst_489 = arith.constant dense<0.000000e+00> : vector<16x128xf32>
    %547 = tpu.matmul %544, %546, %cst_489 {dimension_numbers = #tpu.dot_dimension_numbers<[1], [0], [0], [1], [0, 0, 1, 1], [], []>} : vector<16x128xf32>, vector<128x128xf32>, vector<16x128xf32> -> vector<16x128xf32>
    %548 = arith.addf %542, %547 : vector<16x128xf32>
    %c1_490 = arith.constant 1 : index
    %c1_491 = arith.constant 1 : index
    %c0_492 = arith.constant 0 : index
    %549 = vector.load %arg6[%c1_490, %c1_491, %c0_492] : memref<5x18x128xf32, #tpu.memory_space<vmem>>, vector<1x16x128xf32>
    %550 = vector.shape_cast %549 : vector<1x16x128xf32> to vector<16x128xf32>
    %c15_493 = arith.constant 15 : index
    %c1_494 = arith.constant 1 : index
    %c0_495 = arith.constant 0 : index
    %c0_496 = arith.constant 0 : index
    %551 = vector.load %arg2[%c15_493, %c1_494, %c0_495, %c0_496] : memref<22x3x128x128xf32, #tpu.memory_space<vmem>>, vector<1x1x128x128xf32>
    %552 = vector.shape_cast %551 : vector<1x1x128x128xf32> to vector<128x128xf32>
    %cst_497 = arith.constant dense<0.000000e+00> : vector<16x128xf32>
    %553 = tpu.matmul %550, %552, %cst_497 {dimension_numbers = #tpu.dot_dimension_numbers<[1], [0], [0], [1], [0, 0, 1, 1], [], []>} : vector<16x128xf32>, vector<128x128xf32>, vector<16x128xf32> -> vector<16x128xf32>
    %554 = arith.addf %548, %553 : vector<16x128xf32>
    %c1_498 = arith.constant 1 : index
    %c2_499 = arith.constant 2 : index
    %c0_500 = arith.constant 0 : index
    %555 = vector.load %arg6[%c1_498, %c2_499, %c0_500] : memref<5x18x128xf32, #tpu.memory_space<vmem>>, vector<1x16x128xf32>
    %556 = vector.shape_cast %555 : vector<1x16x128xf32> to vector<16x128xf32>
    %c15_501 = arith.constant 15 : index
    %c2_502 = arith.constant 2 : index
    %c0_503 = arith.constant 0 : index
    %c0_504 = arith.constant 0 : index
    %557 = vector.load %arg2[%c15_501, %c2_502, %c0_503, %c0_504] : memref<22x3x128x128xf32, #tpu.memory_space<vmem>>, vector<1x1x128x128xf32>
    %558 = vector.shape_cast %557 : vector<1x1x128x128xf32> to vector<128x128xf32>
    %cst_505 = arith.constant dense<0.000000e+00> : vector<16x128xf32>
    %559 = tpu.matmul %556, %558, %cst_505 {dimension_numbers = #tpu.dot_dimension_numbers<[1], [0], [0], [1], [0, 0, 1, 1], [], []>} : vector<16x128xf32>, vector<128x128xf32>, vector<16x128xf32> -> vector<16x128xf32>
    %560 = arith.addf %554, %559 : vector<16x128xf32>
    %c2_506 = arith.constant 2 : index
    %c0_507 = arith.constant 0 : index
    %c0_508 = arith.constant 0 : index
    %561 = vector.load %arg6[%c2_506, %c0_507, %c0_508] : memref<5x18x128xf32, #tpu.memory_space<vmem>>, vector<1x16x128xf32>
    %562 = vector.shape_cast %561 : vector<1x16x128xf32> to vector<16x128xf32>
    %c16 = arith.constant 16 : index
    %c0_509 = arith.constant 0 : index
    %c0_510 = arith.constant 0 : index
    %c0_511 = arith.constant 0 : index
    %563 = vector.load %arg2[%c16, %c0_509, %c0_510, %c0_511] : memref<22x3x128x128xf32, #tpu.memory_space<vmem>>, vector<1x1x128x128xf32>
    %564 = vector.shape_cast %563 : vector<1x1x128x128xf32> to vector<128x128xf32>
    %cst_512 = arith.constant dense<0.000000e+00> : vector<16x128xf32>
    %565 = tpu.matmul %562, %564, %cst_512 {dimension_numbers = #tpu.dot_dimension_numbers<[1], [0], [0], [1], [0, 0, 1, 1], [], []>} : vector<16x128xf32>, vector<128x128xf32>, vector<16x128xf32> -> vector<16x128xf32>
    %566 = arith.addf %560, %565 : vector<16x128xf32>
    %c2_513 = arith.constant 2 : index
    %c1_514 = arith.constant 1 : index
    %c0_515 = arith.constant 0 : index
    %567 = vector.load %arg6[%c2_513, %c1_514, %c0_515] : memref<5x18x128xf32, #tpu.memory_space<vmem>>, vector<1x16x128xf32>
    %568 = vector.shape_cast %567 : vector<1x16x128xf32> to vector<16x128xf32>
    %c16_516 = arith.constant 16 : index
    %c1_517 = arith.constant 1 : index
    %c0_518 = arith.constant 0 : index
    %c0_519 = arith.constant 0 : index
    %569 = vector.load %arg2[%c16_516, %c1_517, %c0_518, %c0_519] : memref<22x3x128x128xf32, #tpu.memory_space<vmem>>, vector<1x1x128x128xf32>
    %570 = vector.shape_cast %569 : vector<1x1x128x128xf32> to vector<128x128xf32>
    %cst_520 = arith.constant dense<0.000000e+00> : vector<16x128xf32>
    %571 = tpu.matmul %568, %570, %cst_520 {dimension_numbers = #tpu.dot_dimension_numbers<[1], [0], [0], [1], [0, 0, 1, 1], [], []>} : vector<16x128xf32>, vector<128x128xf32>, vector<16x128xf32> -> vector<16x128xf32>
    %572 = arith.addf %566, %571 : vector<16x128xf32>
    %c2_521 = arith.constant 2 : index
    %c2_522 = arith.constant 2 : index
    %c0_523 = arith.constant 0 : index
    %573 = vector.load %arg6[%c2_521, %c2_522, %c0_523] : memref<5x18x128xf32, #tpu.memory_space<vmem>>, vector<1x16x128xf32>
    %574 = vector.shape_cast %573 : vector<1x16x128xf32> to vector<16x128xf32>
    %c16_524 = arith.constant 16 : index
    %c2_525 = arith.constant 2 : index
    %c0_526 = arith.constant 0 : index
    %c0_527 = arith.constant 0 : index
    %575 = vector.load %arg2[%c16_524, %c2_525, %c0_526, %c0_527] : memref<22x3x128x128xf32, #tpu.memory_space<vmem>>, vector<1x1x128x128xf32>
    %576 = vector.shape_cast %575 : vector<1x1x128x128xf32> to vector<128x128xf32>
    %cst_528 = arith.constant dense<0.000000e+00> : vector<16x128xf32>
    %577 = tpu.matmul %574, %576, %cst_528 {dimension_numbers = #tpu.dot_dimension_numbers<[1], [0], [0], [1], [0, 0, 1, 1], [], []>} : vector<16x128xf32>, vector<128x128xf32>, vector<16x128xf32> -> vector<16x128xf32>
    %578 = arith.addf %572, %577 : vector<16x128xf32>
    %c3_529 = arith.constant 3 : index
    %c0_530 = arith.constant 0 : index
    %c0_531 = arith.constant 0 : index
    %579 = vector.load %arg6[%c3_529, %c0_530, %c0_531] : memref<5x18x128xf32, #tpu.memory_space<vmem>>, vector<1x16x128xf32>
    %580 = vector.shape_cast %579 : vector<1x16x128xf32> to vector<16x128xf32>
    %c17 = arith.constant 17 : index
    %c0_532 = arith.constant 0 : index
    %c0_533 = arith.constant 0 : index
    %c0_534 = arith.constant 0 : index
    %581 = vector.load %arg2[%c17, %c0_532, %c0_533, %c0_534] : memref<22x3x128x128xf32, #tpu.memory_space<vmem>>, vector<1x1x128x128xf32>
    %582 = vector.shape_cast %581 : vector<1x1x128x128xf32> to vector<128x128xf32>
    %cst_535 = arith.constant dense<0.000000e+00> : vector<16x128xf32>
    %583 = tpu.matmul %580, %582, %cst_535 {dimension_numbers = #tpu.dot_dimension_numbers<[1], [0], [0], [1], [0, 0, 1, 1], [], []>} : vector<16x128xf32>, vector<128x128xf32>, vector<16x128xf32> -> vector<16x128xf32>
    %584 = arith.addf %578, %583 : vector<16x128xf32>
    %c3_536 = arith.constant 3 : index
    %c1_537 = arith.constant 1 : index
    %c0_538 = arith.constant 0 : index
    %585 = vector.load %arg6[%c3_536, %c1_537, %c0_538] : memref<5x18x128xf32, #tpu.memory_space<vmem>>, vector<1x16x128xf32>
    %586 = vector.shape_cast %585 : vector<1x16x128xf32> to vector<16x128xf32>
    %c17_539 = arith.constant 17 : index
    %c1_540 = arith.constant 1 : index
    %c0_541 = arith.constant 0 : index
    %c0_542 = arith.constant 0 : index
    %587 = vector.load %arg2[%c17_539, %c1_540, %c0_541, %c0_542] : memref<22x3x128x128xf32, #tpu.memory_space<vmem>>, vector<1x1x128x128xf32>
    %588 = vector.shape_cast %587 : vector<1x1x128x128xf32> to vector<128x128xf32>
    %cst_543 = arith.constant dense<0.000000e+00> : vector<16x128xf32>
    %589 = tpu.matmul %586, %588, %cst_543 {dimension_numbers = #tpu.dot_dimension_numbers<[1], [0], [0], [1], [0, 0, 1, 1], [], []>} : vector<16x128xf32>, vector<128x128xf32>, vector<16x128xf32> -> vector<16x128xf32>
    %590 = arith.addf %584, %589 : vector<16x128xf32>
    %c3_544 = arith.constant 3 : index
    %c2_545 = arith.constant 2 : index
    %c0_546 = arith.constant 0 : index
    %591 = vector.load %arg6[%c3_544, %c2_545, %c0_546] : memref<5x18x128xf32, #tpu.memory_space<vmem>>, vector<1x16x128xf32>
    %592 = vector.shape_cast %591 : vector<1x16x128xf32> to vector<16x128xf32>
    %c17_547 = arith.constant 17 : index
    %c2_548 = arith.constant 2 : index
    %c0_549 = arith.constant 0 : index
    %c0_550 = arith.constant 0 : index
    %593 = vector.load %arg2[%c17_547, %c2_548, %c0_549, %c0_550] : memref<22x3x128x128xf32, #tpu.memory_space<vmem>>, vector<1x1x128x128xf32>
    %594 = vector.shape_cast %593 : vector<1x1x128x128xf32> to vector<128x128xf32>
    %cst_551 = arith.constant dense<0.000000e+00> : vector<16x128xf32>
    %595 = tpu.matmul %592, %594, %cst_551 {dimension_numbers = #tpu.dot_dimension_numbers<[1], [0], [0], [1], [0, 0, 1, 1], [], []>} : vector<16x128xf32>, vector<128x128xf32>, vector<16x128xf32> -> vector<16x128xf32>
    %596 = arith.addf %590, %595 : vector<16x128xf32>
    %597 = vector.shape_cast %596 : vector<16x128xf32> to vector<1x16x128xf32>
    %cst_552 = arith.constant dense<0.000000e+00> : vector<1xf32>
    %598 = vector.multi_reduction <add>, %597, %cst_552 [1, 2] : vector<1x16x128xf32> to vector<1xf32>
    %599 = vector.shape_cast %598 : vector<1xf32> to vector<1x1x1xf32>
    %600 = vector.extract %599[0, 0, 0] : f32 from vector<1x1x1xf32>
    %cst_553 = arith.constant 2.048000e+03 : f32
    %601 = arith.divf %600, %cst_553 : f32
    %602 = vector.broadcast %601 : f32 to vector<16x128xf32>
    %603 = arith.subf %596, %602 : vector<16x128xf32>
    %604 = arith.mulf %603, %603 : vector<16x128xf32>
    %605 = vector.shape_cast %604 : vector<16x128xf32> to vector<1x16x128xf32>
    %cst_554 = arith.constant dense<0.000000e+00> : vector<1xf32>
    %606 = vector.multi_reduction <add>, %605, %cst_554 [1, 2] : vector<1x16x128xf32> to vector<1xf32>
    %607 = vector.shape_cast %606 : vector<1xf32> to vector<1x1x1xf32>
    %608 = vector.extract %607[0, 0, 0] : f32 from vector<1x1x1xf32>
    %cst_555 = arith.constant 2.048000e+03 : f32
    %609 = arith.divf %608, %cst_555 : f32
    %cst_556 = arith.constant 9.99999974E-6 : f32
    %610 = arith.addf %609, %cst_556 : f32
    %611 = math.rsqrt %610 : f32
    %612 = vector.broadcast %601 : f32 to vector<16x128xf32>
    %613 = arith.subf %596, %612 : vector<16x128xf32>
    %614 = vector.broadcast %611 : f32 to vector<16x128xf32>
    %615 = arith.mulf %613, %614 : vector<16x128xf32>
    %c1_557 = arith.constant 1 : index
    %c0_558 = arith.constant 0 : index
    %c0_559 = arith.constant 0 : index
    %616 = vector.load %arg3[%c1_557, %c0_558, %c0_559] : memref<2x1x128xf32, #tpu.memory_space<vmem>>, vector<1x1x128xf32>
    %617 = vector.shape_cast %616 : vector<1x1x128xf32> to vector<1x128xf32>
    %618 = vector.broadcast %617 : vector<1x128xf32> to vector<16x128xf32>
    %619 = arith.mulf %615, %618 : vector<16x128xf32>
    %c1_560 = arith.constant 1 : index
    %c0_561 = arith.constant 0 : index
    %c0_562 = arith.constant 0 : index
    %620 = vector.load %arg4[%c1_560, %c0_561, %c0_562] : memref<2x1x128xf32, #tpu.memory_space<vmem>>, vector<1x1x128xf32>
    %621 = vector.shape_cast %620 : vector<1x1x128xf32> to vector<1x128xf32>
    %622 = vector.broadcast %621 : vector<1x128xf32> to vector<16x128xf32>
    %623 = arith.addf %619, %622 : vector<16x128xf32>
    %cst_563 = arith.constant 0.000000e+00 : f32
    %624 = vector.broadcast %cst_563 : f32 to vector<16x128xf32>
    %625 = arith.maximumf %623, %624 : vector<16x128xf32>
    %c4_564 = arith.constant 4 : index
    %c1_565 = arith.constant 1 : index
    %c0_566 = arith.constant 0 : index
    %626 = vector.load %arg6[%c4_564, %c1_565, %c0_566] : memref<5x18x128xf32, #tpu.memory_space<vmem>>, vector<1x16x128xf32>
    %627 = vector.shape_cast %626 : vector<1x16x128xf32> to vector<16x128xf32>
    %628 = vector.shape_cast %625 : vector<16x128xf32> to vector<1x16x128xf32>
    tpu.vector_store %arg6[%c4_564, %c1_565, %c0_566], %628 {strides = array<i32>} : memref<5x18x128xf32, #tpu.memory_space<vmem>>, vector<1x16x128xf32>,
    %cst_567 = arith.constant 0.000000e+00 : f32
    %629 = vector.broadcast %cst_567 : f32 to vector<16x128xf32>
    %c1_568 = arith.constant 1 : index
    %c0_569 = arith.constant 0 : index
    %c0_570 = arith.constant 0 : index
    %630 = vector.load %arg6[%c1_568, %c0_569, %c0_570] : memref<5x18x128xf32, #tpu.memory_space<vmem>>, vector<1x16x128xf32>
    %631 = vector.shape_cast %630 : vector<1x16x128xf32> to vector<16x128xf32>
    %c18 = arith.constant 18 : index
    %c0_571 = arith.constant 0 : index
    %c0_572 = arith.constant 0 : index
    %c0_573 = arith.constant 0 : index
    %632 = vector.load %arg2[%c18, %c0_571, %c0_572, %c0_573] : memref<22x3x128x128xf32, #tpu.memory_space<vmem>>, vector<1x1x128x128xf32>
    %633 = vector.shape_cast %632 : vector<1x1x128x128xf32> to vector<128x128xf32>
    %cst_574 = arith.constant dense<0.000000e+00> : vector<16x128xf32>
    %634 = tpu.matmul %631, %633, %cst_574 {dimension_numbers = #tpu.dot_dimension_numbers<[1], [0], [0], [1], [0, 0, 1, 1], [], []>} : vector<16x128xf32>, vector<128x128xf32>, vector<16x128xf32> -> vector<16x128xf32>
    %635 = arith.addf %629, %634 : vector<16x128xf32>
    %c1_575 = arith.constant 1 : index
    %c1_576 = arith.constant 1 : index
    %c0_577 = arith.constant 0 : index
    %636 = vector.load %arg6[%c1_575, %c1_576, %c0_577] : memref<5x18x128xf32, #tpu.memory_space<vmem>>, vector<1x16x128xf32>
    %637 = vector.shape_cast %636 : vector<1x16x128xf32> to vector<16x128xf32>
    %c18_578 = arith.constant 18 : index
    %c1_579 = arith.constant 1 : index
    %c0_580 = arith.constant 0 : index
    %c0_581 = arith.constant 0 : index
    %638 = vector.load %arg2[%c18_578, %c1_579, %c0_580, %c0_581] : memref<22x3x128x128xf32, #tpu.memory_space<vmem>>, vector<1x1x128x128xf32>
    %639 = vector.shape_cast %638 : vector<1x1x128x128xf32> to vector<128x128xf32>
    %cst_582 = arith.constant dense<0.000000e+00> : vector<16x128xf32>
    %640 = tpu.matmul %637, %639, %cst_582 {dimension_numbers = #tpu.dot_dimension_numbers<[1], [0], [0], [1], [0, 0, 1, 1], [], []>} : vector<16x128xf32>, vector<128x128xf32>, vector<16x128xf32> -> vector<16x128xf32>
    %641 = arith.addf %635, %640 : vector<16x128xf32>
    %c1_583 = arith.constant 1 : index
    %c2_584 = arith.constant 2 : index
    %c0_585 = arith.constant 0 : index
    %642 = vector.load %arg6[%c1_583, %c2_584, %c0_585] : memref<5x18x128xf32, #tpu.memory_space<vmem>>, vector<1x16x128xf32>
    %643 = vector.shape_cast %642 : vector<1x16x128xf32> to vector<16x128xf32>
    %c18_586 = arith.constant 18 : index
    %c2_587 = arith.constant 2 : index
    %c0_588 = arith.constant 0 : index
    %c0_589 = arith.constant 0 : index
    %644 = vector.load %arg2[%c18_586, %c2_587, %c0_588, %c0_589] : memref<22x3x128x128xf32, #tpu.memory_space<vmem>>, vector<1x1x128x128xf32>
    %645 = vector.shape_cast %644 : vector<1x1x128x128xf32> to vector<128x128xf32>
    %cst_590 = arith.constant dense<0.000000e+00> : vector<16x128xf32>
    %646 = tpu.matmul %643, %645, %cst_590 {dimension_numbers = #tpu.dot_dimension_numbers<[1], [0], [0], [1], [0, 0, 1, 1], [], []>} : vector<16x128xf32>, vector<128x128xf32>, vector<16x128xf32> -> vector<16x128xf32>
    %647 = arith.addf %641, %646 : vector<16x128xf32>
    %c2_591 = arith.constant 2 : index
    %c0_592 = arith.constant 0 : index
    %c0_593 = arith.constant 0 : index
    %648 = vector.load %arg6[%c2_591, %c0_592, %c0_593] : memref<5x18x128xf32, #tpu.memory_space<vmem>>, vector<1x16x128xf32>
    %649 = vector.shape_cast %648 : vector<1x16x128xf32> to vector<16x128xf32>
    %c19 = arith.constant 19 : index
    %c0_594 = arith.constant 0 : index
    %c0_595 = arith.constant 0 : index
    %c0_596 = arith.constant 0 : index
    %650 = vector.load %arg2[%c19, %c0_594, %c0_595, %c0_596] : memref<22x3x128x128xf32, #tpu.memory_space<vmem>>, vector<1x1x128x128xf32>
    %651 = vector.shape_cast %650 : vector<1x1x128x128xf32> to vector<128x128xf32>
    %cst_597 = arith.constant dense<0.000000e+00> : vector<16x128xf32>
    %652 = tpu.matmul %649, %651, %cst_597 {dimension_numbers = #tpu.dot_dimension_numbers<[1], [0], [0], [1], [0, 0, 1, 1], [], []>} : vector<16x128xf32>, vector<128x128xf32>, vector<16x128xf32> -> vector<16x128xf32>
    %653 = arith.addf %647, %652 : vector<16x128xf32>
    %c2_598 = arith.constant 2 : index
    %c1_599 = arith.constant 1 : index
    %c0_600 = arith.constant 0 : index
    %654 = vector.load %arg6[%c2_598, %c1_599, %c0_600] : memref<5x18x128xf32, #tpu.memory_space<vmem>>, vector<1x16x128xf32>
    %655 = vector.shape_cast %654 : vector<1x16x128xf32> to vector<16x128xf32>
    %c19_601 = arith.constant 19 : index
    %c1_602 = arith.constant 1 : index
    %c0_603 = arith.constant 0 : index
    %c0_604 = arith.constant 0 : index
    %656 = vector.load %arg2[%c19_601, %c1_602, %c0_603, %c0_604] : memref<22x3x128x128xf32, #tpu.memory_space<vmem>>, vector<1x1x128x128xf32>
    %657 = vector.shape_cast %656 : vector<1x1x128x128xf32> to vector<128x128xf32>
    %cst_605 = arith.constant dense<0.000000e+00> : vector<16x128xf32>
    %658 = tpu.matmul %655, %657, %cst_605 {dimension_numbers = #tpu.dot_dimension_numbers<[1], [0], [0], [1], [0, 0, 1, 1], [], []>} : vector<16x128xf32>, vector<128x128xf32>, vector<16x128xf32> -> vector<16x128xf32>
    %659 = arith.addf %653, %658 : vector<16x128xf32>
    %c2_606 = arith.constant 2 : index
    %c2_607 = arith.constant 2 : index
    %c0_608 = arith.constant 0 : index
    %660 = vector.load %arg6[%c2_606, %c2_607, %c0_608] : memref<5x18x128xf32, #tpu.memory_space<vmem>>, vector<1x16x128xf32>
    %661 = vector.shape_cast %660 : vector<1x16x128xf32> to vector<16x128xf32>
    %c19_609 = arith.constant 19 : index
    %c2_610 = arith.constant 2 : index
    %c0_611 = arith.constant 0 : index
    %c0_612 = arith.constant 0 : index
    %662 = vector.load %arg2[%c19_609, %c2_610, %c0_611, %c0_612] : memref<22x3x128x128xf32, #tpu.memory_space<vmem>>, vector<1x1x128x128xf32>
    %663 = vector.shape_cast %662 : vector<1x1x128x128xf32> to vector<128x128xf32>
    %cst_613 = arith.constant dense<0.000000e+00> : vector<16x128xf32>
    %664 = tpu.matmul %661, %663, %cst_613 {dimension_numbers = #tpu.dot_dimension_numbers<[1], [0], [0], [1], [0, 0, 1, 1], [], []>} : vector<16x128xf32>, vector<128x128xf32>, vector<16x128xf32> -> vector<16x128xf32>
    %665 = arith.addf %659, %664 : vector<16x128xf32>
    %c3_614 = arith.constant 3 : index
    %c0_615 = arith.constant 0 : index
    %c0_616 = arith.constant 0 : index
    %666 = vector.load %arg6[%c3_614, %c0_615, %c0_616] : memref<5x18x128xf32, #tpu.memory_space<vmem>>, vector<1x16x128xf32>
    %667 = vector.shape_cast %666 : vector<1x16x128xf32> to vector<16x128xf32>
    %c20 = arith.constant 20 : index
    %c0_617 = arith.constant 0 : index
    %c0_618 = arith.constant 0 : index
    %c0_619 = arith.constant 0 : index
    %668 = vector.load %arg2[%c20, %c0_617, %c0_618, %c0_619] : memref<22x3x128x128xf32, #tpu.memory_space<vmem>>, vector<1x1x128x128xf32>
    %669 = vector.shape_cast %668 : vector<1x1x128x128xf32> to vector<128x128xf32>
    %cst_620 = arith.constant dense<0.000000e+00> : vector<16x128xf32>
    %670 = tpu.matmul %667, %669, %cst_620 {dimension_numbers = #tpu.dot_dimension_numbers<[1], [0], [0], [1], [0, 0, 1, 1], [], []>} : vector<16x128xf32>, vector<128x128xf32>, vector<16x128xf32> -> vector<16x128xf32>
    %671 = arith.addf %665, %670 : vector<16x128xf32>
    %c3_621 = arith.constant 3 : index
    %c1_622 = arith.constant 1 : index
    %c0_623 = arith.constant 0 : index
    %672 = vector.load %arg6[%c3_621, %c1_622, %c0_623] : memref<5x18x128xf32, #tpu.memory_space<vmem>>, vector<1x16x128xf32>
    %673 = vector.shape_cast %672 : vector<1x16x128xf32> to vector<16x128xf32>
    %c20_624 = arith.constant 20 : index
    %c1_625 = arith.constant 1 : index
    %c0_626 = arith.constant 0 : index
    %c0_627 = arith.constant 0 : index
    %674 = vector.load %arg2[%c20_624, %c1_625, %c0_626, %c0_627] : memref<22x3x128x128xf32, #tpu.memory_space<vmem>>, vector<1x1x128x128xf32>
    %675 = vector.shape_cast %674 : vector<1x1x128x128xf32> to vector<128x128xf32>
    %cst_628 = arith.constant dense<0.000000e+00> : vector<16x128xf32>
    %676 = tpu.matmul %673, %675, %cst_628 {dimension_numbers = #tpu.dot_dimension_numbers<[1], [0], [0], [1], [0, 0, 1, 1], [], []>} : vector<16x128xf32>, vector<128x128xf32>, vector<16x128xf32> -> vector<16x128xf32>
    %677 = arith.addf %671, %676 : vector<16x128xf32>
    %c3_629 = arith.constant 3 : index
    %c2_630 = arith.constant 2 : index
    %c0_631 = arith.constant 0 : index
    %678 = vector.load %arg6[%c3_629, %c2_630, %c0_631] : memref<5x18x128xf32, #tpu.memory_space<vmem>>, vector<1x16x128xf32>
    %679 = vector.shape_cast %678 : vector<1x16x128xf32> to vector<16x128xf32>
    %c20_632 = arith.constant 20 : index
    %c2_633 = arith.constant 2 : index
    %c0_634 = arith.constant 0 : index
    %c0_635 = arith.constant 0 : index
    %680 = vector.load %arg2[%c20_632, %c2_633, %c0_634, %c0_635] : memref<22x3x128x128xf32, #tpu.memory_space<vmem>>, vector<1x1x128x128xf32>
    %681 = vector.shape_cast %680 : vector<1x1x128x128xf32> to vector<128x128xf32>
    %cst_636 = arith.constant dense<0.000000e+00> : vector<16x128xf32>
    %682 = tpu.matmul %679, %681, %cst_636 {dimension_numbers = #tpu.dot_dimension_numbers<[1], [0], [0], [1], [0, 0, 1, 1], [], []>} : vector<16x128xf32>, vector<128x128xf32>, vector<16x128xf32> -> vector<16x128xf32>
    %683 = arith.addf %677, %682 : vector<16x128xf32>
    %c4_637 = arith.constant 4 : index
    %c0_638 = arith.constant 0 : index
    %c0_639 = arith.constant 0 : index
    %684 = vector.load %arg6[%c4_637, %c0_638, %c0_639] : memref<5x18x128xf32, #tpu.memory_space<vmem>>, vector<1x16x128xf32>
    %685 = vector.shape_cast %684 : vector<1x16x128xf32> to vector<16x128xf32>
    %c21 = arith.constant 21 : index
    %c0_640 = arith.constant 0 : index
    %c0_641 = arith.constant 0 : index
    %c0_642 = arith.constant 0 : index
    %686 = vector.load %arg2[%c21, %c0_640, %c0_641, %c0_642] : memref<22x3x128x128xf32, #tpu.memory_space<vmem>>, vector<1x1x128x128xf32>
    %687 = vector.shape_cast %686 : vector<1x1x128x128xf32> to vector<128x128xf32>
    %cst_643 = arith.constant dense<0.000000e+00> : vector<16x128xf32>
    %688 = tpu.matmul %685, %687, %cst_643 {dimension_numbers = #tpu.dot_dimension_numbers<[1], [0], [0], [1], [0, 0, 1, 1], [], []>} : vector<16x128xf32>, vector<128x128xf32>, vector<16x128xf32> -> vector<16x128xf32>
    %689 = arith.addf %683, %688 : vector<16x128xf32>
    %c4_644 = arith.constant 4 : index
    %c1_645 = arith.constant 1 : index
    %c0_646 = arith.constant 0 : index
    %690 = vector.load %arg6[%c4_644, %c1_645, %c0_646] : memref<5x18x128xf32, #tpu.memory_space<vmem>>, vector<1x16x128xf32>
    %691 = vector.shape_cast %690 : vector<1x16x128xf32> to vector<16x128xf32>
    %c21_647 = arith.constant 21 : index
    %c1_648 = arith.constant 1 : index
    %c0_649 = arith.constant 0 : index
    %c0_650 = arith.constant 0 : index
    %692 = vector.load %arg2[%c21_647, %c1_648, %c0_649, %c0_650] : memref<22x3x128x128xf32, #tpu.memory_space<vmem>>, vector<1x1x128x128xf32>
    %693 = vector.shape_cast %692 : vector<1x1x128x128xf32> to vector<128x128xf32>
    %cst_651 = arith.constant dense<0.000000e+00> : vector<16x128xf32>
    %694 = tpu.matmul %691, %693, %cst_651 {dimension_numbers = #tpu.dot_dimension_numbers<[1], [0], [0], [1], [0, 0, 1, 1], [], []>} : vector<16x128xf32>, vector<128x128xf32>, vector<16x128xf32> -> vector<16x128xf32>
    %695 = arith.addf %689, %694 : vector<16x128xf32>
    %c4_652 = arith.constant 4 : index
    %c2_653 = arith.constant 2 : index
    %c0_654 = arith.constant 0 : index
    %696 = vector.load %arg6[%c4_652, %c2_653, %c0_654] : memref<5x18x128xf32, #tpu.memory_space<vmem>>, vector<1x16x128xf32>
    %697 = vector.shape_cast %696 : vector<1x16x128xf32> to vector<16x128xf32>
    %c21_655 = arith.constant 21 : index
    %c2_656 = arith.constant 2 : index
    %c0_657 = arith.constant 0 : index
    %c0_658 = arith.constant 0 : index
    %698 = vector.load %arg2[%c21_655, %c2_656, %c0_657, %c0_658] : memref<22x3x128x128xf32, #tpu.memory_space<vmem>>, vector<1x1x128x128xf32>
    %699 = vector.shape_cast %698 : vector<1x1x128x128xf32> to vector<128x128xf32>
    %cst_659 = arith.constant dense<0.000000e+00> : vector<16x128xf32>
    %700 = tpu.matmul %697, %699, %cst_659 {dimension_numbers = #tpu.dot_dimension_numbers<[1], [0], [0], [1], [0, 0, 1, 1], [], []>} : vector<16x128xf32>, vector<128x128xf32>, vector<16x128xf32> -> vector<16x128xf32>
    %701 = arith.addf %695, %700 : vector<16x128xf32>
    %702 = vector.shape_cast %701 : vector<16x128xf32> to vector<1x16x128xf32>
    %cst_660 = arith.constant dense<0.000000e+00> : vector<1xf32>
    %703 = vector.multi_reduction <add>, %702, %cst_660 [1, 2] : vector<1x16x128xf32> to vector<1xf32>
    %704 = vector.shape_cast %703 : vector<1xf32> to vector<1x1x1xf32>
    %705 = vector.extract %704[0, 0, 0] : f32 from vector<1x1x1xf32>
    %cst_661 = arith.constant 2.048000e+03 : f32
    %706 = arith.divf %705, %cst_661 : f32
    %707 = vector.broadcast %706 : f32 to vector<16x128xf32>
    %708 = arith.subf %701, %707 : vector<16x128xf32>
    %709 = arith.mulf %708, %708 : vector<16x128xf32>
    %710 = vector.shape_cast %709 : vector<16x128xf32> to vector<1x16x128xf32>
    %cst_662 = arith.constant dense<0.000000e+00> : vector<1xf32>
    %711 = vector.multi_reduction <add>, %710, %cst_662 [1, 2] : vector<1x16x128xf32> to vector<1xf32>
    %712 = vector.shape_cast %711 : vector<1xf32> to vector<1x1x1xf32>
    %713 = vector.extract %712[0, 0, 0] : f32 from vector<1x1x1xf32>
    %cst_663 = arith.constant 2.048000e+03 : f32
    %714 = arith.divf %713, %cst_663 : f32
    %cst_664 = arith.constant 9.99999974E-6 : f32
    %715 = arith.addf %714, %cst_664 : f32
    %716 = math.rsqrt %715 : f32
    %717 = vector.broadcast %706 : f32 to vector<16x128xf32>
    %718 = arith.subf %701, %717 : vector<16x128xf32>
    %719 = vector.broadcast %716 : f32 to vector<16x128xf32>
    %720 = arith.mulf %718, %719 : vector<16x128xf32>
    %c1_665 = arith.constant 1 : index
    %c0_666 = arith.constant 0 : index
    %c0_667 = arith.constant 0 : index
    %721 = vector.load %arg3[%c1_665, %c0_666, %c0_667] : memref<2x1x128xf32, #tpu.memory_space<vmem>>, vector<1x1x128xf32>
    %722 = vector.shape_cast %721 : vector<1x1x128xf32> to vector<1x128xf32>
    %723 = vector.broadcast %722 : vector<1x128xf32> to vector<16x128xf32>
    %724 = arith.mulf %720, %723 : vector<16x128xf32>
    %c1_668 = arith.constant 1 : index
    %c0_669 = arith.constant 0 : index
    %c0_670 = arith.constant 0 : index
    %725 = vector.load %arg4[%c1_668, %c0_669, %c0_670] : memref<2x1x128xf32, #tpu.memory_space<vmem>>, vector<1x1x128xf32>
    %726 = vector.shape_cast %725 : vector<1x1x128xf32> to vector<1x128xf32>
    %727 = vector.broadcast %726 : vector<1x128xf32> to vector<16x128xf32>
    %728 = arith.addf %724, %727 : vector<16x128xf32>
    %cst_671 = arith.constant 0.000000e+00 : f32
    %729 = vector.broadcast %cst_671 : f32 to vector<16x128xf32>
    %730 = arith.maximumf %728, %729 : vector<16x128xf32>
    %c0_672 = arith.constant 0 : index
    %c0_673 = arith.constant 0 : index
    %c0_674 = arith.constant 0 : index
    %731 = vector.load %arg5[%c0_672, %c0_673, %c0_674] : memref<1x16x128xf32, #tpu.memory_space<vmem>>, vector<1x16x128xf32>
    %732 = vector.shape_cast %731 : vector<1x16x128xf32> to vector<16x128xf32>
    %733 = vector.shape_cast %730 : vector<16x128xf32> to vector<1x16x128xf32>
    tpu.vector_store %arg5[%c0_672, %c0_673, %c0_674], %733 {strides = array<i32>} : memref<1x16x128xf32, #tpu.memory_space<vmem>>, vector<1x16x128xf32>,
    return
  }
  func.func @transform_0(%arg0: i32) -> (i32, i32, i32) {
    %c0_i32 = arith.constant 0 : i32
    %c0_i32_0 = arith.constant 0 : i32
    %c0_i32_1 = arith.constant 0 : i32
    return %arg0, %c0_i32, %c0_i32_0 : i32, i32, i32
  }
  func.func @transform_1(%arg0: i32) -> (i32, i32, i32, i32) {
    %c0_i32 = arith.constant 0 : i32
    %c0_i32_0 = arith.constant 0 : i32
    %c0_i32_1 = arith.constant 0 : i32
    %c0_i32_2 = arith.constant 0 : i32
    %c0_i32_3 = arith.constant 0 : i32
    return %c0_i32, %c0_i32_0, %c0_i32_1, %c0_i32_2 : i32, i32, i32, i32
  }
  func.func @transform_2(%arg0: i32) -> (i32, i32, i32) {
    %c0_i32 = arith.constant 0 : i32
    %c0_i32_0 = arith.constant 0 : i32
    %c0_i32_1 = arith.constant 0 : i32
    %c0_i32_2 = arith.constant 0 : i32
    return %c0_i32, %c0_i32_0, %c0_i32_1 : i32, i32, i32
  }
  func.func @transform_3(%arg0: i32) -> (i32, i32, i32) {
    %c0_i32 = arith.constant 0 : i32
    %c0_i32_0 = arith.constant 0 : i32
    %c0_i32_1 = arith.constant 0 : i32
    %c0_i32_2 = arith.constant 0 : i32
    return %c0_i32, %c0_i32_0, %c0_i32_1 : i32, i32, i32
  }
  func.func @transform_4(%arg0: i32) -> (i32, i32, i32) {
    %c0_i32 = arith.constant 0 : i32
    %c0_i32_0 = arith.constant 0 : i32
    %c0_i32_1 = arith.constant 0 : i32
    return %arg0, %c0_i32, %c0_i32_0 : i32, i32, i32
  }
}

</mosaic_0001>

<bundles_post_ra>
// kernel: tile.33
= control target key start
LH: loop header
LB: loop body
LE: loop exit
PB: predicated region body
PF: predicated region fallthrough
CT: control target
= control target key end

     0   :  { %2 = vsyncpa [#allocation1], 0  ;;  %s45_s6 = smov [#allocation0]   ;;  %s65_s0 = inlined_call_operand.hbm [shape: f32[8], index: 0, kind: input, shape index: {}]   ;;  %s66_s1 = inlined_call_operand.vmem [shape: f32[16,8], index: 1, kind: output, shape index: {}]  }
   0x1   :  { %s9_s7 = sshll.u32 %s45_s6, 4  ;;  %s10_s7 = int_to_ptr.vmem [resolvable:$true] %s9_s7 }
   0x2   :  { %s31_s8 = scalar_lea.vmem %s10_s7, 16  ;;  %s35_s9 = scalar_lea.vmem %s10_s7, 32 }
   0x3   :  { %p32_p0 = scmp.ne.s32.totalorder %s10_s7, %s31_s8  ;;  %p36_p1 = scmp.lt.s32.totalorder %s10_s7, %s10_s7 }
   0x4   :  { %p37_p2 = scmp.lt.s32.totalorder %s35_s9, %s31_s8 }
   0x6   :  { %p38_p3 = por %p37_p2, %p36_p1 }
   0x8   :  { %p39_p4 = pnand %p38_p3, %p32_p0 }
   0xa   :  { %42 = shalt.err (!%p39_p4)
}
   0xb   :  { %12 = dma.hbm_to_vmem [thread:$0]  %s65_s0, 16, %s10_s7, [#allocation1]  }
   0xc   :  { %43 = dma.done.wait [#allocation1], 16  }
   0xd   :  { %44 = vsyncadd [#allocation1], 4294967280  ;;  %v16_v0 = vld [vmem:[#allocation0] ss:$0 sm:$0xff] }
   0xe   :  { %17 = vst [vmem:[%s66_s1] sm:$0xff] %v16_v0  ;;  %21 = vst [vmem:[%s66_s1 + $0x8] sm:$0xff] %v16_v0 }
   0xf   :  { %20 = vsyncpa [#allocation1], 1 }

// kernel: tile.38
= control target key start
LH: loop header
LB: loop body
LE: loop exit
PB: predicated region body
PF: predicated region fallthrough
CT: control target
= control target key end

     0   :  { %s133_s10 = smov 120   ;;  %s134_s11 = smov 104   ;;  %vm3_vm0 = vcmask 64512   ;;  %vm9_vm1 = vcmask 1048512   ;;  %vm15_vm2 = vcmask 982912   ;;  %vm21_vm3 = vcmask 917312   ;;  %s209_s0 = inlined_call_operand.vmem [shape: f32[16,8], index: 0, kind: input, shape index: {}]   ;;  %s210_s1 = inlined_call_operand.vmem [shape: f32[1,128], index: 1, kind: output, shape index: {}]  }
   0x1   :  { %v103_v0 = vld [vmem:[%s209_s0 + $0xf] sm:$0x1]   ;;  %v105_v1 = vld [vmem:[%s209_s0 + $0xd] sm:$0x1]   ;;  %v104_v2 = vld [vmem:[%s209_s0 + $0xe] sm:$0x1]  }
   0x2   :  { %7 = vrot.lane.b32.xlu0 %v103_v0, %s133_s10  ;;  %19 = vrot.lane.b32.xlu1 %v105_v1, %s134_s11  ;;  %v106_v3 = vld [vmem:[%s209_s0 + $0xc] sm:$0x1]   ;;  %s135_s16 = smov 112   ;;  %s136_s17 = smov 96   ;;  %v107_v4 = vld [vmem:[%s209_s0 + $0xb] sm:$0x1]  }
   0x3   :  { %v108_v5 = vld [vmem:[%s209_s0 + $0xa] sm:$0x1]   ;;  %v2_v6 = vld [vmem:[%s209_s0] sm:$0x1]   ;;  %s137_s24 = smov 88   ;;  %s138_s25 = smov 80  }
   0x4   :  { %4 = vst.msk [vmem:[#allocation0] sm:$0x1] %vm3_vm0, %v2_v6   ;;  %v109_v7 = vld [vmem:[%s209_s0 + $0x9] sm:$0x1]   ;;  %v110_v8 = vld [vmem:[%s209_s0 + $0x8] sm:$0x1]  }
   0x5   :  { %s139_s30 = smov 72   ;;  %s140_s2 = smov 64   ;;  %v111_v9 = vld [vmem:[%s209_s0 + $0x7] sm:$0x1]   ;;  %v112_v10 = vld [vmem:[%s209_s0 + $0x6] sm:$0x1]  }
   0x6   :  { %13 = vrot.lane.b32.xlu0 %v104_v2, %s135_s16  ;;  %25 = vrot.lane.b32.xlu1 %v106_v3, %s136_s17  ;;  %s141_s7 = smov 56   ;;  %s142_s8 = smov 48   ;;  %v113_v11 = vld [vmem:[%s209_s0 + $0x5] sm:$0x1]   ;;  %v114_v12 = vld [vmem:[%s209_s0 + $0x4] sm:$0x1]  }
   0x7   :  { %s143_s13 = smov 40   ;;  %s144_s14 = smov 32   ;;  %v115_v13 = vld [vmem:[%s209_s0 + $0x3] sm:$0x1]   ;;  %v116_v14 = vld [vmem:[%s209_s0 + $0x2] sm:$0x1]  }
   0x8   :  { %s145_s19 = smov 24   ;;  %s146_s20 = smov 16   ;;  %v117_v15 = vld [vmem:[%s209_s0 + $0x1] sm:$0x1]   ;;  %vm27_vm4 = vcmask 851712   ;;  %vm33_vm5 = vcmask 786112  }
   0x9   :  { %s147_s0 = smov 8   ;;  %vm39_vm6 = vcmask 720512   ;;  %vm45_vm7 = vcmask 654912   ;;  %vm51_vm8 = vcmask 589312   ;;  %vm57_vm9 = vcmask 523712  }
   0xa   :  { %31 = vrot.lane.b32.xlu0 %v107_v4, %s137_s24  ;;  %37 = vrot.lane.b32.xlu1 %v108_v5, %s138_s25  ;;  %vm63_vm10 = vcmask 458112   ;;  %vm69_vm11 = vcmask 392512   ;;  %vm75_vm12 = vcmask 326912   ;;  %vm81_vm13 = vcmask 261312  }
   0xb   :  { %vm87_vm14 = vcmask 195712   ;;  %vm93_vm15 = vcmask 130112  }
   0xe   :  { %43 = vrot.lane.b32.xlu0 %v109_v7, %s139_s30  ;;  %49 = vrot.lane.b32.xlu1 %v110_v8, %s140_s2 }
  0x12   :  { %55 = vrot.lane.b32.xlu0 %v111_v9, %s141_s7  ;;  %61 = vrot.lane.b32.xlu1 %v112_v10, %s142_s8 }
  0x16   :  { %67 = vrot.lane.b32.xlu0 %v113_v11, %s143_s13  ;;  %73 = vrot.lane.b32.xlu1 %v114_v12, %s144_s14 }
  0x1a   :  { %79 = vrot.lane.b32.xlu0 %v115_v13, %s145_s19  ;;  %85 = vrot.lane.b32.xlu1 %v116_v14, %s146_s20 }
  0x1e   :  { %91 = vrot.lane.b32.xlu0 %v117_v15, %s147_s0 }
  0x74   :  { %v8_v16 = vpop.permute.xlu0 %7   ;;  %v20_v17 = vpop.permute.xlu1 %19  }
  0x75   :  { %10 = vst.msk [vmem:[#allocation0] sm:$0x1] %vm9_vm1, %v8_v16  }
  0x78   :  { %v14_v18 = vpop.permute.xlu0 %13   ;;  %v26_v19 = vpop.permute.xlu1 %25  }
  0x79   :  { %16 = vst.msk [vmem:[#allocation0] sm:$0x1] %vm15_vm2, %v14_v18  }
  0x7a   :  { %22 = vst.msk [vmem:[#allocation0] sm:$0x1] %vm21_vm3, %v20_v17  }
  0x7b   :  { %28 = vst.msk [vmem:[#allocation0] sm:$0x1] %vm27_vm4, %v26_v19  }
  0x7c   :  { %v32_v20 = vpop.permute.xlu0 %31   ;;  %v38_v21 = vpop.permute.xlu1 %37  }
  0x7d   :  { %34 = vst.msk [vmem:[#allocation0] sm:$0x1] %vm33_vm5, %v32_v20  }
  0x7e   :  { %40 = vst.msk [vmem:[#allocation0] sm:$0x1] %vm39_vm6, %v38_v21  }
  0x80   :  { %v44_v22 = vpop.permute.xlu0 %43   ;;  %v50_v23 = vpop.permute.xlu1 %49  }
  0x81   :  { %46 = vst.msk [vmem:[#allocation0] sm:$0x1] %vm45_vm7, %v44_v22  }
  0x82   :  { %52 = vst.msk [vmem:[#allocation0] sm:$0x1] %vm51_vm8, %v50_v23  }
  0x84   :  { %v56_v24 = vpop.permute.xlu0 %55   ;;  %v62_v25 = vpop.permute.xlu1 %61  }
  0x85   :  { %58 = vst.msk [vmem:[#allocation0] sm:$0x1] %vm57_vm9, %v56_v24  }
  0x86   :  { %64 = vst.msk [vmem:[#allocation0] sm:$0x1] %vm63_vm10, %v62_v25  }
  0x88   :  { %v68_v26 = vpop.permute.xlu0 %67   ;;  %v74_v27 = vpop.permute.xlu1 %73  }
  0x89   :  { %70 = vst.msk [vmem:[#allocation0] sm:$0x1] %vm69_vm11, %v68_v26  }
  0x8a   :  { %76 = vst.msk [vmem:[#allocation0] sm:$0x1] %vm75_vm12, %v74_v27  }
  0x8c   :  { %v80_v28 = vpop.permute.xlu0 %79   ;;  %v86_v29 = vpop.permute.xlu1 %85  }
  0x8d   :  { %82 = vst.msk [vmem:[#allocation0] sm:$0x1] %vm81_vm13, %v80_v28  }
  0x8e   :  { %88 = vst.msk [vmem:[#allocation0] sm:$0x1] %vm87_vm14, %v86_v29  }
  0x90   :  { %v92_v30 = vpop.permute.xlu0 %91  }
  0x91   :  { %94 = vst.msk [vmem:[#allocation0] sm:$0x1] %vm93_vm15, %v92_v30  }
  0x98   :  { %v99_v31 = vld [vmem:[#allocation0] sm:$0x1] }
  0x99   :  { %102 = vst [vmem:[%s210_s1] sm:$0x1] %v99_v31 }

// kernel: sharenet_forward.1
= control target key start
LH: loop header
LB: loop body
LE: loop exit
PB: predicated region body
PF: predicated region fallthrough
CT: control target
= control target key end

     0   :  { %s11881_s15 = smov 0   ;;  %s15419_s0 = inlined_call_operand.vmem [shape: f32[2,16,128], index: 0, kind: input, shape index: {}]   ;;  %s15420_s1 = inlined_call_operand.vmem [shape: f32[22,3,128,128], index: 1, kind: input, shape index: {}]   ;;  %s15421_s2 = inlined_call_operand.vmem [shape: f32[2,1,128], index: 2, kind: input, shape index: {}]   ;;  %s15422_s3 = inlined_call_operand.vmem [shape: f32[2,1,128], index: 3, kind: input, shape index: {}]   ;;  %s15423_s4 = inlined_call_operand.vmem [shape: f32[2,16,128], index: 4, kind: output, shape index: {}]  }
   0x1 LB: > { %s7175_s16 = sadd.s32 4294967295, %s11853_s15   ;;  %p7179_p0 = scmp.ge.s32.totalorder %s11853_s15, 1  ;;  %s11853_s15 = sphi %s11881_s15, %s14_s15  }
   0x2   : > { %p162_p1 = scmp.lt.s32.totalorder %s11853_s15, 3 }
   0x4   : > { %p163_p2 = pnand %p7179_p0, %p162_p1 }
   0x5   : > { %p11900_p3 = scmp.lt.s32.totalorder (!%p163_p2), %s7175_s16, 1 }
   0x6   : > { %166 = sbr.rel (%p163_p2) target bundleno = 7291 (0x1c7b), region = 36 }
   0xb   : > { %v7199_v0 = vld [vmem:[%s15420_s1 + $0xf8] sm:$0xff]  ;;  %v7198_v2 = vld [vmem:[%s15420_s1 + $0xf0] sm:$0xff]  ;;  %v11855_v4 = vmov 0.0   ;;  %v7197_v5 = vld [vmem:[%s15420_s1 + $0xe8] sm:$0xff]  ;;  %s15426_s16 = smov (!%p11900_p3, %s7175_s16), 1 }
   0xc   : > { %v234_v1 = vld [vmem:[%s15420_s1 + $0x78] sm:$0xff]  ;;  %9446 = vmatprep.subr.mxu0 %v7199_v0  ;;  %v233_v3 = vld [vmem:[%s15420_s1 + $0x70] sm:$0xff]  ;;  %198 = vst [vmem:[#allocation2] sm:$0xff] %v11855_v4  ;;  %199 = vst [vmem:[#allocation2 + $0x8] sm:$0xff] %v11855_v4  ;;  %s8256_s8 = sshll.u32 %s15426_s16, 4 }
   0xd   : > { %9481 = vmatprep.subr.mxu1 %v234_v1  ;;  %200 = vst [vmem:[#allocation2 + $0x10] sm:$0x3] %v11855_v4  ;;  %201 = vst [vmem:[#allocation2 + $0x18] sm:$0xff] %v11855_v4  ;;  %9447 = vmatpush3.msra.mxu0 %v7199_v0  ;;  %v232_v6 = vld [vmem:[%s15420_s1 + $0x68] sm:$0xff]  ;;  %v7196_v7 = vld [vmem:[%s15420_s1 + $0xe0] sm:$0xff]  ;;  %s192_s17 = scalar_lea.vmem %s15419_s0, %s8256_s8 }
   0xe   : > { %202 = vst [vmem:[#allocation2 + $0x20] sm:$0xff] %v11855_v4  ;;  %203 = vst [vmem:[#allocation2 + $0x28] sm:$0x3] %v11855_v4  ;;  %9482 = vmatpush3.msra.mxu1 %v234_v1  ;;  %9448 = vmatprep.subr.mxu0 %v7198_v2  ;;  %v231_v8 = vld [vmem:[%s15420_s1 + $0x60] sm:$0xff]  ;;  %v7195_v9 = vld [vmem:[%s15420_s1 + $0xd8] sm:$0xff] }
   0xf   : > { %204 = vst [vmem:[#allocation2 + $0x30] sm:$0xff] %v11855_v4  ;;  %205 = vst [vmem:[#allocation2 + $0x38] sm:$0xff] %v11855_v4  ;;  %9483 = vmatprep.subr.mxu1 %v233_v3  ;;  %9449 = vmatpush3.msra.mxu0 %v7198_v2  ;;  %v230_v10 = vld [vmem:[%s15420_s1 + $0x58] sm:$0xff]  ;;  %v7194_v11 = vld [vmem:[%s15420_s1 + $0xd0] sm:$0xff] }
  0x10   : > { %206 = vst [vmem:[#allocation2 + $0x40] sm:$0x3] %v11855_v4  ;;  %207 = vst [vmem:[#allocation2 + $0x48] sm:$0xff] %v11855_v4  ;;  %9484 = vmatpush3.msra.mxu1 %v233_v3  ;;  %9450 = vmatprep.subr.mxu0 %v7197_v5  ;;  %v229_v12 = vld [vmem:[%s15420_s1 + $0x50] sm:$0xff]  ;;  %v7193_v13 = vld [vmem:[%s15420_s1 + $0xc8] sm:$0xff] }
  0x11   : > { %208 = vst [vmem:[#allocation2 + $0x50] sm:$0xff] %v11855_v4  ;;  %209 = vst [vmem:[#allocation2 + $0x58] sm:$0x3] %v11855_v4  ;;  %9485 = vmatprep.subr.mxu1 %v232_v6  ;;  %9451 = vmatpush3.msra.mxu0 %v7197_v5  ;;  %v228_v14 = vld [vmem:[%s15420_s1 + $0x48] sm:$0xff]  ;;  %v11949_v15 = vld [vmem:[%s192_s17] sm:$0xff] }
  0x12   : > { %210 = vst [vmem:[#allocation2 + $0x60] sm:$0xff] %v11855_v4  ;;  %211 = vst [vmem:[#allocation2 + $0x68] sm:$0xff] %v11855_v4  ;;  %9486 = vmatpush3.msra.mxu1 %v232_v6  ;;  %9452 = vmatprep.subr.mxu0 %v7196_v7  ;;  %v11952_v16 = vld [vmem:[%s192_s17 + $0x8] sm:$0xff]  ;;  %v7192_v17 = vld [vmem:[%s15420_s1 + $0xc0] sm:$0xff] }
  0x13   : > { %212 = vst [vmem:[#allocation2 + $0x70] sm:$0x3] %v11855_v4  ;;  %9487 = vmatprep.subr.mxu1 %v231_v8  ;;  %9453 = vmatpush3.msra.mxu0 %v7196_v7  ;;  %215 = vst [vmem:[#allocation2 + $0x1] sm:$0xff] %v11949_v15  ;;  %v227_v18 = vld [vmem:[%s15420_s1 + $0x40] sm:$0xff]  ;;  %v7191_v19 = vld [vmem:[%s15420_s1 + $0xb8] sm:$0xff] }
  0x14   : > { %9488 = vmatpush3.msra.mxu1 %v231_v8  ;;  %9454 = vmatprep.subr.mxu0 %v7195_v9  ;;  %216 = vst [vmem:[#allocation2 + $0x9] sm:$0xff] %v11952_v16  ;;  %v226_v20 = vld [vmem:[%s15420_s1 + $0x38] sm:$0xff]  ;;  %v7190_v21 = vld [vmem:[%s15420_s1 + $0xb0] sm:$0xff]  ;;  %v7189_v23 = vld [vmem:[%s15420_s1 + $0xa8] sm:$0xff] }
  0x15   : > { %9489 = vmatprep.subr.mxu1 %v230_v10  ;;  %9455 = vmatpush3.msra.mxu0 %v7195_v9  ;;  %v225_v22 = vld [vmem:[%s15420_s1 + $0x30] sm:$0xff]  ;;  %v224_v24 = vld [vmem:[%s15420_s1 + $0x28] sm:$0xff]  ;;  %v7188_v25 = vld [vmem:[%s15420_s1 + $0xa0] sm:$0xff] }
  0x16   : > { %9490 = vmatpush3.msra.mxu1 %v230_v10  ;;  %9456 = vmatprep.subr.mxu0 %v7194_v11  ;;  %v223_v26 = vld [vmem:[%s15420_s1 + $0x20] sm:$0xff]  ;;  %v7187_v27 = vld [vmem:[%s15420_s1 + $0x98] sm:$0xff]  ;;  %v7186_v29 = vld [vmem:[%s15420_s1 + $0x90] sm:$0xff] }
  0x17   : > { %9491 = vmatprep.subr.mxu1 %v229_v12  ;;  %9457 = vmatpush3.msra.mxu0 %v7194_v11  ;;  %v222_v28 = vld [vmem:[%s15420_s1 + $0x18] sm:$0xff]  ;;  %v221_v30 = vld [vmem:[%s15420_s1 + $0x10] sm:$0xff]  ;;  %v7185_v31 = vld [vmem:[%s15420_s1 + $0x88] sm:$0xff] }
  0x18   : > { %9492 = vmatpush3.msra.mxu1 %v229_v12  ;;  %9458 = vmatprep.subr.mxu0 %v7193_v13  ;;  %v220_v32 = vld [vmem:[%s15420_s1 + $0x8] sm:$0xff]  ;;  %v7184_v33 = vld [vmem:[%s15420_s1 + $0x80] sm:$0xff]  ;;  %v7215_v37 = vld [vmem:[%s15420_s1 + $0x178] sm:$0xff] }
  0x19   : > { %9493 = vmatprep.subr.mxu1 %v228_v14  ;;  %9459 = vmatpush3.msra.mxu0 %v7193_v13  ;;  %v219_v34 = vld [vmem:[%s15420_s1] sm:$0xff]  ;;  %v7214_v39 = vld [vmem:[%s15420_s1 + $0x170] sm:$0xff]  ;;  %v7213_v40 = vld [vmem:[%s15420_s1 + $0x168] sm:$0xff] }
  0x1a   : > { %9494 = vmatpush3.msra.mxu1 %v228_v14  ;;  %9460 = vmatprep.subr.mxu0 %v7192_v17  ;;  %v217_v35 = vld [vmem:[#allocation2] sm:$0xff]  ;;  %v7211_v42 = vld [vmem:[%s15420_s1 + $0x158] sm:$0xff]  ;;  %v7210_v43 = vld [vmem:[%s15420_s1 + $0x150] sm:$0xff] }
  0x1b   : > { %9495 = vmatprep.subr.mxu1 %v227_v18  ;;  %9461 = vmatpush3.msra.mxu0 %v7192_v17  ;;  %v218_v36 = vld [vmem:[#allocation2 + $0x8] sm:$0xff]  ;;  %v7212_v41 = vld [vmem:[%s15420_s1 + $0x160] sm:$0xff]  ;;  %v7207_v46 = vld [vmem:[%s15420_s1 + $0x138] sm:$0xff] }
  0x1c   : > { %9496 = vmatpush3.msra.mxu1 %v227_v18  ;;  %9462 = vmatprep.subr.mxu0 %v7191_v19  ;;  %v404_v38 = vld [vmem:[#allocation2 + $0x2] sm:$0xff]  ;;  %v7206_v47 = vld [vmem:[%s15420_s1 + $0x130] sm:$0xff]  ;;  %v7203_v50 = vld [vmem:[%s15420_s1 + $0x118] sm:$0xff] }
  0x1d   : > { %9497 = vmatprep.subr.mxu1 %v226_v20  ;;  %9463 = vmatpush3.msra.mxu0 %v7191_v19  ;;  %v7209_v44 = vld [vmem:[%s15420_s1 + $0x148] sm:$0xff]  ;;  %v7208_v45 = vld [vmem:[%s15420_s1 + $0x140] sm:$0xff]  ;;  %v7202_v51 = vld [vmem:[%s15420_s1 + $0x110] sm:$0xff] }
  0x1e   : > { %9498 = vmatpush3.msra.mxu1 %v226_v20  ;;  %9464 = vmatprep.subr.mxu0 %v7190_v21  ;;  %v7205_v48 = vld [vmem:[%s15420_s1 + $0x128] sm:$0xff]  ;;  %v7204_v49 = vld [vmem:[%s15420_s1 + $0x120] sm:$0xff]  ;;  %v7248_v17 = vld [vmem:[%s15420_s1 + $0x270] sm:$0xff] }
  0x1f   : > { %9499 = vmatprep.subr.mxu1 %v225_v22  ;;  %9465 = vmatpush3.msra.mxu0 %v7190_v21  ;;  %v7201_v52 = vld [vmem:[%s15420_s1 + $0x108] sm:$0xff]  ;;  %v7200_v53 = vld [vmem:[%s15420_s1 + $0x100] sm:$0xff]  ;;  %v7232_v18 = vld [vmem:[%s15420_s1 + $0x1f0] sm:$0xff] }
  0x20   : > { %9500 = vmatpush3.msra.mxu1 %v225_v22  ;;  %9466 = vmatprep.subr.mxu0 %v7189_v23  ;;  %v405_v54 = vld [vmem:[#allocation2 + $0xa] sm:$0xff]  ;;  %v7246_v21 = vld [vmem:[%s15420_s1 + $0x260] sm:$0xff] }
  0x21   : > { %9501 = vmatprep.subr.mxu1 %v224_v24  ;;  %9467 = vmatpush3.msra.mxu0 %v7189_v23  ;;  %v7247_v19 = vld [vmem:[%s15420_s1 + $0x268] sm:$0xff]  ;;  %v7230_v22 = vld [vmem:[%s15420_s1 + $0x1e0] sm:$0xff]  ;;  %v7245_v23 = vld [vmem:[%s15420_s1 + $0x258] sm:$0xff] }
  0x22   : > { %9502 = vmatpush3.msra.mxu1 %v224_v24  ;;  %9468 = vmatprep.subr.mxu0 %v7188_v25  ;;  %v7231_v20 = vld [vmem:[%s15420_s1 + $0x1e8] sm:$0xff]  ;;  %v7229_v24 = vld [vmem:[%s15420_s1 + $0x1d8] sm:$0xff] }
  0x23   : > { %9503 = vmatprep.subr.mxu1 %v223_v26  ;;  %9469 = vmatpush3.msra.mxu0 %v7188_v25  ;;  %v7244_v25 = vld [vmem:[%s15420_s1 + $0x250] sm:$0xff] }
  0x24   : > { %9504 = vmatpush3.msra.mxu1 %v223_v26  ;;  %9470 = vmatprep.subr.mxu0 %v7187_v27  ;;  %v7228_v26 = vld [vmem:[%s15420_s1 + $0x1d0] sm:$0xff] }
  0x25   : > { %9505 = vmatprep.subr.mxu1 %v222_v28  ;;  %9471 = vmatpush3.msra.mxu0 %v7187_v27  ;;  %v7243_v27 = vld [vmem:[%s15420_s1 + $0x248] sm:$0xff] }
  0x26   : > { %9506 = vmatpush3.msra.mxu1 %v222_v28  ;;  %9472 = vmatprep.subr.mxu0 %v7186_v29  ;;  %v7227_v28 = vld [vmem:[%s15420_s1 + $0x1c8] sm:$0xff] }
  0x27   : > { %9507 = vmatprep.subr.mxu1 %v221_v30  ;;  %9473 = vmatpush3.msra.mxu0 %v7186_v29  ;;  %v7242_v29 = vld [vmem:[%s15420_s1 + $0x240] sm:$0xff] }
  0x28   : > { %9508 = vmatpush3.msra.mxu1 %v221_v30  ;;  %9474 = vmatprep.subr.mxu0 %v7185_v31  ;;  %v7241_v30 = vld [vmem:[%s15420_s1 + $0x238] sm:$0xff] }
  0x29   : > { %9509 = vmatprep.subr.mxu1 %v220_v32  ;;  %9475 = vmatpush3.msra.mxu0 %v7185_v31  ;;  %v7240_v31 = vld [vmem:[%s15420_s1 + $0x230] sm:$0xff] }
  0x2a   : > { %9510 = vmatpush3.msra.mxu1 %v220_v32  ;;  %9476 = vmatprep.subr.mxu0 %v7184_v33 }
  0x2b   : > { %9511 = vmatprep.subr.mxu1 %v219_v34  ;;  %9477 = vmatpush3.msra.mxu0 %v7184_v33  ;;  %v7239_v33 = vld [vmem:[%s15420_s1 + $0x228] sm:$0xff] }
  0x2c   : > { %9478 = vmatprep.mubr.f32.mxu0 %v11949_v15  ;;  %9512 = vmatpush3.msra.mxu1 %v219_v34  ;;  %v7249_v15 = vld [vmem:[%s15420_s1 + $0x278] sm:$0xff] }
  0x2d   : > { %9513 = vmatprep.mubr.f32.mxu1 %v217_v35  ;;  %9479 = vmatmul.mubr.f32.vlgmr.msra.gmra.mxu0 %v11952_v16  ;;  %v7233_v16 = vld [vmem:[%s15420_s1 + $0x1f8] sm:$0xff]  ;;  %v7226_v35 = vld [vmem:[%s15420_s1 + $0x1c0] sm:$0xff] }
  0x2e   : > { %9514 = vmatmul.mubr.f32.vlgmr.msra.gmra.mxu1 %v218_v36  ;;  %9516 = vmatprep.subr.mxu0 %v7215_v37  ;;  %v7238_v36 = vld [vmem:[%s15420_s1 + $0x220] sm:$0xff] }
  0x2f   : > { %9548 = vmatprep.mubr.f32.mxu0 %v404_v38  ;;  %9517 = vmatpush3.msra.mxu0 %v7215_v37  ;;  %v7225_v38 = vld [vmem:[%s15420_s1 + $0x1b8] sm:$0xff] }
  0x30   : > { %9518 = vmatprep.subr.mxu0 %v7214_v39  ;;  %9551 = vmatprep.subr.mxu1 %v7249_v15 }
  0x31   : > { %9519 = vmatpush3.msra.mxu0 %v7214_v39  ;;  %9552 = vmatpush3.msra.mxu1 %v7249_v15  ;;  %v7237_v39 = vld [vmem:[%s15420_s1 + $0x218] sm:$0xff]  ;;  %v7296_v15 = vld [vmem:[%s15420_s1 + $0x3e0] sm:$0xff] }
  0x32   : > { %9520 = vmatprep.subr.mxu0 %v7213_v40  ;;  %9553 = vmatprep.subr.mxu1 %v7248_v17 }
  0x33   : > { %9521 = vmatpush3.msra.mxu0 %v7213_v40  ;;  %9554 = vmatpush3.msra.mxu1 %v7248_v17  ;;  %v7295_v17 = vld [vmem:[%s15420_s1 + $0x3d8] sm:$0xff] }
  0x34   : > { %9522 = vmatprep.subr.mxu0 %v7212_v41  ;;  %9555 = vmatprep.subr.mxu1 %v7247_v19 }
  0x35   : > { %9523 = vmatpush3.msra.mxu0 %v7212_v41  ;;  %9556 = vmatpush3.msra.mxu1 %v7247_v19  ;;  %v7224_v41 = vld [vmem:[%s15420_s1 + $0x1b0] sm:$0xff] }
  0x36   : > { %9524 = vmatprep.subr.mxu0 %v7211_v42  ;;  %9557 = vmatprep.subr.mxu1 %v7246_v21  ;;  %v7294_v19 = vld [vmem:[%s15420_s1 + $0x3d0] sm:$0xff] }
  0x37   : > { %9525 = vmatpush3.msra.mxu0 %v7211_v42  ;;  %9558 = vmatpush3.msra.mxu1 %v7246_v21  ;;  %v7236_v42 = vld [vmem:[%s15420_s1 + $0x210] sm:$0xff]  ;;  %v7293_v21 = vld [vmem:[%s15420_s1 + $0x3c8] sm:$0xff] }
  0x38   : > { %9526 = vmatprep.subr.mxu0 %v7210_v43  ;;  %9559 = vmatprep.subr.mxu1 %v7245_v23 }
  0x39   : > { %9527 = vmatpush3.msra.mxu0 %v7210_v43  ;;  %9560 = vmatpush3.msra.mxu1 %v7245_v23  ;;  %v7292_v23 = vld [vmem:[%s15420_s1 + $0x3c0] sm:$0xff] }
  0x3a   : > { %9528 = vmatprep.subr.mxu0 %v7209_v44  ;;  %9561 = vmatprep.subr.mxu1 %v7244_v25 }
  0x3b   : > { %9529 = vmatpush3.msra.mxu0 %v7209_v44  ;;  %9562 = vmatpush3.msra.mxu1 %v7244_v25  ;;  %v7223_v44 = vld [vmem:[%s15420_s1 + $0x1a8] sm:$0xff]  ;;  %v7291_v25 = vld [vmem:[%s15420_s1 + $0x3b8] sm:$0xff] }
  0x3c   : > { %9530 = vmatprep.subr.mxu0 %v7208_v45  ;;  %9563 = vmatprep.subr.mxu1 %v7243_v27 }
  0x3d   : > { %9531 = vmatpush3.msra.mxu0 %v7208_v45  ;;  %9564 = vmatpush3.msra.mxu1 %v7243_v27  ;;  %v7235_v45 = vld [vmem:[%s15420_s1 + $0x208] sm:$0xff]  ;;  %v7290_v27 = vld [vmem:[%s15420_s1 + $0x3b0] sm:$0xff] }
  0x3e   : > { %9532 = vmatprep.subr.mxu0 %v7207_v46  ;;  %9565 = vmatprep.subr.mxu1 %v7242_v29 }
  0x3f   : > { %9533 = vmatpush3.msra.mxu0 %v7207_v46  ;;  %9566 = vmatpush3.msra.mxu1 %v7242_v29  ;;  %v7289_v29 = vld [vmem:[%s15420_s1 + $0x3a8] sm:$0xff] }
  0x40   : > { %9534 = vmatprep.subr.mxu0 %v7206_v47  ;;  %9567 = vmatprep.subr.mxu1 %v7241_v30 }
  0x41   : > { %9535 = vmatpush3.msra.mxu0 %v7206_v47  ;;  %9568 = vmatpush3.msra.mxu1 %v7241_v30  ;;  %v7222_v47 = vld [vmem:[%s15420_s1 + $0x1a0] sm:$0xff]  ;;  %v7252_v30 = vld [vmem:[%s15420_s1 + $0x290] sm:$0xff] }
  0x42   : > { %9536 = vmatprep.subr.mxu0 %v7205_v48  ;;  %9569 = vmatprep.subr.mxu1 %v7240_v31 }
  0x43   : > { %9537 = vmatpush3.msra.mxu0 %v7205_v48  ;;  %9570 = vmatpush3.msra.mxu1 %v7240_v31  ;;  %v7234_v48 = vld [vmem:[%s15420_s1 + $0x200] sm:$0xff] }
  0x44   : > { %9538 = vmatprep.subr.mxu0 %v7204_v49  ;;  %9571 = vmatprep.subr.mxu1 %v7239_v33  ;;  %v7288_v31 = vld [vmem:[%s15420_s1 + $0x3a0] sm:$0xff] }
  0x45   : > { %9539 = vmatpush3.msra.mxu0 %v7204_v49  ;;  %9572 = vmatpush3.msra.mxu1 %v7239_v33  ;;  %v7287_v33 = vld [vmem:[%s15420_s1 + $0x398] sm:$0xff] }
  0x46   : > { %9540 = vmatprep.subr.mxu0 %v7203_v50  ;;  %9573 = vmatprep.subr.mxu1 %v7238_v36 }
  0x47   : > { %9541 = vmatpush3.msra.mxu0 %v7203_v50  ;;  %9574 = vmatpush3.msra.mxu1 %v7238_v36  ;;  %v7221_v50 = vld [vmem:[%s15420_s1 + $0x198] sm:$0xff] }
  0x48   : > { %9542 = vmatprep.subr.mxu0 %v7202_v51  ;;  %9575 = vmatprep.subr.mxu1 %v7237_v39  ;;  %v7283_v36 = vld [vmem:[%s15420_s1 + $0x378] sm:$0xff] }
  0x49   : > { %9543 = vmatpush3.msra.mxu0 %v7202_v51  ;;  %9576 = vmatpush3.msra.mxu1 %v7237_v39  ;;  %v7265_v51 = vld [vmem:[%s15420_s1 + $0x2f8] sm:$0xff]  ;;  %v7284_v39 = vld [vmem:[%s15420_s1 + $0x380] sm:$0xff] }
  0x4a   : > { %9544 = vmatprep.subr.mxu0 %v7201_v52  ;;  %9577 = vmatprep.subr.mxu1 %v7236_v42 }
  0x4b   : > { %9545 = vmatpush3.msra.mxu0 %v7201_v52  ;;  %9578 = vmatpush3.msra.mxu1 %v7236_v42  ;;  %v7220_v52 = vld [vmem:[%s15420_s1 + $0x190] sm:$0xff] }
  0x4c   : > { %9546 = vmatprep.subr.mxu0 %v7200_v53  ;;  %9579 = vmatprep.subr.mxu1 %v7235_v45  ;;  %v7314_v42 = vld [vmem:[%s15420_s1 + $0x470] sm:$0xff] }
  0x4d   : > { %9547 = vmatpush3.msra.mxu0 %v7200_v53  ;;  %9580 = vmatpush3.msra.mxu1 %v7235_v45  ;;  %v7219_v53 = vld [vmem:[%s15420_s1 + $0x188] sm:$0xff]  ;;  %v7280_v45 = vld [vmem:[%s15420_s1 + $0x360] sm:$0xff] }
  0x4e   : > { %9549 = vmatmul.mubr.f32.vlgmr.msra.gmra.mxu0 %v405_v54  ;;  %9586 = vmatprep.subr.mxu0 %v7233_v16  ;;  %v7218_v54 = vld [vmem:[%s15420_s1 + $0x180] sm:$0xff] }
  0x4f   : > { %9587 = vmatpush3.msra.mxu0 %v7233_v16  ;;  %9581 = vmatprep.subr.mxu1 %v7234_v48  ;;  %v7259_v16 = vld [vmem:[%s15420_s1 + $0x2c8] sm:$0xff] }
  0x50   : > { %9588 = vmatprep.subr.mxu0 %v7232_v18  ;;  %9582 = vmatpush3.msra.mxu1 %v7234_v48  ;;  %v7311_v48 = vld [vmem:[%s15420_s1 + $0x458] sm:$0xff] }
  0x51   : > { %9589 = vmatpush3.msra.mxu0 %v7232_v18  ;;  %9621 = vmatprep.subr.mxu1 %v7265_v51  ;;  %v7258_v18 = vld [vmem:[%s15420_s1 + $0x2c0] sm:$0xff] }
  0x52   : > { %9590 = vmatprep.subr.mxu0 %v7231_v20 }
  0x53   : > { %9591 = vmatpush3.msra.mxu0 %v7231_v20  ;;  %v7257_v20 = vld [vmem:[%s15420_s1 + $0x2b8] sm:$0xff] }
  0x54   : > { %9592 = vmatprep.subr.mxu0 %v7230_v22 }
  0x55   : > { %9593 = vmatpush3.msra.mxu0 %v7230_v22  ;;  %v7256_v22 = vld [vmem:[%s15420_s1 + $0x2b0] sm:$0xff] }
  0x56   : > { %9594 = vmatprep.subr.mxu0 %v7229_v24 }
  0x57   : > { %9595 = vmatpush3.msra.mxu0 %v7229_v24  ;;  %v7255_v24 = vld [vmem:[%s15420_s1 + $0x2a8] sm:$0xff] }
  0x58   : > { %9596 = vmatprep.subr.mxu0 %v7228_v26 }
  0x59   : > { %9597 = vmatpush3.msra.mxu0 %v7228_v26  ;;  %v7254_v26 = vld [vmem:[%s15420_s1 + $0x2a0] sm:$0xff] }
  0x5a   : > { %9598 = vmatprep.subr.mxu0 %v7227_v28 }
  0x5b   : > { %9599 = vmatpush3.msra.mxu0 %v7227_v28  ;;  %v7253_v28 = vld [vmem:[%s15420_s1 + $0x298] sm:$0xff] }
  0x5c   : > { %9600 = vmatprep.subr.mxu0 %v7226_v35 }
  0x5d   : > { %9601 = vmatpush3.msra.mxu0 %v7226_v35  ;;  %v7286_v35 = vld [vmem:[%s15420_s1 + $0x390] sm:$0xff] }
  0x5e   : > { %9602 = vmatprep.subr.mxu0 %v7225_v38 }
  0x5f   : > { %9603 = vmatpush3.msra.mxu0 %v7225_v38 }
  0x60   : > { %9604 = vmatprep.subr.mxu0 %v7224_v41 }
  0x61   : > { %9605 = vmatpush3.msra.mxu0 %v7224_v41  ;;  %v7315_v41 = vld [vmem:[%s15420_s1 + $0x478] sm:$0xff] }
  0x62   : > { %9606 = vmatprep.subr.mxu0 %v7223_v44 }
  0x63   : > { %9607 = vmatpush3.msra.mxu0 %v7223_v44  ;;  %v7313_v44 = vld [vmem:[%s15420_s1 + $0x468] sm:$0xff] }
  0x64   : > { %9608 = vmatprep.subr.mxu0 %v7222_v47 }
  0x65   : > { %9609 = vmatpush3.msra.mxu0 %v7222_v47  ;;  %v7279_v47 = vld [vmem:[%s15420_s1 + $0x358] sm:$0xff] }
  0x66   : > { %9610 = vmatprep.subr.mxu0 %v7221_v50 }
  0x67   : > { %9611 = vmatpush3.msra.mxu0 %v7221_v50  ;;  %v7310_v50 = vld [vmem:[%s15420_s1 + $0x450] sm:$0xff] }
  0x68   : > { %9612 = vmatprep.subr.mxu0 %v7220_v52 }
  0x69   : > { %9613 = vmatpush3.msra.mxu0 %v7220_v52  ;;  %v7309_v52 = vld [vmem:[%s15420_s1 + $0x448] sm:$0xff] }
  0x6a   : > { %9614 = vmatprep.subr.mxu0 %v7219_v53 }
  0x6b   : > { %9615 = vmatpush3.msra.mxu0 %v7219_v53  ;;  %v7276_v53 = vld [vmem:[%s15420_s1 + $0x340] sm:$0xff] }
  0x6c   : > { %9616 = vmatprep.subr.mxu0 %v7218_v54 }
  0x6d   : > { %9617 = vmatpush3.msra.mxu0 %v7218_v54  ;;  %v7308_v54 = vld [vmem:[%s15420_s1 + $0x440] sm:$0xff] }
  0xed   : > { %v9480_v55 = vpop.f32.mrf.mxu0 }
  0xee   : > { %v9515_v56 = vpop.f32.mrf.mxu1 }
  0xef   : > { %v320_v57 = vpop.f32.mrf.mxu0  ;;  %v401_v60 = vadd.f32 %v9515_v56, %v9480_v55  ;;  %v7299_v55 = vld [vmem:[%s15420_s1 + $0x3f8] sm:$0xff] }
  0xf0   : > { %v395_v58 = vpop.f32.mrf.mxu1  ;;  %9656 = vmatprep.subr.mxu0 %v7299_v55 }
  0xf1   : > { %v396_v61 = vadd.f32 %v395_v58, %v320_v57 }
 0x10e   : > { %v9550_v59 = vpop.f32.mrf.mxu0 }
 0x10f   : > { %v499_v63 = vadd.f32 %v9550_v59, %v401_v60  ;;  %v12172_v59 = vld [vmem:[%s15421_s2] ss:$0 sm:$0xff] }
 0x110   : > { %v489_v62 = vpop.f32.mrf.mxu0 }
 0x111   : > { %v498_v0 = vadd.f32 %v489_v62, %v396_v61  ;;  %v12179_v62 = vld [vmem:[%s15422_s3] ss:$0 sm:$0xff] }
 0x113   : > { %v500_v1 = vadd.f32 %v499_v63, %v498_v0 }
 0x115   : > { %501 = vadd.xlane.f32.xlu0 %v500_v1 }
 0x19e   : > { %v502_v2 = vpop.xlane.xlu0 %501 }
 0x19f   : > { %v503_v3 = vrot.slane %v502_v2, 4 }
 0x1a1   : > { %v504_v4 = vadd.f32 %v503_v3, %v502_v2 }
 0x1a3   : > { %v505_v5 = vrot.slane %v504_v4, 2 }
 0x1a5   : > { %v506_v6 = vadd.f32 %v505_v5, %v504_v4  ;;  %v7264_v5 = vld [vmem:[%s15420_s1 + $0x2f0] sm:$0xff] }
 0x1a7   : > { %v507_v7 = vrot.slane %v506_v6, 1 }
 0x1a9   : > { %v508_v8 = vadd.f32 %v507_v7, %v506_v6  ;;  %v7263_v6 = vld [vmem:[%s15420_s1 + $0x2e8] sm:$0xff]  ;;  %v7262_v7 = vld [vmem:[%s15420_s1 + $0x2e0] sm:$0xff] }
 0x1ab   : > { %11756 = vpush %v508_v8 }
 0x1dc   : > { %s11757_s25 = spop %11756 }
 0x1dd   : > { %s512_s26 = smul.f32 0.00048828125, %s11757_s25 }
 0x1df   : > { %v513_v9 = vstv %s512_s26 }
 0x1e0   : > { %v12059_v10 = vsub.f32 %v498_v0, %v513_v9  ;;  %v12061_v11 = vsub.f32 %v499_v63, %v513_v9 }
 0x1e2   : > { %v516_v12 = vmul.f32 %v12059_v10, %v12059_v10  ;;  %v517_v13 = vmul.f32 %v12061_v11, %v12061_v11 }
 0x1e4   : > { %v518_v14 = vadd.f32 %v517_v13, %v516_v12  ;;  %v7261_v12 = vld [vmem:[%s15420_s1 + $0x2d8] sm:$0xff]  ;;  %v7297_v13 = vld [vmem:[%s15420_s1 + $0x3e8] sm:$0xff] }
 0x1e6   : > { %519 = vadd.xlane.f32.xlu0 %v518_v14  ;;  %v7260_v14 = vld [vmem:[%s15420_s1 + $0x2d0] sm:$0xff] }
 0x26f   : > { %v520_v32 = vpop.xlane.xlu0 %519 }
 0x270   : > { %v521_v34 = vrot.slane %v520_v32, 4 }
 0x272   : > { %v522_v37 = vadd.f32 %v521_v34, %v520_v32  ;;  %v7251_v32 = vld [vmem:[%s15420_s1 + $0x288] sm:$0xff]  ;;  %v7250_v34 = vld [vmem:[%s15420_s1 + $0x280] sm:$0xff] }
 0x274   : > { %v523_v40 = vrot.slane %v522_v37, 2 }
 0x276   : > { %v524_v43 = vadd.f32 %v523_v40, %v522_v37  ;;  %v7285_v37 = vld [vmem:[%s15420_s1 + $0x388] sm:$0xff]  ;;  %v7282_v40 = vld [vmem:[%s15420_s1 + $0x370] sm:$0xff] }
 0x278   : > { %v525_v46 = vrot.slane %v524_v43, 1 }
 0x27a   : > { %v526_v49 = vadd.f32 %v525_v46, %v524_v43  ;;  %v7281_v43 = vld [vmem:[%s15420_s1 + $0x368] sm:$0xff]  ;;  %v7312_v46 = vld [vmem:[%s15420_s1 + $0x460] sm:$0xff] }
 0x27c   : > { %11758 = vpush %v526_v49  ;;  %v7278_v49 = vld [vmem:[%s15420_s1 + $0x350] sm:$0xff] }
 0x2ad   : > { %s11759_s26 = spop %11758 }
 0x2ae   : > { %s530_s27 = smul.f32 0.00048828125, %s11759_s26 }
 0x2b0   : > { %s531_s28 = sadd.f32 1e-05, %s530_s27 }
 0x2b2   : > { %v532_v56 = vstv %s531_s28 }
 0x2b3   : > { %11825 = vrsqrt.f32 %v532_v56  ;;  %v7307_v56 = vld [vmem:[%s15420_s1 + $0x438] sm:$0xff] }
 0x2c0   : > { %v11826_v57 = vpop.eup %11825 }
 0x2c1   : > { %11760 = vpush %v11826_v57  ;;  %v7274_v57 = vld [vmem:[%s15420_s1 + $0x330] sm:$0xff] }
 0x2f2   : > { %s11761_s29 = spop %11760 }
 0x2f3   : > { %v535_v58 = vstv %s11761_s29 }
 0x2f4   : > { %v536_v60 = vmul.f32 %v535_v58, %v12059_v10  ;;  %v537_v61 = vmul.f32 %v535_v58, %v12061_v11  ;;  %v7298_v11 = vld [vmem:[%s15420_s1 + $0x3f0] sm:$0xff] }
 0x2f5   : > { %v7306_v58 = vld [vmem:[%s15420_s1 + $0x430] sm:$0xff] }
 0x2f6   : > { %v545_v63 = vmul.f32 %v12172_v59, %v536_v60  ;;  %v546_v0 = vmul.f32 %v12172_v59, %v537_v61  ;;  %v7273_v60 = vld [vmem:[%s15420_s1 + $0x328] sm:$0xff] }
 0x2f7   : > { %v7305_v61 = vld [vmem:[%s15420_s1 + $0x428] sm:$0xff] }
 0x2f8   : > { %v554_v1 = vadd.f32 %v12179_v62, %v545_v63  ;;  %v555_v2 = vadd.f32 %v12179_v62, %v546_v0  ;;  %v7272_v63 = vld [vmem:[%s15420_s1 + $0x320] sm:$0xff] }
 0x2f9   : > { %v7304_v0 = vld [vmem:[%s15420_s1 + $0x420] sm:$0xff] }
 0x2fa   : > { %v12185_v3 = vmax.f32 %v554_v1, 0.0  ;;  %v12187_v4 = vmax.f32 %v555_v2, 0.0  ;;  %v7271_v1 = vld [vmem:[%s15420_s1 + $0x318] sm:$0xff] }
 0x2fb   : > { %v7303_v2 = vld [vmem:[%s15420_s1 + $0x418] sm:$0xff] }
 0x2fc   : > { %559 = vst [vmem:[#allocation2 + $0x19] sm:$0xff] %v12185_v3  ;;  %560 = vst [vmem:[#allocation2 + $0x21] sm:$0xff] %v12187_v4  ;;  %9583 = vmatprep.mubr.f32.mxu1 %v12185_v3 }
 0x2fd   : > { %9584 = vmatmul.mubr.f32.vlgmr.msra.gmra.mxu1 %v12187_v4 }
 0x2fe   : > { %9622 = vmatpush3.msra.mxu1 %v7265_v51  ;;  %v7277_v51 = vld [vmem:[%s15420_s1 + $0x348] sm:$0xff] }
 0x2ff   : > { %9623 = vmatprep.subr.mxu1 %v7264_v5 }
 0x300   : > { %9624 = vmatpush3.msra.mxu1 %v7264_v5  ;;  %v7302_v5 = vld [vmem:[%s15420_s1 + $0x410] sm:$0xff] }
 0x301   : > { %9625 = vmatprep.subr.mxu1 %v7263_v6 }
 0x302   : > { %9626 = vmatpush3.msra.mxu1 %v7263_v6  ;;  %v7269_v6 = vld [vmem:[%s15420_s1 + $0x308] sm:$0xff] }
 0x303   : > { %v12202_v8 = vld [vmem:[#allocation2 + $0x18] sm:$0xff]  ;;  %v12204_v9 = vld [vmem:[#allocation2 + $0x20] sm:$0xff]  ;;  %9627 = vmatprep.subr.mxu1 %v7262_v7 }
 0x304   : > { %v12206_v10 = vld [vmem:[#allocation2 + $0x1a] sm:$0xff]  ;;  %9618 = vmatprep.mubr.f32.mxu0 %v12202_v8  ;;  %9628 = vmatpush3.msra.mxu1 %v7262_v7  ;;  %v12293_v38 = vld [vmem:[#allocation2 + $0x22] sm:$0xff] }
 0x305   : > { %9653 = vmatprep.mubr.f32.mxu1 %v12206_v10  ;;  %9619 = vmatmul.mubr.f32.vlgmr.msra.gmra.mxu0 %v12204_v9  ;;  %v7301_v7 = vld [vmem:[%s15420_s1 + $0x408] sm:$0xff] }
 0x306   : > { %9657 = vmatpush3.msra.mxu0 %v7299_v55  ;;  %9688 = vmatprep.mubr.f32.mxu0 %v12185_v3  ;;  %v7275_v55 = vld [vmem:[%s15420_s1 + $0x338] sm:$0xff] }
 0x307   : > { %9658 = vmatprep.subr.mxu0 %v7298_v11  ;;  %9629 = vmatprep.subr.mxu1 %v7261_v12 }
 0x308   : > { %9659 = vmatpush3.msra.mxu0 %v7298_v11  ;;  %9630 = vmatpush3.msra.mxu1 %v7261_v12  ;;  %v7268_v11 = vld [vmem:[%s15420_s1 + $0x300] sm:$0xff] }
 0x309   : > { %9660 = vmatprep.subr.mxu0 %v7297_v13  ;;  %9631 = vmatprep.subr.mxu1 %v7260_v14  ;;  %v7300_v12 = vld [vmem:[%s15420_s1 + $0x400] sm:$0xff] }
 0x30a   : > { %9661 = vmatpush3.msra.mxu0 %v7297_v13  ;;  %9632 = vmatpush3.msra.mxu1 %v7260_v14 }
 0x30b   : > { %9662 = vmatprep.subr.mxu0 %v7296_v15  ;;  %9633 = vmatprep.subr.mxu1 %v7259_v16 }
 0x30c   : > { %9663 = vmatpush3.msra.mxu0 %v7296_v15  ;;  %9634 = vmatpush3.msra.mxu1 %v7259_v16 }
 0x30d   : > { %9664 = vmatprep.subr.mxu0 %v7295_v17  ;;  %9635 = vmatprep.subr.mxu1 %v7258_v18 }
 0x30e   : > { %9665 = vmatpush3.msra.mxu0 %v7295_v17  ;;  %9636 = vmatpush3.msra.mxu1 %v7258_v18 }
 0x30f   : > { %9666 = vmatprep.subr.mxu0 %v7294_v19  ;;  %9637 = vmatprep.subr.mxu1 %v7257_v20 }
 0x310   : > { %9667 = vmatpush3.msra.mxu0 %v7294_v19  ;;  %9638 = vmatpush3.msra.mxu1 %v7257_v20 }
 0x311   : > { %9668 = vmatprep.subr.mxu0 %v7293_v21  ;;  %9639 = vmatprep.subr.mxu1 %v7256_v22 }
 0x312   : > { %9669 = vmatpush3.msra.mxu0 %v7293_v21  ;;  %9640 = vmatpush3.msra.mxu1 %v7256_v22 }
 0x313   : > { %9670 = vmatprep.subr.mxu0 %v7292_v23  ;;  %9641 = vmatprep.subr.mxu1 %v7255_v24 }
 0x314   : > { %9671 = vmatpush3.msra.mxu0 %v7292_v23  ;;  %9642 = vmatpush3.msra.mxu1 %v7255_v24 }
 0x315   : > { %9672 = vmatprep.subr.mxu0 %v7291_v25  ;;  %9643 = vmatprep.subr.mxu1 %v7254_v26 }
 0x316   : > { %9673 = vmatpush3.msra.mxu0 %v7291_v25  ;;  %9644 = vmatpush3.msra.mxu1 %v7254_v26 }
 0x317   : > { %9674 = vmatprep.subr.mxu0 %v7290_v27  ;;  %9645 = vmatprep.subr.mxu1 %v7253_v28 }
 0x318   : > { %9675 = vmatpush3.msra.mxu0 %v7290_v27  ;;  %9646 = vmatpush3.msra.mxu1 %v7253_v28 }
 0x319   : > { %9676 = vmatprep.subr.mxu0 %v7289_v29  ;;  %9647 = vmatprep.subr.mxu1 %v7252_v30 }
 0x31a   : > { %9677 = vmatpush3.msra.mxu0 %v7289_v29  ;;  %9648 = vmatpush3.msra.mxu1 %v7252_v30 }
 0x31b   : > { %9678 = vmatprep.subr.mxu0 %v7288_v31  ;;  %9649 = vmatprep.subr.mxu1 %v7251_v32 }
 0x31c   : > { %9679 = vmatpush3.msra.mxu0 %v7288_v31  ;;  %9650 = vmatpush3.msra.mxu1 %v7251_v32 }
 0x31d   : > { %9680 = vmatprep.subr.mxu0 %v7287_v33  ;;  %9651 = vmatprep.subr.mxu1 %v7250_v34 }
 0x31e   : > { %9681 = vmatpush3.msra.mxu0 %v7287_v33  ;;  %9652 = vmatpush3.msra.mxu1 %v7250_v34 }
 0x31f   : > { %9682 = vmatprep.subr.mxu0 %v7286_v35  ;;  %9654 = vmatmul.mubr.f32.vlgmr.msra.gmra.mxu1 %v12293_v38 }
 0x320   : > { %9683 = vmatpush3.msra.mxu0 %v7286_v35  ;;  %9691 = vmatprep.subr.mxu1 %v7283_v36 }
 0x321   : > { %9684 = vmatprep.subr.mxu0 %v7285_v37  ;;  %9692 = vmatpush3.msra.mxu1 %v7283_v36  ;;  %v7331_v36 = vld [vmem:[%s15420_s1 + $0x4f8] sm:$0xff] }
 0x322   : > { %9685 = vmatpush3.msra.mxu0 %v7285_v37  ;;  %9723 = vmatprep.mubr.f32.mxu1 %v12202_v8  ;;  %v7347_v37 = vld [vmem:[%s15420_s1 + $0x578] sm:$0xff] }
 0x323   : > { %9686 = vmatprep.subr.mxu0 %v7284_v39  ;;  %9693 = vmatprep.subr.mxu1 %v7282_v40 }
 0x324   : > { %9687 = vmatpush3.msra.mxu0 %v7284_v39  ;;  %9694 = vmatpush3.msra.mxu1 %v7282_v40  ;;  %v7330_v39 = vld [vmem:[%s15420_s1 + $0x4f0] sm:$0xff] }
 0x325   : > { %9689 = vmatmul.mubr.f32.vlgmr.msra.gmra.mxu0 %v12187_v4  ;;  %9726 = vmatprep.subr.mxu0 %v7315_v41  ;;  %v7270_v4 = vld [vmem:[%s15420_s1 + $0x310] sm:$0xff] }
 0x326   : > { %9727 = vmatpush3.msra.mxu0 %v7315_v41  ;;  %9758 = vmatprep.mubr.f32.mxu0 %v12206_v10  ;;  %v7346_v40 = vld [vmem:[%s15420_s1 + $0x570] sm:$0xff]  ;;  %v7329_v41 = vld [vmem:[%s15420_s1 + $0x4e8] sm:$0xff] }
 0x327   : > { %9728 = vmatprep.subr.mxu0 %v7314_v42  ;;  %9695 = vmatprep.subr.mxu1 %v7281_v43 }
 0x328   : > { %9729 = vmatpush3.msra.mxu0 %v7314_v42  ;;  %9696 = vmatpush3.msra.mxu1 %v7281_v43  ;;  %v7345_v42 = vld [vmem:[%s15420_s1 + $0x568] sm:$0xff]  ;;  %v7328_v43 = vld [vmem:[%s15420_s1 + $0x4e0] sm:$0xff] }
 0x329   : > { %9730 = vmatprep.subr.mxu0 %v7313_v44  ;;  %9697 = vmatprep.subr.mxu1 %v7280_v45 }
 0x32a   : > { %9731 = vmatpush3.msra.mxu0 %v7313_v44  ;;  %9698 = vmatpush3.msra.mxu1 %v7280_v45  ;;  %v7344_v44 = vld [vmem:[%s15420_s1 + $0x560] sm:$0xff]  ;;  %v7327_v45 = vld [vmem:[%s15420_s1 + $0x4d8] sm:$0xff] }
 0x32b   : > { %9732 = vmatprep.subr.mxu0 %v7312_v46  ;;  %9699 = vmatprep.subr.mxu1 %v7279_v47 }
 0x32c   : > { %9733 = vmatpush3.msra.mxu0 %v7312_v46  ;;  %9700 = vmatpush3.msra.mxu1 %v7279_v47  ;;  %v7343_v46 = vld [vmem:[%s15420_s1 + $0x558] sm:$0xff]  ;;  %v7326_v47 = vld [vmem:[%s15420_s1 + $0x4d0] sm:$0xff] }
 0x32d   : > { %9734 = vmatprep.subr.mxu0 %v7311_v48  ;;  %9701 = vmatprep.subr.mxu1 %v7278_v49 }
 0x32e   : > { %9735 = vmatpush3.msra.mxu0 %v7311_v48  ;;  %9702 = vmatpush3.msra.mxu1 %v7278_v49  ;;  %v7342_v48 = vld [vmem:[%s15420_s1 + $0x550] sm:$0xff]  ;;  %v7325_v49 = vld [vmem:[%s15420_s1 + $0x4c8] sm:$0xff] }
 0x32f   : > { %9736 = vmatprep.subr.mxu0 %v7310_v50  ;;  %9703 = vmatprep.subr.mxu1 %v7277_v51 }
 0x330   : > { %9737 = vmatpush3.msra.mxu0 %v7310_v50  ;;  %9704 = vmatpush3.msra.mxu1 %v7277_v51  ;;  %v7341_v50 = vld [vmem:[%s15420_s1 + $0x548] sm:$0xff]  ;;  %v7340_v51 = vld [vmem:[%s15420_s1 + $0x540] sm:$0xff] }
 0x331   : > { %9738 = vmatprep.subr.mxu0 %v7309_v52  ;;  %9705 = vmatprep.subr.mxu1 %v7276_v53 }
 0x332   : > { %9739 = vmatpush3.msra.mxu0 %v7309_v52  ;;  %9706 = vmatpush3.msra.mxu1 %v7276_v53  ;;  %v7339_v53 = vld [vmem:[%s15420_s1 + $0x538] sm:$0xff] }
 0x333   : > { %9740 = vmatprep.subr.mxu0 %v7308_v54  ;;  %9707 = vmatprep.subr.mxu1 %v7275_v55 }
 0x334   : > { %9741 = vmatpush3.msra.mxu0 %v7308_v54  ;;  %9708 = vmatpush3.msra.mxu1 %v7275_v55  ;;  %v7338_v55 = vld [vmem:[%s15420_s1 + $0x530] sm:$0xff] }
 0x335   : > { %9742 = vmatprep.subr.mxu0 %v7307_v56  ;;  %9709 = vmatprep.subr.mxu1 %v7274_v57 }
 0x336   : > { %9743 = vmatpush3.msra.mxu0 %v7307_v56  ;;  %9710 = vmatpush3.msra.mxu1 %v7274_v57  ;;  %v7337_v57 = vld [vmem:[%s15420_s1 + $0x528] sm:$0xff] }
 0x337   : > { %9744 = vmatprep.subr.mxu0 %v7306_v58  ;;  %9711 = vmatprep.subr.mxu1 %v7273_v60 }
 0x338   : > { %9745 = vmatpush3.msra.mxu0 %v7306_v58  ;;  %9712 = vmatpush3.msra.mxu1 %v7273_v60  ;;  %v7324_v60 = vld [vmem:[%s15420_s1 + $0x4c0] sm:$0xff] }
 0x339   : > { %9746 = vmatprep.subr.mxu0 %v7305_v61  ;;  %9713 = vmatprep.subr.mxu1 %v7272_v63 }
 0x33a   : > { %9747 = vmatpush3.msra.mxu0 %v7305_v61  ;;  %9714 = vmatpush3.msra.mxu1 %v7272_v63  ;;  %v7336_v61 = vld [vmem:[%s15420_s1 + $0x520] sm:$0xff] }
 0x33b   : > { %9748 = vmatprep.subr.mxu0 %v7304_v0  ;;  %9715 = vmatprep.subr.mxu1 %v7271_v1 }
 0x33c   : > { %9749 = vmatpush3.msra.mxu0 %v7304_v0  ;;  %9716 = vmatpush3.msra.mxu1 %v7271_v1  ;;  %v7323_v0 = vld [vmem:[%s15420_s1 + $0x4b8] sm:$0xff] }
 0x33d   : > { %9750 = vmatprep.subr.mxu0 %v7303_v2  ;;  %9717 = vmatprep.subr.mxu1 %v7270_v4  ;;  %v7335_v1 = vld [vmem:[%s15420_s1 + $0x518] sm:$0xff] }
 0x33e   : > { %9751 = vmatpush3.msra.mxu0 %v7303_v2  ;;  %9718 = vmatpush3.msra.mxu1 %v7270_v4  ;;  %v7322_v4 = vld [vmem:[%s15420_s1 + $0x4b0] sm:$0xff] }
 0x33f   : > { %9752 = vmatprep.subr.mxu0 %v7302_v5  ;;  %9719 = vmatprep.subr.mxu1 %v7269_v6 }
 0x340   : > { %9753 = vmatpush3.msra.mxu0 %v7302_v5  ;;  %9720 = vmatpush3.msra.mxu1 %v7269_v6  ;;  %v7334_v5 = vld [vmem:[%s15420_s1 + $0x510] sm:$0xff] }
 0x341   : > { %9754 = vmatprep.subr.mxu0 %v7301_v7  ;;  %9721 = vmatprep.subr.mxu1 %v7268_v11 }
 0x342   : > { %9755 = vmatpush3.msra.mxu0 %v7301_v7  ;;  %9722 = vmatpush3.msra.mxu1 %v7268_v11  ;;  %v7321_v7 = vld [vmem:[%s15420_s1 + $0x4a8] sm:$0xff] }
 0x343   : > { %9756 = vmatprep.subr.mxu0 %v7300_v12  ;;  %9724 = vmatmul.mubr.f32.vlgmr.msra.gmra.mxu1 %v12204_v9  ;;  %v7333_v11 = vld [vmem:[%s15420_s1 + $0x508] sm:$0xff] }
 0x344   : > { %9757 = vmatpush3.msra.mxu0 %v7300_v12  ;;  %9761 = vmatprep.subr.mxu1 %v7331_v36  ;;  %v7320_v12 = vld [vmem:[%s15420_s1 + $0x4a0] sm:$0xff] }
 0x345   : > { %9759 = vmatmul.mubr.f32.vlgmr.msra.gmra.mxu0 %v12293_v38  ;;  %9796 = vmatprep.subr.mxu0 %v7347_v37 }
 0x346   : > { %9762 = vmatpush3.msra.mxu1 %v7331_v36  ;;  %9797 = vmatpush3.msra.mxu0 %v7347_v37  ;;  %v7361_v36 = vld [vmem:[%s15420_s1 + $0x5e8] sm:$0xff] }
 0x347   : > { %9763 = vmatprep.subr.mxu1 %v7330_v39  ;;  %9798 = vmatprep.subr.mxu0 %v7346_v40  ;;  %v7391_v37 = vld [vmem:[%s15420_s1 + $0x6c8] sm:$0xff] }
 0x348   : > { %9764 = vmatpush3.msra.mxu1 %v7330_v39  ;;  %9799 = vmatpush3.msra.mxu0 %v7346_v40  ;;  %v7360_v39 = vld [vmem:[%s15420_s1 + $0x5e0] sm:$0xff] }
 0x349   : > { %9765 = vmatprep.subr.mxu1 %v7329_v41  ;;  %9800 = vmatprep.subr.mxu0 %v7345_v42  ;;  %v7390_v40 = vld [vmem:[%s15420_s1 + $0x6c0] sm:$0xff] }
 0x34a   : > { %9766 = vmatpush3.msra.mxu1 %v7329_v41  ;;  %9801 = vmatpush3.msra.mxu0 %v7345_v42  ;;  %v7359_v41 = vld [vmem:[%s15420_s1 + $0x5d8] sm:$0xff] }
 0x34b   : > { %9767 = vmatprep.subr.mxu1 %v7328_v43  ;;  %9802 = vmatprep.subr.mxu0 %v7344_v44  ;;  %v7389_v42 = vld [vmem:[%s15420_s1 + $0x6b8] sm:$0xff] }
 0x34c   : > { %9768 = vmatpush3.msra.mxu1 %v7328_v43  ;;  %9803 = vmatpush3.msra.mxu0 %v7344_v44  ;;  %v7358_v43 = vld [vmem:[%s15420_s1 + $0x5d0] sm:$0xff] }
 0x34d   : > { %9769 = vmatprep.subr.mxu1 %v7327_v45  ;;  %9804 = vmatprep.subr.mxu0 %v7343_v46  ;;  %v7388_v44 = vld [vmem:[%s15420_s1 + $0x6b0] sm:$0xff] }
 0x34e   : > { %9770 = vmatpush3.msra.mxu1 %v7327_v45  ;;  %9805 = vmatpush3.msra.mxu0 %v7343_v46  ;;  %v7357_v45 = vld [vmem:[%s15420_s1 + $0x5c8] sm:$0xff] }
 0x34f   : > { %9771 = vmatprep.subr.mxu1 %v7326_v47  ;;  %9806 = vmatprep.subr.mxu0 %v7342_v48  ;;  %v7387_v46 = vld [vmem:[%s15420_s1 + $0x6a8] sm:$0xff] }
 0x350   : > { %9772 = vmatpush3.msra.mxu1 %v7326_v47  ;;  %9807 = vmatpush3.msra.mxu0 %v7342_v48  ;;  %v7356_v47 = vld [vmem:[%s15420_s1 + $0x5c0] sm:$0xff] }
 0x351   : > { %9773 = vmatprep.subr.mxu1 %v7325_v49  ;;  %9808 = vmatprep.subr.mxu0 %v7341_v50  ;;  %v7386_v48 = vld [vmem:[%s15420_s1 + $0x6a0] sm:$0xff] }
 0x352   : > { %9774 = vmatpush3.msra.mxu1 %v7325_v49  ;;  %9809 = vmatpush3.msra.mxu0 %v7341_v50  ;;  %v7355_v49 = vld [vmem:[%s15420_s1 + $0x5b8] sm:$0xff] }
 0x353   : > { %9810 = vmatprep.subr.mxu0 %v7340_v51  ;;  %9775 = vmatprep.subr.mxu1 %v7324_v60  ;;  %v7385_v50 = vld [vmem:[%s15420_s1 + $0x698] sm:$0xff] }
 0x354   : > { %9811 = vmatpush3.msra.mxu0 %v7340_v51  ;;  %9776 = vmatpush3.msra.mxu1 %v7324_v60  ;;  %v7354_v51 = vld [vmem:[%s15420_s1 + $0x5b0] sm:$0xff]  ;;  %v7413_v60 = vld [vmem:[%s15420_s1 + $0x778] sm:$0xff] }
 0x355   : > { %9812 = vmatprep.subr.mxu0 %v7339_v53  ;;  %9777 = vmatprep.subr.mxu1 %v7323_v0 }
 0x356   : > { %9813 = vmatpush3.msra.mxu0 %v7339_v53  ;;  %9778 = vmatpush3.msra.mxu1 %v7323_v0  ;;  %v7353_v53 = vld [vmem:[%s15420_s1 + $0x5a8] sm:$0xff]  ;;  %v7412_v0 = vld [vmem:[%s15420_s1 + $0x770] sm:$0xff] }
 0x357   : > { %9814 = vmatprep.subr.mxu0 %v7338_v55  ;;  %9779 = vmatprep.subr.mxu1 %v7322_v4 }
 0x358   : > { %9815 = vmatpush3.msra.mxu0 %v7338_v55  ;;  %9780 = vmatpush3.msra.mxu1 %v7322_v4  ;;  %v7352_v55 = vld [vmem:[%s15420_s1 + $0x5a0] sm:$0xff]  ;;  %v7381_v4 = vld [vmem:[%s15420_s1 + $0x678] sm:$0xff] }
 0x359   : > { %9816 = vmatprep.subr.mxu0 %v7337_v57  ;;  %9781 = vmatprep.subr.mxu1 %v7321_v7 }
 0x35a   : > { %9817 = vmatpush3.msra.mxu0 %v7337_v57  ;;  %9782 = vmatpush3.msra.mxu1 %v7321_v7  ;;  %v7351_v57 = vld [vmem:[%s15420_s1 + $0x598] sm:$0xff]  ;;  %v7379_v7 = vld [vmem:[%s15420_s1 + $0x668] sm:$0xff] }
 0x35b   : > { %9818 = vmatprep.subr.mxu0 %v7336_v61  ;;  %9783 = vmatprep.subr.mxu1 %v7320_v12 }
 0x35c   : > { %9819 = vmatpush3.msra.mxu0 %v7336_v61  ;;  %9784 = vmatpush3.msra.mxu1 %v7320_v12  ;;  %v1559_v61 = vld [vmem:[#allocation2 + $0x21] sm:$0xff] }
 0x35d   : > { %9820 = vmatprep.subr.mxu0 %v7335_v1  ;;  %v7378_v12 = vld [vmem:[%s15420_s1 + $0x660] sm:$0xff] }
 0x35e   : > { %9821 = vmatpush3.msra.mxu0 %v7335_v1  ;;  %v7348_v1 = vld [vmem:[%s15420_s1 + $0x580] sm:$0xff] }
 0x35f   : > { %9822 = vmatprep.subr.mxu0 %v7334_v5 }
 0x360   : > { %9823 = vmatpush3.msra.mxu0 %v7334_v5 }
 0x361   : > { %9824 = vmatprep.subr.mxu0 %v7333_v11 }
 0x362   : > { %9825 = vmatpush3.msra.mxu0 %v7333_v11  ;;  %v7409_v11 = vld [vmem:[%s15420_s1 + $0x758] sm:$0xff] }
 0x3bd   : > { %v9585_v13 = vpop.f32.mrf.mxu1 }
 0x3bf   : > { %v665_v15 = vpop.f32.mrf.mxu1 }
 0x3c5   : > { %v9620_v14 = vpop.f32.mrf.mxu0 }
 0x3c6   : > { %v746_v18 = vadd.f32 %v9620_v14, %v9585_v13  ;;  %v7319_v13 = vld [vmem:[%s15420_s1 + $0x498] sm:$0xff]  ;;  %v7332_v14 = vld [vmem:[%s15420_s1 + $0x500] sm:$0xff] }
 0x3c7   : > { %v740_v16 = vpop.f32.mrf.mxu0  ;;  %9826 = vmatprep.subr.mxu0 %v7332_v14  ;;  %9785 = vmatprep.subr.mxu1 %v7319_v13 }
 0x3c8   : > { %v741_v19 = vadd.f32 %v740_v16, %v665_v15  ;;  %v7318_v15 = vld [vmem:[%s15420_s1 + $0x490] sm:$0xff]  ;;  %9827 = vmatpush3.msra.mxu0 %v7332_v14  ;;  %v7397_v16 = vld [vmem:[%s15420_s1 + $0x6f8] sm:$0xff]  ;;  %9786 = vmatpush3.msra.mxu1 %v7319_v13  ;;  %v7407_v14 = vld [vmem:[%s15420_s1 + $0x748] sm:$0xff] }
 0x3c9   : > { %9866 = vmatprep.subr.mxu0 %v7397_v16  ;;  %9787 = vmatprep.subr.mxu1 %v7318_v15  ;;  %v7377_v13 = vld [vmem:[%s15420_s1 + $0x658] sm:$0xff] }
 0x3ca   : > { %9788 = vmatpush3.msra.mxu1 %v7318_v15  ;;  %v7376_v15 = vld [vmem:[%s15420_s1 + $0x650] sm:$0xff] }
 0x3df   : > { %v9655_v17 = vpop.f32.mrf.mxu1 }
 0x3e0   : > { %v844_v21 = vadd.f32 %v9655_v17, %v746_v18  ;;  %v7317_v17 = vld [vmem:[%s15420_s1 + $0x488] sm:$0xff]  ;;  %v7316_v18 = vld [vmem:[%s15420_s1 + $0x480] sm:$0xff] }
 0x3e1   : > { %v834_v20 = vpop.f32.mrf.mxu1  ;;  %9789 = vmatprep.subr.mxu1 %v7317_v17 }
 0x3e2   : > { %v843_v22 = vadd.f32 %v834_v20, %v741_v19  ;;  %9790 = vmatpush3.msra.mxu1 %v7317_v17  ;;  %v7363_v19 = vld [vmem:[%s15420_s1 + $0x5f8] sm:$0xff]  ;;  %v7375_v17 = vld [vmem:[%s15420_s1 + $0x648] sm:$0xff] }
 0x3e3   : > { %9791 = vmatprep.subr.mxu1 %v7316_v18 }
 0x3e4   : > { %v845_v23 = vadd.f32 %v844_v21, %v843_v22  ;;  %9792 = vmatpush3.msra.mxu1 %v7316_v18  ;;  %v7405_v18 = vld [vmem:[%s15420_s1 + $0x738] sm:$0xff] }
 0x3e5   : > { %9831 = vmatprep.subr.mxu1 %v7363_v19 }
 0x3e6   : > { %846 = vadd.xlane.f32.xlu1 %v845_v23 }
 0x46f   : > { %v847_v24 = vpop.xlane.xlu1 %846 }
 0x470   : > { %v848_v25 = vrot.slane %v847_v24, 4 }
 0x472   : > { %v849_v26 = vadd.f32 %v848_v25, %v847_v24 }
 0x474   : > { %v850_v27 = vrot.slane %v849_v26, 2 }
 0x476   : > { %v851_v9 = vadd.f32 %v850_v27, %v849_v26 }
 0x478   : > { %v852_v28 = vrot.slane %v851_v9, 1 }
 0x47a   : > { %v853_v29 = vadd.f32 %v852_v28, %v851_v9 }
 0x47c   : > { %11762 = vpush %v853_v29 }
 0x4ad   : > { %s11763_s20 = spop %11762 }
 0x4ae   : > { %s857_s21 = smul.f32 0.00048828125, %s11763_s20 }
 0x4b0   : > { %v858_v30 = vstv %s857_s21 }
 0x4b1   : > { %v12397_v31 = vsub.f32 %v843_v22, %v858_v30  ;;  %v12399_v32 = vsub.f32 %v844_v21, %v858_v30  ;;  %v7396_v30 = vld [vmem:[%s15420_s1 + $0x6f0] sm:$0xff] }
 0x4b3   : > { %v861_v33 = vmul.f32 %v12397_v31, %v12397_v31  ;;  %v862_v34 = vmul.f32 %v12399_v32, %v12399_v32 }
 0x4b5   : > { %v863_v35 = vadd.f32 %v862_v34, %v861_v33 }
 0x4b7   : > { %864 = vadd.xlane.f32.xlu1 %v863_v35  ;;  %v7392_v35 = vld [vmem:[%s15420_s1 + $0x6d0] sm:$0xff] }
 0x540   : > { %v865_v52 = vpop.xlane.xlu1 %864 }
 0x541   : > { %v866_v54 = vrot.slane %v865_v52, 4 }
 0x543   : > { %v867_v56 = vadd.f32 %v866_v54, %v865_v52  ;;  %v7384_v52 = vld [vmem:[%s15420_s1 + $0x690] sm:$0xff]  ;;  %v7383_v54 = vld [vmem:[%s15420_s1 + $0x688] sm:$0xff] }
 0x545   : > { %v868_v58 = vrot.slane %v867_v56, 2 }
 0x547   : > { %v869_v63 = vadd.f32 %v868_v58, %v867_v56  ;;  %v7382_v56 = vld [vmem:[%s15420_s1 + $0x680] sm:$0xff]  ;;  %v7350_v58 = vld [vmem:[%s15420_s1 + $0x590] sm:$0xff] }
 0x549   : > { %v870_v2 = vrot.slane %v869_v63, 1 }
 0x54b   : > { %v871_v6 = vadd.f32 %v870_v2, %v869_v63  ;;  %v7349_v63 = vld [vmem:[%s15420_s1 + $0x588] sm:$0xff] }
 0x54c   : > { %v7411_v2 = vld [vmem:[%s15420_s1 + $0x768] sm:$0xff] }
 0x54d   : > { %11764 = vpush %v871_v6  ;;  %v7380_v6 = vld [vmem:[%s15420_s1 + $0x670] sm:$0xff] }
 0x57e   : > { %s11765_s21 = spop %11764 }
 0x57f   : > { %s875_s22 = smul.f32 0.00048828125, %s11765_s21 }
 0x581   : > { %s876_s23 = sadd.f32 1e-05, %s875_s22 }
 0x583   : > { %v877_v20 = vstv %s876_s23 }
 0x584   : > { %11827 = vrsqrt.f32 %v877_v20  ;;  %v7404_v20 = vld [vmem:[%s15420_s1 + $0x730] sm:$0xff] }
 0x591   : > { %v11828_v21 = vpop.eup %11827 }
 0x592   : > { %11766 = vpush %v11828_v21  ;;  %v7373_v21 = vld [vmem:[%s15420_s1 + $0x638] sm:$0xff] }
 0x5c3   : > { %s11767_s24 = spop %11766 }
 0x5c4   : > { %v880_v22 = vstv %s11767_s24 }
 0x5c5   : > { %v881_v23 = vmul.f32 %v880_v22, %v12397_v31  ;;  %v882_v24 = vmul.f32 %v880_v22, %v12399_v32  ;;  %v7393_v31 = vld [vmem:[%s15420_s1 + $0x6d8] sm:$0xff]  ;;  %v7403_v22 = vld [vmem:[%s15420_s1 + $0x728] sm:$0xff] }
 0x5c7   : > { %v890_v25 = vmul.f32 %v12172_v59, %v881_v23  ;;  %v891_v26 = vmul.f32 %v12172_v59, %v882_v24  ;;  %v7395_v59 = vld [vmem:[%s15420_s1 + $0x6e8] sm:$0xff]  ;;  %v7372_v23 = vld [vmem:[%s15420_s1 + $0x630] sm:$0xff]  ;;  %v7402_v24 = vld [vmem:[%s15420_s1 + $0x720] sm:$0xff] }
 0x5c9   : > { %v899_v27 = vadd.f32 %v12179_v62, %v890_v25  ;;  %v900_v9 = vadd.f32 %v12179_v62, %v891_v26  ;;  %v7394_v62 = vld [vmem:[%s15420_s1 + $0x6e0] sm:$0xff]  ;;  %v7371_v25 = vld [vmem:[%s15420_s1 + $0x628] sm:$0xff]  ;;  %v7401_v26 = vld [vmem:[%s15420_s1 + $0x718] sm:$0xff] }
 0x5cb   : > { %v12513_v28 = vmax.f32 %v899_v27, 0.0  ;;  %v12515_v29 = vmax.f32 %v900_v9, 0.0  ;;  %v7370_v27 = vld [vmem:[%s15420_s1 + $0x620] sm:$0xff]  ;;  %v7400_v9 = vld [vmem:[%s15420_s1 + $0x710] sm:$0xff] }
 0x5cd   : > { %904 = vst [vmem:[#allocation2 + $0x31] sm:$0xff] %v12513_v28  ;;  %905 = vst [vmem:[#allocation2 + $0x39] sm:$0xff] %v12515_v29  ;;  %9828 = vmatprep.mubr.f32.mxu0 %v12513_v28 }
 0x5ce   : > { %9829 = vmatmul.mubr.f32.vlgmr.msra.gmra.mxu0 %v12515_v29 }
 0x5cf   : > { %9867 = vmatpush3.msra.mxu0 %v7397_v16  ;;  %9898 = vmatprep.mubr.f32.mxu0 %v12185_v3  ;;  %v7362_v3 = vld [vmem:[%s15420_s1 + $0x5f0] sm:$0xff]  ;;  %v7406_v16 = vld [vmem:[%s15420_s1 + $0x740] sm:$0xff] }
 0x5d0   : > { %9868 = vmatprep.subr.mxu0 %v7396_v30 }
 0x5d1   : > { %9869 = vmatpush3.msra.mxu0 %v7396_v30  ;;  %v7369_v30 = vld [vmem:[%s15420_s1 + $0x618] sm:$0xff] }
 0x5d2   : > { %9870 = vmatprep.subr.mxu0 %v7395_v59 }
 0x5d3   : > { %9871 = vmatpush3.msra.mxu0 %v7395_v59  ;;  %v7399_v59 = vld [vmem:[%s15420_s1 + $0x708] sm:$0xff] }
 0x5d4   : > { %v12534_v32 = vld [vmem:[#allocation2 + $0x30] sm:$0xff]  ;;  %v12536_v33 = vld [vmem:[#allocation2 + $0x38] sm:$0xff]  ;;  %9872 = vmatprep.subr.mxu0 %v7394_v62 }
 0x5d5   : > { %9793 = vmatprep.mubr.f32.mxu1 %v12534_v32  ;;  %9873 = vmatpush3.msra.mxu0 %v7394_v62  ;;  %v12543_v34 = vld [vmem:[#allocation2 + $0x32] sm:$0xff]  ;;  %v12634_v5 = vld [vmem:[#allocation2 + $0x3a] sm:$0xff] }
 0x5d6   : > { %9794 = vmatmul.mubr.f32.vlgmr.msra.gmra.mxu1 %v12536_v33  ;;  %9874 = vmatprep.subr.mxu0 %v7393_v31  ;;  %v7368_v62 = vld [vmem:[%s15420_s1 + $0x610] sm:$0xff] }
 0x5d7   : > { %9832 = vmatpush3.msra.mxu1 %v7363_v19  ;;  %9863 = vmatprep.mubr.f32.mxu1 %v12543_v34  ;;  %v7374_v19 = vld [vmem:[%s15420_s1 + $0x640] sm:$0xff] }
 0x5d8   : > { %9833 = vmatprep.subr.mxu1 %v7362_v3  ;;  %9875 = vmatpush3.msra.mxu0 %v7393_v31  ;;  %v7398_v31 = vld [vmem:[%s15420_s1 + $0x700] sm:$0xff] }
 0x5d9   : > { %9834 = vmatpush3.msra.mxu1 %v7362_v3  ;;  %9876 = vmatprep.subr.mxu0 %v7392_v35  ;;  %v7367_v3 = vld [vmem:[%s15420_s1 + $0x608] sm:$0xff] }
 0x5da   : > { %9835 = vmatprep.subr.mxu1 %v7361_v36  ;;  %9877 = vmatpush3.msra.mxu0 %v7392_v35  ;;  %v7366_v35 = vld [vmem:[%s15420_s1 + $0x600] sm:$0xff] }
 0x5db   : > { %9836 = vmatpush3.msra.mxu1 %v7361_v36  ;;  %9878 = vmatprep.subr.mxu0 %v7391_v37  ;;  %v7445_v36 = vld [vmem:[%s15420_s1 + $0x878] sm:$0xff] }
 0x5dc   : > { %9837 = vmatprep.subr.mxu1 %v7360_v39  ;;  %9879 = vmatpush3.msra.mxu0 %v7391_v37  ;;  %v7429_v37 = vld [vmem:[%s15420_s1 + $0x7f8] sm:$0xff] }
 0x5dd   : > { %9838 = vmatpush3.msra.mxu1 %v7360_v39  ;;  %9880 = vmatprep.subr.mxu0 %v7390_v40  ;;  %v1540_v39 = vld [vmem:[#allocation2 + $0x20] sm:$0xff] }
 0x5de   : > { %9839 = vmatprep.subr.mxu1 %v7359_v41  ;;  %9881 = vmatpush3.msra.mxu0 %v7390_v40  ;;  %v7428_v40 = vld [vmem:[%s15420_s1 + $0x7f0] sm:$0xff] }
 0x5df   : > { %9840 = vmatpush3.msra.mxu1 %v7359_v41  ;;  %9882 = vmatprep.subr.mxu0 %v7389_v42  ;;  %v7444_v41 = vld [vmem:[%s15420_s1 + $0x870] sm:$0xff] }
 0x5e0   : > { %9841 = vmatprep.subr.mxu1 %v7358_v43  ;;  %9883 = vmatpush3.msra.mxu0 %v7389_v42  ;;  %v7443_v42 = vld [vmem:[%s15420_s1 + $0x868] sm:$0xff] }
 0x5e1   : > { %9842 = vmatpush3.msra.mxu1 %v7358_v43  ;;  %9884 = vmatprep.subr.mxu0 %v7388_v44  ;;  %v7426_v43 = vld [vmem:[%s15420_s1 + $0x7e0] sm:$0xff] }
 0x5e2   : > { %9843 = vmatprep.subr.mxu1 %v7357_v45  ;;  %9885 = vmatpush3.msra.mxu0 %v7388_v44  ;;  %v7441_v44 = vld [vmem:[%s15420_s1 + $0x858] sm:$0xff] }
 0x5e3   : > { %9844 = vmatpush3.msra.mxu1 %v7357_v45  ;;  %9886 = vmatprep.subr.mxu0 %v7387_v46  ;;  %v7424_v45 = vld [vmem:[%s15420_s1 + $0x7d0] sm:$0xff] }
 0x5e4   : > { %9845 = vmatprep.subr.mxu1 %v7356_v47  ;;  %9887 = vmatpush3.msra.mxu0 %v7387_v46  ;;  %v7440_v46 = vld [vmem:[%s15420_s1 + $0x850] sm:$0xff] }
 0x5e5   : > { %9846 = vmatpush3.msra.mxu1 %v7356_v47  ;;  %9888 = vmatprep.subr.mxu0 %v7386_v48  ;;  %v7423_v47 = vld [vmem:[%s15420_s1 + $0x7c8] sm:$0xff] }
 0x5e6   : > { %9847 = vmatprep.subr.mxu1 %v7355_v49  ;;  %9889 = vmatpush3.msra.mxu0 %v7386_v48  ;;  %v7439_v48 = vld [vmem:[%s15420_s1 + $0x848] sm:$0xff] }
 0x5e7   : > { %9848 = vmatpush3.msra.mxu1 %v7355_v49  ;;  %9890 = vmatprep.subr.mxu0 %v7385_v50  ;;  %v7422_v49 = vld [vmem:[%s15420_s1 + $0x7c0] sm:$0xff] }
 0x5e8   : > { %9849 = vmatprep.subr.mxu1 %v7354_v51  ;;  %9891 = vmatpush3.msra.mxu0 %v7385_v50  ;;  %v7438_v50 = vld [vmem:[%s15420_s1 + $0x840] sm:$0xff] }
 0x5e9   : > { %9850 = vmatpush3.msra.mxu1 %v7354_v51  ;;  %9892 = vmatprep.subr.mxu0 %v7384_v52  ;;  %v7421_v51 = vld [vmem:[%s15420_s1 + $0x7b8] sm:$0xff] }
 0x5ea   : > { %9851 = vmatprep.subr.mxu1 %v7353_v53  ;;  %9893 = vmatpush3.msra.mxu0 %v7384_v52  ;;  %v7437_v52 = vld [vmem:[%s15420_s1 + $0x838] sm:$0xff] }
 0x5eb   : > { %9852 = vmatpush3.msra.mxu1 %v7353_v53  ;;  %9894 = vmatprep.subr.mxu0 %v7383_v54  ;;  %v7420_v53 = vld [vmem:[%s15420_s1 + $0x7b0] sm:$0xff] }
 0x5ec   : > { %9853 = vmatprep.subr.mxu1 %v7352_v55  ;;  %9895 = vmatpush3.msra.mxu0 %v7383_v54  ;;  %v7436_v54 = vld [vmem:[%s15420_s1 + $0x830] sm:$0xff] }
 0x5ed   : > { %9854 = vmatpush3.msra.mxu1 %v7352_v55  ;;  %9896 = vmatprep.subr.mxu0 %v7382_v56  ;;  %v7419_v55 = vld [vmem:[%s15420_s1 + $0x7a8] sm:$0xff] }
 0x5ee   : > { %9855 = vmatprep.subr.mxu1 %v7351_v57  ;;  %9897 = vmatpush3.msra.mxu0 %v7382_v56  ;;  %v7435_v56 = vld [vmem:[%s15420_s1 + $0x828] sm:$0xff] }
 0x5ef   : > { %9856 = vmatpush3.msra.mxu1 %v7351_v57  ;;  %9899 = vmatmul.mubr.f32.vlgmr.msra.gmra.mxu0 %v1559_v61  ;;  %v7418_v57 = vld [vmem:[%s15420_s1 + $0x7a0] sm:$0xff]  ;;  %v7433_v61 = vld [vmem:[%s15420_s1 + $0x818] sm:$0xff] }
 0x5f0   : > { %9857 = vmatprep.subr.mxu1 %v7350_v58  ;;  %9936 = vmatprep.subr.mxu0 %v7413_v60 }
 0x5f1   : > { %9858 = vmatpush3.msra.mxu1 %v7350_v58  ;;  %9937 = vmatpush3.msra.mxu0 %v7413_v60  ;;  %v7434_v58 = vld [vmem:[%s15420_s1 + $0x820] sm:$0xff]  ;;  %v7417_v60 = vld [vmem:[%s15420_s1 + $0x798] sm:$0xff] }
 0x5f2   : > { %9859 = vmatprep.subr.mxu1 %v7349_v63  ;;  %9968 = vmatprep.mubr.f32.mxu0 %v12206_v10  ;;  %v7410_v10 = vld [vmem:[%s15420_s1 + $0x760] sm:$0xff] }
 0x5f3   : > { %9860 = vmatpush3.msra.mxu1 %v7349_v63  ;;  %9938 = vmatprep.subr.mxu0 %v7412_v0  ;;  %v7416_v63 = vld [vmem:[%s15420_s1 + $0x790] sm:$0xff] }
 0x5f4   : > { %9861 = vmatprep.subr.mxu1 %v7348_v1  ;;  %9939 = vmatpush3.msra.mxu0 %v7412_v0  ;;  %v7432_v0 = vld [vmem:[%s15420_s1 + $0x810] sm:$0xff] }
 0x5f5   : > { %9862 = vmatpush3.msra.mxu1 %v7348_v1  ;;  %9940 = vmatprep.subr.mxu0 %v7411_v2  ;;  %v7415_v1 = vld [vmem:[%s15420_s1 + $0x788] sm:$0xff] }
 0x5f6   : > { %9864 = vmatmul.mubr.f32.vlgmr.msra.gmra.mxu1 %v12634_v5  ;;  %9901 = vmatprep.subr.mxu1 %v7381_v4 }
 0x5f7   : > { %9902 = vmatpush3.msra.mxu1 %v7381_v4  ;;  %9933 = vmatprep.mubr.f32.mxu1 %v12202_v8  ;;  %v7408_v8 = vld [vmem:[%s15420_s1 + $0x750] sm:$0xff]  ;;  %v7414_v4 = vld [vmem:[%s15420_s1 + $0x780] sm:$0xff] }
 0x5f8   : > { %9903 = vmatprep.subr.mxu1 %v7380_v6  ;;  %9941 = vmatpush3.msra.mxu0 %v7411_v2  ;;  %v7431_v2 = vld [vmem:[%s15420_s1 + $0x808] sm:$0xff] }
 0x5f9   : > { %9904 = vmatpush3.msra.mxu1 %v7380_v6  ;;  %9942 = vmatprep.subr.mxu0 %v7410_v10  ;;  %v7430_v6 = vld [vmem:[%s15420_s1 + $0x800] sm:$0xff] }
 0x5fa   : > { %9905 = vmatprep.subr.mxu1 %v7379_v7  ;;  %9943 = vmatpush3.msra.mxu0 %v7410_v10  ;;  %v7461_v10 = vld [vmem:[%s15420_s1 + $0x8f8] sm:$0xff] }
 0x5fb   : > { %9906 = vmatpush3.msra.mxu1 %v7379_v7  ;;  %9944 = vmatprep.subr.mxu0 %v7409_v11  ;;  %v7460_v7 = vld [vmem:[%s15420_s1 + $0x8f0] sm:$0xff] }
 0x5fc   : > { %9907 = vmatprep.subr.mxu1 %v7378_v12  ;;  %9945 = vmatpush3.msra.mxu0 %v7409_v11  ;;  %v7459_v11 = vld [vmem:[%s15420_s1 + $0x8e8] sm:$0xff] }
 0x5fd   : > { %9908 = vmatpush3.msra.mxu1 %v7378_v12  ;;  %9946 = vmatprep.subr.mxu0 %v7408_v8  ;;  %v7455_v12 = vld [vmem:[%s15420_s1 + $0x8c8] sm:$0xff] }
 0x5fe   : > { %9909 = vmatprep.subr.mxu1 %v7377_v13  ;;  %9947 = vmatpush3.msra.mxu0 %v7408_v8  ;;  %v7454_v8 = vld [vmem:[%s15420_s1 + $0x8c0] sm:$0xff] }
 0x5ff   : > { %9910 = vmatpush3.msra.mxu1 %v7377_v13  ;;  %9948 = vmatprep.subr.mxu0 %v7407_v14  ;;  %v7453_v13 = vld [vmem:[%s15420_s1 + $0x8b8] sm:$0xff] }
 0x600   : > { %9911 = vmatprep.subr.mxu1 %v7376_v15  ;;  %9949 = vmatpush3.msra.mxu0 %v7407_v14  ;;  %v7452_v14 = vld [vmem:[%s15420_s1 + $0x8b0] sm:$0xff] }
 0x601   : > { %9912 = vmatpush3.msra.mxu1 %v7376_v15  ;;  %9950 = vmatprep.subr.mxu0 %v7406_v16  ;;  %v7451_v15 = vld [vmem:[%s15420_s1 + $0x8a8] sm:$0xff] }
 0x602   : > { %9913 = vmatprep.subr.mxu1 %v7375_v17  ;;  %9951 = vmatpush3.msra.mxu0 %v7406_v16  ;;  %v7450_v16 = vld [vmem:[%s15420_s1 + $0x8a0] sm:$0xff] }
 0x603   : > { %9914 = vmatpush3.msra.mxu1 %v7375_v17  ;;  %9952 = vmatprep.subr.mxu0 %v7405_v18  ;;  %v7449_v17 = vld [vmem:[%s15420_s1 + $0x898] sm:$0xff] }
 0x604   : > { %9915 = vmatprep.subr.mxu1 %v7374_v19  ;;  %9953 = vmatpush3.msra.mxu0 %v7405_v18  ;;  %v7448_v18 = vld [vmem:[%s15420_s1 + $0x890] sm:$0xff] }
 0x605   : > { %9916 = vmatpush3.msra.mxu1 %v7374_v19  ;;  %9954 = vmatprep.subr.mxu0 %v7404_v20  ;;  %v7447_v19 = vld [vmem:[%s15420_s1 + $0x888] sm:$0xff] }
 0x606   : > { %9917 = vmatprep.subr.mxu1 %v7373_v21  ;;  %9955 = vmatpush3.msra.mxu0 %v7404_v20  ;;  %v7446_v20 = vld [vmem:[%s15420_s1 + $0x880] sm:$0xff] }
 0x607   : > { %9918 = vmatpush3.msra.mxu1 %v7373_v21  ;;  %9956 = vmatprep.subr.mxu0 %v7403_v22  ;;  %v9690_v21 = vpop.f32.mrf.mxu0 }
 0x608   : > { %9919 = vmatprep.subr.mxu1 %v7372_v23  ;;  %9957 = vmatpush3.msra.mxu0 %v7403_v22  ;;  %v9725_v22 = vpop.f32.mrf.mxu1 }
 0x609   : > { %9920 = vmatpush3.msra.mxu1 %v7372_v23  ;;  %9958 = vmatprep.subr.mxu0 %v7402_v24  ;;  %v1010_v23 = vpop.f32.mrf.mxu0 }
 0x60a   : > { %9921 = vmatprep.subr.mxu1 %v7371_v25  ;;  %9959 = vmatpush3.msra.mxu0 %v7402_v24 }
 0x60b   : > { %9922 = vmatpush3.msra.mxu1 %v7371_v25  ;;  %9960 = vmatprep.subr.mxu0 %v7401_v26  ;;  %v9760_v24 = vpop.f32.mrf.mxu0  ;;  %v1085_v25 = vpop.f32.mrf.mxu1 }
 0x60c   : > { %9923 = vmatprep.subr.mxu1 %v7370_v27  ;;  %9961 = vmatpush3.msra.mxu0 %v7401_v26 }
 0x60d   : > { %9924 = vmatpush3.msra.mxu1 %v7370_v27  ;;  %9962 = vmatprep.subr.mxu0 %v7400_v9  ;;  %v1179_v27 = vpop.f32.mrf.mxu0 }
 0x60e   : > { %9925 = vmatprep.subr.mxu1 %v7369_v30  ;;  %9963 = vmatpush3.msra.mxu0 %v7400_v9  ;;  %v1091_v9 = vadd.f32 %v9725_v22, %v9690_v21  ;;  %v7468_v21 = vld [vmem:[%s15420_s1 + $0x930] sm:$0xff]  ;;  %v7481_v22 = vld [vmem:[%s15420_s1 + $0x998] sm:$0xff] }
 0x60f   : > { %9926 = vmatpush3.msra.mxu1 %v7369_v30  ;;  %9964 = vmatprep.subr.mxu0 %v7399_v59  ;;  %v1086_v30 = vadd.f32 %v1085_v25, %v1010_v23  ;;  %v7467_v23 = vld [vmem:[%s15420_s1 + $0x928] sm:$0xff] }
 0x610   : > { %9927 = vmatprep.subr.mxu1 %v7368_v62  ;;  %9965 = vmatpush3.msra.mxu0 %v7399_v59  ;;  %v7479_v25 = vld [vmem:[%s15420_s1 + $0x988] sm:$0xff] }
 0x611   : > { %9928 = vmatpush3.msra.mxu1 %v7368_v62  ;;  %9966 = vmatprep.subr.mxu0 %v7398_v31  ;;  %v1189_v62 = vadd.f32 %v9760_v24, %v1091_v9  ;;  %v7480_v24 = vld [vmem:[%s15420_s1 + $0x990] sm:$0xff]  ;;  %v7465_v9 = vld [vmem:[%s15420_s1 + $0x918] sm:$0xff] }
 0x612   : > { %9929 = vmatprep.subr.mxu1 %v7367_v3  ;;  %9967 = vmatpush3.msra.mxu0 %v7398_v31  ;;  %v1188_v31 = vadd.f32 %v1179_v27, %v1086_v30  ;;  %v7478_v27 = vld [vmem:[%s15420_s1 + $0x980] sm:$0xff]  ;;  %v7464_v30 = vld [vmem:[%s15420_s1 + $0x910] sm:$0xff] }
 0x613   : > { %9930 = vmatpush3.msra.mxu1 %v7367_v3  ;;  %9969 = vmatmul.mubr.f32.vlgmr.msra.gmra.mxu0 %v12293_v38  ;;  %v7427_v38 = vld [vmem:[%s15420_s1 + $0x7e8] sm:$0xff] }
 0x614   : > { %9931 = vmatprep.subr.mxu1 %v7366_v35  ;;  %10006 = vmatprep.subr.mxu0 %v7445_v36 }
 0x615   : > { %9932 = vmatpush3.msra.mxu1 %v7366_v35  ;;  %10007 = vmatpush3.msra.mxu0 %v7445_v36 }
 0x616   : > { %9934 = vmatmul.mubr.f32.vlgmr.msra.gmra.mxu1 %v1540_v39  ;;  %9971 = vmatprep.subr.mxu1 %v7429_v37 }
 0x617   : > { %9972 = vmatpush3.msra.mxu1 %v7429_v37  ;;  %10003 = vmatprep.mubr.f32.mxu1 %v12534_v32  ;;  %v7442_v32 = vld [vmem:[%s15420_s1 + $0x860] sm:$0xff] }
 0x618   : > { %10038 = vmatprep.mubr.f32.mxu0 %v12513_v28  ;;  %9973 = vmatprep.subr.mxu1 %v7428_v40  ;;  %v7425_v28 = vld [vmem:[%s15420_s1 + $0x7d8] sm:$0xff] }
 0x619   : > { %10008 = vmatprep.subr.mxu0 %v7444_v41  ;;  %9974 = vmatpush3.msra.mxu1 %v7428_v40 }
 0x61a   : > { %10009 = vmatpush3.msra.mxu0 %v7444_v41  ;;  %9975 = vmatprep.subr.mxu1 %v7427_v38 }
 0x61b   : > { %10010 = vmatprep.subr.mxu0 %v7443_v42  ;;  %9976 = vmatpush3.msra.mxu1 %v7427_v38 }
 0x61c   : > { %10011 = vmatpush3.msra.mxu0 %v7443_v42  ;;  %9977 = vmatprep.subr.mxu1 %v7426_v43 }
 0x61d   : > { %10012 = vmatprep.subr.mxu0 %v7442_v32  ;;  %9978 = vmatpush3.msra.mxu1 %v7426_v43 }
 0x61e   : > { %10013 = vmatpush3.msra.mxu0 %v7442_v32  ;;  %9979 = vmatprep.subr.mxu1 %v7425_v28 }
 0x61f   : > { %10014 = vmatprep.subr.mxu0 %v7441_v44  ;;  %9980 = vmatpush3.msra.mxu1 %v7425_v28 }
 0x620   : > { %10015 = vmatpush3.msra.mxu0 %v7441_v44  ;;  %9981 = vmatprep.subr.mxu1 %v7424_v45 }
 0x621   : > { %10016 = vmatprep.subr.mxu0 %v7440_v46  ;;  %9982 = vmatpush3.msra.mxu1 %v7424_v45 }
 0x622   : > { %10017 = vmatpush3.msra.mxu0 %v7440_v46  ;;  %9983 = vmatprep.subr.mxu1 %v7423_v47 }
 0x623   : > { %10018 = vmatprep.subr.mxu0 %v7439_v48  ;;  %9984 = vmatpush3.msra.mxu1 %v7423_v47 }
 0x624   : > { %10019 = vmatpush3.msra.mxu0 %v7439_v48  ;;  %9985 = vmatprep.subr.mxu1 %v7422_v49 }
 0x625   : > { %10020 = vmatprep.subr.mxu0 %v7438_v50  ;;  %9986 = vmatpush3.msra.mxu1 %v7422_v49 }
 0x626   : > { %10021 = vmatpush3.msra.mxu0 %v7438_v50  ;;  %9987 = vmatprep.subr.mxu1 %v7421_v51 }
 0x627   : > { %10022 = vmatprep.subr.mxu0 %v7437_v52  ;;  %9988 = vmatpush3.msra.mxu1 %v7421_v51 }
 0x628   : > { %10023 = vmatpush3.msra.mxu0 %v7437_v52  ;;  %9989 = vmatprep.subr.mxu1 %v7420_v53 }
 0x629   : > { %10024 = vmatprep.subr.mxu0 %v7436_v54  ;;  %9990 = vmatpush3.msra.mxu1 %v7420_v53 }
 0x62a   : > { %10025 = vmatpush3.msra.mxu0 %v7436_v54  ;;  %9991 = vmatprep.subr.mxu1 %v7419_v55 }
 0x62b   : > { %10026 = vmatprep.subr.mxu0 %v7435_v56  ;;  %9992 = vmatpush3.msra.mxu1 %v7419_v55  ;;  %v7477_v55 = vld [vmem:[%s15420_s1 + $0x978] sm:$0xff] }
 0x62c   : > { %10027 = vmatpush3.msra.mxu0 %v7435_v56  ;;  %9993 = vmatprep.subr.mxu1 %v7418_v57  ;;  %v7493_v56 = vld [vmem:[%s15420_s1 + $0x9f8] sm:$0xff] }
 0x62d   : > { %10028 = vmatprep.subr.mxu0 %v7434_v58  ;;  %9994 = vmatpush3.msra.mxu1 %v7418_v57  ;;  %v7476_v57 = vld [vmem:[%s15420_s1 + $0x970] sm:$0xff] }
 0x62e   : > { %10029 = vmatpush3.msra.mxu0 %v7434_v58  ;;  %9995 = vmatprep.subr.mxu1 %v7417_v60  ;;  %v7492_v58 = vld [vmem:[%s15420_s1 + $0x9f0] sm:$0xff] }
 0x62f   : > { %10030 = vmatprep.subr.mxu0 %v7433_v61  ;;  %9996 = vmatpush3.msra.mxu1 %v7417_v60  ;;  %v7475_v60 = vld [vmem:[%s15420_s1 + $0x968] sm:$0xff] }
 0x630   : > { %10031 = vmatpush3.msra.mxu0 %v7433_v61  ;;  %9997 = vmatprep.subr.mxu1 %v7416_v63  ;;  %v7491_v61 = vld [vmem:[%s15420_s1 + $0x9e8] sm:$0xff] }
 0x631   : > { %10032 = vmatprep.subr.mxu0 %v7432_v0  ;;  %9998 = vmatpush3.msra.mxu1 %v7416_v63  ;;  %v7474_v63 = vld [vmem:[%s15420_s1 + $0x960] sm:$0xff] }
 0x632   : > { %10033 = vmatpush3.msra.mxu0 %v7432_v0  ;;  %9999 = vmatprep.subr.mxu1 %v7415_v1  ;;  %v7490_v0 = vld [vmem:[%s15420_s1 + $0x9e0] sm:$0xff] }
 0x633   : > { %10034 = vmatprep.subr.mxu0 %v7431_v2  ;;  %10000 = vmatpush3.msra.mxu1 %v7415_v1  ;;  %v7473_v1 = vld [vmem:[%s15420_s1 + $0x958] sm:$0xff] }
 0x634   : > { %10035 = vmatpush3.msra.mxu0 %v7431_v2  ;;  %10001 = vmatprep.subr.mxu1 %v7414_v4  ;;  %v7489_v2 = vld [vmem:[%s15420_s1 + $0x9d8] sm:$0xff] }
 0x635   : > { %10036 = vmatprep.subr.mxu0 %v7430_v6  ;;  %10002 = vmatpush3.msra.mxu1 %v7414_v4  ;;  %v7472_v4 = vld [vmem:[%s15420_s1 + $0x950] sm:$0xff] }
 0x636   : > { %10037 = vmatpush3.msra.mxu0 %v7430_v6  ;;  %10004 = vmatmul.mubr.f32.vlgmr.msra.gmra.mxu1 %v12536_v33  ;;  %v7458_v33 = vld [vmem:[%s15420_s1 + $0x8e0] sm:$0xff]  ;;  %v7488_v6 = vld [vmem:[%s15420_s1 + $0x9d0] sm:$0xff] }
 0x637   : > { %10039 = vmatmul.mubr.f32.vlgmr.msra.gmra.mxu0 %v12515_v29  ;;  %10041 = vmatprep.subr.mxu1 %v7461_v10  ;;  %v7457_v29 = vld [vmem:[%s15420_s1 + $0x8d8] sm:$0xff] }
 0x638   : > { %10042 = vmatpush3.msra.mxu1 %v7461_v10  ;;  %10073 = vmatprep.mubr.f32.mxu1 %v12543_v34  ;;  %v7456_v34 = vld [vmem:[%s15420_s1 + $0x8d0] sm:$0xff]  ;;  %v7471_v10 = vld [vmem:[%s15420_s1 + $0x948] sm:$0xff] }
 0x639   : > { %10043 = vmatprep.subr.mxu1 %v7460_v7  ;;  %10076 = vmatprep.subr.mxu0 %v7477_v55 }
 0x63a   : > { %10044 = vmatpush3.msra.mxu1 %v7460_v7  ;;  %10077 = vmatpush3.msra.mxu0 %v7477_v55  ;;  %v7487_v7 = vld [vmem:[%s15420_s1 + $0x9c8] sm:$0xff] }
 0x63b   : > { %10045 = vmatprep.subr.mxu1 %v7459_v11  ;;  %10078 = vmatprep.subr.mxu0 %v7476_v57  ;;  %v7507_v55 = vld [vmem:[%s15420_s1 + $0xa68] sm:$0xff] }
 0x63c   : > { %10046 = vmatpush3.msra.mxu1 %v7459_v11  ;;  %10079 = vmatpush3.msra.mxu0 %v7476_v57  ;;  %v7506_v57 = vld [vmem:[%s15420_s1 + $0xa60] sm:$0xff] }
 0x63d   : > { %10047 = vmatprep.subr.mxu1 %v7458_v33  ;;  %10080 = vmatprep.subr.mxu0 %v7475_v60 }
 0x63e   : > { %10048 = vmatpush3.msra.mxu1 %v7458_v33  ;;  %10081 = vmatpush3.msra.mxu0 %v7475_v60  ;;  %v7505_v60 = vld [vmem:[%s15420_s1 + $0xa58] sm:$0xff] }
 0x63f   : > { %10049 = vmatprep.subr.mxu1 %v7457_v29  ;;  %10082 = vmatprep.subr.mxu0 %v7474_v63 }
 0x640   : > { %10050 = vmatpush3.msra.mxu1 %v7457_v29  ;;  %10083 = vmatpush3.msra.mxu0 %v7474_v63  ;;  %v7504_v63 = vld [vmem:[%s15420_s1 + $0xa50] sm:$0xff] }
 0x641   : > { %10051 = vmatprep.subr.mxu1 %v7456_v34  ;;  %10084 = vmatprep.subr.mxu0 %v7473_v1 }
 0x642   : > { %10052 = vmatpush3.msra.mxu1 %v7456_v34  ;;  %10085 = vmatpush3.msra.mxu0 %v7473_v1  ;;  %v7486_v34 = vld [vmem:[%s15420_s1 + $0x9c0] sm:$0xff]  ;;  %v7503_v1 = vld [vmem:[%s15420_s1 + $0xa48] sm:$0xff] }
 0x643   : > { %10053 = vmatprep.subr.mxu1 %v7455_v12  ;;  %10086 = vmatprep.subr.mxu0 %v7472_v4 }
 0x644   : > { %10054 = vmatpush3.msra.mxu1 %v7455_v12  ;;  %10087 = vmatpush3.msra.mxu0 %v7472_v4  ;;  %v7502_v4 = vld [vmem:[%s15420_s1 + $0xa40] sm:$0xff] }
 0x645   : > { %10055 = vmatprep.subr.mxu1 %v7454_v8  ;;  %10088 = vmatprep.subr.mxu0 %v7471_v10 }
 0x646   : > { %10056 = vmatpush3.msra.mxu1 %v7454_v8  ;;  %10089 = vmatpush3.msra.mxu0 %v7471_v10  ;;  %v7485_v8 = vld [vmem:[%s15420_s1 + $0x9b8] sm:$0xff] }
 0x647   : > { %10057 = vmatprep.subr.mxu1 %v7453_v13  ;;  %v7501_v10 = vld [vmem:[%s15420_s1 + $0xa38] sm:$0xff] }
 0x648   : > { %10058 = vmatpush3.msra.mxu1 %v7453_v13 }
 0x649   : > { %10059 = vmatprep.subr.mxu1 %v7452_v14 }
 0x64a   : > { %10060 = vmatpush3.msra.mxu1 %v7452_v14  ;;  %v7484_v14 = vld [vmem:[%s15420_s1 + $0x9b0] sm:$0xff] }
 0x64b   : > { %10061 = vmatprep.subr.mxu1 %v7451_v15 }
 0x64c   : > { %10062 = vmatpush3.msra.mxu1 %v7451_v15 }
 0x64d   : > { %10063 = vmatprep.subr.mxu1 %v7450_v16 }
 0x64e   : > { %10064 = vmatpush3.msra.mxu1 %v7450_v16  ;;  %v7483_v16 = vld [vmem:[%s15420_s1 + $0x9a8] sm:$0xff] }
 0x64f   : > { %10065 = vmatprep.subr.mxu1 %v7449_v17 }
 0x650   : > { %10066 = vmatpush3.msra.mxu1 %v7449_v17 }
 0x651   : > { %10067 = vmatprep.subr.mxu1 %v7448_v18 }
 0x652   : > { %10068 = vmatpush3.msra.mxu1 %v7448_v18  ;;  %v7470_v18 = vld [vmem:[%s15420_s1 + $0x940] sm:$0xff] }
 0x653   : > { %10069 = vmatprep.subr.mxu1 %v7447_v19  ;;  %10090 = vmatprep.subr.mxu0 %v7470_v18 }
 0x654   : > { %10070 = vmatpush3.msra.mxu1 %v7447_v19  ;;  %v7482_v19 = vld [vmem:[%s15420_s1 + $0x9a0] sm:$0xff]  ;;  %10091 = vmatpush3.msra.mxu0 %v7470_v18  ;;  %v7558_v18 = vld [vmem:[%s15420_s1 + $0xbf0] sm:$0xff] }
 0x655   : > { %10071 = vmatprep.subr.mxu1 %v7446_v20 }
 0x656   : > { %10072 = vmatpush3.msra.mxu1 %v7446_v20  ;;  %v7469_v20 = vld [vmem:[%s15420_s1 + $0x938] sm:$0xff] }
 0x657   : > { %10074 = vmatmul.mubr.f32.vlgmr.msra.gmra.mxu1 %v12634_v5  ;;  %10111 = vmatprep.subr.mxu1 %v7493_v56 }
 0x658   : > { %10112 = vmatpush3.msra.mxu1 %v7493_v56  ;;  %10092 = vmatprep.subr.mxu0 %v7469_v20  ;;  %v7537_v56 = vld [vmem:[%s15420_s1 + $0xb48] sm:$0xff] }
 0x659   : > { %10113 = vmatprep.subr.mxu1 %v7492_v58  ;;  %10093 = vmatpush3.msra.mxu0 %v7469_v20  ;;  %v2648_v20 = vld [vmem:[#allocation2 + $0x1a] sm:$0xff] }
 0x65a   : > { %10114 = vmatpush3.msra.mxu1 %v7492_v58  ;;  %10094 = vmatprep.subr.mxu0 %v7468_v21  ;;  %v7536_v58 = vld [vmem:[%s15420_s1 + $0xb40] sm:$0xff] }
 0x65b   : > { %10115 = vmatprep.subr.mxu1 %v7491_v61  ;;  %10095 = vmatpush3.msra.mxu0 %v7468_v21  ;;  %v7557_v21 = vld [vmem:[%s15420_s1 + $0xbe8] sm:$0xff] }
 0x65c   : > { %10116 = vmatpush3.msra.mxu1 %v7491_v61  ;;  %10096 = vmatprep.subr.mxu0 %v7467_v23  ;;  %v7535_v61 = vld [vmem:[%s15420_s1 + $0xb38] sm:$0xff] }
 0x65d   : > { %10117 = vmatprep.subr.mxu1 %v7490_v0  ;;  %10097 = vmatpush3.msra.mxu0 %v7467_v23 }
 0x65e   : > { %10118 = vmatpush3.msra.mxu1 %v7490_v0  ;;  %v7534_v0 = vld [vmem:[%s15420_s1 + $0xb30] sm:$0xff] }
 0x65f   : > { %10119 = vmatprep.subr.mxu1 %v7489_v2 }
 0x660   : > { %10120 = vmatpush3.msra.mxu1 %v7489_v2  ;;  %v7533_v2 = vld [vmem:[%s15420_s1 + $0xb28] sm:$0xff] }
 0x661   : > { %10121 = vmatprep.subr.mxu1 %v7488_v6 }
 0x662   : > { %10122 = vmatpush3.msra.mxu1 %v7488_v6  ;;  %v7532_v6 = vld [vmem:[%s15420_s1 + $0xb20] sm:$0xff] }
 0x663   : > { %10123 = vmatprep.subr.mxu1 %v7487_v7 }
 0x664   : > { %10124 = vmatpush3.msra.mxu1 %v7487_v7  ;;  %v7531_v7 = vld [vmem:[%s15420_s1 + $0xb18] sm:$0xff] }
 0x665   : > { %10125 = vmatprep.subr.mxu1 %v7486_v34 }
 0x666   : > { %10126 = vmatpush3.msra.mxu1 %v7486_v34  ;;  %v7529_v34 = vld [vmem:[%s15420_s1 + $0xb08] sm:$0xff] }
 0x667   : > { %10127 = vmatprep.subr.mxu1 %v7485_v8 }
 0x668   : > { %10128 = vmatpush3.msra.mxu1 %v7485_v8  ;;  %v7528_v8 = vld [vmem:[%s15420_s1 + $0xb00] sm:$0xff] }
 0x669   : > { %10129 = vmatprep.subr.mxu1 %v7484_v14 }
 0x66a   : > { %10130 = vmatpush3.msra.mxu1 %v7484_v14  ;;  %v7496_v14 = vld [vmem:[%s15420_s1 + $0xa10] sm:$0xff] }
 0x66b   : > { %10131 = vmatprep.subr.mxu1 %v7483_v16 }
 0x66c   : > { %10132 = vmatpush3.msra.mxu1 %v7483_v16  ;;  %v2480_v16 = vld [vmem:[#allocation2 + $0x21] sm:$0xff] }
 0x66d   : > { %10133 = vmatprep.subr.mxu1 %v7482_v19 }
 0x66e   : > { %10134 = vmatpush3.msra.mxu1 %v7482_v19  ;;  %v7494_v19 = vld [vmem:[%s15420_s1 + $0xa00] sm:$0xff] }
 0x66f   : > { %10135 = vmatprep.subr.mxu1 %v7481_v22 }
 0x670   : > { %10136 = vmatpush3.msra.mxu1 %v7481_v22  ;;  %v7527_v22 = vld [vmem:[%s15420_s1 + $0xaf8] sm:$0xff] }
 0x671   : > { %10137 = vmatprep.subr.mxu1 %v7480_v24 }
 0x672   : > { %10138 = vmatpush3.msra.mxu1 %v7480_v24  ;;  %v7526_v24 = vld [vmem:[%s15420_s1 + $0xaf0] sm:$0xff] }
 0x673   : > { %10139 = vmatprep.subr.mxu1 %v7479_v25 }
 0x674   : > { %10140 = vmatpush3.msra.mxu1 %v7479_v25  ;;  %v2460_v25 = vld [vmem:[#allocation2 + $0x18] sm:$0xff] }
 0x675   : > { %10141 = vmatprep.subr.mxu1 %v7478_v27 }
 0x676   : > { %10142 = vmatpush3.msra.mxu1 %v7478_v27  ;;  %v7525_v27 = vld [vmem:[%s15420_s1 + $0xae8] sm:$0xff] }
 0x68e   : > { %v9830_v3 = vpop.f32.mrf.mxu0 }
 0x690   : > { %v1371_v37 = vpop.f32.mrf.mxu0 }
 0x696   : > { %v9795_v26 = vpop.f32.mrf.mxu1 }
 0x697   : > { %v1285_v35 = vadd.f32 %v9795_v26, %v1189_v62  ;;  %v7466_v26 = vld [vmem:[%s15420_s1 + $0x920] sm:$0xff]  ;;  %v7463_v62 = vld [vmem:[%s15420_s1 + $0x908] sm:$0xff] }
 0x698   : > { %v1275_v59 = vpop.f32.mrf.mxu1  ;;  %10098 = vmatprep.subr.mxu0 %v7466_v26 }
 0x699   : > { %v1284_v36 = vadd.f32 %v1275_v59, %v1188_v31  ;;  %v1381_v40 = vadd.f32 %v9830_v3, %v1285_v35  ;;  %10099 = vmatpush3.msra.mxu0 %v7466_v26  ;;  %v7543_v59 = vld [vmem:[%s15420_s1 + $0xb78] sm:$0xff]  ;;  %v7462_v31 = vld [vmem:[%s15420_s1 + $0x900] sm:$0xff] }
 0x69a   : > { %10100 = vmatprep.subr.mxu0 %v7465_v9  ;;  %10181 = vmatprep.subr.mxu1 %v7543_v59  ;;  %v7509_v3 = vld [vmem:[%s15420_s1 + $0xa78] sm:$0xff]  ;;  %v7556_v26 = vld [vmem:[%s15420_s1 + $0xbe0] sm:$0xff] }
 0x69b   : > { %v1380_v41 = vadd.f32 %v1371_v37, %v1284_v36  ;;  %10101 = vmatpush3.msra.mxu0 %v7465_v9  ;;  %v7555_v9 = vld [vmem:[%s15420_s1 + $0xbd8] sm:$0xff] }
 0x69c   : > { %10102 = vmatprep.subr.mxu0 %v7464_v30 }
 0x69d   : > { %10103 = vmatpush3.msra.mxu0 %v7464_v30  ;;  %v7524_v30 = vld [vmem:[%s15420_s1 + $0xae0] sm:$0xff] }
 0x69e   : > { %10104 = vmatprep.subr.mxu0 %v7463_v62 }
 0x69f   : > { %10105 = vmatpush3.msra.mxu0 %v7463_v62  ;;  %v7523_v62 = vld [vmem:[%s15420_s1 + $0xad8] sm:$0xff] }
 0x6a0   : > { %10106 = vmatprep.subr.mxu0 %v7462_v31 }
 0x6a1   : > { %10107 = vmatpush3.msra.mxu0 %v7462_v31  ;;  %v7553_v31 = vld [vmem:[%s15420_s1 + $0xbc8] sm:$0xff] }
 0x6a2   : > { %10146 = vmatprep.subr.mxu0 %v7509_v3 }
 0x6b6   : > { %v9865_v39 = vpop.f32.mrf.mxu1 }
 0x6b7   : > { %v1477_v38 = vadd.f32 %v9865_v39, %v1381_v40  ;;  %v7364_v39 = vld [vmem:[%s15421_s2] ss:$0 sm:$0xff] }
 0x6b8   : > { %v1467_v5 = vpop.f32.mrf.mxu1 }
 0x6b9   : > { %v1476_v42 = vadd.f32 %v1467_v5, %v1380_v41  ;;  %v7365_v5 = vld [vmem:[%s15422_s3] ss:$0 sm:$0xff] }
 0x6bb   : > { %v1478_v43 = vadd.f32 %v1477_v38, %v1476_v42 }
 0x6bd   : > { %1479 = vadd.xlane.f32.xlu0 %v1478_v43 }
 0x746   : > { %v1480_v32 = vpop.xlane.xlu0 %1479 }
 0x747   : > { %v1481_v28 = vrot.slane %v1480_v32, 4 }
 0x749   : > { %v1482_v44 = vadd.f32 %v1481_v28, %v1480_v32 }
 0x74b   : > { %v1483_v45 = vrot.slane %v1482_v44, 2 }
 0x74d   : > { %v1484_v46 = vadd.f32 %v1483_v45, %v1482_v44  ;;  %v7542_v45 = vld [vmem:[%s15420_s1 + $0xb70] sm:$0xff] }
 0x74f   : > { %v1485_v47 = vrot.slane %v1484_v46, 1 }
 0x751   : > { %v1486_v48 = vadd.f32 %v1485_v47, %v1484_v46  ;;  %v2479_v46 = vld [vmem:[#allocation2 + $0x19] sm:$0xff]  ;;  %v7541_v47 = vld [vmem:[%s15420_s1 + $0xb68] sm:$0xff] }
 0x753   : > { %11768 = vpush %v1486_v48  ;;  %v7540_v48 = vld [vmem:[%s15420_s1 + $0xb60] sm:$0xff] }
 0x784   : > { %s11769_s13 = spop %11768 }
 0x785   : > { %s1490_s14 = smul.f32 0.00048828125, %s11769_s13 }
 0x787   : > { %v1491_v49 = vstv %s1490_s14 }
 0x788   : > { %v12873_v50 = vsub.f32 %v1476_v42, %v1491_v49  ;;  %v12875_v51 = vsub.f32 %v1477_v38, %v1491_v49  ;;  %v7539_v49 = vld [vmem:[%s15420_s1 + $0xb58] sm:$0xff] }
 0x78a   : > { %v1494_v52 = vmul.f32 %v12873_v50, %v12873_v50  ;;  %v1495_v53 = vmul.f32 %v12875_v51, %v12875_v51 }
 0x78c   : > { %v1496_v54 = vadd.f32 %v1495_v53, %v1494_v52  ;;  %v7508_v52 = vld [vmem:[%s15420_s1 + $0xa70] sm:$0xff] }
 0x78e   : > { %1497 = vadd.xlane.f32.xlu1 %v1496_v54  ;;  %v7538_v54 = vld [vmem:[%s15420_s1 + $0xb50] sm:$0xff] }
 0x817   : > { %v1498_v11 = vpop.xlane.xlu1 %1497 }
 0x818   : > { %v1499_v33 = vrot.slane %v1498_v11, 4 }
 0x81a   : > { %v1500_v29 = vadd.f32 %v1499_v33, %v1498_v11  ;;  %v7500_v11 = vld [vmem:[%s15420_s1 + $0xa30] sm:$0xff] }
 0x81b   : > { %v7530_v33 = vld [vmem:[%s15420_s1 + $0xb10] sm:$0xff] }
 0x81c   : > { %v1501_v12 = vrot.slane %v1500_v29, 2 }
 0x81e   : > { %v1502_v13 = vadd.f32 %v1501_v12, %v1500_v29  ;;  %v7499_v29 = vld [vmem:[%s15420_s1 + $0xa28] sm:$0xff]  ;;  %v7498_v12 = vld [vmem:[%s15420_s1 + $0xa20] sm:$0xff] }
 0x820   : > { %v1503_v15 = vrot.slane %v1502_v13, 1 }
 0x822   : > { %v1504_v17 = vadd.f32 %v1503_v15, %v1502_v13  ;;  %v7497_v13 = vld [vmem:[%s15420_s1 + $0xa18] sm:$0xff] }
 0x823   : > { %v7559_v15 = vld [vmem:[%s15420_s1 + $0xbf8] sm:$0xff] }
 0x824   : > { %11770 = vpush %v1504_v17  ;;  %v7495_v17 = vld [vmem:[%s15420_s1 + $0xa08] sm:$0xff] }
 0x855   : > { %s11771_s14 = spop %11770 }
 0x856   : > { %s1508_s17 = smul.f32 0.00048828125, %s11771_s14 }
 0x858   : > { %s1509_s18 = sadd.f32 1e-05, %s1508_s17 }
 0x85a   : > { %v1510_v35 = vstv %s1509_s18 }
 0x85b   : > { %11829 = vrsqrt.f32 %v1510_v35  ;;  %v7552_v35 = vld [vmem:[%s15420_s1 + $0xbc0] sm:$0xff] }
 0x868   : > { %v11830_v36 = vpop.eup %11829 }
 0x869   : > { %11772 = vpush %v11830_v36  ;;  %v7521_v36 = vld [vmem:[%s15420_s1 + $0xac8] sm:$0xff] }
 0x89a   : > { %s11773_s19 = spop %11772 }
 0x89b   : > { %v1513_v37 = vstv %s11773_s19 }
 0x89c   : > { %v1514_v40 = vmul.f32 %v1513_v37, %v12873_v50  ;;  %v1515_v41 = vmul.f32 %v1513_v37, %v12875_v51  ;;  %v7551_v37 = vld [vmem:[%s15420_s1 + $0xbb8] sm:$0xff] }
 0x89e   : > { %v1523_v38 = vmul.f32 %v7364_v39, %v1514_v40  ;;  %v1524_v42 = vmul.f32 %v7364_v39, %v1515_v41  ;;  %v7520_v39 = vld [vmem:[%s15420_s1 + $0xac0] sm:$0xff]  ;;  %v7550_v40 = vld [vmem:[%s15420_s1 + $0xbb0] sm:$0xff]  ;;  %v7519_v41 = vld [vmem:[%s15420_s1 + $0xab8] sm:$0xff] }
 0x8a0   : > { %v1532_v43 = vadd.f32 %v7365_v5, %v1523_v38  ;;  %v1533_v32 = vadd.f32 %v7365_v5, %v1524_v42  ;;  %v7549_v5 = vld [vmem:[%s15420_s1 + $0xba8] sm:$0xff]  ;;  %v7518_v38 = vld [vmem:[%s15420_s1 + $0xab0] sm:$0xff]  ;;  %v7548_v42 = vld [vmem:[%s15420_s1 + $0xba0] sm:$0xff] }
 0x8a2   : > { %v12991_v28 = vmax.f32 %v1532_v43, 0.0  ;;  %v1535_v44 = vmax.f32 %v1533_v32, 0.0  ;;  %v7517_v43 = vld [vmem:[%s15420_s1 + $0xaa8] sm:$0xff]  ;;  %v7547_v32 = vld [vmem:[%s15420_s1 + $0xb98] sm:$0xff] }
 0x8a4   : > { %1537 = vst [vmem:[#allocation2 + $0x49] sm:$0xff] %v12991_v28  ;;  %1538 = vst [vmem:[#allocation2 + $0x51] sm:$0xff] %v1535_v44  ;;  %10143 = vmatprep.mubr.f32.mxu1 %v12991_v28 }
 0x8a5   : > { %10144 = vmatmul.mubr.f32.vlgmr.msra.gmra.mxu1 %v1535_v44  ;;  %v7516_v44 = vld [vmem:[%s15420_s1 + $0xaa0] sm:$0xff] }
 0x8a6   : > { %10182 = vmatpush3.msra.mxu1 %v7543_v59  ;;  %10213 = vmatprep.mubr.f32.mxu1 %v2479_v46  ;;  %v7554_v59 = vld [vmem:[%s15420_s1 + $0xbd0] sm:$0xff]  ;;  %v7515_v46 = vld [vmem:[%s15420_s1 + $0xa98] sm:$0xff] }
 0x8a7   : > { %10183 = vmatprep.subr.mxu1 %v7542_v45 }
 0x8a8   : > { %10184 = vmatpush3.msra.mxu1 %v7542_v45  ;;  %v7546_v45 = vld [vmem:[%s15420_s1 + $0xb90] sm:$0xff] }
 0x8a9   : > { %10185 = vmatprep.subr.mxu1 %v7541_v47 }
 0x8aa   : > { %10186 = vmatpush3.msra.mxu1 %v7541_v47  ;;  %v7545_v47 = vld [vmem:[%s15420_s1 + $0xb88] sm:$0xff] }
 0x8ab   : > { %v13007_v50 = vld [vmem:[#allocation2 + $0x48] sm:$0xff]  ;;  %v13009_v51 = vld [vmem:[#allocation2 + $0x50] sm:$0xff]  ;;  %10187 = vmatprep.subr.mxu1 %v7540_v48 }
 0x8ac   : > { %10108 = vmatprep.mubr.f32.mxu0 %v13007_v50  ;;  %10188 = vmatpush3.msra.mxu1 %v7540_v48  ;;  %v13016_v53 = vld [vmem:[#allocation2 + $0x4a] sm:$0xff]  ;;  %v13106_v23 = vld [vmem:[#allocation2 + $0x52] sm:$0xff] }
 0x8ad   : > { %10109 = vmatmul.mubr.f32.vlgmr.msra.gmra.mxu0 %v13009_v51  ;;  %10189 = vmatprep.subr.mxu1 %v7539_v49  ;;  %v7514_v48 = vld [vmem:[%s15420_s1 + $0xa90] sm:$0xff] }
 0x8ae   : > { %10147 = vmatpush3.msra.mxu0 %v7509_v3  ;;  %10178 = vmatprep.mubr.f32.mxu0 %v13016_v53  ;;  %v7522_v3 = vld [vmem:[%s15420_s1 + $0xad0] sm:$0xff] }
 0x8af   : > { %10148 = vmatprep.subr.mxu0 %v7508_v52  ;;  %10190 = vmatpush3.msra.mxu1 %v7539_v49  ;;  %v7544_v49 = vld [vmem:[%s15420_s1 + $0xb80] sm:$0xff] }
 0x8b0   : > { %10149 = vmatpush3.msra.mxu0 %v7508_v52  ;;  %10191 = vmatprep.subr.mxu1 %v7538_v54  ;;  %v7513_v52 = vld [vmem:[%s15420_s1 + $0xa88] sm:$0xff] }
 0x8b1   : > { %10150 = vmatprep.subr.mxu0 %v7507_v55  ;;  %10192 = vmatpush3.msra.mxu1 %v7538_v54  ;;  %v7512_v54 = vld [vmem:[%s15420_s1 + $0xa80] sm:$0xff] }
 0x8b2   : > { %10151 = vmatpush3.msra.mxu0 %v7507_v55  ;;  %10193 = vmatprep.subr.mxu1 %v7537_v56  ;;  %v7591_v55 = vld [vmem:[%s15420_s1 + $0xcf8] sm:$0xff] }
 0x8b3   : > { %10152 = vmatprep.subr.mxu0 %v7506_v57  ;;  %10194 = vmatpush3.msra.mxu1 %v7537_v56  ;;  %v2649_v56 = vld [vmem:[#allocation2 + $0x22] sm:$0xff] }
 0x8b4   : > { %10153 = vmatpush3.msra.mxu0 %v7506_v57  ;;  %10195 = vmatprep.subr.mxu1 %v7536_v58  ;;  %v7575_v57 = vld [vmem:[%s15420_s1 + $0xc78] sm:$0xff] }
 0x8b5   : > { %10154 = vmatprep.subr.mxu0 %v7505_v60  ;;  %10196 = vmatpush3.msra.mxu1 %v7536_v58  ;;  %v2461_v58 = vld [vmem:[#allocation2 + $0x20] sm:$0xff] }
 0x8b6   : > { %10155 = vmatpush3.msra.mxu0 %v7505_v60  ;;  %10197 = vmatprep.subr.mxu1 %v7535_v61  ;;  %v7574_v60 = vld [vmem:[%s15420_s1 + $0xc70] sm:$0xff] }
 0x8b7   : > { %10156 = vmatprep.subr.mxu0 %v7504_v63  ;;  %10198 = vmatpush3.msra.mxu1 %v7535_v61  ;;  %v2744_v61 = vld [vmem:[#allocation2 + $0x30] sm:$0xff] }
 0x8b8   : > { %10157 = vmatpush3.msra.mxu0 %v7504_v63  ;;  %10199 = vmatprep.subr.mxu1 %v7534_v0  ;;  %v7590_v63 = vld [vmem:[%s15420_s1 + $0xcf0] sm:$0xff] }
 0x8b9   : > { %10158 = vmatprep.subr.mxu0 %v7503_v1  ;;  %10200 = vmatpush3.msra.mxu1 %v7534_v0  ;;  %v2840_v0 = vld [vmem:[#allocation2 + $0x31] sm:$0xff] }
 0x8ba   : > { %10159 = vmatpush3.msra.mxu0 %v7503_v1  ;;  %10201 = vmatprep.subr.mxu1 %v7533_v2  ;;  %v7573_v1 = vld [vmem:[%s15420_s1 + $0xc68] sm:$0xff] }
 0x8bb   : > { %10160 = vmatprep.subr.mxu0 %v7502_v4  ;;  %10202 = vmatpush3.msra.mxu1 %v7533_v2  ;;  %v7589_v2 = vld [vmem:[%s15420_s1 + $0xce8] sm:$0xff] }
 0x8bc   : > { %10161 = vmatpush3.msra.mxu0 %v7502_v4  ;;  %10203 = vmatprep.subr.mxu1 %v7532_v6  ;;  %v7572_v4 = vld [vmem:[%s15420_s1 + $0xc60] sm:$0xff] }
 0x8bd   : > { %10162 = vmatprep.subr.mxu0 %v7501_v10  ;;  %10204 = vmatpush3.msra.mxu1 %v7532_v6  ;;  %v7588_v6 = vld [vmem:[%s15420_s1 + $0xce0] sm:$0xff] }
 0x8be   : > { %10163 = vmatpush3.msra.mxu0 %v7501_v10  ;;  %10205 = vmatprep.subr.mxu1 %v7531_v7  ;;  %v7571_v10 = vld [vmem:[%s15420_s1 + $0xc58] sm:$0xff] }
 0x8bf   : > { %10164 = vmatprep.subr.mxu0 %v7500_v11  ;;  %10206 = vmatpush3.msra.mxu1 %v7531_v7  ;;  %v7587_v7 = vld [vmem:[%s15420_s1 + $0xcd8] sm:$0xff] }
 0x8c0   : > { %10165 = vmatpush3.msra.mxu0 %v7500_v11  ;;  %10207 = vmatprep.subr.mxu1 %v7530_v33  ;;  %v7570_v11 = vld [vmem:[%s15420_s1 + $0xc50] sm:$0xff] }
 0x8c1   : > { %10166 = vmatprep.subr.mxu0 %v7499_v29  ;;  %10208 = vmatpush3.msra.mxu1 %v7530_v33  ;;  %v7586_v33 = vld [vmem:[%s15420_s1 + $0xcd0] sm:$0xff] }
 0x8c2   : > { %10167 = vmatpush3.msra.mxu0 %v7499_v29  ;;  %10209 = vmatprep.subr.mxu1 %v7529_v34  ;;  %v7569_v29 = vld [vmem:[%s15420_s1 + $0xc48] sm:$0xff] }
 0x8c3   : > { %10168 = vmatprep.subr.mxu0 %v7498_v12  ;;  %10210 = vmatpush3.msra.mxu1 %v7529_v34  ;;  %v7585_v34 = vld [vmem:[%s15420_s1 + $0xcc8] sm:$0xff] }
 0x8c4   : > { %10169 = vmatpush3.msra.mxu0 %v7498_v12  ;;  %10211 = vmatprep.subr.mxu1 %v7528_v8  ;;  %v7568_v12 = vld [vmem:[%s15420_s1 + $0xc40] sm:$0xff] }
 0x8c5   : > { %10170 = vmatprep.subr.mxu0 %v7497_v13  ;;  %10212 = vmatpush3.msra.mxu1 %v7528_v8  ;;  %v7584_v8 = vld [vmem:[%s15420_s1 + $0xcc0] sm:$0xff] }
 0x8c6   : > { %10171 = vmatpush3.msra.mxu0 %v7497_v13  ;;  %10214 = vmatmul.mubr.f32.vlgmr.msra.gmra.mxu1 %v2480_v16  ;;  %v7567_v13 = vld [vmem:[%s15420_s1 + $0xc38] sm:$0xff]  ;;  %v7582_v16 = vld [vmem:[%s15420_s1 + $0xcb0] sm:$0xff] }
 0x8c7   : > { %10172 = vmatprep.subr.mxu0 %v7496_v14  ;;  %10251 = vmatprep.subr.mxu1 %v7559_v15 }
 0x8c8   : > { %10173 = vmatpush3.msra.mxu0 %v7496_v14  ;;  %10252 = vmatpush3.msra.mxu1 %v7559_v15  ;;  %v7583_v14 = vld [vmem:[%s15420_s1 + $0xcb8] sm:$0xff]  ;;  %v7566_v15 = vld [vmem:[%s15420_s1 + $0xc30] sm:$0xff] }
 0x8c9   : > { %10174 = vmatprep.subr.mxu0 %v7495_v17  ;;  %10283 = vmatprep.mubr.f32.mxu1 %v2648_v20  ;;  %v7580_v20 = vld [vmem:[%s15420_s1 + $0xca0] sm:$0xff] }
 0x8ca   : > { %10175 = vmatpush3.msra.mxu0 %v7495_v17  ;;  %10253 = vmatprep.subr.mxu1 %v7558_v18  ;;  %v7565_v17 = vld [vmem:[%s15420_s1 + $0xc28] sm:$0xff] }
 0x8cb   : > { %10176 = vmatprep.subr.mxu0 %v7494_v19  ;;  %10254 = vmatpush3.msra.mxu1 %v7558_v18  ;;  %v7581_v18 = vld [vmem:[%s15420_s1 + $0xca8] sm:$0xff] }
 0x8cc   : > { %10177 = vmatpush3.msra.mxu0 %v7494_v19  ;;  %10255 = vmatprep.subr.mxu1 %v7557_v21  ;;  %v7564_v19 = vld [vmem:[%s15420_s1 + $0xc20] sm:$0xff] }
 0x8cd   : > { %10179 = vmatmul.mubr.f32.vlgmr.msra.gmra.mxu0 %v13106_v23  ;;  %10216 = vmatprep.subr.mxu0 %v7527_v22 }
 0x8ce   : > { %10217 = vmatpush3.msra.mxu0 %v7527_v22  ;;  %10248 = vmatprep.mubr.f32.mxu0 %v2460_v25  ;;  %v7579_v22 = vld [vmem:[%s15420_s1 + $0xc98] sm:$0xff]  ;;  %v7578_v25 = vld [vmem:[%s15420_s1 + $0xc90] sm:$0xff] }
 0x8cf   : > { %10218 = vmatprep.subr.mxu0 %v7526_v24  ;;  %10256 = vmatpush3.msra.mxu1 %v7557_v21  ;;  %v7563_v21 = vld [vmem:[%s15420_s1 + $0xc18] sm:$0xff] }
 0x8d0   : > { %10219 = vmatpush3.msra.mxu0 %v7526_v24  ;;  %10257 = vmatprep.subr.mxu1 %v7556_v26  ;;  %v7562_v24 = vld [vmem:[%s15420_s1 + $0xc10] sm:$0xff] }
 0x8d1   : > { %10220 = vmatprep.subr.mxu0 %v7525_v27  ;;  %10258 = vmatpush3.msra.mxu1 %v7556_v26  ;;  %v7561_v26 = vld [vmem:[%s15420_s1 + $0xc08] sm:$0xff] }
 0x8d2   : > { %10221 = vmatpush3.msra.mxu0 %v7525_v27  ;;  %10259 = vmatprep.subr.mxu1 %v7555_v9  ;;  %v7577_v27 = vld [vmem:[%s15420_s1 + $0xc88] sm:$0xff] }
 0x8d3   : > { %10222 = vmatprep.subr.mxu0 %v7524_v30  ;;  %10260 = vmatpush3.msra.mxu1 %v7555_v9  ;;  %v7560_v9 = vld [vmem:[%s15420_s1 + $0xc00] sm:$0xff] }
 0x8d4   : > { %10223 = vmatpush3.msra.mxu0 %v7524_v30  ;;  %10261 = vmatprep.subr.mxu1 %v7554_v59  ;;  %v7576_v30 = vld [vmem:[%s15420_s1 + $0xc80] sm:$0xff] }
 0x8d5   : > { %10224 = vmatprep.subr.mxu0 %v7523_v62  ;;  %10262 = vmatpush3.msra.mxu1 %v7554_v59  ;;  %v7607_v59 = vld [vmem:[%s15420_s1 + $0xd78] sm:$0xff] }
 0x8d6   : > { %10225 = vmatpush3.msra.mxu0 %v7523_v62  ;;  %10263 = vmatprep.subr.mxu1 %v7553_v31  ;;  %v2745_v62 = vld [vmem:[#allocation2 + $0x38] sm:$0xff] }
 0x8d7   : > { %10226 = vmatprep.subr.mxu0 %v7522_v3  ;;  %10264 = vmatpush3.msra.mxu1 %v7553_v31  ;;  %v7623_v31 = vld [vmem:[%s15420_s1 + $0xdf8] sm:$0xff] }
 0x8d8   : > { %10227 = vmatpush3.msra.mxu0 %v7522_v3  ;;  %10265 = vmatprep.subr.mxu1 %v7552_v35  ;;  %v2841_v3 = vld [vmem:[#allocation2 + $0x39] sm:$0xff] }
 0x8d9   : > { %10228 = vmatprep.subr.mxu0 %v7521_v36  ;;  %10266 = vmatpush3.msra.mxu1 %v7552_v35  ;;  %v7606_v35 = vld [vmem:[%s15420_s1 + $0xd70] sm:$0xff] }
 0x8da   : > { %10229 = vmatpush3.msra.mxu0 %v7521_v36  ;;  %10267 = vmatprep.subr.mxu1 %v7551_v37  ;;  %v2936_v36 = vld [vmem:[#allocation2 + $0x32] sm:$0xff] }
 0x8db   : > { %10230 = vmatprep.subr.mxu0 %v7520_v39  ;;  %10268 = vmatpush3.msra.mxu1 %v7551_v37  ;;  %v7622_v37 = vld [vmem:[%s15420_s1 + $0xdf0] sm:$0xff] }
 0x8dc   : > { %10231 = vmatpush3.msra.mxu0 %v7520_v39  ;;  %10269 = vmatprep.subr.mxu1 %v7550_v40  ;;  %v7605_v39 = vld [vmem:[%s15420_s1 + $0xd68] sm:$0xff] }
 0x8dd   : > { %10232 = vmatprep.subr.mxu0 %v7519_v41  ;;  %10270 = vmatpush3.msra.mxu1 %v7550_v40  ;;  %v7621_v40 = vld [vmem:[%s15420_s1 + $0xde8] sm:$0xff] }
 0x8de   : > { %10233 = vmatpush3.msra.mxu0 %v7519_v41  ;;  %10271 = vmatprep.subr.mxu1 %v7549_v5  ;;  %v7604_v41 = vld [vmem:[%s15420_s1 + $0xd60] sm:$0xff] }
 0x8df   : > { %10234 = vmatprep.subr.mxu0 %v7518_v38  ;;  %10272 = vmatpush3.msra.mxu1 %v7549_v5  ;;  %v7620_v5 = vld [vmem:[%s15420_s1 + $0xde0] sm:$0xff] }
 0x8e0   : > { %10235 = vmatpush3.msra.mxu0 %v7518_v38  ;;  %10273 = vmatprep.subr.mxu1 %v7548_v42  ;;  %v7619_v38 = vld [vmem:[%s15420_s1 + $0xdd8] sm:$0xff] }
 0x8e1   : > { %10236 = vmatprep.subr.mxu0 %v7517_v43  ;;  %10274 = vmatpush3.msra.mxu1 %v7548_v42  ;;  %v7602_v42 = vld [vmem:[%s15420_s1 + $0xd50] sm:$0xff] }
 0x8e2   : > { %10237 = vmatpush3.msra.mxu0 %v7517_v43  ;;  %10275 = vmatprep.subr.mxu1 %v7547_v32  ;;  %v7618_v43 = vld [vmem:[%s15420_s1 + $0xdd0] sm:$0xff] }
 0x8e3   : > { %10238 = vmatprep.subr.mxu0 %v7516_v44  ;;  %10276 = vmatpush3.msra.mxu1 %v7547_v32  ;;  %v7601_v32 = vld [vmem:[%s15420_s1 + $0xd48] sm:$0xff] }
 0x8e4   : > { %10239 = vmatpush3.msra.mxu0 %v7516_v44  ;;  %10277 = vmatprep.subr.mxu1 %v7546_v45  ;;  %v7617_v44 = vld [vmem:[%s15420_s1 + $0xdc8] sm:$0xff] }
 0x8e5   : > { %10240 = vmatprep.subr.mxu0 %v7515_v46  ;;  %10278 = vmatpush3.msra.mxu1 %v7546_v45  ;;  %v7600_v45 = vld [vmem:[%s15420_s1 + $0xd40] sm:$0xff] }
 0x8e6   : > { %10241 = vmatpush3.msra.mxu0 %v7515_v46  ;;  %10279 = vmatprep.subr.mxu1 %v7545_v47  ;;  %v7616_v46 = vld [vmem:[%s15420_s1 + $0xdc0] sm:$0xff] }
 0x8e7   : > { %10242 = vmatprep.subr.mxu0 %v7514_v48  ;;  %10280 = vmatpush3.msra.mxu1 %v7545_v47  ;;  %v7599_v47 = vld [vmem:[%s15420_s1 + $0xd38] sm:$0xff] }
 0x8e8   : > { %10243 = vmatpush3.msra.mxu0 %v7514_v48  ;;  %10281 = vmatprep.subr.mxu1 %v7544_v49  ;;  %v7615_v48 = vld [vmem:[%s15420_s1 + $0xdb8] sm:$0xff] }
 0x8e9   : > { %10244 = vmatprep.subr.mxu0 %v7513_v52  ;;  %10282 = vmatpush3.msra.mxu1 %v7544_v49  ;;  %v7598_v49 = vld [vmem:[%s15420_s1 + $0xd30] sm:$0xff] }
 0x8ea   : > { %10245 = vmatpush3.msra.mxu0 %v7513_v52  ;;  %10284 = vmatmul.mubr.f32.vlgmr.msra.gmra.mxu1 %v2649_v56  ;;  %v7614_v52 = vld [vmem:[%s15420_s1 + $0xdb0] sm:$0xff]  ;;  %v7596_v56 = vld [vmem:[%s15420_s1 + $0xd20] sm:$0xff] }
 0x8eb   : > { %10246 = vmatprep.subr.mxu0 %v7512_v54  ;;  %10321 = vmatprep.subr.mxu1 %v7591_v55 }
 0x8ec   : > { %10247 = vmatpush3.msra.mxu0 %v7512_v54  ;;  %10322 = vmatpush3.msra.mxu1 %v7591_v55  ;;  %v7597_v54 = vld [vmem:[%s15420_s1 + $0xd28] sm:$0xff] }
 0x8ed   : > { %10249 = vmatmul.mubr.f32.vlgmr.msra.gmra.mxu0 %v2461_v58  ;;  %10286 = vmatprep.subr.mxu0 %v7575_v57  ;;  %v7613_v55 = vld [vmem:[%s15420_s1 + $0xda8] sm:$0xff]  ;;  %v7595_v58 = vld [vmem:[%s15420_s1 + $0xd18] sm:$0xff] }
 0x8ee   : > { %10287 = vmatpush3.msra.mxu0 %v7575_v57  ;;  %10318 = vmatprep.mubr.f32.mxu0 %v2744_v61  ;;  %v7612_v57 = vld [vmem:[%s15420_s1 + $0xda0] sm:$0xff]  ;;  %v7594_v61 = vld [vmem:[%s15420_s1 + $0xd10] sm:$0xff] }
 0x8ef   : > { %10353 = vmatprep.mubr.f32.mxu1 %v2840_v0  ;;  %10288 = vmatprep.subr.mxu0 %v7574_v60  ;;  %v7593_v0 = vld [vmem:[%s15420_s1 + $0xd08] sm:$0xff] }
 0x8f0   : > { %10323 = vmatprep.subr.mxu1 %v7590_v63  ;;  %10289 = vmatpush3.msra.mxu0 %v7574_v60  ;;  %v7611_v60 = vld [vmem:[%s15420_s1 + $0xd98] sm:$0xff] }
 0x8f1   : > { %10324 = vmatpush3.msra.mxu1 %v7590_v63  ;;  %10290 = vmatprep.subr.mxu0 %v7573_v1  ;;  %v7610_v63 = vld [vmem:[%s15420_s1 + $0xd90] sm:$0xff] }
 0x8f2   : > { %10325 = vmatprep.subr.mxu1 %v7589_v2  ;;  %10291 = vmatpush3.msra.mxu0 %v7573_v1  ;;  %v7609_v1 = vld [vmem:[%s15420_s1 + $0xd88] sm:$0xff] }
 0x8f3   : > { %10326 = vmatpush3.msra.mxu1 %v7589_v2  ;;  %10292 = vmatprep.subr.mxu0 %v7572_v4  ;;  %v7592_v2 = vld [vmem:[%s15420_s1 + $0xd00] sm:$0xff] }
 0x8f4   : > { %10327 = vmatprep.subr.mxu1 %v7588_v6  ;;  %10293 = vmatpush3.msra.mxu0 %v7572_v4  ;;  %v7608_v4 = vld [vmem:[%s15420_s1 + $0xd80] sm:$0xff] }
 0x8f5   : > { %10328 = vmatpush3.msra.mxu1 %v7588_v6  ;;  %10294 = vmatprep.subr.mxu0 %v7571_v10  ;;  %v7639_v6 = vld [vmem:[%s15420_s1 + $0xe78] sm:$0xff] }
 0x8f6   : > { %10329 = vmatprep.subr.mxu1 %v7587_v7  ;;  %10295 = vmatpush3.msra.mxu0 %v7571_v10  ;;  %v2937_v10 = vld [vmem:[#allocation2 + $0x3a] sm:$0xff] }
 0x8f7   : > { %10330 = vmatpush3.msra.mxu1 %v7587_v7  ;;  %10296 = vmatprep.subr.mxu0 %v7570_v11  ;;  %v7655_v7 = vld [vmem:[%s15420_s1 + $0xef8] sm:$0xff] }
 0x8f8   : > { %10331 = vmatprep.subr.mxu1 %v7586_v33  ;;  %10297 = vmatpush3.msra.mxu0 %v7570_v11  ;;  %v7638_v11 = vld [vmem:[%s15420_s1 + $0xe70] sm:$0xff] }
 0x8f9   : > { %10332 = vmatpush3.msra.mxu1 %v7586_v33  ;;  %10298 = vmatprep.subr.mxu0 %v7569_v29  ;;  %v7654_v33 = vld [vmem:[%s15420_s1 + $0xef0] sm:$0xff] }
 0x8fa   : > { %10333 = vmatprep.subr.mxu1 %v7585_v34  ;;  %10299 = vmatpush3.msra.mxu0 %v7569_v29  ;;  %v7637_v29 = vld [vmem:[%s15420_s1 + $0xe68] sm:$0xff] }
 0x8fb   : > { %10334 = vmatpush3.msra.mxu1 %v7585_v34  ;;  %10300 = vmatprep.subr.mxu0 %v7568_v12  ;;  %v7636_v34 = vld [vmem:[%s15420_s1 + $0xe60] sm:$0xff] }
 0x8fc   : > { %10335 = vmatprep.subr.mxu1 %v7584_v8  ;;  %10301 = vmatpush3.msra.mxu0 %v7568_v12  ;;  %v7651_v12 = vld [vmem:[%s15420_s1 + $0xed8] sm:$0xff] }
 0x8fd   : > { %10336 = vmatpush3.msra.mxu1 %v7584_v8  ;;  %10302 = vmatprep.subr.mxu0 %v7567_v13  ;;  %v7634_v8 = vld [vmem:[%s15420_s1 + $0xe50] sm:$0xff] }
 0x8fe   : > { %10337 = vmatprep.subr.mxu1 %v7583_v14  ;;  %10303 = vmatpush3.msra.mxu0 %v7567_v13  ;;  %v7650_v13 = vld [vmem:[%s15420_s1 + $0xed0] sm:$0xff] }
 0x8ff   : > { %10338 = vmatpush3.msra.mxu1 %v7583_v14  ;;  %10304 = vmatprep.subr.mxu0 %v7566_v15  ;;  %v7633_v14 = vld [vmem:[%s15420_s1 + $0xe48] sm:$0xff] }
 0x900   : > { %10339 = vmatprep.subr.mxu1 %v7582_v16  ;;  %10305 = vmatpush3.msra.mxu0 %v7566_v15  ;;  %v7649_v15 = vld [vmem:[%s15420_s1 + $0xec8] sm:$0xff] }
 0x901   : > { %10340 = vmatpush3.msra.mxu1 %v7582_v16  ;;  %10306 = vmatprep.subr.mxu0 %v7565_v17  ;;  %v7632_v16 = vld [vmem:[%s15420_s1 + $0xe40] sm:$0xff] }
 0x902   : > { %10341 = vmatprep.subr.mxu1 %v7581_v18  ;;  %10307 = vmatpush3.msra.mxu0 %v7565_v17  ;;  %v7648_v17 = vld [vmem:[%s15420_s1 + $0xec0] sm:$0xff] }
 0x903   : > { %10342 = vmatpush3.msra.mxu1 %v7581_v18  ;;  %10308 = vmatprep.subr.mxu0 %v7564_v19  ;;  %v7631_v18 = vld [vmem:[%s15420_s1 + $0xe38] sm:$0xff] }
 0x904   : > { %10343 = vmatprep.subr.mxu1 %v7580_v20  ;;  %10309 = vmatpush3.msra.mxu0 %v7564_v19  ;;  %v7647_v19 = vld [vmem:[%s15420_s1 + $0xeb8] sm:$0xff] }
 0x905   : > { %10344 = vmatpush3.msra.mxu1 %v7580_v20  ;;  %10310 = vmatprep.subr.mxu0 %v7563_v21  ;;  %v7630_v20 = vld [vmem:[%s15420_s1 + $0xe30] sm:$0xff] }
 0x906   : > { %10345 = vmatprep.subr.mxu1 %v7579_v22  ;;  %10311 = vmatpush3.msra.mxu0 %v7563_v21  ;;  %v7646_v21 = vld [vmem:[%s15420_s1 + $0xeb0] sm:$0xff] }
 0x907   : > { %10346 = vmatpush3.msra.mxu1 %v7579_v22  ;;  %10312 = vmatprep.subr.mxu0 %v7562_v24  ;;  %v7629_v22 = vld [vmem:[%s15420_s1 + $0xe28] sm:$0xff] }
 0x908   : > { %10347 = vmatprep.subr.mxu1 %v7578_v25  ;;  %10313 = vmatpush3.msra.mxu0 %v7562_v24  ;;  %v7645_v24 = vld [vmem:[%s15420_s1 + $0xea8] sm:$0xff] }
 0x909   : > { %10348 = vmatpush3.msra.mxu1 %v7578_v25  ;;  %10314 = vmatprep.subr.mxu0 %v7561_v26  ;;  %v7628_v25 = vld [vmem:[%s15420_s1 + $0xe20] sm:$0xff] }
 0x90a   : > { %10349 = vmatprep.subr.mxu1 %v7577_v27  ;;  %10315 = vmatpush3.msra.mxu0 %v7561_v26  ;;  %v7644_v26 = vld [vmem:[%s15420_s1 + $0xea0] sm:$0xff] }
 0x90b   : > { %10350 = vmatpush3.msra.mxu1 %v7577_v27  ;;  %10316 = vmatprep.subr.mxu0 %v7560_v9  ;;  %v7627_v27 = vld [vmem:[%s15420_s1 + $0xe18] sm:$0xff] }
 0x90c   : > { %10351 = vmatprep.subr.mxu1 %v7576_v30  ;;  %10317 = vmatpush3.msra.mxu0 %v7560_v9  ;;  %v7643_v9 = vld [vmem:[%s15420_s1 + $0xe98] sm:$0xff] }
 0x90d   : > { %10352 = vmatpush3.msra.mxu1 %v7576_v30  ;;  %10319 = vmatmul.mubr.f32.vlgmr.msra.gmra.mxu0 %v2745_v62  ;;  %v7626_v30 = vld [vmem:[%s15420_s1 + $0xe10] sm:$0xff]  ;;  %v7625_v62 = vld [vmem:[%s15420_s1 + $0xe08] sm:$0xff] }
 0x90e   : > { %10354 = vmatmul.mubr.f32.vlgmr.msra.gmra.mxu1 %v2841_v3  ;;  %10356 = vmatprep.subr.mxu0 %v7607_v59  ;;  %v7624_v3 = vld [vmem:[%s15420_s1 + $0xe00] sm:$0xff] }
 0x90f   : > { %10391 = vmatprep.subr.mxu1 %v7623_v31  ;;  %10357 = vmatpush3.msra.mxu0 %v7607_v59  ;;  %v7642_v59 = vld [vmem:[%s15420_s1 + $0xe90] sm:$0xff] }
 0x910   : > { %10388 = vmatprep.mubr.f32.mxu0 %v2936_v36  ;;  %10392 = vmatpush3.msra.mxu1 %v7623_v31  ;;  %v7641_v31 = vld [vmem:[%s15420_s1 + $0xe88] sm:$0xff]  ;;  %v3129_v36 = vld [vmem:[#allocation2 + $0x51] sm:$0xff] }
 0x911   : > { %10423 = vmatprep.mubr.f32.mxu1 %v13007_v50  ;;  %10358 = vmatprep.subr.mxu0 %v7606_v35  ;;  %v7603_v50 = vld [vmem:[%s15420_s1 + $0xd58] sm:$0xff] }
 0x912   : > { %10393 = vmatprep.subr.mxu1 %v7622_v37  ;;  %10359 = vmatpush3.msra.mxu0 %v7606_v35  ;;  %v7640_v35 = vld [vmem:[%s15420_s1 + $0xe80] sm:$0xff] }
 0x913   : > { %10394 = vmatpush3.msra.mxu1 %v7622_v37  ;;  %10360 = vmatprep.subr.mxu0 %v7605_v39  ;;  %v9900_v37 = vpop.f32.mrf.mxu0 }
 0x914   : > { %10395 = vmatprep.subr.mxu1 %v7621_v40  ;;  %10361 = vmatpush3.msra.mxu0 %v7605_v39 }
 0x915   : > { %10396 = vmatpush3.msra.mxu1 %v7621_v40  ;;  %10362 = vmatprep.subr.mxu0 %v7604_v41  ;;  %v1643_v39 = vpop.f32.mrf.mxu0  ;;  %v9935_v40 = vpop.f32.mrf.mxu1 }
 0x916   : > { %10397 = vmatprep.subr.mxu1 %v7620_v5  ;;  %10363 = vmatpush3.msra.mxu0 %v7604_v41 }
 0x917   : > { %10398 = vmatpush3.msra.mxu1 %v7620_v5  ;;  %10364 = vmatprep.subr.mxu0 %v7603_v50  ;;  %v9970_v41 = vpop.f32.mrf.mxu0  ;;  %v1718_v5 = vpop.f32.mrf.mxu1 }
 0x918   : > { %10399 = vmatprep.subr.mxu1 %v7619_v38  ;;  %10365 = vmatpush3.msra.mxu0 %v7603_v50 }
 0x919   : > { %10400 = vmatpush3.msra.mxu1 %v7619_v38  ;;  %10366 = vmatprep.subr.mxu0 %v7602_v42  ;;  %v1812_v50 = vpop.f32.mrf.mxu0  ;;  %v10005_v38 = vpop.f32.mrf.mxu1 }
 0x91a   : > { %10401 = vmatprep.subr.mxu1 %v7618_v43  ;;  %10367 = vmatpush3.msra.mxu0 %v7602_v42  ;;  %v1724_v42 = vadd.f32 %v9935_v40, %v9900_v37 }
 0x91b   : > { %10402 = vmatpush3.msra.mxu1 %v7618_v43  ;;  %10368 = vmatprep.subr.mxu0 %v7601_v32  ;;  %v1719_v43 = vadd.f32 %v1718_v5, %v1643_v39 }
 0x91c   : > { %10403 = vmatprep.subr.mxu1 %v7617_v44  ;;  %10369 = vmatpush3.msra.mxu0 %v7601_v32  ;;  %v10040_v32 = vpop.f32.mrf.mxu0 }
 0x91d   : > { %10404 = vmatpush3.msra.mxu1 %v7617_v44  ;;  %10370 = vmatprep.subr.mxu0 %v7600_v45  ;;  %v1908_v44 = vpop.f32.mrf.mxu1 }
 0x91e   : > { %10405 = vmatprep.subr.mxu1 %v7616_v46  ;;  %10371 = vmatpush3.msra.mxu0 %v7600_v45  ;;  %v1822_v45 = vadd.f32 %v9970_v41, %v1724_v42  ;;  %v7680_v41 = vld [vmem:[%s15420_s1 + $0xfc0] sm:$0xff]  ;;  %v7678_v42 = vld [vmem:[%s15420_s1 + $0xfb0] sm:$0xff] }
 0x91f   : > { %10406 = vmatpush3.msra.mxu1 %v7616_v46  ;;  %10372 = vmatprep.subr.mxu0 %v7599_v47  ;;  %v1821_v46 = vadd.f32 %v1812_v50, %v1719_v43  ;;  %v7679_v50 = vld [vmem:[%s15420_s1 + $0xfb8] sm:$0xff]  ;;  %v7664_v43 = vld [vmem:[%s15420_s1 + $0xf40] sm:$0xff] }
 0x920   : > { %10407 = vmatprep.subr.mxu1 %v7615_v48  ;;  %10373 = vmatpush3.msra.mxu0 %v7599_v47  ;;  %v2004_v47 = vpop.f32.mrf.mxu0 }
 0x921   : > { %10408 = vmatpush3.msra.mxu1 %v7615_v48  ;;  %10374 = vmatprep.subr.mxu0 %v7598_v49  ;;  %v10075_v48 = vpop.f32.mrf.mxu1 }
 0x922   : > { %10409 = vmatprep.subr.mxu1 %v7614_v52  ;;  %10375 = vmatpush3.msra.mxu0 %v7598_v49  ;;  %v1918_v49 = vadd.f32 %v10005_v38, %v1822_v45  ;;  %v7662_v45 = vld [vmem:[%s15420_s1 + $0xf30] sm:$0xff] }
 0x923   : > { %10410 = vmatpush3.msra.mxu1 %v7614_v52  ;;  %10376 = vmatprep.subr.mxu0 %v7597_v54  ;;  %v1917_v52 = vadd.f32 %v1908_v44, %v1821_v46  ;;  %v7677_v44 = vld [vmem:[%s15420_s1 + $0xfa8] sm:$0xff]  ;;  %v7676_v46 = vld [vmem:[%s15420_s1 + $0xfa0] sm:$0xff] }
 0x924   : > { %10411 = vmatprep.subr.mxu1 %v7613_v55  ;;  %10377 = vmatpush3.msra.mxu0 %v7597_v54 }
 0x925   : > { %10412 = vmatpush3.msra.mxu1 %v7613_v55  ;;  %10378 = vmatprep.subr.mxu0 %v7596_v56  ;;  %v2100_v55 = vpop.f32.mrf.mxu1 }
 0x926   : > { %10413 = vmatprep.subr.mxu1 %v7612_v57  ;;  %10379 = vmatpush3.msra.mxu0 %v7596_v56  ;;  %v2013_v56 = vadd.f32 %v2004_v47, %v1917_v52  ;;  %v7675_v47 = vld [vmem:[%s15420_s1 + $0xf98] sm:$0xff]  ;;  %v7660_v52 = vld [vmem:[%s15420_s1 + $0xf20] sm:$0xff] }
 0x927   : > { %10414 = vmatpush3.msra.mxu1 %v7612_v57  ;;  %10380 = vmatprep.subr.mxu0 %v7595_v58 }
 0x928   : > { %10415 = vmatprep.subr.mxu1 %v7611_v60  ;;  %10381 = vmatpush3.msra.mxu0 %v7595_v58 }
 0x929   : > { %10416 = vmatpush3.msra.mxu1 %v7611_v60  ;;  %10382 = vmatprep.subr.mxu0 %v7594_v61  ;;  %v2109_v60 = vadd.f32 %v2100_v55, %v2013_v56  ;;  %v7659_v55 = vld [vmem:[%s15420_s1 + $0xf18] sm:$0xff]  ;;  %v7658_v56 = vld [vmem:[%s15420_s1 + $0xf10] sm:$0xff] }
 0x92a   : > { %10417 = vmatprep.subr.mxu1 %v7610_v63  ;;  %10383 = vmatpush3.msra.mxu0 %v7594_v61 }
 0x92b   : > { %10418 = vmatpush3.msra.mxu1 %v7610_v63  ;;  %10384 = vmatprep.subr.mxu0 %v7593_v0 }
 0x92c   : > { %10419 = vmatprep.subr.mxu1 %v7609_v1  ;;  %10385 = vmatpush3.msra.mxu0 %v7593_v0 }
 0x92d   : > { %10420 = vmatpush3.msra.mxu1 %v7609_v1  ;;  %10386 = vmatprep.subr.mxu0 %v7592_v2 }
 0x92e   : > { %10421 = vmatprep.subr.mxu1 %v7608_v4  ;;  %10387 = vmatpush3.msra.mxu0 %v7592_v2 }
 0x92f   : > { %10422 = vmatpush3.msra.mxu1 %v7608_v4  ;;  %10389 = vmatmul.mubr.f32.vlgmr.msra.gmra.mxu0 %v2937_v10 }
 0x930   : > { %10424 = vmatmul.mubr.f32.vlgmr.msra.gmra.mxu1 %v13009_v51  ;;  %10426 = vmatprep.subr.mxu0 %v7639_v6  ;;  %v7653_v51 = vld [vmem:[%s15420_s1 + $0xee8] sm:$0xff] }
 0x931   : > { %10461 = vmatprep.subr.mxu1 %v7655_v7  ;;  %10427 = vmatpush3.msra.mxu0 %v7639_v6 }
 0x932   : > { %10458 = vmatprep.mubr.f32.mxu0 %v12991_v28  ;;  %10462 = vmatpush3.msra.mxu1 %v7655_v7  ;;  %v7652_v28 = vld [vmem:[%s15420_s1 + $0xee0] sm:$0xff] }
 0x933   : > { %10493 = vmatprep.mubr.f32.mxu1 %v13016_v53  ;;  %10428 = vmatprep.subr.mxu0 %v7638_v11  ;;  %v7635_v53 = vld [vmem:[%s15420_s1 + $0xe58] sm:$0xff] }
 0x934   : > { %10463 = vmatprep.subr.mxu1 %v7654_v33  ;;  %10429 = vmatpush3.msra.mxu0 %v7638_v11 }
 0x935   : > { %10464 = vmatpush3.msra.mxu1 %v7654_v33  ;;  %10430 = vmatprep.subr.mxu0 %v7637_v29 }
 0x936   : > { %10465 = vmatprep.subr.mxu1 %v7653_v51  ;;  %10431 = vmatpush3.msra.mxu0 %v7637_v29 }
 0x937   : > { %10466 = vmatpush3.msra.mxu1 %v7653_v51  ;;  %10432 = vmatprep.subr.mxu0 %v7636_v34 }
 0x938   : > { %10467 = vmatprep.subr.mxu1 %v7652_v28  ;;  %10433 = vmatpush3.msra.mxu0 %v7636_v34 }
 0x939   : > { %10468 = vmatpush3.msra.mxu1 %v7652_v28  ;;  %10434 = vmatprep.subr.mxu0 %v7635_v53 }
 0x93a   : > { %10469 = vmatprep.subr.mxu1 %v7651_v12  ;;  %10435 = vmatpush3.msra.mxu0 %v7635_v53 }
 0x93b   : > { %10470 = vmatpush3.msra.mxu1 %v7651_v12  ;;  %10436 = vmatprep.subr.mxu0 %v7634_v8 }
 0x93c   : > { %10471 = vmatprep.subr.mxu1 %v7650_v13  ;;  %10437 = vmatpush3.msra.mxu0 %v7634_v8 }
 0x93d   : > { %10472 = vmatpush3.msra.mxu1 %v7650_v13  ;;  %10438 = vmatprep.subr.mxu0 %v7633_v14 }
 0x93e   : > { %10473 = vmatprep.subr.mxu1 %v7649_v15  ;;  %10439 = vmatpush3.msra.mxu0 %v7633_v14 }
 0x93f   : > { %10474 = vmatpush3.msra.mxu1 %v7649_v15  ;;  %10440 = vmatprep.subr.mxu0 %v7632_v16 }
 0x940   : > { %10475 = vmatprep.subr.mxu1 %v7648_v17  ;;  %10441 = vmatpush3.msra.mxu0 %v7632_v16 }
 0x941   : > { %10476 = vmatpush3.msra.mxu1 %v7648_v17  ;;  %10442 = vmatprep.subr.mxu0 %v7631_v18 }
 0x942   : > { %10477 = vmatprep.subr.mxu1 %v7647_v19  ;;  %10443 = vmatpush3.msra.mxu0 %v7631_v18 }
 0x943   : > { %10478 = vmatpush3.msra.mxu1 %v7647_v19  ;;  %10444 = vmatprep.subr.mxu0 %v7630_v20  ;;  %v7671_v19 = vld [vmem:[%s15420_s1 + $0xf78] sm:$0xff] }
 0x944   : > { %10479 = vmatprep.subr.mxu1 %v7646_v21  ;;  %10445 = vmatpush3.msra.mxu0 %v7630_v20  ;;  %v7687_v20 = vld [vmem:[%s15420_s1 + $0xff8] sm:$0xff] }
 0x945   : > { %10480 = vmatpush3.msra.mxu1 %v7646_v21  ;;  %10446 = vmatprep.subr.mxu0 %v7629_v22  ;;  %v7670_v21 = vld [vmem:[%s15420_s1 + $0xf70] sm:$0xff] }
 0x946   : > { %10481 = vmatprep.subr.mxu1 %v7645_v24  ;;  %10447 = vmatpush3.msra.mxu0 %v7629_v22  ;;  %v7686_v22 = vld [vmem:[%s15420_s1 + $0xff0] sm:$0xff] }
 0x947   : > { %10482 = vmatpush3.msra.mxu1 %v7645_v24  ;;  %10448 = vmatprep.subr.mxu0 %v7628_v25  ;;  %v7669_v24 = vld [vmem:[%s15420_s1 + $0xf68] sm:$0xff] }
 0x948   : > { %10483 = vmatprep.subr.mxu1 %v7644_v26  ;;  %10449 = vmatpush3.msra.mxu0 %v7628_v25  ;;  %v7685_v25 = vld [vmem:[%s15420_s1 + $0xfe8] sm:$0xff] }
 0x949   : > { %10484 = vmatpush3.msra.mxu1 %v7644_v26  ;;  %10450 = vmatprep.subr.mxu0 %v7627_v27  ;;  %v7668_v26 = vld [vmem:[%s15420_s1 + $0xf60] sm:$0xff] }
 0x94a   : > { %10485 = vmatprep.subr.mxu1 %v7643_v9  ;;  %10451 = vmatpush3.msra.mxu0 %v7627_v27  ;;  %v7684_v27 = vld [vmem:[%s15420_s1 + $0xfe0] sm:$0xff] }
 0x94b   : > { %10486 = vmatpush3.msra.mxu1 %v7643_v9  ;;  %10452 = vmatprep.subr.mxu0 %v7626_v30  ;;  %v7667_v9 = vld [vmem:[%s15420_s1 + $0xf58] sm:$0xff] }
 0x94c   : > { %10487 = vmatprep.subr.mxu1 %v7642_v59  ;;  %10453 = vmatpush3.msra.mxu0 %v7626_v30  ;;  %v7683_v30 = vld [vmem:[%s15420_s1 + $0xfd8] sm:$0xff] }
 0x94d   : > { %10488 = vmatpush3.msra.mxu1 %v7642_v59  ;;  %10454 = vmatprep.subr.mxu0 %v7625_v62  ;;  %v7666_v59 = vld [vmem:[%s15420_s1 + $0xf50] sm:$0xff] }
 0x94e   : > { %10489 = vmatprep.subr.mxu1 %v7641_v31  ;;  %10455 = vmatpush3.msra.mxu0 %v7625_v62  ;;  %v7682_v62 = vld [vmem:[%s15420_s1 + $0xfd0] sm:$0xff] }
 0x94f   : > { %10490 = vmatpush3.msra.mxu1 %v7641_v31  ;;  %10456 = vmatprep.subr.mxu0 %v7624_v3  ;;  %v7665_v31 = vld [vmem:[%s15420_s1 + $0xf48] sm:$0xff] }
 0x950   : > { %10491 = vmatprep.subr.mxu1 %v7640_v35  ;;  %10457 = vmatpush3.msra.mxu0 %v7624_v3  ;;  %v7681_v3 = vld [vmem:[%s15420_s1 + $0xfc8] sm:$0xff] }
 0x951   : > { %10492 = vmatpush3.msra.mxu1 %v7640_v35  ;;  %10459 = vmatmul.mubr.f32.vlgmr.msra.gmra.mxu0 %v3129_v36 }
 0x952   : > { %10494 = vmatmul.mubr.f32.vlgmr.msra.gmra.mxu1 %v13106_v23  ;;  %v2014_v23 = vadd.f32 %v10040_v32, %v1918_v49  ;;  %10496 = vmatprep.subr.mxu0 %v7671_v19  ;;  %v7663_v32 = vld [vmem:[%s15420_s1 + $0xf38] sm:$0xff]  ;;  %v7674_v49 = vld [vmem:[%s15420_s1 + $0xf90] sm:$0xff] }
 0x953   : > { %10531 = vmatprep.subr.mxu1 %v7687_v20  ;;  %10497 = vmatpush3.msra.mxu0 %v7671_v19  ;;  %v7694_v19 = vld [vmem:[%s15420_s1 + $0x1030] sm:$0xff] }
 0x954   : > { %v2110_v58 = vadd.f32 %v10075_v48, %v2014_v23  ;;  %10532 = vmatpush3.msra.mxu1 %v7687_v20  ;;  %10498 = vmatprep.subr.mxu0 %v7670_v21  ;;  %v7661_v48 = vld [vmem:[%s15420_s1 + $0xf28] sm:$0xff]  ;;  %v7672_v23 = vld [vmem:[%s15420_s1 + $0xf80] sm:$0xff] }
 0x955   : > { %10533 = vmatprep.subr.mxu1 %v7686_v22  ;;  %10499 = vmatpush3.msra.mxu0 %v7670_v21  ;;  %v7693_v20 = vld [vmem:[%s15420_s1 + $0x1028] sm:$0xff]  ;;  %v7692_v21 = vld [vmem:[%s15420_s1 + $0x1020] sm:$0xff] }
 0x956   : > { %10534 = vmatpush3.msra.mxu1 %v7686_v22  ;;  %10500 = vmatprep.subr.mxu0 %v7669_v24  ;;  %v7691_v22 = vld [vmem:[%s15420_s1 + $0x1018] sm:$0xff] }
 0x957   : > { %10535 = vmatprep.subr.mxu1 %v7685_v25  ;;  %10501 = vmatpush3.msra.mxu0 %v7669_v24  ;;  %v7690_v24 = vld [vmem:[%s15420_s1 + $0x1010] sm:$0xff] }
 0x958   : > { %10536 = vmatpush3.msra.mxu1 %v7685_v25  ;;  %10502 = vmatprep.subr.mxu0 %v7668_v26  ;;  %v7689_v25 = vld [vmem:[%s15420_s1 + $0x1008] sm:$0xff] }
 0x959   : > { %10537 = vmatprep.subr.mxu1 %v7684_v27  ;;  %10503 = vmatpush3.msra.mxu0 %v7668_v26  ;;  %v7688_v26 = vld [vmem:[%s15420_s1 + $0x1000] sm:$0xff] }
 0x95a   : > { %10538 = vmatpush3.msra.mxu1 %v7684_v27  ;;  %10504 = vmatprep.subr.mxu0 %v7667_v9 }
 0x95b   : > { %10539 = vmatprep.subr.mxu1 %v7683_v30  ;;  %10505 = vmatpush3.msra.mxu0 %v7667_v9 }
 0x95c   : > { %10540 = vmatpush3.msra.mxu1 %v7683_v30  ;;  %10506 = vmatprep.subr.mxu0 %v7666_v59 }
 0x95d   : > { %10541 = vmatprep.subr.mxu1 %v7682_v62  ;;  %10507 = vmatpush3.msra.mxu0 %v7666_v59 }
 0x95e   : > { %10542 = vmatpush3.msra.mxu1 %v7682_v62  ;;  %10508 = vmatprep.subr.mxu0 %v7665_v31 }
 0x95f   : > { %10543 = vmatprep.subr.mxu1 %v7681_v3  ;;  %10509 = vmatpush3.msra.mxu0 %v7665_v31 }
 0x960   : > { %10544 = vmatpush3.msra.mxu1 %v7681_v3  ;;  %10510 = vmatprep.subr.mxu0 %v7664_v43 }
 0x961   : > { %10545 = vmatprep.subr.mxu1 %v7680_v41  ;;  %10511 = vmatpush3.msra.mxu0 %v7664_v43 }
 0x962   : > { %10546 = vmatpush3.msra.mxu1 %v7680_v41  ;;  %10512 = vmatprep.subr.mxu0 %v7663_v32 }
 0x963   : > { %10547 = vmatprep.subr.mxu1 %v7679_v50  ;;  %10513 = vmatpush3.msra.mxu0 %v7663_v32 }
 0x964   : > { %10548 = vmatpush3.msra.mxu1 %v7679_v50  ;;  %10514 = vmatprep.subr.mxu0 %v7662_v45 }
 0x965   : > { %v10145_v61 = vpop.f32.mrf.mxu1  ;;  %10549 = vmatprep.subr.mxu1 %v7678_v42  ;;  %10515 = vmatpush3.msra.mxu0 %v7662_v45 }
 0x966   : > { %10550 = vmatpush3.msra.mxu1 %v7678_v42  ;;  %10516 = vmatprep.subr.mxu0 %v7661_v48 }
 0x967   : > { %v2292_v1 = vpop.f32.mrf.mxu1  ;;  %10551 = vmatprep.subr.mxu1 %v7677_v44  ;;  %10517 = vmatpush3.msra.mxu0 %v7661_v48 }
 0x968   : > { %10552 = vmatpush3.msra.mxu1 %v7677_v44  ;;  %10518 = vmatprep.subr.mxu0 %v7660_v52 }
 0x969   : > { %10553 = vmatprep.subr.mxu1 %v7676_v46  ;;  %10519 = vmatpush3.msra.mxu0 %v7660_v52 }
 0x96a   : > { %10554 = vmatpush3.msra.mxu1 %v7676_v46  ;;  %10520 = vmatprep.subr.mxu0 %v7659_v55 }
 0x96b   : > { %10555 = vmatprep.subr.mxu1 %v7675_v47  ;;  %10521 = vmatpush3.msra.mxu0 %v7659_v55 }
 0x96c   : > { %10556 = vmatpush3.msra.mxu1 %v7675_v47  ;;  %10522 = vmatprep.subr.mxu0 %v7658_v56 }
 0x96d   : > { %v10110_v54 = vpop.f32.mrf.mxu0  ;;  %10557 = vmatprep.subr.mxu1 %v7674_v49  ;;  %10523 = vmatpush3.msra.mxu0 %v7658_v56 }
 0x96e   : > { %v2206_v63 = vadd.f32 %v10110_v54, %v2110_v58  ;;  %v7673_v54 = vld [vmem:[%s15420_s1 + $0xf88] sm:$0xff]  ;;  %10558 = vmatpush3.msra.mxu1 %v7674_v49  ;;  %v7656_v58 = vld [vmem:[%s15420_s1 + $0xf00] sm:$0xff] }
 0x96f   : > { %v2196_v57 = vpop.f32.mrf.mxu0  ;;  %10559 = vmatprep.subr.mxu1 %v7673_v54 }
 0x970   : > { %v2205_v0 = vadd.f32 %v2196_v57, %v2109_v60  ;;  %v2302_v4 = vadd.f32 %v10145_v61, %v2206_v63  ;;  %10560 = vmatpush3.msra.mxu1 %v7673_v54  ;;  %v7657_v57 = vld [vmem:[%s15420_s1 + $0xf08] sm:$0xff]  ;;  %v7703_v60 = vld [vmem:[%s15420_s1 + $0x1078] sm:$0xff] }
 0x971   : > { %10561 = vmatprep.subr.mxu1 %v7672_v23  ;;  %10524 = vmatprep.subr.mxu0 %v7657_v57 }
 0x972   : > { %v2301_v6 = vadd.f32 %v2292_v1, %v2205_v0  ;;  %10562 = vmatpush3.msra.mxu1 %v7672_v23  ;;  %10525 = vmatpush3.msra.mxu0 %v7657_v57  ;;  %v13596_v1 = vld [vmem:[%s15421_s2] ss:$0 sm:$0xff] }
 0x973   : > { %10526 = vmatprep.subr.mxu0 %v7656_v58 }
 0x974   : > { %10527 = vmatpush3.msra.mxu0 %v7656_v58 }
 0x975   : > { %10566 = vmatprep.subr.mxu0 %v7703_v60 }
 0x986   : > { %v10215_v9 = vpop.f32.mrf.mxu1 }
 0x988   : > { %v2564_v59 = vpop.f32.mrf.mxu1 }
 0x98d   : > { %v10180_v2 = vpop.f32.mrf.mxu0 }
 0x98e   : > { %v2398_v7 = vadd.f32 %v10180_v2, %v2302_v4 }
 0x98f   : > { %v2388_v10 = vpop.f32.mrf.mxu0 }
 0x990   : > { %v2397_v11 = vadd.f32 %v2388_v10, %v2301_v6  ;;  %v13603_v6 = vld [vmem:[%s15422_s3] ss:$0 sm:$0xff] }
 0x992   : > { %v2399_v33 = vadd.f32 %v2398_v7, %v2397_v11 }
 0x994   : > { %2400 = vadd.xlane.f32.xlu0 %v2399_v33 }
 0x9aa   : > { %v10285_v31 = vpop.f32.mrf.mxu1 }
 0x9ad   : > { %v10250_v30 = vpop.f32.mrf.mxu0 }
 0x9af   : > { %v2639_v62 = vpop.f32.mrf.mxu0 }
 0x9cd   : > { %v10320_v3 = vpop.f32.mrf.mxu0 }
 0xa1d   : > { %v2401_v29 = vpop.xlane.xlu0 %2400 }
 0xa1e   : > { %v2402_v51 = vrot.slane %v2401_v29, 4 }
 0xa20   : > { %v2403_v34 = vadd.f32 %v2402_v51, %v2401_v29 }
 0xa22   : > { %v2404_v28 = vrot.slane %v2403_v34, 2 }
 0xa24   : > { %v2405_v53 = vadd.f32 %v2404_v28, %v2403_v34 }
 0xa26   : > { %v2406_v12 = vrot.slane %v2405_v53, 1 }
 0xa28   : > { %v2407_v8 = vadd.f32 %v2406_v12, %v2405_v53  ;;  %v7702_v53 = vld [vmem:[%s15420_s1 + $0x1070] sm:$0xff] }
 0xa2a   : > { %11774 = vpush %v2407_v8  ;;  %v7701_v8 = vld [vmem:[%s15420_s1 + $0x1068] sm:$0xff] }
 0xa5b   : > { %s11775_s18 = spop %11774 }
 0xa5c   : > { %s2411_s19 = smul.f32 0.00048828125, %s11775_s18 }
 0xa5e   : > { %v2412_v13 = vstv %s2411_s19 }
 0xa5f   : > { %v13486_v14 = vsub.f32 %v2397_v11, %v2412_v13  ;;  %v13488_v15 = vsub.f32 %v2398_v7, %v2412_v13  ;;  %v7700_v13 = vld [vmem:[%s15420_s1 + $0x1060] sm:$0xff] }
 0xa61   : > { %v2415_v16 = vmul.f32 %v13486_v14, %v13486_v14  ;;  %v2416_v17 = vmul.f32 %v13488_v15, %v13488_v15 }
 0xa63   : > { %v2417_v18 = vadd.f32 %v2416_v17, %v2415_v16  ;;  %v7697_v16 = vld [vmem:[%s15420_s1 + $0x1048] sm:$0xff]  ;;  %v7696_v17 = vld [vmem:[%s15420_s1 + $0x1040] sm:$0xff] }
 0xa65   : > { %2418 = vadd.xlane.f32.xlu1 %v2417_v18  ;;  %v7695_v18 = vld [vmem:[%s15420_s1 + $0x1038] sm:$0xff] }
 0xaee   : > { %v2419_v35 = vpop.xlane.xlu1 %2418 }
 0xaef   : > { %v2420_v36 = vrot.slane %v2419_v35, 4 }
 0xaf1   : > { %v2421_v37 = vadd.f32 %v2420_v36, %v2419_v35  ;;  %v2645_v35 = vadd.f32 %v10250_v30, %v10215_v9  ;;  %v2640_v36 = vadd.f32 %v2639_v62, %v2564_v59  ;;  %v7736_v9 = vld [vmem:[%s15420_s1 + $0x1170] sm:$0xff]  ;;  %v7735_v59 = vld [vmem:[%s15420_s1 + $0x1168] sm:$0xff] }
 0xaf2   : > { %v7720_v30 = vld [vmem:[%s15420_s1 + $0x10f0] sm:$0xff]  ;;  %v7719_v62 = vld [vmem:[%s15420_s1 + $0x10e8] sm:$0xff] }
 0xaf3   : > { %v2422_v39 = vrot.slane %v2421_v37, 2 }
 0xaf5   : > { %v2423_v40 = vadd.f32 %v2422_v39, %v2421_v37  ;;  %v2733_v37 = vpop.f32.mrf.mxu1  ;;  %v2829_v39 = vpop.f32.mrf.mxu0 }
 0xaf6   : > { %v2742_v41 = vadd.f32 %v2733_v37, %v2640_v36  ;;  %v7717_v36 = vld [vmem:[%s15420_s1 + $0x10d8] sm:$0xff]  ;;  %v7732_v37 = vld [vmem:[%s15420_s1 + $0x1150] sm:$0xff] }
 0xaf7   : > { %v2424_v5 = vrot.slane %v2423_v40, 1  ;;  %v10390_v50 = vpop.f32.mrf.mxu0 }
 0xaf8   : > { %v2838_v42 = vadd.f32 %v2829_v39, %v2742_v41  ;;  %v7716_v39 = vld [vmem:[%s15420_s1 + $0x10d0] sm:$0xff] }
 0xaf9   : > { %v2425_v38 = vadd.f32 %v2424_v5, %v2423_v40  ;;  %v2743_v40 = vadd.f32 %v10285_v31, %v2645_v35  ;;  %v10355_v5 = vpop.f32.mrf.mxu1  ;;  %v3021_v32 = vpop.f32.mrf.mxu0  ;;  %v7734_v31 = vld [vmem:[%s15420_s1 + $0x1160] sm:$0xff]  ;;  %v7733_v35 = vld [vmem:[%s15420_s1 + $0x1158] sm:$0xff] }
 0xafb   : > { %11776 = vpush %v2425_v38  ;;  %v2839_v38 = vadd.f32 %v10320_v3, %v2743_v40  ;;  %v2925_v43 = vpop.f32.mrf.mxu1  ;;  %v10460_v47 = vpop.f32.mrf.mxu0  ;;  %v7718_v3 = vld [vmem:[%s15420_s1 + $0x10e0] sm:$0xff] }
 0xafc   : > { %v2934_v45 = vadd.f32 %v2925_v43, %v2838_v42  ;;  %v7730_v43 = vld [vmem:[%s15420_s1 + $0x1140] sm:$0xff] }
 0xafd   : > { %v2935_v44 = vadd.f32 %v10355_v5, %v2839_v38  ;;  %v10425_v46 = vpop.f32.mrf.mxu1  ;;  %v3213_v54 = vpop.f32.mrf.mxu0  ;;  %v7731_v38 = vld [vmem:[%s15420_s1 + $0x1148] sm:$0xff] }
 0xafe   : > { %v3030_v49 = vadd.f32 %v3021_v32, %v2934_v45 }
 0xaff   : > { %v3031_v48 = vadd.f32 %v10390_v50, %v2935_v44  ;;  %v3117_v52 = vpop.f32.mrf.mxu1  ;;  %v7729_v44 = vld [vmem:[%s15420_s1 + $0x1138] sm:$0xff] }
 0xb00   : > { %v3126_v23 = vadd.f32 %v3117_v52, %v3030_v49  ;;  %v7714_v49 = vld [vmem:[%s15420_s1 + $0x10c0] sm:$0xff] }
 0xb01   : > { %v3127_v55 = vadd.f32 %v10425_v46, %v3031_v48  ;;  %v10495_v56 = vpop.f32.mrf.mxu1  ;;  %v7728_v46 = vld [vmem:[%s15420_s1 + $0x1130] sm:$0xff]  ;;  %v7715_v48 = vld [vmem:[%s15420_s1 + $0x10c8] sm:$0xff]  ;;  %v7726_v52 = vld [vmem:[%s15420_s1 + $0x1120] sm:$0xff] }
 0xb03   : > { %v3223_v58 = vadd.f32 %v10460_v47, %v3127_v55  ;;  %v7727_v47 = vld [vmem:[%s15420_s1 + $0x1128] sm:$0xff]  ;;  %v7725_v55 = vld [vmem:[%s15420_s1 + $0x1118] sm:$0xff] }
 0xb2c   : > { %s11777_s17 = spop %11776 }
 0xb2d   : > { %s2429_s18 = smul.f32 0.00048828125, %s11777_s17 }
 0xb2f   : > { %s2430_s19 = sadd.f32 1e-05, %s2429_s18 }
 0xb31   : > { %v2431_v61 = vstv %s2430_s19 }
 0xb32   : > { %11831 = vrsqrt.f32 %v2431_v61  ;;  %v3309_v61 = vpop.f32.mrf.mxu1 }
 0xb3f   : > { %v11832_v63 = vpop.eup %11831 }
 0xb40   : > { %11778 = vpush %v11832_v63 }
 0xb71   : > { %s11779_s20 = spop %11778 }
 0xb72   : > { %v2434_v0 = vstv %s11779_s20 }
 0xb73   : > { %v2435_v2 = vmul.f32 %v2434_v0, %v13486_v14  ;;  %v2436_v4 = vmul.f32 %v2434_v0, %v13488_v15  ;;  %v7699_v14 = vld [vmem:[%s15420_s1 + $0x1058] sm:$0xff]  ;;  %v7698_v15 = vld [vmem:[%s15420_s1 + $0x1050] sm:$0xff]  ;;  %v3319_v0 = vadd.f32 %v10495_v56, %v3223_v58  ;;  %v7711_v58 = vld [vmem:[%s15420_s1 + $0x10a8] sm:$0xff] }
 0xb74   : > { %v7712_v56 = vld [vmem:[%s15420_s1 + $0x10b0] sm:$0xff] }
 0xb75   : > { %v2444_v10 = vmul.f32 %v13596_v1, %v2435_v2  ;;  %v2445_v7 = vmul.f32 %v13596_v1, %v2436_v4 }
 0xb77   : > { %v2453_v11 = vadd.f32 %v13603_v6, %v2444_v10  ;;  %v2454_v33 = vadd.f32 %v13603_v6, %v2445_v7 }
 0xb79   : > { %v2455_v29 = vmax.f32 %v2453_v11, 0.0  ;;  %v2456_v51 = vmax.f32 %v2454_v33, 0.0 }
 0xb7b   : > { %2458 = vst [vmem:[#allocation2 + $0x61] sm:$0xff] %v2455_v29  ;;  %2459 = vst [vmem:[#allocation2 + $0x69] sm:$0xff] %v2456_v51  ;;  %10563 = vmatprep.mubr.f32.mxu1 %v2455_v29 }
 0xb7c   : > { %10564 = vmatmul.mubr.f32.vlgmr.msra.gmra.mxu1 %v2456_v51 }
 0xb82   : > { %v3320_v34 = vld [vmem:[#allocation2 + $0x60] sm:$0xff]  ;;  %v3321_v28 = vld [vmem:[#allocation2 + $0x68] sm:$0xff] }
 0xb83   : > { %10528 = vmatprep.mubr.f32.mxu0 %v3320_v34  ;;  %v3512_v12 = vld [vmem:[#allocation2 + $0x62] sm:$0xff]  ;;  %v3513_v27 = vld [vmem:[#allocation2 + $0x6a] sm:$0xff] }
 0xb84   : > { %10529 = vmatmul.mubr.f32.vlgmr.msra.gmra.mxu0 %v3321_v28 }
 0xb85   : > { %10567 = vmatpush3.msra.mxu0 %v7703_v60  ;;  %10598 = vmatprep.mubr.f32.mxu0 %v3512_v12  ;;  %v3222_v60 = vadd.f32 %v3213_v54, %v3126_v23  ;;  %v7713_v54 = vld [vmem:[%s15420_s1 + $0x10b8] sm:$0xff]  ;;  %v7724_v23 = vld [vmem:[%s15420_s1 + $0x1110] sm:$0xff] }
 0xb86   : > { %10568 = vmatprep.subr.mxu0 %v7702_v53 }
 0xb87   : > { %10569 = vmatpush3.msra.mxu0 %v7702_v53  ;;  %v3318_v2 = vadd.f32 %v3309_v61, %v3222_v60  ;;  %v7722_v60 = vld [vmem:[%s15420_s1 + $0x1100] sm:$0xff] }
 0xb88   : > { %10570 = vmatprep.subr.mxu0 %v7701_v8  ;;  %v7710_v61 = vld [vmem:[%s15420_s1 + $0x10a0] sm:$0xff] }
 0xb89   : > { %10571 = vmatpush3.msra.mxu0 %v7701_v8 }
 0xb8a   : > { %10572 = vmatprep.subr.mxu0 %v7700_v13 }
 0xb8b   : > { %10573 = vmatpush3.msra.mxu0 %v7700_v13 }
 0xb8c   : > { %10574 = vmatprep.subr.mxu0 %v7699_v14 }
 0xb8d   : > { %10575 = vmatpush3.msra.mxu0 %v7699_v14 }
 0xb8e   : > { %10576 = vmatprep.subr.mxu0 %v7698_v15 }
 0xb8f   : > { %10577 = vmatpush3.msra.mxu0 %v7698_v15 }
 0xb90   : > { %10578 = vmatprep.subr.mxu0 %v7697_v16 }
 0xb91   : > { %10579 = vmatpush3.msra.mxu0 %v7697_v16 }
 0xb92   : > { %10580 = vmatprep.subr.mxu0 %v7696_v17 }
 0xb93   : > { %10581 = vmatpush3.msra.mxu0 %v7696_v17 }
 0xb94   : > { %10582 = vmatprep.subr.mxu0 %v7695_v18 }
 0xb95   : > { %10583 = vmatpush3.msra.mxu0 %v7695_v18 }
 0xb96   : > { %10584 = vmatprep.subr.mxu0 %v7694_v19 }
 0xb97   : > { %10585 = vmatpush3.msra.mxu0 %v7694_v19 }
 0xb98   : > { %10586 = vmatprep.subr.mxu0 %v7693_v20 }
 0xb99   : > { %10587 = vmatpush3.msra.mxu0 %v7693_v20 }
 0xb9a   : > { %10588 = vmatprep.subr.mxu0 %v7692_v21 }
 0xb9b   : > { %10589 = vmatpush3.msra.mxu0 %v7692_v21 }
 0xb9c   : > { %10590 = vmatprep.subr.mxu0 %v7691_v22 }
 0xb9d   : > { %10591 = vmatpush3.msra.mxu0 %v7691_v22 }
 0xb9e   : > { %10592 = vmatprep.subr.mxu0 %v7690_v24 }
 0xb9f   : > { %10593 = vmatpush3.msra.mxu0 %v7690_v24 }
 0xba0   : > { %10594 = vmatprep.subr.mxu0 %v7689_v25 }
 0xba1   : > { %10595 = vmatpush3.msra.mxu0 %v7689_v25 }
 0xba2   : > { %10596 = vmatprep.subr.mxu0 %v7688_v26 }
 0xba3   : > { %10597 = vmatpush3.msra.mxu0 %v7688_v26  ;;  %v7737_v26 = vld [vmem:[%s15420_s1 + $0x1178] sm:$0xff] }
 0xba4   : > { %10599 = vmatmul.mubr.f32.vlgmr.msra.gmra.mxu0 %v3513_v27  ;;  %v7721_v27 = vld [vmem:[%s15420_s1 + $0x10f8] sm:$0xff]  ;;  %10601 = vmatprep.subr.mxu1 %v7737_v26 }
 0xba5   : > { %10636 = vmatprep.subr.mxu0 %v7721_v27  ;;  %10602 = vmatpush3.msra.mxu1 %v7737_v26  ;;  %v7746_v26 = vld [vmem:[%s15420_s1 + $0x11c0] sm:$0xff] }
 0xba6   : > { %10637 = vmatpush3.msra.mxu0 %v7721_v27  ;;  %10603 = vmatprep.subr.mxu1 %v7736_v9  ;;  %v7745_v27 = vld [vmem:[%s15420_s1 + $0x11b8] sm:$0xff] }
 0xba7   : > { %10638 = vmatprep.subr.mxu0 %v7720_v30  ;;  %10604 = vmatpush3.msra.mxu1 %v7736_v9  ;;  %v7744_v9 = vld [vmem:[%s15420_s1 + $0x11b0] sm:$0xff] }
 0xba8   : > { %10639 = vmatpush3.msra.mxu0 %v7720_v30  ;;  %10605 = vmatprep.subr.mxu1 %v7735_v59  ;;  %v7743_v30 = vld [vmem:[%s15420_s1 + $0x11a8] sm:$0xff] }
 0xba9   : > { %10640 = vmatprep.subr.mxu0 %v7719_v62  ;;  %10606 = vmatpush3.msra.mxu1 %v7735_v59  ;;  %v7742_v59 = vld [vmem:[%s15420_s1 + $0x11a0] sm:$0xff] }
 0xbaa   : > { %10641 = vmatpush3.msra.mxu0 %v7719_v62  ;;  %10607 = vmatprep.subr.mxu1 %v7734_v31  ;;  %v7741_v62 = vld [vmem:[%s15420_s1 + $0x1198] sm:$0xff] }
 0xbab   : > { %10642 = vmatprep.subr.mxu0 %v7718_v3  ;;  %10608 = vmatpush3.msra.mxu1 %v7734_v31  ;;  %v7740_v31 = vld [vmem:[%s15420_s1 + $0x1190] sm:$0xff] }
 0xbac   : > { %10643 = vmatpush3.msra.mxu0 %v7718_v3  ;;  %10609 = vmatprep.subr.mxu1 %v7733_v35  ;;  %v7739_v3 = vld [vmem:[%s15420_s1 + $0x1188] sm:$0xff] }
 0xbad   : > { %10644 = vmatprep.subr.mxu0 %v7717_v36  ;;  %10610 = vmatpush3.msra.mxu1 %v7733_v35  ;;  %v7738_v35 = vld [vmem:[%s15420_s1 + $0x1180] sm:$0xff] }
 0xbae   : > { %10645 = vmatpush3.msra.mxu0 %v7717_v36  ;;  %10611 = vmatprep.subr.mxu1 %v7732_v37 }
 0xbaf   : > { %10646 = vmatprep.subr.mxu0 %v7716_v39  ;;  %10612 = vmatpush3.msra.mxu1 %v7732_v37 }
 0xbb0   : > { %10647 = vmatpush3.msra.mxu0 %v7716_v39  ;;  %10613 = vmatprep.subr.mxu1 %v7731_v38 }
 0xbb1   : > { %10614 = vmatpush3.msra.mxu1 %v7731_v38  ;;  %10648 = vmatprep.subr.mxu0 %v7715_v48 }
 0xbb2   : > { %10615 = vmatprep.subr.mxu1 %v7730_v43  ;;  %10649 = vmatpush3.msra.mxu0 %v7715_v48 }
 0xbb3   : > { %10616 = vmatpush3.msra.mxu1 %v7730_v43  ;;  %10650 = vmatprep.subr.mxu0 %v7714_v49 }
 0xbb4   : > { %10617 = vmatprep.subr.mxu1 %v7729_v44  ;;  %10651 = vmatpush3.msra.mxu0 %v7714_v49 }
 0xbb5   : > { %10618 = vmatpush3.msra.mxu1 %v7729_v44  ;;  %10652 = vmatprep.subr.mxu0 %v7713_v54 }
 0xbb6   : > { %10619 = vmatprep.subr.mxu1 %v7728_v46  ;;  %10653 = vmatpush3.msra.mxu0 %v7713_v54 }
 0xbb7   : > { %10620 = vmatpush3.msra.mxu1 %v7728_v46  ;;  %10654 = vmatprep.subr.mxu0 %v7712_v56 }
 0xbb8   : > { %10621 = vmatprep.subr.mxu1 %v7727_v47  ;;  %10655 = vmatpush3.msra.mxu0 %v7712_v56 }
 0xbb9   : > { %10622 = vmatpush3.msra.mxu1 %v7727_v47  ;;  %10656 = vmatprep.subr.mxu0 %v7711_v58 }
 0xbba   : > { %10623 = vmatprep.subr.mxu1 %v7726_v52  ;;  %10657 = vmatpush3.msra.mxu0 %v7711_v58 }
 0xbbb   : > { %10624 = vmatpush3.msra.mxu1 %v7726_v52  ;;  %10658 = vmatprep.subr.mxu0 %v7710_v61 }
 0xbbc   : > { %10625 = vmatprep.subr.mxu1 %v7725_v55  ;;  %10659 = vmatpush3.msra.mxu0 %v7710_v61  ;;  %v7789_v61 = vld [vmem:[%s15420_s1 + $0x12f8] sm:$0xff] }
 0xbbd   : > { %10626 = vmatpush3.msra.mxu1 %v7725_v55 }
 0xbbe   : > { %10627 = vmatprep.subr.mxu1 %v7724_v23 }
 0xbbf   : > { %10628 = vmatpush3.msra.mxu1 %v7724_v23 }
 0xc3c   : > { %v10565_v4 = vpop.f32.mrf.mxu1 }
 0xc3e   : > { %v3501_v11 = vpop.f32.mrf.mxu1 }
 0xc44   : > { %v10530_v57 = vpop.f32.mrf.mxu0 }
 0xc45   : > { %v3415_v10 = vadd.f32 %v10530_v57, %v3319_v0  ;;  %v7723_v57 = vld [vmem:[%s15420_s1 + $0x1108] sm:$0xff]  ;;  %v7709_v0 = vld [vmem:[%s15420_s1 + $0x1098] sm:$0xff] }
 0xc46   : > { %v3405_v63 = vpop.f32.mrf.mxu0  ;;  %10629 = vmatprep.subr.mxu1 %v7723_v57  ;;  %10660 = vmatprep.subr.mxu0 %v7709_v0 }
 0xc47   : > { %v3414_v7 = vadd.f32 %v3405_v63, %v3318_v2  ;;  %v3511_v29 = vadd.f32 %v10565_v4, %v3415_v10  ;;  %10630 = vmatpush3.msra.mxu1 %v7723_v57  ;;  %v7753_v63 = vld [vmem:[%s15420_s1 + $0x11f8] sm:$0xff]  ;;  %v7708_v2 = vld [vmem:[%s15420_s1 + $0x1090] sm:$0xff]  ;;  %10661 = vmatpush3.msra.mxu0 %v7709_v0  ;;  %v7707_v4 = vld [vmem:[%s15420_s1 + $0x1088] sm:$0xff] }
 0xc48   : > { %10631 = vmatprep.subr.mxu1 %v7722_v60  ;;  %10662 = vmatprep.subr.mxu0 %v7708_v2  ;;  %v7706_v10 = vld [vmem:[%s15420_s1 + $0x1080] sm:$0xff]  ;;  %v7788_v0 = vld [vmem:[%s15420_s1 + $0x12f0] sm:$0xff] }
 0xc49   : > { %v3510_v51 = vadd.f32 %v3501_v11, %v3414_v7  ;;  %10632 = vmatpush3.msra.mxu1 %v7722_v60  ;;  %10663 = vmatpush3.msra.mxu0 %v7708_v2  ;;  %v7772_v2 = vld [vmem:[%s15420_s1 + $0x1270] sm:$0xff] }
 0xc4a   : > { %10671 = vmatprep.subr.mxu1 %v7753_v63  ;;  %10664 = vmatprep.subr.mxu0 %v7707_v4 }
 0xc4b   : > { %10665 = vmatpush3.msra.mxu0 %v7707_v4  ;;  %v7787_v4 = vld [vmem:[%s15420_s1 + $0x12e8] sm:$0xff] }
 0xc4c   : > { %10666 = vmatprep.subr.mxu0 %v7706_v10 }
 0xc4d   : > { %10667 = vmatpush3.msra.mxu0 %v7706_v10  ;;  %v7771_v10 = vld [vmem:[%s15420_s1 + $0x1268] sm:$0xff] }
 0xc4e   : > { %10706 = vmatprep.subr.mxu0 %v7789_v61 }
 0xc64   : > { %v10600_v33 = vpop.f32.mrf.mxu0 }
 0xc65   : > { %v3607_v28 = vadd.f32 %v10600_v33, %v3511_v29 }
 0xc66   : > { %v3597_v34 = vpop.f32.mrf.mxu0 }
 0xc67   : > { %v3606_v53 = vadd.f32 %v3597_v34, %v3510_v51 }
 0xc69   : > { %v3608_v12 = vadd.f32 %v3607_v28, %v3606_v53 }
 0xc6b   : > { %3609 = vadd.xlane.f32.xlu0 %v3608_v12 }
 0xcf4   : > { %v3610_v8 = vpop.xlane.xlu0 %3609 }
 0xcf5   : > { %v3611_v13 = vrot.slane %v3610_v8, 4 }
 0xcf7   : > { %v3612_v14 = vadd.f32 %v3611_v13, %v3610_v8 }
 0xcf9   : > { %v3613_v15 = vrot.slane %v3612_v14, 2 }
 0xcfb   : > { %v3614_v16 = vadd.f32 %v3613_v15, %v3612_v14  ;;  %v11845_v14 = vld [vmem:[#allocation2 + $0x1] sm:$0xff] }
 0xcfd   : > { %v3615_v17 = vrot.slane %v3614_v16, 1 }
 0xcff   : > { %v3616_v18 = vadd.f32 %v3615_v17, %v3614_v16  ;;  %v11846_v16 = vld [vmem:[#allocation2 + $0x9] sm:$0xff] }
 0xd01   : > { %11780 = vpush %v3616_v18  ;;  %v7752_v18 = vld [vmem:[%s15420_s1 + $0x11f0] sm:$0xff] }
 0xd32   : > { %s11781_s6 = spop %11780 }
 0xd33   : > { %s3620_s7 = smul.f32 0.00048828125, %s11781_s6 }
 0xd35   : > { %v3621_v19 = vstv %s3620_s7 }
 0xd36   : > { %v13654_v20 = vsub.f32 %v3606_v53, %v3621_v19  ;;  %v13656_v21 = vsub.f32 %v3607_v28, %v3621_v19  ;;  %v7749_v19 = vld [vmem:[%s15420_s1 + $0x11d8] sm:$0xff] }
 0xd38   : > { %v3624_v22 = vmul.f32 %v13654_v20, %v13654_v20  ;;  %v3625_v24 = vmul.f32 %v13656_v21, %v13656_v21 }
 0xd3a   : > { %v3626_v25 = vadd.f32 %v3625_v24, %v3624_v22  ;;  %v7748_v24 = vld [vmem:[%s15420_s1 + $0x11d0] sm:$0xff] }
 0xd3c   : > { %3627 = vadd.xlane.f32.xlu1 %v3626_v25  ;;  %v7747_v25 = vld [vmem:[%s15420_s1 + $0x11c8] sm:$0xff] }
 0xdc5   : > { %v3628_v40 = vpop.xlane.xlu1 %3627 }
 0xdc6   : > { %v3629_v41 = vrot.slane %v3628_v40, 4 }
 0xdc8   : > { %v3630_v5 = vadd.f32 %v3629_v41, %v3628_v40 }
 0xdca   : > { %v3631_v50 = vrot.slane %v3630_v5, 2 }
 0xdcc   : > { %v3632_v42 = vadd.f32 %v3631_v50, %v3630_v5 }
 0xdce   : > { %v3633_v32 = vrot.slane %v3632_v42, 1 }
 0xdd0   : > { %v3634_v45 = vadd.f32 %v3633_v32, %v3632_v42 }
 0xdd2   : > { %11782 = vpush %v3634_v45 }
 0xe03   : > { %s11783_s5 = spop %11782 }
 0xe04   : > { %s3638_s6 = smul.f32 0.00048828125, %s11783_s5 }
 0xe06   : > { %s3639_s7 = sadd.f32 1e-05, %s3638_s6 }
 0xe08   : > { %v3640_v7 = vstv %s3639_s7 }
 0xe09   : > { %11833 = vrsqrt.f32 %v3640_v7  ;;  %v7786_v7 = vld [vmem:[%s15420_s1 + $0x12e0] sm:$0xff] }
 0xe16   : > { %v11834_v11 = vpop.eup %11833 }
 0xe17   : > { %11784 = vpush %v11834_v11  ;;  %v7770_v11 = vld [vmem:[%s15420_s1 + $0x1260] sm:$0xff] }
 0xe48   : > { %s11785_s9 = spop %11784 }
 0xe49   : > { %v3643_v33 = vstv %s11785_s9 }
 0xe4a   : > { %v3644_v29 = vmul.f32 %v3643_v33, %v13654_v20  ;;  %v3645_v51 = vmul.f32 %v3643_v33, %v13656_v21  ;;  %v7785_v33 = vld [vmem:[%s15420_s1 + $0x12d8] sm:$0xff] }
 0xe4c   : > { %v3653_v34 = vmul.f32 %v13596_v1, %v3644_v29  ;;  %v3654_v28 = vmul.f32 %v13596_v1, %v3645_v51  ;;  %v7751_v1 = vld [vmem:[%s15420_s1 + $0x11e8] sm:$0xff]  ;;  %v7769_v29 = vld [vmem:[%s15420_s1 + $0x1258] sm:$0xff]  ;;  %v7784_v51 = vld [vmem:[%s15420_s1 + $0x12d0] sm:$0xff] }
 0xe4e   : > { %v3662_v53 = vadd.f32 %v13603_v6, %v3653_v34  ;;  %v3663_v12 = vadd.f32 %v13603_v6, %v3654_v28  ;;  %v7750_v6 = vld [vmem:[%s15420_s1 + $0x11e0] sm:$0xff]  ;;  %v7768_v34 = vld [vmem:[%s15420_s1 + $0x1250] sm:$0xff]  ;;  %v7783_v28 = vld [vmem:[%s15420_s1 + $0x12c8] sm:$0xff] }
 0xe50   : > { %v3664_v8 = vmax.f32 %v3662_v53, 0.0  ;;  %v3665_v13 = vmax.f32 %v3663_v12, 0.0  ;;  %v7767_v53 = vld [vmem:[%s15420_s1 + $0x1248] sm:$0xff] }
 0xe52   : > { %v3666_v15 = vadd.f32 %v11845_v14, %v3664_v8  ;;  %v3667_v17 = vadd.f32 %v11846_v16, %v3665_v13  ;;  %v7782_v14 = vld [vmem:[%s15420_s1 + $0x12c0] sm:$0xff]  ;;  %v7781_v16 = vld [vmem:[%s15420_s1 + $0x12b8] sm:$0xff] }
 0xe54   : > { %3668 = vst [vmem:[#allocation2 + $0x1] sm:$0xff] %v3666_v15  ;;  %3669 = vst [vmem:[#allocation2 + $0x9] sm:$0xff] %v3667_v17  ;;  %10633 = vmatprep.mubr.f32.mxu1 %v3666_v15 }
 0xe55   : > { %10634 = vmatmul.mubr.f32.vlgmr.msra.gmra.mxu1 %v3667_v17 }
 0xe56   : > { %10672 = vmatpush3.msra.mxu1 %v7753_v63  ;;  %v7773_v63 = vld [vmem:[%s15420_s1 + $0x1278] sm:$0xff] }
 0xe57   : > { %10673 = vmatprep.subr.mxu1 %v7752_v18 }
 0xe58   : > { %10674 = vmatpush3.msra.mxu1 %v7752_v18  ;;  %v7780_v18 = vld [vmem:[%s15420_s1 + $0x12b0] sm:$0xff] }
 0xe59   : > { %10675 = vmatprep.subr.mxu1 %v7751_v1 }
 0xe5a   : > { %10676 = vmatpush3.msra.mxu1 %v7751_v1 }
 0xe5b   : > { %v3670_v20 = vld [vmem:[#allocation2] sm:$0xff]  ;;  %v3671_v21 = vld [vmem:[#allocation2 + $0x8] sm:$0xff]  ;;  %10677 = vmatprep.subr.mxu1 %v7750_v6 }
 0xe5c   : > { %v3858_v22 = vld [vmem:[#allocation2 + $0x2] sm:$0xff]  ;;  %10668 = vmatprep.mubr.f32.mxu0 %v3670_v20  ;;  %10678 = vmatpush3.msra.mxu1 %v7750_v6  ;;  %v3859_v36 = vld [vmem:[#allocation2 + $0xa] sm:$0xff] }
 0xe5d   : > { %10703 = vmatprep.mubr.f32.mxu1 %v3858_v22  ;;  %10669 = vmatmul.mubr.f32.vlgmr.msra.gmra.mxu0 %v3671_v21  ;;  %v7779_v6 = vld [vmem:[%s15420_s1 + $0x12a8] sm:$0xff]  ;;  %v7766_v20 = vld [vmem:[%s15420_s1 + $0x1240] sm:$0xff]  ;;  %v7765_v22 = vld [vmem:[%s15420_s1 + $0x1238] sm:$0xff] }
 0xe5e   : > { %10679 = vmatprep.subr.mxu1 %v7749_v19  ;;  %10707 = vmatpush3.msra.mxu0 %v7789_v61  ;;  %v7778_v21 = vld [vmem:[%s15420_s1 + $0x12a0] sm:$0xff] }
 0xe5f   : > { %10680 = vmatpush3.msra.mxu1 %v7749_v19  ;;  %10708 = vmatprep.subr.mxu0 %v7788_v0  ;;  %v7838_v61 = vld [vmem:[%s15420_s1 + $0x1460] sm:$0xff] }
 0xe60   : > { %10681 = vmatprep.subr.mxu1 %v7748_v24  ;;  %10709 = vmatpush3.msra.mxu0 %v7788_v0  ;;  %v7837_v0 = vld [vmem:[%s15420_s1 + $0x1458] sm:$0xff] }
 0xe61   : > { %10682 = vmatpush3.msra.mxu1 %v7748_v24  ;;  %10710 = vmatprep.subr.mxu0 %v7787_v4  ;;  %v7764_v24 = vld [vmem:[%s15420_s1 + $0x1230] sm:$0xff] }
 0xe62   : > { %10683 = vmatprep.subr.mxu1 %v7747_v25  ;;  %10711 = vmatpush3.msra.mxu0 %v7787_v4  ;;  %v7836_v4 = vld [vmem:[%s15420_s1 + $0x1450] sm:$0xff] }
 0xe63   : > { %10684 = vmatpush3.msra.mxu1 %v7747_v25  ;;  %10712 = vmatprep.subr.mxu0 %v7786_v7  ;;  %v7777_v25 = vld [vmem:[%s15420_s1 + $0x1298] sm:$0xff] }
 0xe64   : > { %10685 = vmatprep.subr.mxu1 %v7746_v26  ;;  %10713 = vmatpush3.msra.mxu0 %v7786_v7  ;;  %v7835_v7 = vld [vmem:[%s15420_s1 + $0x1448] sm:$0xff] }
 0xe65   : > { %10686 = vmatpush3.msra.mxu1 %v7746_v26  ;;  %10714 = vmatprep.subr.mxu0 %v7785_v33  ;;  %v7776_v26 = vld [vmem:[%s15420_s1 + $0x1290] sm:$0xff] }
 0xe66   : > { %10687 = vmatprep.subr.mxu1 %v7745_v27  ;;  %10715 = vmatpush3.msra.mxu0 %v7785_v33  ;;  %v7834_v33 = vld [vmem:[%s15420_s1 + $0x1440] sm:$0xff] }
 0xe67   : > { %10688 = vmatpush3.msra.mxu1 %v7745_v27  ;;  %10716 = vmatprep.subr.mxu0 %v7784_v51  ;;  %v7763_v27 = vld [vmem:[%s15420_s1 + $0x1228] sm:$0xff] }
 0xe68   : > { %10689 = vmatprep.subr.mxu1 %v7744_v9  ;;  %10717 = vmatpush3.msra.mxu0 %v7784_v51  ;;  %v7833_v51 = vld [vmem:[%s15420_s1 + $0x1438] sm:$0xff] }
 0xe69   : > { %10690 = vmatpush3.msra.mxu1 %v7744_v9  ;;  %10718 = vmatprep.subr.mxu0 %v7783_v28  ;;  %v7775_v9 = vld [vmem:[%s15420_s1 + $0x1288] sm:$0xff] }
 0xe6a   : > { %10691 = vmatprep.subr.mxu1 %v7743_v30  ;;  %10719 = vmatpush3.msra.mxu0 %v7783_v28  ;;  %v7832_v28 = vld [vmem:[%s15420_s1 + $0x1430] sm:$0xff] }
 0xe6b   : > { %10692 = vmatpush3.msra.mxu1 %v7743_v30  ;;  %10720 = vmatprep.subr.mxu0 %v7782_v14  ;;  %v7762_v30 = vld [vmem:[%s15420_s1 + $0x1220] sm:$0xff] }
 0xe6c   : > { %10693 = vmatprep.subr.mxu1 %v7742_v59  ;;  %10721 = vmatpush3.msra.mxu0 %v7782_v14  ;;  %v7791_v14 = vld [vmem:[%s15420_s1 + $0x1308] sm:$0xff] }
 0xe6d   : > { %10694 = vmatpush3.msra.mxu1 %v7742_v59  ;;  %10722 = vmatprep.subr.mxu0 %v7781_v16  ;;  %v7774_v59 = vld [vmem:[%s15420_s1 + $0x1280] sm:$0xff] }
 0xe6e   : > { %10695 = vmatprep.subr.mxu1 %v7741_v62  ;;  %10723 = vmatpush3.msra.mxu0 %v7781_v16  ;;  %v7790_v16 = vld [vmem:[%s15420_s1 + $0x1300] sm:$0xff] }
 0xe6f   : > { %10696 = vmatpush3.msra.mxu1 %v7741_v62  ;;  %10724 = vmatprep.subr.mxu0 %v7780_v18  ;;  %v7761_v62 = vld [vmem:[%s15420_s1 + $0x1218] sm:$0xff] }
 0xe70   : > { %10697 = vmatprep.subr.mxu1 %v7740_v31  ;;  %10725 = vmatpush3.msra.mxu0 %v7780_v18  ;;  %v7825_v18 = vld [vmem:[%s15420_s1 + $0x13f8] sm:$0xff] }
 0xe71   : > { %10698 = vmatpush3.msra.mxu1 %v7740_v31  ;;  %10726 = vmatprep.subr.mxu0 %v7779_v6  ;;  %v7805_v31 = vld [vmem:[%s15420_s1 + $0x1378] sm:$0xff] }
 0xe72   : > { %10699 = vmatprep.subr.mxu1 %v7739_v3  ;;  %10727 = vmatpush3.msra.mxu0 %v7779_v6 }
 0xe73   : > { %10700 = vmatpush3.msra.mxu1 %v7739_v3  ;;  %10728 = vmatprep.subr.mxu0 %v7778_v21  ;;  %v7760_v3 = vld [vmem:[%s15420_s1 + $0x1210] sm:$0xff] }
 0xe74   : > { %10701 = vmatprep.subr.mxu1 %v7738_v35  ;;  %10729 = vmatpush3.msra.mxu0 %v7778_v21  ;;  %v7857_v21 = vld [vmem:[%s15420_s1 + $0x14f8] sm:$0xff] }
 0xe75   : > { %10702 = vmatpush3.msra.mxu1 %v7738_v35  ;;  %10730 = vmatprep.subr.mxu0 %v7777_v25  ;;  %v7759_v35 = vld [vmem:[%s15420_s1 + $0x1208] sm:$0xff] }
 0xe76   : > { %10704 = vmatmul.mubr.f32.vlgmr.msra.gmra.mxu1 %v3859_v36  ;;  %10741 = vmatprep.subr.mxu1 %v7773_v63  ;;  %v7758_v36 = vld [vmem:[%s15420_s1 + $0x1200] sm:$0xff] }
 0xe77   : > { %10742 = vmatpush3.msra.mxu1 %v7773_v63  ;;  %10731 = vmatpush3.msra.mxu0 %v7777_v25  ;;  %v7799_v63 = vld [vmem:[%s15420_s1 + $0x1348] sm:$0xff] }
 0xe78   : > { %10743 = vmatprep.subr.mxu1 %v7772_v2  ;;  %10732 = vmatprep.subr.mxu0 %v7776_v26  ;;  %v7855_v25 = vld [vmem:[%s15420_s1 + $0x14e8] sm:$0xff] }
 0xe79   : > { %10744 = vmatpush3.msra.mxu1 %v7772_v2  ;;  %10733 = vmatpush3.msra.mxu0 %v7776_v26  ;;  %v7798_v2 = vld [vmem:[%s15420_s1 + $0x1340] sm:$0xff] }
 0xe7a   : > { %10745 = vmatprep.subr.mxu1 %v7771_v10  ;;  %10734 = vmatprep.subr.mxu0 %v7775_v9  ;;  %v7822_v26 = vld [vmem:[%s15420_s1 + $0x13e0] sm:$0xff] }
 0xe7b   : > { %10746 = vmatpush3.msra.mxu1 %v7771_v10  ;;  %10735 = vmatpush3.msra.mxu0 %v7775_v9  ;;  %v7797_v10 = vld [vmem:[%s15420_s1 + $0x1338] sm:$0xff] }
 0xe7c   : > { %10747 = vmatprep.subr.mxu1 %v7770_v11  ;;  %10736 = vmatprep.subr.mxu0 %v7774_v59  ;;  %v7821_v9 = vld [vmem:[%s15420_s1 + $0x13d8] sm:$0xff] }
 0xe7d   : > { %10748 = vmatpush3.msra.mxu1 %v7770_v11  ;;  %10737 = vmatpush3.msra.mxu0 %v7774_v59  ;;  %v7796_v11 = vld [vmem:[%s15420_s1 + $0x1330] sm:$0xff] }
 0xe7e   : > { %10749 = vmatprep.subr.mxu1 %v7769_v29  ;;  %10776 = vmatprep.subr.mxu0 %v7805_v31  ;;  %v7820_v59 = vld [vmem:[%s15420_s1 + $0x13d0] sm:$0xff] }
 0xe7f   : > { %10750 = vmatpush3.msra.mxu1 %v7769_v29  ;;  %v7795_v29 = vld [vmem:[%s15420_s1 + $0x1328] sm:$0xff] }
 0xe80   : > { %10751 = vmatprep.subr.mxu1 %v7768_v34 }
 0xe81   : > { %10752 = vmatpush3.msra.mxu1 %v7768_v34  ;;  %v7794_v34 = vld [vmem:[%s15420_s1 + $0x1320] sm:$0xff] }
 0xe82   : > { %10753 = vmatprep.subr.mxu1 %v7767_v53 }
 0xe83   : > { %10754 = vmatpush3.msra.mxu1 %v7767_v53  ;;  %v7793_v53 = vld [vmem:[%s15420_s1 + $0x1318] sm:$0xff] }
 0xe84   : > { %10755 = vmatprep.subr.mxu1 %v7766_v20 }
 0xe85   : > { %10756 = vmatpush3.msra.mxu1 %v7766_v20  ;;  %v7824_v20 = vld [vmem:[%s15420_s1 + $0x13f0] sm:$0xff] }
 0xe86   : > { %10757 = vmatprep.subr.mxu1 %v7765_v22 }
 0xe87   : > { %10758 = vmatpush3.msra.mxu1 %v7765_v22  ;;  %v7856_v22 = vld [vmem:[%s15420_s1 + $0x14f0] sm:$0xff] }
 0xe88   : > { %10759 = vmatprep.subr.mxu1 %v7764_v24 }
 0xe89   : > { %10760 = vmatpush3.msra.mxu1 %v7764_v24  ;;  %v7823_v24 = vld [vmem:[%s15420_s1 + $0x13e8] sm:$0xff] }
 0xe8a   : > { %10761 = vmatprep.subr.mxu1 %v7763_v27 }
 0xe8b   : > { %10762 = vmatpush3.msra.mxu1 %v7763_v27  ;;  %v7854_v27 = vld [vmem:[%s15420_s1 + $0x14e0] sm:$0xff] }
 0xe8c   : > { %10763 = vmatprep.subr.mxu1 %v7762_v30 }
 0xe8d   : > { %10764 = vmatpush3.msra.mxu1 %v7762_v30  ;;  %v7853_v30 = vld [vmem:[%s15420_s1 + $0x14d8] sm:$0xff] }
 0xe8e   : > { %10765 = vmatprep.subr.mxu1 %v7761_v62 }
 0xe8f   : > { %10766 = vmatpush3.msra.mxu1 %v7761_v62  ;;  %v7852_v62 = vld [vmem:[%s15420_s1 + $0x14d0] sm:$0xff] }
 0xe90   : > { %10767 = vmatprep.subr.mxu1 %v7760_v3 }
 0xe91   : > { %10768 = vmatpush3.msra.mxu1 %v7760_v3  ;;  %v7851_v3 = vld [vmem:[%s15420_s1 + $0x14c8] sm:$0xff] }
 0xe92   : > { %10769 = vmatprep.subr.mxu1 %v7759_v35 }
 0xe93   : > { %10770 = vmatpush3.msra.mxu1 %v7759_v35  ;;  %v7818_v35 = vld [vmem:[%s15420_s1 + $0x13c0] sm:$0xff] }
 0xe94   : > { %10771 = vmatprep.subr.mxu1 %v7758_v36 }
 0xe95   : > { %10772 = vmatpush3.msra.mxu1 %v7758_v36  ;;  %v7850_v36 = vld [vmem:[%s15420_s1 + $0x14c0] sm:$0xff] }
 0xf15   : > { %v10635_v37 = vpop.f32.mrf.mxu1 }
 0xf17   : > { %v3774_v40 = vpop.f32.mrf.mxu1 }
 0xf1d   : > { %v10670_v39 = vpop.f32.mrf.mxu0 }
 0xf1e   : > { %v3855_v50 = vadd.f32 %v10670_v39, %v10635_v37  ;;  %v7841_v37 = vld [vmem:[%s15420_s1 + $0x1478] sm:$0xff] }
 0xf1f   : > { %v3849_v41 = vpop.f32.mrf.mxu0  ;;  %10811 = vmatprep.subr.mxu1 %v7841_v37 }
 0xf20   : > { %v3850_v38 = vadd.f32 %v3849_v41, %v3774_v40 }
 0xf36   : > { %v10705_v5 = vpop.f32.mrf.mxu1 }
 0xf37   : > { %v3953_v43 = vadd.f32 %v10705_v5, %v3855_v50  ;;  %v13925_v5 = vld [vmem:[%s15421_s2 + $0x1] ss:$0 sm:$0xff] }
 0xf38   : > { %v3943_v42 = vpop.f32.mrf.mxu1 }
 0xf39   : > { %v3952_v32 = vadd.f32 %v3943_v42, %v3850_v38  ;;  %v13932_v42 = vld [vmem:[%s15422_s3 + $0x1] ss:$0 sm:$0xff] }
 0xf3b   : > { %v3954_v44 = vadd.f32 %v3953_v43, %v3952_v32 }
 0xf3d   : > { %3955 = vadd.xlane.f32.xlu0 %v3954_v44 }
 0xfc6   : > { %v3956_v45 = vpop.xlane.xlu0 %3955 }
 0xfc7   : > { %v3957_v46 = vrot.slane %v3956_v45, 4 }
 0xfc9   : > { %v3958_v47 = vadd.f32 %v3957_v46, %v3956_v45 }
 0xfcb   : > { %v3959_v48 = vrot.slane %v3958_v47, 2 }
 0xfcd   : > { %v3960_v49 = vadd.f32 %v3959_v48, %v3958_v47  ;;  %v7804_v48 = vld [vmem:[%s15420_s1 + $0x1370] sm:$0xff] }
 0xfcf   : > { %v3961_v52 = vrot.slane %v3960_v49, 1 }
 0xfd1   : > { %v3962_v54 = vadd.f32 %v3961_v52, %v3960_v49  ;;  %v7803_v49 = vld [vmem:[%s15420_s1 + $0x1368] sm:$0xff]  ;;  %v7802_v52 = vld [vmem:[%s15420_s1 + $0x1360] sm:$0xff] }
 0xfd3   : > { %11786 = vpush %v3962_v54 }
0x1004   : > { %s11787_s19 = spop %11786 }
0x1005   : > { %s3966_s20 = smul.f32 0.00048828125, %s11787_s19 }
0x1007   : > { %v3967_v55 = vstv %s3966_s20 }
0x1008   : > { %v13812_v23 = vsub.f32 %v3952_v32, %v3967_v55  ;;  %v13814_v56 = vsub.f32 %v3953_v43, %v3967_v55 }
0x100a   : > { %v3970_v57 = vmul.f32 %v13812_v23, %v13812_v23  ;;  %v3971_v58 = vmul.f32 %v13814_v56, %v13814_v56 }
0x100c   : > { %v3972_v60 = vadd.f32 %v3971_v58, %v3970_v57  ;;  %v7801_v57 = vld [vmem:[%s15420_s1 + $0x1358] sm:$0xff]  ;;  %v7839_v58 = vld [vmem:[%s15420_s1 + $0x1468] sm:$0xff] }
0x100e   : > { %3973 = vadd.xlane.f32.xlu1 %v3972_v60  ;;  %v7800_v60 = vld [vmem:[%s15420_s1 + $0x1350] sm:$0xff] }
0x1097   : > { %v3974_v12 = vpop.xlane.xlu1 %3973 }
0x1098   : > { %v3975_v8 = vrot.slane %v3974_v12, 4 }
0x109a   : > { %v3976_v13 = vadd.f32 %v3975_v8, %v3974_v12  ;;  %v7831_v12 = vld [vmem:[%s15420_s1 + $0x1428] sm:$0xff]  ;;  %v7792_v8 = vld [vmem:[%s15420_s1 + $0x1310] sm:$0xff] }
0x109c   : > { %v3977_v15 = vrot.slane %v3976_v13, 2 }
0x109e   : > { %v3978_v17 = vadd.f32 %v3977_v15, %v3976_v13  ;;  %v7830_v13 = vld [vmem:[%s15420_s1 + $0x1420] sm:$0xff]  ;;  %v7829_v15 = vld [vmem:[%s15420_s1 + $0x1418] sm:$0xff] }
0x10a0   : > { %v3979_v1 = vrot.slane %v3978_v17, 1 }
0x10a2   : > { %v3980_v19 = vadd.f32 %v3979_v1, %v3978_v17  ;;  %v7828_v17 = vld [vmem:[%s15420_s1 + $0x1410] sm:$0xff]  ;;  %v7827_v1 = vld [vmem:[%s15420_s1 + $0x1408] sm:$0xff] }
0x10a4   : > { %11788 = vpush %v3980_v19  ;;  %v7826_v19 = vld [vmem:[%s15420_s1 + $0x1400] sm:$0xff] }
0x10d5   : > { %s11789_s20 = spop %11788 }
0x10d6   : > { %s3984_s21 = smul.f32 0.00048828125, %s11789_s20 }
0x10d8   : > { %s3985_s22 = sadd.f32 1e-05, %s3984_s21 }
0x10da   : > { %v3986_v39 = vstv %s3985_s22 }
0x10db   : > { %11835 = vrsqrt.f32 %v3986_v39  ;;  %v7849_v39 = vld [vmem:[%s15420_s1 + $0x14b8] sm:$0xff] }
0x10e8   : > { %v11836_v40 = vpop.eup %11835 }
0x10e9   : > { %11790 = vpush %v11836_v40  ;;  %v7816_v40 = vld [vmem:[%s15420_s1 + $0x13b0] sm:$0xff] }
0x111a   : > { %s11791_s23 = spop %11790 }
0x111b   : > { %v3989_v41 = vstv %s11791_s23 }
0x111c   : > { %v3990_v50 = vmul.f32 %v3989_v41, %v13812_v23  ;;  %v3991_v38 = vmul.f32 %v3989_v41, %v13814_v56  ;;  %v7840_v56 = vld [vmem:[%s15420_s1 + $0x1470] sm:$0xff] }
0x111d   : > { %v7848_v41 = vld [vmem:[%s15420_s1 + $0x14b0] sm:$0xff] }
0x111e   : > { %v4000_v43 = vmul.f32 %v13925_v5, %v3990_v50  ;;  %v4001_v32 = vmul.f32 %v13925_v5, %v3991_v38  ;;  %v7815_v50 = vld [vmem:[%s15420_s1 + $0x13a8] sm:$0xff] }
0x111f   : > { %v7847_v38 = vld [vmem:[%s15420_s1 + $0x14a8] sm:$0xff] }
0x1120   : > { %v4010_v44 = vadd.f32 %v13932_v42, %v4000_v43  ;;  %v4011_v45 = vadd.f32 %v13932_v42, %v4001_v32  ;;  %v7814_v43 = vld [vmem:[%s15420_s1 + $0x13a0] sm:$0xff] }
0x1121   : > { %v7846_v32 = vld [vmem:[%s15420_s1 + $0x14a0] sm:$0xff] }
0x1122   : > { %v13938_v46 = vmax.f32 %v4010_v44, 0.0  ;;  %v13940_v47 = vmax.f32 %v4011_v45, 0.0  ;;  %v7813_v44 = vld [vmem:[%s15420_s1 + $0x1398] sm:$0xff] }
0x1123   : > { %v7845_v45 = vld [vmem:[%s15420_s1 + $0x1498] sm:$0xff] }
0x1124   : > { %4014 = vst [vmem:[#allocation2 + $0x19] sm:$0xff] %v13938_v46  ;;  %4015 = vst [vmem:[#allocation2 + $0x21] sm:$0xff] %v13940_v47  ;;  %10738 = vmatprep.mubr.f32.mxu0 %v13938_v46 }
0x1125   : > { %10739 = vmatmul.mubr.f32.vlgmr.msra.gmra.mxu0 %v13940_v47 }
0x1126   : > { %10777 = vmatpush3.msra.mxu0 %v7805_v31  ;;  %v7819_v31 = vld [vmem:[%s15420_s1 + $0x13c8] sm:$0xff] }
0x1127   : > { %10778 = vmatprep.subr.mxu0 %v7804_v48 }
0x1128   : > { %10779 = vmatpush3.msra.mxu0 %v7804_v48  ;;  %v7844_v48 = vld [vmem:[%s15420_s1 + $0x1490] sm:$0xff] }
0x1129   : > { %10780 = vmatprep.subr.mxu0 %v7803_v49 }
0x112a   : > { %10781 = vmatpush3.msra.mxu0 %v7803_v49  ;;  %v7811_v49 = vld [vmem:[%s15420_s1 + $0x1388] sm:$0xff] }
0x112b   : > { %v13955_v54 = vld [vmem:[#allocation2 + $0x18] sm:$0xff]  ;;  %v13957_v55 = vld [vmem:[#allocation2 + $0x20] sm:$0xff]  ;;  %10782 = vmatprep.subr.mxu0 %v7802_v52 }
0x112c   : > { %v13959_v23 = vld [vmem:[#allocation2 + $0x1a] sm:$0xff]  ;;  %10773 = vmatprep.mubr.f32.mxu1 %v13955_v54  ;;  %10783 = vmatpush3.msra.mxu0 %v7802_v52  ;;  %v14046_v6 = vld [vmem:[#allocation2 + $0x22] sm:$0xff] }
0x112d   : > { %10808 = vmatprep.mubr.f32.mxu0 %v13959_v23  ;;  %10774 = vmatmul.mubr.f32.vlgmr.msra.gmra.mxu1 %v13957_v55  ;;  %v7843_v52 = vld [vmem:[%s15420_s1 + $0x1488] sm:$0xff] }
0x112e   : > { %10812 = vmatpush3.msra.mxu1 %v7841_v37  ;;  %10843 = vmatprep.mubr.f32.mxu1 %v13938_v46  ;;  %v7817_v37 = vld [vmem:[%s15420_s1 + $0x13b8] sm:$0xff] }
0x112f   : > { %10813 = vmatprep.subr.mxu1 %v7840_v56  ;;  %10784 = vmatprep.subr.mxu0 %v7801_v57 }
0x1130   : > { %10814 = vmatpush3.msra.mxu1 %v7840_v56  ;;  %10785 = vmatpush3.msra.mxu0 %v7801_v57  ;;  %v7810_v56 = vld [vmem:[%s15420_s1 + $0x1380] sm:$0xff] }
0x1131   : > { %10815 = vmatprep.subr.mxu1 %v7839_v58  ;;  %10786 = vmatprep.subr.mxu0 %v7800_v60  ;;  %v7842_v57 = vld [vmem:[%s15420_s1 + $0x1480] sm:$0xff] }
0x1132   : > { %10816 = vmatpush3.msra.mxu1 %v7839_v58  ;;  %10787 = vmatpush3.msra.mxu0 %v7800_v60 }
0x1133   : > { %10817 = vmatprep.subr.mxu1 %v7838_v61  ;;  %10788 = vmatprep.subr.mxu0 %v7799_v63 }
0x1134   : > { %10818 = vmatpush3.msra.mxu1 %v7838_v61  ;;  %10789 = vmatpush3.msra.mxu0 %v7799_v63 }
0x1135   : > { %10819 = vmatprep.subr.mxu1 %v7837_v0  ;;  %10790 = vmatprep.subr.mxu0 %v7798_v2 }
0x1136   : > { %10820 = vmatpush3.msra.mxu1 %v7837_v0  ;;  %10791 = vmatpush3.msra.mxu0 %v7798_v2 }
0x1137   : > { %10821 = vmatprep.subr.mxu1 %v7836_v4  ;;  %10792 = vmatprep.subr.mxu0 %v7797_v10 }
0x1138   : > { %10822 = vmatpush3.msra.mxu1 %v7836_v4  ;;  %10793 = vmatpush3.msra.mxu0 %v7797_v10 }
0x1139   : > { %10823 = vmatprep.subr.mxu1 %v7835_v7  ;;  %10794 = vmatprep.subr.mxu0 %v7796_v11 }
0x113a   : > { %10824 = vmatpush3.msra.mxu1 %v7835_v7  ;;  %10795 = vmatpush3.msra.mxu0 %v7796_v11 }
0x113b   : > { %10825 = vmatprep.subr.mxu1 %v7834_v33  ;;  %10796 = vmatprep.subr.mxu0 %v7795_v29 }
0x113c   : > { %10826 = vmatpush3.msra.mxu1 %v7834_v33  ;;  %10797 = vmatpush3.msra.mxu0 %v7795_v29 }
0x113d   : > { %10827 = vmatprep.subr.mxu1 %v7833_v51  ;;  %10798 = vmatprep.subr.mxu0 %v7794_v34 }
0x113e   : > { %10828 = vmatpush3.msra.mxu1 %v7833_v51  ;;  %10799 = vmatpush3.msra.mxu0 %v7794_v34 }
0x113f   : > { %10829 = vmatprep.subr.mxu1 %v7832_v28  ;;  %10800 = vmatprep.subr.mxu0 %v7793_v53 }
0x1140   : > { %10830 = vmatpush3.msra.mxu1 %v7832_v28  ;;  %10801 = vmatpush3.msra.mxu0 %v7793_v53 }
0x1141   : > { %10831 = vmatprep.subr.mxu1 %v7831_v12  ;;  %10802 = vmatprep.subr.mxu0 %v7792_v8 }
0x1142   : > { %10832 = vmatpush3.msra.mxu1 %v7831_v12  ;;  %10803 = vmatpush3.msra.mxu0 %v7792_v8 }
0x1143   : > { %10833 = vmatprep.subr.mxu1 %v7830_v13  ;;  %10804 = vmatprep.subr.mxu0 %v7791_v14 }
0x1144   : > { %10834 = vmatpush3.msra.mxu1 %v7830_v13  ;;  %10805 = vmatpush3.msra.mxu0 %v7791_v14 }
0x1145   : > { %10835 = vmatprep.subr.mxu1 %v7829_v15  ;;  %10806 = vmatprep.subr.mxu0 %v7790_v16 }
0x1146   : > { %10836 = vmatpush3.msra.mxu1 %v7829_v15  ;;  %10807 = vmatpush3.msra.mxu0 %v7790_v16 }
0x1147   : > { %10837 = vmatprep.subr.mxu1 %v7828_v17  ;;  %10809 = vmatmul.mubr.f32.vlgmr.msra.gmra.mxu0 %v14046_v6 }
0x1148   : > { %10838 = vmatpush3.msra.mxu1 %v7828_v17  ;;  %10846 = vmatprep.subr.mxu0 %v7825_v18 }
0x1149   : > { %10839 = vmatprep.subr.mxu1 %v7827_v1  ;;  %10847 = vmatpush3.msra.mxu0 %v7825_v18  ;;  %v7873_v18 = vld [vmem:[%s15420_s1 + $0x1578] sm:$0xff] }
0x114a   : > { %10840 = vmatpush3.msra.mxu1 %v7827_v1  ;;  %10878 = vmatprep.mubr.f32.mxu0 %v13955_v54  ;;  %v7889_v1 = vld [vmem:[%s15420_s1 + $0x15f8] sm:$0xff] }
0x114b   : > { %10841 = vmatprep.subr.mxu1 %v7826_v19  ;;  %10848 = vmatprep.subr.mxu0 %v7824_v20 }
0x114c   : > { %10842 = vmatpush3.msra.mxu1 %v7826_v19  ;;  %10849 = vmatpush3.msra.mxu0 %v7824_v20  ;;  %v7872_v19 = vld [vmem:[%s15420_s1 + $0x1570] sm:$0xff] }
0x114d   : > { %10844 = vmatmul.mubr.f32.vlgmr.msra.gmra.mxu1 %v13940_v47  ;;  %10881 = vmatprep.subr.mxu1 %v7857_v21  ;;  %v7812_v47 = vld [vmem:[%s15420_s1 + $0x1390] sm:$0xff] }
0x114e   : > { %10882 = vmatpush3.msra.mxu1 %v7857_v21  ;;  %10913 = vmatprep.mubr.f32.mxu1 %v13959_v23  ;;  %v7888_v20 = vld [vmem:[%s15420_s1 + $0x15f0] sm:$0xff]  ;;  %v7871_v21 = vld [vmem:[%s15420_s1 + $0x1568] sm:$0xff] }
0x114f   : > { %10883 = vmatprep.subr.mxu1 %v7856_v22  ;;  %10850 = vmatprep.subr.mxu0 %v7823_v24 }
0x1150   : > { %10884 = vmatpush3.msra.mxu1 %v7856_v22  ;;  %10851 = vmatpush3.msra.mxu0 %v7823_v24  ;;  %v7887_v22 = vld [vmem:[%s15420_s1 + $0x15e8] sm:$0xff]  ;;  %v7870_v24 = vld [vmem:[%s15420_s1 + $0x1560] sm:$0xff] }
0x1151   : > { %10885 = vmatprep.subr.mxu1 %v7855_v25  ;;  %10852 = vmatprep.subr.mxu0 %v7822_v26 }
0x1152   : > { %10886 = vmatpush3.msra.mxu1 %v7855_v25  ;;  %10853 = vmatpush3.msra.mxu0 %v7822_v26  ;;  %v7886_v25 = vld [vmem:[%s15420_s1 + $0x15e0] sm:$0xff]  ;;  %v7869_v26 = vld [vmem:[%s15420_s1 + $0x1558] sm:$0xff] }
0x1153   : > { %10887 = vmatprep.subr.mxu1 %v7854_v27  ;;  %10854 = vmatprep.subr.mxu0 %v7821_v9 }
0x1154   : > { %10888 = vmatpush3.msra.mxu1 %v7854_v27  ;;  %10855 = vmatpush3.msra.mxu0 %v7821_v9  ;;  %v7885_v27 = vld [vmem:[%s15420_s1 + $0x15d8] sm:$0xff]  ;;  %v7868_v9 = vld [vmem:[%s15420_s1 + $0x1550] sm:$0xff] }
0x1155   : > { %10889 = vmatprep.subr.mxu1 %v7853_v30  ;;  %10856 = vmatprep.subr.mxu0 %v7820_v59 }
0x1156   : > { %10890 = vmatpush3.msra.mxu1 %v7853_v30  ;;  %10857 = vmatpush3.msra.mxu0 %v7820_v59  ;;  %v7884_v30 = vld [vmem:[%s15420_s1 + $0x15d0] sm:$0xff]  ;;  %v7867_v59 = vld [vmem:[%s15420_s1 + $0x1548] sm:$0xff] }
0x1157   : > { %10891 = vmatprep.subr.mxu1 %v7852_v62  ;;  %10858 = vmatprep.subr.mxu0 %v7819_v31 }
0x1158   : > { %10892 = vmatpush3.msra.mxu1 %v7852_v62  ;;  %10859 = vmatpush3.msra.mxu0 %v7819_v31  ;;  %v7883_v62 = vld [vmem:[%s15420_s1 + $0x15c8] sm:$0xff] }
0x1159   : > { %10893 = vmatprep.subr.mxu1 %v7851_v3  ;;  %10860 = vmatprep.subr.mxu0 %v7818_v35 }
0x115a   : > { %10894 = vmatpush3.msra.mxu1 %v7851_v3  ;;  %10861 = vmatpush3.msra.mxu0 %v7818_v35  ;;  %v7882_v35 = vld [vmem:[%s15420_s1 + $0x15c0] sm:$0xff] }
0x115b   : > { %10895 = vmatprep.subr.mxu1 %v7850_v36  ;;  %10862 = vmatprep.subr.mxu0 %v7817_v37 }
0x115c   : > { %10896 = vmatpush3.msra.mxu1 %v7850_v36  ;;  %10863 = vmatpush3.msra.mxu0 %v7817_v37  ;;  %v7881_v37 = vld [vmem:[%s15420_s1 + $0x15b8] sm:$0xff] }
0x115d   : > { %10897 = vmatprep.subr.mxu1 %v7849_v39  ;;  %10864 = vmatprep.subr.mxu0 %v7816_v40 }
0x115e   : > { %10898 = vmatpush3.msra.mxu1 %v7849_v39  ;;  %10865 = vmatpush3.msra.mxu0 %v7816_v40  ;;  %v7880_v40 = vld [vmem:[%s15420_s1 + $0x15b0] sm:$0xff] }
0x115f   : > { %10899 = vmatprep.subr.mxu1 %v7848_v41  ;;  %10866 = vmatprep.subr.mxu0 %v7815_v50 }
0x1160   : > { %10900 = vmatpush3.msra.mxu1 %v7848_v41  ;;  %10867 = vmatpush3.msra.mxu0 %v7815_v50  ;;  %v7879_v50 = vld [vmem:[%s15420_s1 + $0x15a8] sm:$0xff] }
0x1161   : > { %10901 = vmatprep.subr.mxu1 %v7847_v38  ;;  %10868 = vmatprep.subr.mxu0 %v7814_v43 }
0x1162   : > { %10902 = vmatpush3.msra.mxu1 %v7847_v38  ;;  %10869 = vmatpush3.msra.mxu0 %v7814_v43  ;;  %v7866_v43 = vld [vmem:[%s15420_s1 + $0x1540] sm:$0xff] }
0x1163   : > { %10903 = vmatprep.subr.mxu1 %v7846_v32  ;;  %10870 = vmatprep.subr.mxu0 %v7813_v44 }
0x1164   : > { %10904 = vmatpush3.msra.mxu1 %v7846_v32  ;;  %10871 = vmatpush3.msra.mxu0 %v7813_v44  ;;  %v7878_v32 = vld [vmem:[%s15420_s1 + $0x15a0] sm:$0xff] }
0x1165   : > { %10905 = vmatprep.subr.mxu1 %v7845_v45  ;;  %10872 = vmatprep.subr.mxu0 %v7812_v47 }
0x1166   : > { %10906 = vmatpush3.msra.mxu1 %v7845_v45  ;;  %10873 = vmatpush3.msra.mxu0 %v7812_v47  ;;  %v7865_v45 = vld [vmem:[%s15420_s1 + $0x1538] sm:$0xff] }
0x1167   : > { %10907 = vmatprep.subr.mxu1 %v7844_v48  ;;  %10874 = vmatprep.subr.mxu0 %v7811_v49  ;;  %v7877_v47 = vld [vmem:[%s15420_s1 + $0x1598] sm:$0xff] }
0x1168   : > { %10908 = vmatpush3.msra.mxu1 %v7844_v48  ;;  %10875 = vmatpush3.msra.mxu0 %v7811_v49  ;;  %v7864_v48 = vld [vmem:[%s15420_s1 + $0x1530] sm:$0xff]  ;;  %v7863_v49 = vld [vmem:[%s15420_s1 + $0x1528] sm:$0xff] }
0x1169   : > { %10909 = vmatprep.subr.mxu1 %v7843_v52  ;;  %10876 = vmatprep.subr.mxu0 %v7810_v56 }
0x116a   : > { %10910 = vmatpush3.msra.mxu1 %v7843_v52  ;;  %10877 = vmatpush3.msra.mxu0 %v7810_v56  ;;  %v7876_v52 = vld [vmem:[%s15420_s1 + $0x1590] sm:$0xff]  ;;  %v7862_v56 = vld [vmem:[%s15420_s1 + $0x1520] sm:$0xff] }
0x116b   : > { %10911 = vmatprep.subr.mxu1 %v7842_v57  ;;  %10879 = vmatmul.mubr.f32.vlgmr.msra.gmra.mxu0 %v13957_v55 }
0x116c   : > { %10912 = vmatpush3.msra.mxu1 %v7842_v57  ;;  %10916 = vmatprep.subr.mxu0 %v7873_v18  ;;  %v7875_v57 = vld [vmem:[%s15420_s1 + $0x1588] sm:$0xff] }
0x116d   : > { %10914 = vmatmul.mubr.f32.vlgmr.msra.gmra.mxu1 %v14046_v6  ;;  %10951 = vmatprep.subr.mxu1 %v7889_v1 }
0x116e   : > { %10917 = vmatpush3.msra.mxu0 %v7873_v18  ;;  %10952 = vmatpush3.msra.mxu1 %v7889_v1  ;;  %v7903_v18 = vld [vmem:[%s15420_s1 + $0x1668] sm:$0xff] }
0x116f   : > { %10918 = vmatprep.subr.mxu0 %v7872_v19  ;;  %10953 = vmatprep.subr.mxu1 %v7888_v20  ;;  %v7935_v1 = vld [vmem:[%s15420_s1 + $0x1748] sm:$0xff] }
0x1170   : > { %10919 = vmatpush3.msra.mxu0 %v7872_v19  ;;  %10954 = vmatpush3.msra.mxu1 %v7888_v20  ;;  %v7902_v19 = vld [vmem:[%s15420_s1 + $0x1660] sm:$0xff] }
0x1171   : > { %10920 = vmatprep.subr.mxu0 %v7871_v21  ;;  %10955 = vmatprep.subr.mxu1 %v7887_v22  ;;  %v7934_v20 = vld [vmem:[%s15420_s1 + $0x1740] sm:$0xff] }
0x1172   : > { %10921 = vmatpush3.msra.mxu0 %v7871_v21  ;;  %10956 = vmatpush3.msra.mxu1 %v7887_v22  ;;  %v7901_v21 = vld [vmem:[%s15420_s1 + $0x1658] sm:$0xff] }
0x1173   : > { %10922 = vmatprep.subr.mxu0 %v7870_v24  ;;  %10957 = vmatprep.subr.mxu1 %v7886_v25  ;;  %v7933_v22 = vld [vmem:[%s15420_s1 + $0x1738] sm:$0xff] }
0x1174   : > { %10923 = vmatpush3.msra.mxu0 %v7870_v24  ;;  %10958 = vmatpush3.msra.mxu1 %v7886_v25  ;;  %v7900_v24 = vld [vmem:[%s15420_s1 + $0x1650] sm:$0xff] }
0x1175   : > { %10924 = vmatprep.subr.mxu0 %v7869_v26  ;;  %10959 = vmatprep.subr.mxu1 %v7885_v27  ;;  %v7932_v25 = vld [vmem:[%s15420_s1 + $0x1730] sm:$0xff] }
0x1176   : > { %10925 = vmatpush3.msra.mxu0 %v7869_v26  ;;  %10960 = vmatpush3.msra.mxu1 %v7885_v27  ;;  %v7899_v26 = vld [vmem:[%s15420_s1 + $0x1648] sm:$0xff] }
0x1177   : > { %10926 = vmatprep.subr.mxu0 %v7868_v9  ;;  %10961 = vmatprep.subr.mxu1 %v7884_v30  ;;  %v7931_v27 = vld [vmem:[%s15420_s1 + $0x1728] sm:$0xff] }
0x1178   : > { %10927 = vmatpush3.msra.mxu0 %v7868_v9  ;;  %10962 = vmatpush3.msra.mxu1 %v7884_v30  ;;  %v7898_v9 = vld [vmem:[%s15420_s1 + $0x1640] sm:$0xff] }
0x1179   : > { %10928 = vmatprep.subr.mxu0 %v7867_v59  ;;  %10963 = vmatprep.subr.mxu1 %v7883_v62  ;;  %v7930_v30 = vld [vmem:[%s15420_s1 + $0x1720] sm:$0xff] }
0x117a   : > { %10929 = vmatpush3.msra.mxu0 %v7867_v59  ;;  %10964 = vmatpush3.msra.mxu1 %v7883_v62  ;;  %v7897_v59 = vld [vmem:[%s15420_s1 + $0x1638] sm:$0xff] }
0x117b   : > { %10965 = vmatprep.subr.mxu1 %v7882_v35  ;;  %10930 = vmatprep.subr.mxu0 %v7866_v43  ;;  %v7929_v62 = vld [vmem:[%s15420_s1 + $0x1718] sm:$0xff] }
0x117c   : > { %10966 = vmatpush3.msra.mxu1 %v7882_v35  ;;  %10931 = vmatpush3.msra.mxu0 %v7866_v43  ;;  %v7895_v35 = vld [vmem:[%s15420_s1 + $0x1628] sm:$0xff] }
0x117d   : > { %10967 = vmatprep.subr.mxu1 %v7881_v37  ;;  %10932 = vmatprep.subr.mxu0 %v7865_v45  ;;  %v7891_v43 = vld [vmem:[%s15420_s1 + $0x1608] sm:$0xff] }
0x117e   : > { %10968 = vmatpush3.msra.mxu1 %v7881_v37  ;;  %10933 = vmatpush3.msra.mxu0 %v7865_v45  ;;  %v7894_v37 = vld [vmem:[%s15420_s1 + $0x1620] sm:$0xff]  ;;  %v7955_v45 = vld [vmem:[%s15420_s1 + $0x17e8] sm:$0xff] }
0x117f   : > { %10969 = vmatprep.subr.mxu1 %v7880_v40  ;;  %10934 = vmatprep.subr.mxu0 %v7864_v48 }
0x1180   : > { %10970 = vmatpush3.msra.mxu1 %v7880_v40  ;;  %10935 = vmatpush3.msra.mxu0 %v7864_v48  ;;  %v7893_v40 = vld [vmem:[%s15420_s1 + $0x1618] sm:$0xff] }
0x1181   : > { %10971 = vmatprep.subr.mxu1 %v7879_v50  ;;  %10936 = vmatprep.subr.mxu0 %v7863_v49 }
0x1182   : > { %10972 = vmatpush3.msra.mxu1 %v7879_v50  ;;  %10937 = vmatpush3.msra.mxu0 %v7863_v49  ;;  %v7957_v50 = vld [vmem:[%s15420_s1 + $0x17f8] sm:$0xff]  ;;  %v7924_v49 = vld [vmem:[%s15420_s1 + $0x16f0] sm:$0xff] }
0x1183   : > { %10973 = vmatprep.subr.mxu1 %v7878_v32  ;;  %10938 = vmatprep.subr.mxu0 %v7862_v56 }
0x1184   : > { %10974 = vmatpush3.msra.mxu1 %v7878_v32  ;;  %10939 = vmatpush3.msra.mxu0 %v7862_v56  ;;  %v7956_v32 = vld [vmem:[%s15420_s1 + $0x17f0] sm:$0xff]  ;;  %v7953_v56 = vld [vmem:[%s15420_s1 + $0x17d8] sm:$0xff] }
0x1185   : > { %10975 = vmatprep.subr.mxu1 %v7877_v47 }
0x1186   : > { %10976 = vmatpush3.msra.mxu1 %v7877_v47  ;;  %v7925_v47 = vld [vmem:[%s15420_s1 + $0x16f8] sm:$0xff] }
0x1187   : > { %10977 = vmatprep.subr.mxu1 %v7876_v52 }
0x1188   : > { %10978 = vmatpush3.msra.mxu1 %v7876_v52  ;;  %v7923_v52 = vld [vmem:[%s15420_s1 + $0x16e8] sm:$0xff] }
0x1189   : > { %10979 = vmatprep.subr.mxu1 %v7875_v57 }
0x118a   : > { %10980 = vmatpush3.msra.mxu1 %v7875_v57  ;;  %v7922_v57 = vld [vmem:[%s15420_s1 + $0x16e0] sm:$0xff] }
0x11e5   : > { %v10740_v58 = vpop.f32.mrf.mxu0 }
0x11e7   : > { %v4120_v61 = vpop.f32.mrf.mxu0 }
0x11ed   : > { %v10775_v60 = vpop.f32.mrf.mxu1 }
0x11ee   : > { %v4201_v2 = vadd.f32 %v10775_v60, %v10740_v58  ;;  %v7874_v58 = vld [vmem:[%s15420_s1 + $0x1580] sm:$0xff]  ;;  %v7861_v60 = vld [vmem:[%s15420_s1 + $0x1518] sm:$0xff] }
0x11ef   : > { %v4195_v63 = vpop.f32.mrf.mxu1  ;;  %10981 = vmatprep.subr.mxu1 %v7874_v58  ;;  %10940 = vmatprep.subr.mxu0 %v7861_v60 }
0x11f0   : > { %v4196_v4 = vadd.f32 %v4195_v63, %v4120_v61  ;;  %v7860_v61 = vld [vmem:[%s15420_s1 + $0x1510] sm:$0xff]  ;;  %v7941_v63 = vld [vmem:[%s15420_s1 + $0x1778] sm:$0xff]  ;;  %10982 = vmatpush3.msra.mxu1 %v7874_v58  ;;  %10941 = vmatpush3.msra.mxu0 %v7861_v60  ;;  %v7951_v60 = vld [vmem:[%s15420_s1 + $0x17c8] sm:$0xff] }
0x11f1   : > { %11021 = vmatprep.subr.mxu1 %v7941_v63  ;;  %10942 = vmatprep.subr.mxu0 %v7860_v61  ;;  %v7921_v58 = vld [vmem:[%s15420_s1 + $0x16d8] sm:$0xff] }
0x11f2   : > { %10943 = vmatpush3.msra.mxu0 %v7860_v61  ;;  %v7920_v61 = vld [vmem:[%s15420_s1 + $0x16d0] sm:$0xff] }
0x1207   : > { %v10810_v0 = vpop.f32.mrf.mxu0 }
0x1208   : > { %v4299_v7 = vadd.f32 %v10810_v0, %v4201_v2  ;;  %v7859_v0 = vld [vmem:[%s15420_s1 + $0x1508] sm:$0xff]  ;;  %v7858_v2 = vld [vmem:[%s15420_s1 + $0x1500] sm:$0xff] }
0x1209   : > { %v4289_v10 = vpop.f32.mrf.mxu0  ;;  %10944 = vmatprep.subr.mxu0 %v7859_v0 }
0x120a   : > { %v4298_v11 = vadd.f32 %v4289_v10, %v4196_v4  ;;  %10945 = vmatpush3.msra.mxu0 %v7859_v0  ;;  %v7905_v4 = vld [vmem:[%s15420_s1 + $0x1678] sm:$0xff]  ;;  %v7919_v0 = vld [vmem:[%s15420_s1 + $0x16c8] sm:$0xff] }
0x120b   : > { %10946 = vmatprep.subr.mxu0 %v7858_v2 }
0x120c   : > { %v4300_v33 = vadd.f32 %v4299_v7, %v4298_v11  ;;  %10947 = vmatpush3.msra.mxu0 %v7858_v2  ;;  %v7949_v2 = vld [vmem:[%s15420_s1 + $0x17b8] sm:$0xff] }
0x120d   : > { %10986 = vmatprep.subr.mxu0 %v7905_v4 }
0x120e   : > { %4301 = vadd.xlane.f32.xlu0 %v4300_v33 }
0x1297   : > { %v4302_v29 = vpop.xlane.xlu0 %4301 }
0x1298   : > { %v4303_v51 = vrot.slane %v4302_v29, 4 }
0x129a   : > { %v4304_v34 = vadd.f32 %v4303_v51, %v4302_v29 }
0x129c   : > { %v4305_v28 = vrot.slane %v4304_v34, 2 }
0x129e   : > { %v4306_v55 = vadd.f32 %v4305_v28, %v4304_v34 }
0x12a0   : > { %v4307_v53 = vrot.slane %v4306_v55, 1 }
0x12a2   : > { %v4308_v12 = vadd.f32 %v4307_v53, %v4306_v55 }
0x12a4   : > { %11792 = vpush %v4308_v12 }
0x12d5   : > { %s11793_s12 = spop %11792 }
0x12d6   : > { %s4312_s13 = smul.f32 0.00048828125, %s11793_s12 }
0x12d8   : > { %v4313_v8 = vstv %s4312_s13 }
0x12d9   : > { %v14150_v13 = vsub.f32 %v4298_v11, %v4313_v8  ;;  %v14152_v14 = vsub.f32 %v4299_v7, %v4313_v8  ;;  %v7940_v8 = vld [vmem:[%s15420_s1 + $0x1770] sm:$0xff] }
0x12db   : > { %v4316_v15 = vmul.f32 %v14150_v13, %v14150_v13  ;;  %v4317_v16 = vmul.f32 %v14152_v14, %v14152_v14 }
0x12dd   : > { %v4318_v17 = vadd.f32 %v4317_v16, %v4316_v15 }
0x12df   : > { %4319 = vadd.xlane.f32.xlu1 %v4318_v17  ;;  %v7936_v17 = vld [vmem:[%s15420_s1 + $0x1750] sm:$0xff] }
0x1368   : > { %v4320_v31 = vpop.xlane.xlu1 %4319 }
0x1369   : > { %v4321_v3 = vrot.slane %v4320_v31, 4 }
0x136b   : > { %v4322_v36 = vadd.f32 %v4321_v3, %v4320_v31  ;;  %v7896_v31 = vld [vmem:[%s15420_s1 + $0x1630] sm:$0xff] }
0x136c   : > { %v7928_v3 = vld [vmem:[%s15420_s1 + $0x1710] sm:$0xff] }
0x136d   : > { %v4323_v39 = vrot.slane %v4322_v36, 2 }
0x136f   : > { %v4324_v41 = vadd.f32 %v4323_v39, %v4322_v36  ;;  %v7927_v36 = vld [vmem:[%s15420_s1 + $0x1708] sm:$0xff]  ;;  %v7926_v39 = vld [vmem:[%s15420_s1 + $0x1700] sm:$0xff] }
0x1371   : > { %v4325_v38 = vrot.slane %v4324_v41, 1 }
0x1373   : > { %v4326_v44 = vadd.f32 %v4325_v38, %v4324_v41  ;;  %v7892_v41 = vld [vmem:[%s15420_s1 + $0x1610] sm:$0xff]  ;;  %v5012_v38 = vld [vmem:[#allocation2 + $0x21] sm:$0xff] }
0x1375   : > { %11794 = vpush %v4326_v44  ;;  %v7890_v44 = vld [vmem:[%s15420_s1 + $0x1600] sm:$0xff] }
0x13a6   : > { %s11795_s13 = spop %11794 }
0x13a7   : > { %s4330_s14 = smul.f32 0.00048828125, %s11795_s13 }
0x13a9   : > { %s4331_s17 = sadd.f32 1e-05, %s4330_s14 }
0x13ab   : > { %v4332_v10 = vstv %s4331_s17 }
0x13ac   : > { %11837 = vrsqrt.f32 %v4332_v10  ;;  %v7948_v10 = vld [vmem:[%s15420_s1 + $0x17b0] sm:$0xff] }
0x13b9   : > { %v11838_v7 = vpop.eup %11837 }
0x13ba   : > { %11796 = vpush %v11838_v7  ;;  %v7917_v7 = vld [vmem:[%s15420_s1 + $0x16b8] sm:$0xff] }
0x13eb   : > { %s11797_s18 = spop %11796 }
0x13ec   : > { %v4335_v11 = vstv %s11797_s18 }
0x13ed   : > { %v4336_v33 = vmul.f32 %v4335_v11, %v14150_v13  ;;  %v4337_v29 = vmul.f32 %v4335_v11, %v14152_v14  ;;  %v7937_v13 = vld [vmem:[%s15420_s1 + $0x1758] sm:$0xff]  ;;  %v7947_v11 = vld [vmem:[%s15420_s1 + $0x17a8] sm:$0xff] }
0x13ef   : > { %v4345_v51 = vmul.f32 %v13925_v5, %v4336_v33  ;;  %v4346_v34 = vmul.f32 %v13925_v5, %v4337_v29  ;;  %v7939_v5 = vld [vmem:[%s15420_s1 + $0x1768] sm:$0xff]  ;;  %v7916_v33 = vld [vmem:[%s15420_s1 + $0x16b0] sm:$0xff]  ;;  %v7946_v29 = vld [vmem:[%s15420_s1 + $0x17a0] sm:$0xff] }
0x13f1   : > { %v4354_v28 = vadd.f32 %v13932_v42, %v4345_v51  ;;  %v4355_v55 = vadd.f32 %v13932_v42, %v4346_v34  ;;  %v7938_v42 = vld [vmem:[%s15420_s1 + $0x1760] sm:$0xff]  ;;  %v7915_v51 = vld [vmem:[%s15420_s1 + $0x16a8] sm:$0xff]  ;;  %v7945_v34 = vld [vmem:[%s15420_s1 + $0x1798] sm:$0xff] }
0x13f3   : > { %v14266_v53 = vmax.f32 %v4354_v28, 0.0  ;;  %v14268_v12 = vmax.f32 %v4355_v55, 0.0  ;;  %v7914_v28 = vld [vmem:[%s15420_s1 + $0x16a0] sm:$0xff]  ;;  %v7944_v55 = vld [vmem:[%s15420_s1 + $0x1790] sm:$0xff] }
0x13f5   : > { %4358 = vst [vmem:[#allocation2 + $0x31] sm:$0xff] %v14266_v53  ;;  %4359 = vst [vmem:[#allocation2 + $0x39] sm:$0xff] %v14268_v12  ;;  %10983 = vmatprep.mubr.f32.mxu1 %v14266_v53 }
0x13f6   : > { %10984 = vmatmul.mubr.f32.vlgmr.msra.gmra.mxu1 %v14268_v12 }
0x13f7   : > { %11022 = vmatpush3.msra.mxu1 %v7941_v63  ;;  %11053 = vmatprep.mubr.f32.mxu1 %v13938_v46  ;;  %v7904_v46 = vld [vmem:[%s15420_s1 + $0x1670] sm:$0xff]  ;;  %v7950_v63 = vld [vmem:[%s15420_s1 + $0x17c0] sm:$0xff] }
0x13f8   : > { %11023 = vmatprep.subr.mxu1 %v7940_v8 }
0x13f9   : > { %11024 = vmatpush3.msra.mxu1 %v7940_v8  ;;  %v7913_v8 = vld [vmem:[%s15420_s1 + $0x1698] sm:$0xff] }
0x13fa   : > { %11025 = vmatprep.subr.mxu1 %v7939_v5 }
0x13fb   : > { %11026 = vmatpush3.msra.mxu1 %v7939_v5  ;;  %v7943_v5 = vld [vmem:[%s15420_s1 + $0x1788] sm:$0xff] }
0x13fc   : > { %v14287_v14 = vld [vmem:[#allocation2 + $0x30] sm:$0xff]  ;;  %v14289_v15 = vld [vmem:[#allocation2 + $0x38] sm:$0xff]  ;;  %11027 = vmatprep.subr.mxu1 %v7938_v42 }
0x13fd   : > { %10948 = vmatprep.mubr.f32.mxu0 %v14287_v14  ;;  %11028 = vmatpush3.msra.mxu1 %v7938_v42  ;;  %v14296_v16 = vld [vmem:[#allocation2 + $0x32] sm:$0xff]  ;;  %v14387_v48 = vld [vmem:[#allocation2 + $0x3a] sm:$0xff] }
0x13fe   : > { %10949 = vmatmul.mubr.f32.vlgmr.msra.gmra.mxu0 %v14289_v15  ;;  %11029 = vmatprep.subr.mxu1 %v7937_v13  ;;  %v7912_v42 = vld [vmem:[%s15420_s1 + $0x1690] sm:$0xff] }
0x13ff   : > { %10987 = vmatpush3.msra.mxu0 %v7905_v4  ;;  %11018 = vmatprep.mubr.f32.mxu0 %v14296_v16  ;;  %v7918_v4 = vld [vmem:[%s15420_s1 + $0x16c0] sm:$0xff] }
0x1400   : > { %10988 = vmatprep.subr.mxu0 %v7904_v46  ;;  %11030 = vmatpush3.msra.mxu1 %v7937_v13  ;;  %v7942_v13 = vld [vmem:[%s15420_s1 + $0x1780] sm:$0xff] }
0x1401   : > { %10989 = vmatpush3.msra.mxu0 %v7904_v46  ;;  %11031 = vmatprep.subr.mxu1 %v7936_v17  ;;  %v7911_v46 = vld [vmem:[%s15420_s1 + $0x1688] sm:$0xff] }
0x1402   : > { %10990 = vmatprep.subr.mxu0 %v7903_v18  ;;  %11032 = vmatpush3.msra.mxu1 %v7936_v17  ;;  %v7910_v17 = vld [vmem:[%s15420_s1 + $0x1680] sm:$0xff] }
0x1403   : > { %10991 = vmatpush3.msra.mxu0 %v7903_v18  ;;  %11033 = vmatprep.subr.mxu1 %v7935_v1  ;;  %v7989_v18 = vld [vmem:[%s15420_s1 + $0x18f8] sm:$0xff] }
0x1404   : > { %10992 = vmatprep.subr.mxu0 %v7902_v19  ;;  %11034 = vmatpush3.msra.mxu1 %v7935_v1  ;;  %v7973_v1 = vld [vmem:[%s15420_s1 + $0x1878] sm:$0xff] }
0x1405   : > { %10993 = vmatpush3.msra.mxu0 %v7902_v19  ;;  %11035 = vmatprep.subr.mxu1 %v7934_v20  ;;  %v4993_v19 = vld [vmem:[#allocation2 + $0x20] sm:$0xff] }
0x1406   : > { %10994 = vmatprep.subr.mxu0 %v7901_v21  ;;  %11036 = vmatpush3.msra.mxu1 %v7934_v20  ;;  %v7972_v20 = vld [vmem:[%s15420_s1 + $0x1870] sm:$0xff] }
0x1407   : > { %10995 = vmatpush3.msra.mxu0 %v7901_v21  ;;  %11037 = vmatprep.subr.mxu1 %v7933_v22  ;;  %v7988_v21 = vld [vmem:[%s15420_s1 + $0x18f0] sm:$0xff] }
0x1408   : > { %10996 = vmatprep.subr.mxu0 %v7900_v24  ;;  %11038 = vmatpush3.msra.mxu1 %v7933_v22  ;;  %v7987_v22 = vld [vmem:[%s15420_s1 + $0x18e8] sm:$0xff] }
0x1409   : > { %10997 = vmatpush3.msra.mxu0 %v7900_v24  ;;  %11039 = vmatprep.subr.mxu1 %v7932_v25  ;;  %v7970_v24 = vld [vmem:[%s15420_s1 + $0x1860] sm:$0xff] }
0x140a   : > { %10998 = vmatprep.subr.mxu0 %v7899_v26  ;;  %11040 = vmatpush3.msra.mxu1 %v7932_v25  ;;  %v7985_v25 = vld [vmem:[%s15420_s1 + $0x18d8] sm:$0xff] }
0x140b   : > { %10999 = vmatpush3.msra.mxu0 %v7899_v26  ;;  %11041 = vmatprep.subr.mxu1 %v7931_v27  ;;  %v7968_v26 = vld [vmem:[%s15420_s1 + $0x1850] sm:$0xff] }
0x140c   : > { %11000 = vmatprep.subr.mxu0 %v7898_v9  ;;  %11042 = vmatpush3.msra.mxu1 %v7931_v27  ;;  %v7984_v27 = vld [vmem:[%s15420_s1 + $0x18d0] sm:$0xff] }
0x140d   : > { %11001 = vmatpush3.msra.mxu0 %v7898_v9  ;;  %11043 = vmatprep.subr.mxu1 %v7930_v30  ;;  %v7967_v9 = vld [vmem:[%s15420_s1 + $0x1848] sm:$0xff] }
0x140e   : > { %11002 = vmatprep.subr.mxu0 %v7897_v59  ;;  %11044 = vmatpush3.msra.mxu1 %v7930_v30  ;;  %v7983_v30 = vld [vmem:[%s15420_s1 + $0x18c8] sm:$0xff] }
0x140f   : > { %11003 = vmatpush3.msra.mxu0 %v7897_v59  ;;  %11045 = vmatprep.subr.mxu1 %v7929_v62  ;;  %v7966_v59 = vld [vmem:[%s15420_s1 + $0x1840] sm:$0xff] }
0x1410   : > { %11004 = vmatprep.subr.mxu0 %v7896_v31  ;;  %11046 = vmatpush3.msra.mxu1 %v7929_v62  ;;  %v7982_v62 = vld [vmem:[%s15420_s1 + $0x18c0] sm:$0xff] }
0x1411   : > { %11005 = vmatpush3.msra.mxu0 %v7896_v31  ;;  %11047 = vmatprep.subr.mxu1 %v7928_v3  ;;  %v7965_v31 = vld [vmem:[%s15420_s1 + $0x1838] sm:$0xff] }
0x1412   : > { %11006 = vmatprep.subr.mxu0 %v7895_v35  ;;  %11048 = vmatpush3.msra.mxu1 %v7928_v3  ;;  %v7981_v3 = vld [vmem:[%s15420_s1 + $0x18b8] sm:$0xff] }
0x1413   : > { %11007 = vmatpush3.msra.mxu0 %v7895_v35  ;;  %11049 = vmatprep.subr.mxu1 %v7927_v36  ;;  %v7964_v35 = vld [vmem:[%s15420_s1 + $0x1830] sm:$0xff] }
0x1414   : > { %11008 = vmatprep.subr.mxu0 %v7894_v37  ;;  %11050 = vmatpush3.msra.mxu1 %v7927_v36  ;;  %v7980_v36 = vld [vmem:[%s15420_s1 + $0x18b0] sm:$0xff] }
0x1415   : > { %11009 = vmatpush3.msra.mxu0 %v7894_v37  ;;  %11051 = vmatprep.subr.mxu1 %v7926_v39  ;;  %v7963_v37 = vld [vmem:[%s15420_s1 + $0x1828] sm:$0xff] }
0x1416   : > { %11010 = vmatprep.subr.mxu0 %v7893_v40  ;;  %11052 = vmatpush3.msra.mxu1 %v7926_v39  ;;  %v7979_v39 = vld [vmem:[%s15420_s1 + $0x18a8] sm:$0xff] }
0x1417   : > { %11011 = vmatpush3.msra.mxu0 %v7893_v40  ;;  %11054 = vmatmul.mubr.f32.vlgmr.msra.gmra.mxu1 %v5012_v38  ;;  %v7962_v40 = vld [vmem:[%s15420_s1 + $0x1820] sm:$0xff]  ;;  %v7977_v38 = vld [vmem:[%s15420_s1 + $0x1898] sm:$0xff] }
0x1418   : > { %11012 = vmatprep.subr.mxu0 %v7892_v41  ;;  %11091 = vmatprep.subr.mxu1 %v7957_v50 }
0x1419   : > { %11013 = vmatpush3.msra.mxu0 %v7892_v41  ;;  %11092 = vmatpush3.msra.mxu1 %v7957_v50  ;;  %v7978_v41 = vld [vmem:[%s15420_s1 + $0x18a0] sm:$0xff]  ;;  %v7961_v50 = vld [vmem:[%s15420_s1 + $0x1818] sm:$0xff] }
0x141a   : > { %11014 = vmatprep.subr.mxu0 %v7891_v43  ;;  %11123 = vmatprep.mubr.f32.mxu1 %v13959_v23  ;;  %v7954_v23 = vld [vmem:[%s15420_s1 + $0x17e0] sm:$0xff] }
0x141b   : > { %11015 = vmatpush3.msra.mxu0 %v7891_v43  ;;  %11093 = vmatprep.subr.mxu1 %v7956_v32  ;;  %v7960_v43 = vld [vmem:[%s15420_s1 + $0x1810] sm:$0xff] }
0x141c   : > { %11016 = vmatprep.subr.mxu0 %v7890_v44  ;;  %11094 = vmatpush3.msra.mxu1 %v7956_v32  ;;  %v7976_v32 = vld [vmem:[%s15420_s1 + $0x1890] sm:$0xff] }
0x141d   : > { %11017 = vmatpush3.msra.mxu0 %v7890_v44  ;;  %11095 = vmatprep.subr.mxu1 %v7955_v45  ;;  %v7959_v44 = vld [vmem:[%s15420_s1 + $0x1808] sm:$0xff] }
0x141e   : > { %11019 = vmatmul.mubr.f32.vlgmr.msra.gmra.mxu0 %v14387_v48  ;;  %11056 = vmatprep.subr.mxu0 %v7925_v47 }
0x141f   : > { %11057 = vmatpush3.msra.mxu0 %v7925_v47  ;;  %11088 = vmatprep.mubr.f32.mxu0 %v13955_v54  ;;  %v7952_v54 = vld [vmem:[%s15420_s1 + $0x17d0] sm:$0xff]  ;;  %v7958_v47 = vld [vmem:[%s15420_s1 + $0x1800] sm:$0xff] }
0x1420   : > { %11058 = vmatprep.subr.mxu0 %v7924_v49  ;;  %11096 = vmatpush3.msra.mxu1 %v7955_v45  ;;  %v7975_v45 = vld [vmem:[%s15420_s1 + $0x1888] sm:$0xff] }
0x1421   : > { %11059 = vmatpush3.msra.mxu0 %v7924_v49  ;;  %11097 = vmatprep.subr.mxu1 %v7954_v23  ;;  %v7974_v49 = vld [vmem:[%s15420_s1 + $0x1880] sm:$0xff] }
0x1422   : > { %11060 = vmatprep.subr.mxu0 %v7923_v52  ;;  %11098 = vmatpush3.msra.mxu1 %v7954_v23  ;;  %v8005_v23 = vld [vmem:[%s15420_s1 + $0x1978] sm:$0xff] }
0x1423   : > { %11061 = vmatpush3.msra.mxu0 %v7923_v52  ;;  %11099 = vmatprep.subr.mxu1 %v7953_v56  ;;  %v8004_v52 = vld [vmem:[%s15420_s1 + $0x1970] sm:$0xff] }
0x1424   : > { %11062 = vmatprep.subr.mxu0 %v7922_v57  ;;  %11100 = vmatpush3.msra.mxu1 %v7953_v56  ;;  %v8003_v56 = vld [vmem:[%s15420_s1 + $0x1968] sm:$0xff] }
0x1425   : > { %11063 = vmatpush3.msra.mxu0 %v7922_v57  ;;  %11101 = vmatprep.subr.mxu1 %v7952_v54  ;;  %v7999_v57 = vld [vmem:[%s15420_s1 + $0x1948] sm:$0xff] }
0x1426   : > { %11064 = vmatprep.subr.mxu0 %v7921_v58  ;;  %11102 = vmatpush3.msra.mxu1 %v7952_v54  ;;  %v7998_v54 = vld [vmem:[%s15420_s1 + $0x1940] sm:$0xff] }
0x1427   : > { %11065 = vmatpush3.msra.mxu0 %v7921_v58  ;;  %11103 = vmatprep.subr.mxu1 %v7951_v60  ;;  %v7997_v58 = vld [vmem:[%s15420_s1 + $0x1938] sm:$0xff] }
0x1428   : > { %11066 = vmatprep.subr.mxu0 %v7920_v61  ;;  %11104 = vmatpush3.msra.mxu1 %v7951_v60  ;;  %v7996_v60 = vld [vmem:[%s15420_s1 + $0x1930] sm:$0xff] }
0x1429   : > { %11067 = vmatpush3.msra.mxu0 %v7920_v61  ;;  %11105 = vmatprep.subr.mxu1 %v7950_v63  ;;  %v7995_v61 = vld [vmem:[%s15420_s1 + $0x1928] sm:$0xff] }
0x142a   : > { %11068 = vmatprep.subr.mxu0 %v7919_v0  ;;  %11106 = vmatpush3.msra.mxu1 %v7950_v63  ;;  %v7994_v63 = vld [vmem:[%s15420_s1 + $0x1920] sm:$0xff] }
0x142b   : > { %11069 = vmatpush3.msra.mxu0 %v7919_v0  ;;  %11107 = vmatprep.subr.mxu1 %v7949_v2  ;;  %v7993_v0 = vld [vmem:[%s15420_s1 + $0x1918] sm:$0xff] }
0x142c   : > { %11070 = vmatprep.subr.mxu0 %v7918_v4  ;;  %11108 = vmatpush3.msra.mxu1 %v7949_v2  ;;  %v7992_v2 = vld [vmem:[%s15420_s1 + $0x1910] sm:$0xff] }
0x142d   : > { %11071 = vmatpush3.msra.mxu0 %v7918_v4  ;;  %11109 = vmatprep.subr.mxu1 %v7948_v10  ;;  %v7991_v4 = vld [vmem:[%s15420_s1 + $0x1908] sm:$0xff] }
0x142e   : > { %11072 = vmatprep.subr.mxu0 %v7917_v7  ;;  %11110 = vmatpush3.msra.mxu1 %v7948_v10  ;;  %v7990_v10 = vld [vmem:[%s15420_s1 + $0x1900] sm:$0xff] }
0x142f   : > { %11073 = vmatpush3.msra.mxu0 %v7917_v7  ;;  %11111 = vmatprep.subr.mxu1 %v7947_v11  ;;  %v10845_v7 = vpop.f32.mrf.mxu1 }
0x1430   : > { %11074 = vmatprep.subr.mxu0 %v7916_v33  ;;  %11112 = vmatpush3.msra.mxu1 %v7947_v11  ;;  %v10880_v11 = vpop.f32.mrf.mxu0 }
0x1431   : > { %11075 = vmatpush3.msra.mxu0 %v7916_v33  ;;  %11113 = vmatprep.subr.mxu1 %v7946_v29  ;;  %v4464_v33 = vpop.f32.mrf.mxu1 }
0x1432   : > { %11076 = vmatprep.subr.mxu0 %v7915_v51  ;;  %11114 = vmatpush3.msra.mxu1 %v7946_v29 }
0x1433   : > { %11077 = vmatpush3.msra.mxu0 %v7915_v51  ;;  %11115 = vmatprep.subr.mxu1 %v7945_v34  ;;  %v10915_v29 = vpop.f32.mrf.mxu1  ;;  %v4539_v51 = vpop.f32.mrf.mxu0 }
0x1434   : > { %11078 = vmatprep.subr.mxu0 %v7914_v28  ;;  %11116 = vmatpush3.msra.mxu1 %v7945_v34 }
0x1435   : > { %11079 = vmatpush3.msra.mxu0 %v7914_v28  ;;  %11117 = vmatprep.subr.mxu1 %v7944_v55  ;;  %v4633_v28 = vpop.f32.mrf.mxu1 }
0x1436   : > { %11080 = vmatprep.subr.mxu0 %v7913_v8  ;;  %11118 = vmatpush3.msra.mxu1 %v7944_v55  ;;  %v4545_v55 = vadd.f32 %v10880_v11, %v10845_v7  ;;  %v8012_v7 = vld [vmem:[%s15420_s1 + $0x19b0] sm:$0xff]  ;;  %v8025_v11 = vld [vmem:[%s15420_s1 + $0x1a18] sm:$0xff] }
0x1437   : > { %11081 = vmatpush3.msra.mxu0 %v7913_v8  ;;  %11119 = vmatprep.subr.mxu1 %v7943_v5  ;;  %v4540_v8 = vadd.f32 %v4539_v51, %v4464_v33  ;;  %v8011_v33 = vld [vmem:[%s15420_s1 + $0x19a8] sm:$0xff] }
0x1438   : > { %11082 = vmatprep.subr.mxu0 %v7912_v42  ;;  %11120 = vmatpush3.msra.mxu1 %v7943_v5  ;;  %v8023_v51 = vld [vmem:[%s15420_s1 + $0x1a08] sm:$0xff] }
0x1439   : > { %11083 = vmatpush3.msra.mxu0 %v7912_v42  ;;  %11121 = vmatprep.subr.mxu1 %v7942_v13  ;;  %v4643_v42 = vadd.f32 %v10915_v29, %v4545_v55  ;;  %v8024_v29 = vld [vmem:[%s15420_s1 + $0x1a10] sm:$0xff]  ;;  %v8009_v55 = vld [vmem:[%s15420_s1 + $0x1998] sm:$0xff] }
0x143a   : > { %11084 = vmatprep.subr.mxu0 %v7911_v46  ;;  %11122 = vmatpush3.msra.mxu1 %v7942_v13  ;;  %v4642_v13 = vadd.f32 %v4633_v28, %v4540_v8  ;;  %v8022_v28 = vld [vmem:[%s15420_s1 + $0x1a00] sm:$0xff]  ;;  %v8008_v8 = vld [vmem:[%s15420_s1 + $0x1990] sm:$0xff] }
0x143b   : > { %11085 = vmatpush3.msra.mxu0 %v7911_v46  ;;  %11124 = vmatmul.mubr.f32.vlgmr.msra.gmra.mxu1 %v14046_v6  ;;  %v7971_v6 = vld [vmem:[%s15420_s1 + $0x1868] sm:$0xff] }
0x143c   : > { %11086 = vmatprep.subr.mxu0 %v7910_v17  ;;  %11161 = vmatprep.subr.mxu1 %v7989_v18 }
0x143d   : > { %11087 = vmatpush3.msra.mxu0 %v7910_v17  ;;  %11162 = vmatpush3.msra.mxu1 %v7989_v18 }
0x143e   : > { %11089 = vmatmul.mubr.f32.vlgmr.msra.gmra.mxu0 %v4993_v19  ;;  %11126 = vmatprep.subr.mxu0 %v7973_v1 }
0x143f   : > { %11127 = vmatpush3.msra.mxu0 %v7973_v1  ;;  %11158 = vmatprep.mubr.f32.mxu0 %v14287_v14  ;;  %v7986_v14 = vld [vmem:[%s15420_s1 + $0x18e0] sm:$0xff] }
0x1440   : > { %11193 = vmatprep.mubr.f32.mxu1 %v14266_v53  ;;  %11128 = vmatprep.subr.mxu0 %v7972_v20  ;;  %v7969_v53 = vld [vmem:[%s15420_s1 + $0x1858] sm:$0xff] }
0x1441   : > { %11163 = vmatprep.subr.mxu1 %v7988_v21  ;;  %11129 = vmatpush3.msra.mxu0 %v7972_v20 }
0x1442   : > { %11164 = vmatpush3.msra.mxu1 %v7988_v21  ;;  %11130 = vmatprep.subr.mxu0 %v7971_v6 }
0x1443   : > { %11165 = vmatprep.subr.mxu1 %v7987_v22  ;;  %11131 = vmatpush3.msra.mxu0 %v7971_v6 }
0x1444   : > { %11166 = vmatpush3.msra.mxu1 %v7987_v22  ;;  %11132 = vmatprep.subr.mxu0 %v7970_v24 }
0x1445   : > { %11167 = vmatprep.subr.mxu1 %v7986_v14  ;;  %11133 = vmatpush3.msra.mxu0 %v7970_v24 }
0x1446   : > { %11168 = vmatpush3.msra.mxu1 %v7986_v14  ;;  %11134 = vmatprep.subr.mxu0 %v7969_v53 }
0x1447   : > { %11169 = vmatprep.subr.mxu1 %v7985_v25  ;;  %11135 = vmatpush3.msra.mxu0 %v7969_v53 }
0x1448   : > { %11170 = vmatpush3.msra.mxu1 %v7985_v25  ;;  %11136 = vmatprep.subr.mxu0 %v7968_v26 }
0x1449   : > { %11171 = vmatprep.subr.mxu1 %v7984_v27  ;;  %11137 = vmatpush3.msra.mxu0 %v7968_v26 }
0x144a   : > { %11172 = vmatpush3.msra.mxu1 %v7984_v27  ;;  %11138 = vmatprep.subr.mxu0 %v7967_v9 }
0x144b   : > { %11173 = vmatprep.subr.mxu1 %v7983_v30  ;;  %11139 = vmatpush3.msra.mxu0 %v7967_v9 }
0x144c   : > { %11174 = vmatpush3.msra.mxu1 %v7983_v30  ;;  %11140 = vmatprep.subr.mxu0 %v7966_v59 }
0x144d   : > { %11175 = vmatprep.subr.mxu1 %v7982_v62  ;;  %11141 = vmatpush3.msra.mxu0 %v7966_v59 }
0x144e   : > { %11176 = vmatpush3.msra.mxu1 %v7982_v62  ;;  %11142 = vmatprep.subr.mxu0 %v7965_v31 }
0x144f   : > { %11177 = vmatprep.subr.mxu1 %v7981_v3  ;;  %11143 = vmatpush3.msra.mxu0 %v7965_v31 }
0x1450   : > { %11178 = vmatpush3.msra.mxu1 %v7981_v3  ;;  %11144 = vmatprep.subr.mxu0 %v7964_v35 }
0x1451   : > { %11179 = vmatprep.subr.mxu1 %v7980_v36  ;;  %11145 = vmatpush3.msra.mxu0 %v7964_v35 }
0x1452   : > { %11180 = vmatpush3.msra.mxu1 %v7980_v36  ;;  %11146 = vmatprep.subr.mxu0 %v7963_v37 }
0x1453   : > { %11181 = vmatprep.subr.mxu1 %v7979_v39  ;;  %11147 = vmatpush3.msra.mxu0 %v7963_v37  ;;  %v8021_v37 = vld [vmem:[%s15420_s1 + $0x19f8] sm:$0xff] }
0x1454   : > { %11182 = vmatpush3.msra.mxu1 %v7979_v39  ;;  %11148 = vmatprep.subr.mxu0 %v7962_v40  ;;  %v8037_v39 = vld [vmem:[%s15420_s1 + $0x1a78] sm:$0xff] }
0x1455   : > { %11183 = vmatprep.subr.mxu1 %v7978_v41  ;;  %11149 = vmatpush3.msra.mxu0 %v7962_v40  ;;  %v8020_v40 = vld [vmem:[%s15420_s1 + $0x19f0] sm:$0xff] }
0x1456   : > { %11184 = vmatpush3.msra.mxu1 %v7978_v41  ;;  %11150 = vmatprep.subr.mxu0 %v7961_v50  ;;  %v8036_v41 = vld [vmem:[%s15420_s1 + $0x1a70] sm:$0xff] }
0x1457   : > { %11185 = vmatprep.subr.mxu1 %v7977_v38  ;;  %11151 = vmatpush3.msra.mxu0 %v7961_v50  ;;  %v8019_v50 = vld [vmem:[%s15420_s1 + $0x19e8] sm:$0xff] }
0x1458   : > { %11186 = vmatpush3.msra.mxu1 %v7977_v38  ;;  %11152 = vmatprep.subr.mxu0 %v7960_v43  ;;  %v8035_v38 = vld [vmem:[%s15420_s1 + $0x1a68] sm:$0xff] }
0x1459   : > { %11187 = vmatprep.subr.mxu1 %v7976_v32  ;;  %11153 = vmatpush3.msra.mxu0 %v7960_v43  ;;  %v8018_v43 = vld [vmem:[%s15420_s1 + $0x19e0] sm:$0xff] }
0x145a   : > { %11188 = vmatpush3.msra.mxu1 %v7976_v32  ;;  %11154 = vmatprep.subr.mxu0 %v7959_v44  ;;  %v8034_v32 = vld [vmem:[%s15420_s1 + $0x1a60] sm:$0xff] }
0x145b   : > { %11189 = vmatprep.subr.mxu1 %v7975_v45  ;;  %11155 = vmatpush3.msra.mxu0 %v7959_v44  ;;  %v8017_v44 = vld [vmem:[%s15420_s1 + $0x19d8] sm:$0xff] }
0x145c   : > { %11190 = vmatpush3.msra.mxu1 %v7975_v45  ;;  %11156 = vmatprep.subr.mxu0 %v7958_v47  ;;  %v8033_v45 = vld [vmem:[%s15420_s1 + $0x1a58] sm:$0xff] }
0x145d   : > { %11191 = vmatprep.subr.mxu1 %v7974_v49  ;;  %11157 = vmatpush3.msra.mxu0 %v7958_v47  ;;  %v8016_v47 = vld [vmem:[%s15420_s1 + $0x19d0] sm:$0xff] }
0x145e   : > { %11192 = vmatpush3.msra.mxu1 %v7974_v49  ;;  %11159 = vmatmul.mubr.f32.vlgmr.msra.gmra.mxu0 %v14289_v15  ;;  %v8002_v15 = vld [vmem:[%s15420_s1 + $0x1960] sm:$0xff]  ;;  %v8032_v49 = vld [vmem:[%s15420_s1 + $0x1a50] sm:$0xff] }
0x145f   : > { %11194 = vmatmul.mubr.f32.vlgmr.msra.gmra.mxu1 %v14268_v12  ;;  %11196 = vmatprep.subr.mxu0 %v8005_v23  ;;  %v8001_v12 = vld [vmem:[%s15420_s1 + $0x1958] sm:$0xff] }
0x1460   : > { %11197 = vmatpush3.msra.mxu0 %v8005_v23  ;;  %11228 = vmatprep.mubr.f32.mxu0 %v14296_v16  ;;  %v8000_v16 = vld [vmem:[%s15420_s1 + $0x1950] sm:$0xff]  ;;  %v8015_v23 = vld [vmem:[%s15420_s1 + $0x19c8] sm:$0xff] }
0x1461   : > { %11198 = vmatprep.subr.mxu0 %v8004_v52  ;;  %11231 = vmatprep.subr.mxu1 %v8021_v37 }
0x1462   : > { %11199 = vmatpush3.msra.mxu0 %v8004_v52  ;;  %11232 = vmatpush3.msra.mxu1 %v8021_v37  ;;  %v8031_v52 = vld [vmem:[%s15420_s1 + $0x1a48] sm:$0xff] }
0x1463   : > { %11200 = vmatprep.subr.mxu0 %v8003_v56  ;;  %11233 = vmatprep.subr.mxu1 %v8020_v40  ;;  %v8051_v37 = vld [vmem:[%s15420_s1 + $0x1ae8] sm:$0xff] }
0x1464   : > { %11201 = vmatpush3.msra.mxu0 %v8003_v56  ;;  %11234 = vmatpush3.msra.mxu1 %v8020_v40  ;;  %v8050_v40 = vld [vmem:[%s15420_s1 + $0x1ae0] sm:$0xff] }
0x1465   : > { %11202 = vmatprep.subr.mxu0 %v8002_v15  ;;  %11235 = vmatprep.subr.mxu1 %v8019_v50 }
0x1466   : > { %11203 = vmatpush3.msra.mxu0 %v8002_v15  ;;  %11236 = vmatpush3.msra.mxu1 %v8019_v50  ;;  %v8049_v50 = vld [vmem:[%s15420_s1 + $0x1ad8] sm:$0xff] }
0x1467   : > { %11204 = vmatprep.subr.mxu0 %v8001_v12  ;;  %11237 = vmatprep.subr.mxu1 %v8018_v43 }
0x1468   : > { %11205 = vmatpush3.msra.mxu0 %v8001_v12  ;;  %11238 = vmatpush3.msra.mxu1 %v8018_v43  ;;  %v8048_v43 = vld [vmem:[%s15420_s1 + $0x1ad0] sm:$0xff] }
0x1469   : > { %11206 = vmatprep.subr.mxu0 %v8000_v16  ;;  %11239 = vmatprep.subr.mxu1 %v8017_v44 }
0x146a   : > { %11207 = vmatpush3.msra.mxu0 %v8000_v16  ;;  %11240 = vmatpush3.msra.mxu1 %v8017_v44  ;;  %v8030_v16 = vld [vmem:[%s15420_s1 + $0x1a40] sm:$0xff]  ;;  %v8047_v44 = vld [vmem:[%s15420_s1 + $0x1ac8] sm:$0xff] }
0x146b   : > { %11208 = vmatprep.subr.mxu0 %v7999_v57  ;;  %11241 = vmatprep.subr.mxu1 %v8016_v47 }
0x146c   : > { %11209 = vmatpush3.msra.mxu0 %v7999_v57  ;;  %11242 = vmatpush3.msra.mxu1 %v8016_v47  ;;  %v8046_v47 = vld [vmem:[%s15420_s1 + $0x1ac0] sm:$0xff] }
0x146d   : > { %11210 = vmatprep.subr.mxu0 %v7998_v54  ;;  %11243 = vmatprep.subr.mxu1 %v8015_v23 }
0x146e   : > { %11211 = vmatpush3.msra.mxu0 %v7998_v54  ;;  %11244 = vmatpush3.msra.mxu1 %v8015_v23  ;;  %v8029_v54 = vld [vmem:[%s15420_s1 + $0x1a38] sm:$0xff] }
0x146f   : > { %11212 = vmatprep.subr.mxu0 %v7997_v58  ;;  %v8045_v23 = vld [vmem:[%s15420_s1 + $0x1ab8] sm:$0xff] }
0x1470   : > { %11213 = vmatpush3.msra.mxu0 %v7997_v58 }
0x1471   : > { %11214 = vmatprep.subr.mxu0 %v7996_v60 }
0x1472   : > { %11215 = vmatpush3.msra.mxu0 %v7996_v60  ;;  %v8028_v60 = vld [vmem:[%s15420_s1 + $0x1a30] sm:$0xff] }
0x1473   : > { %11216 = vmatprep.subr.mxu0 %v7995_v61 }
0x1474   : > { %11217 = vmatpush3.msra.mxu0 %v7995_v61 }
0x1475   : > { %11218 = vmatprep.subr.mxu0 %v7994_v63 }
0x1476   : > { %11219 = vmatpush3.msra.mxu0 %v7994_v63  ;;  %v8027_v63 = vld [vmem:[%s15420_s1 + $0x1a28] sm:$0xff] }
0x1477   : > { %11220 = vmatprep.subr.mxu0 %v7993_v0 }
0x1478   : > { %11221 = vmatpush3.msra.mxu0 %v7993_v0 }
0x1479   : > { %11222 = vmatprep.subr.mxu0 %v7992_v2 }
0x147a   : > { %11223 = vmatpush3.msra.mxu0 %v7992_v2  ;;  %v8014_v2 = vld [vmem:[%s15420_s1 + $0x19c0] sm:$0xff] }
0x147b   : > { %11224 = vmatprep.subr.mxu0 %v7991_v4  ;;  %11245 = vmatprep.subr.mxu1 %v8014_v2 }
0x147c   : > { %11225 = vmatpush3.msra.mxu0 %v7991_v4  ;;  %v8026_v4 = vld [vmem:[%s15420_s1 + $0x1a20] sm:$0xff]  ;;  %11246 = vmatpush3.msra.mxu1 %v8014_v2  ;;  %v8104_v2 = vld [vmem:[%s15420_s1 + $0x1c70] sm:$0xff] }
0x147d   : > { %11226 = vmatprep.subr.mxu0 %v7990_v10 }
0x147e   : > { %11227 = vmatpush3.msra.mxu0 %v7990_v10  ;;  %v8013_v10 = vld [vmem:[%s15420_s1 + $0x19b8] sm:$0xff] }
0x147f   : > { %11229 = vmatmul.mubr.f32.vlgmr.msra.gmra.mxu0 %v14387_v48  ;;  %11266 = vmatprep.subr.mxu0 %v8037_v39 }
0x1480   : > { %11267 = vmatpush3.msra.mxu0 %v8037_v39  ;;  %11247 = vmatprep.subr.mxu1 %v8013_v10  ;;  %v8083_v39 = vld [vmem:[%s15420_s1 + $0x1bc8] sm:$0xff] }
0x1481   : > { %11268 = vmatprep.subr.mxu0 %v8036_v41  ;;  %11248 = vmatpush3.msra.mxu1 %v8013_v10  ;;  %v6100_v10 = vld [vmem:[#allocation2 + $0x1a] sm:$0xff] }
0x1482   : > { %11269 = vmatpush3.msra.mxu0 %v8036_v41  ;;  %11249 = vmatprep.subr.mxu1 %v8012_v7  ;;  %v8082_v41 = vld [vmem:[%s15420_s1 + $0x1bc0] sm:$0xff] }
0x1483   : > { %11270 = vmatprep.subr.mxu0 %v8035_v38  ;;  %11250 = vmatpush3.msra.mxu1 %v8012_v7  ;;  %v8103_v7 = vld [vmem:[%s15420_s1 + $0x1c68] sm:$0xff] }
0x1484   : > { %11271 = vmatpush3.msra.mxu0 %v8035_v38  ;;  %11251 = vmatprep.subr.mxu1 %v8011_v33  ;;  %v8081_v38 = vld [vmem:[%s15420_s1 + $0x1bb8] sm:$0xff] }
0x1485   : > { %11272 = vmatprep.subr.mxu0 %v8034_v32  ;;  %11252 = vmatpush3.msra.mxu1 %v8011_v33 }
0x1486   : > { %11273 = vmatpush3.msra.mxu0 %v8034_v32  ;;  %v8080_v32 = vld [vmem:[%s15420_s1 + $0x1bb0] sm:$0xff] }
0x1487   : > { %11274 = vmatprep.subr.mxu0 %v8033_v45 }
0x1488   : > { %11275 = vmatpush3.msra.mxu0 %v8033_v45  ;;  %v8079_v45 = vld [vmem:[%s15420_s1 + $0x1ba8] sm:$0xff] }
0x1489   : > { %11276 = vmatprep.subr.mxu0 %v8032_v49 }
0x148a   : > { %11277 = vmatpush3.msra.mxu0 %v8032_v49  ;;  %v8078_v49 = vld [vmem:[%s15420_s1 + $0x1ba0] sm:$0xff] }
0x148b   : > { %11278 = vmatprep.subr.mxu0 %v8031_v52 }
0x148c   : > { %11279 = vmatpush3.msra.mxu0 %v8031_v52  ;;  %v8077_v52 = vld [vmem:[%s15420_s1 + $0x1b98] sm:$0xff] }
0x148d   : > { %11280 = vmatprep.subr.mxu0 %v8030_v16 }
0x148e   : > { %11281 = vmatpush3.msra.mxu0 %v8030_v16  ;;  %v8075_v16 = vld [vmem:[%s15420_s1 + $0x1b88] sm:$0xff] }
0x148f   : > { %11282 = vmatprep.subr.mxu0 %v8029_v54 }
0x1490   : > { %11283 = vmatpush3.msra.mxu0 %v8029_v54  ;;  %v8074_v54 = vld [vmem:[%s15420_s1 + $0x1b80] sm:$0xff] }
0x1491   : > { %11284 = vmatprep.subr.mxu0 %v8028_v60 }
0x1492   : > { %11285 = vmatpush3.msra.mxu0 %v8028_v60  ;;  %v8040_v60 = vld [vmem:[%s15420_s1 + $0x1a90] sm:$0xff] }
0x1493   : > { %11286 = vmatprep.subr.mxu0 %v8027_v63 }
0x1494   : > { %11287 = vmatpush3.msra.mxu0 %v8027_v63  ;;  %v5932_v63 = vld [vmem:[#allocation2 + $0x21] sm:$0xff] }
0x1495   : > { %11288 = vmatprep.subr.mxu0 %v8026_v4 }
0x1496   : > { %11289 = vmatpush3.msra.mxu0 %v8026_v4  ;;  %v8038_v4 = vld [vmem:[%s15420_s1 + $0x1a80] sm:$0xff] }
0x1497   : > { %11290 = vmatprep.subr.mxu0 %v8025_v11 }
0x1498   : > { %11291 = vmatpush3.msra.mxu0 %v8025_v11  ;;  %v8073_v11 = vld [vmem:[%s15420_s1 + $0x1b78] sm:$0xff] }
0x1499   : > { %11292 = vmatprep.subr.mxu0 %v8024_v29 }
0x149a   : > { %11293 = vmatpush3.msra.mxu0 %v8024_v29  ;;  %v8072_v29 = vld [vmem:[%s15420_s1 + $0x1b70] sm:$0xff] }
0x149b   : > { %11294 = vmatprep.subr.mxu0 %v8023_v51 }
0x149c   : > { %11295 = vmatpush3.msra.mxu0 %v8023_v51  ;;  %v5912_v51 = vld [vmem:[#allocation2 + $0x18] sm:$0xff] }
0x149d   : > { %11296 = vmatprep.subr.mxu0 %v8022_v28 }
0x149e   : > { %11297 = vmatpush3.msra.mxu0 %v8022_v28  ;;  %v8071_v28 = vld [vmem:[%s15420_s1 + $0x1b68] sm:$0xff] }
0x14b6   : > { %v10985_v46 = vpop.f32.mrf.mxu1 }
0x14b8   : > { %v4825_v1 = vpop.f32.mrf.mxu1 }
0x14be   : > { %v10950_v34 = vpop.f32.mrf.mxu0 }
0x14bf   : > { %v4739_v17 = vadd.f32 %v10950_v34, %v4643_v42  ;;  %v8010_v34 = vld [vmem:[%s15420_s1 + $0x19a0] sm:$0xff]  ;;  %v8007_v42 = vld [vmem:[%s15420_s1 + $0x1988] sm:$0xff] }
0x14c0   : > { %v4729_v5 = vpop.f32.mrf.mxu0  ;;  %11253 = vmatprep.subr.mxu1 %v8010_v34 }
0x14c1   : > { %v4738_v18 = vadd.f32 %v4729_v5, %v4642_v13  ;;  %v4835_v20 = vadd.f32 %v10985_v46, %v4739_v17  ;;  %11254 = vmatpush3.msra.mxu1 %v8010_v34  ;;  %v8089_v5 = vld [vmem:[%s15420_s1 + $0x1bf8] sm:$0xff]  ;;  %v8006_v13 = vld [vmem:[%s15420_s1 + $0x1980] sm:$0xff] }
0x14c2   : > { %11255 = vmatprep.subr.mxu1 %v8009_v55  ;;  %11336 = vmatprep.subr.mxu0 %v8089_v5  ;;  %v8053_v46 = vld [vmem:[%s15420_s1 + $0x1af8] sm:$0xff]  ;;  %v8102_v34 = vld [vmem:[%s15420_s1 + $0x1c60] sm:$0xff] }
0x14c3   : > { %v4834_v21 = vadd.f32 %v4825_v1, %v4738_v18  ;;  %11256 = vmatpush3.msra.mxu1 %v8009_v55  ;;  %v8101_v55 = vld [vmem:[%s15420_s1 + $0x1c58] sm:$0xff] }
0x14c4   : > { %11257 = vmatprep.subr.mxu1 %v8008_v8 }
0x14c5   : > { %11258 = vmatpush3.msra.mxu1 %v8008_v8  ;;  %v8070_v8 = vld [vmem:[%s15420_s1 + $0x1b60] sm:$0xff] }
0x14c6   : > { %11259 = vmatprep.subr.mxu1 %v8007_v42 }
0x14c7   : > { %11260 = vmatpush3.msra.mxu1 %v8007_v42  ;;  %v8069_v42 = vld [vmem:[%s15420_s1 + $0x1b58] sm:$0xff] }
0x14c8   : > { %11261 = vmatprep.subr.mxu1 %v8006_v13 }
0x14c9   : > { %11262 = vmatpush3.msra.mxu1 %v8006_v13  ;;  %v8099_v13 = vld [vmem:[%s15420_s1 + $0x1c48] sm:$0xff] }
0x14ca   : > { %11301 = vmatprep.subr.mxu1 %v8053_v46 }
0x14de   : > { %v11020_v19 = vpop.f32.mrf.mxu0 }
0x14df   : > { %v4931_v6 = vadd.f32 %v11020_v19, %v4835_v20  ;;  %v7907_v19 = vld [vmem:[%s15421_s2 + $0x1] ss:$0 sm:$0xff] }
0x14e0   : > { %v4921_v48 = vpop.f32.mrf.mxu0 }
0x14e1   : > { %v4930_v22 = vadd.f32 %v4921_v48, %v4834_v21  ;;  %v7909_v48 = vld [vmem:[%s15422_s3 + $0x1] ss:$0 sm:$0xff] }
0x14e3   : > { %v4932_v24 = vadd.f32 %v4931_v6, %v4930_v22 }
0x14e5   : > { %4933 = vadd.xlane.f32.xlu0 %v4932_v24 }
0x156e   : > { %v4934_v14 = vpop.xlane.xlu0 %4933 }
0x156f   : > { %v4935_v53 = vrot.slane %v4934_v14, 4 }
0x1571   : > { %v4936_v25 = vadd.f32 %v4935_v53, %v4934_v14 }
0x1573   : > { %v4937_v26 = vrot.slane %v4936_v25, 2 }
0x1575   : > { %v4938_v27 = vadd.f32 %v4937_v26, %v4936_v25  ;;  %v8088_v26 = vld [vmem:[%s15420_s1 + $0x1bf0] sm:$0xff] }
0x1577   : > { %v4939_v9 = vrot.slane %v4938_v27, 1 }
0x1579   : > { %v4940_v30 = vadd.f32 %v4939_v9, %v4938_v27  ;;  %v5931_v27 = vld [vmem:[#allocation2 + $0x19] sm:$0xff]  ;;  %v8087_v9 = vld [vmem:[%s15420_s1 + $0x1be8] sm:$0xff] }
0x157b   : > { %11798 = vpush %v4940_v30  ;;  %v8086_v30 = vld [vmem:[%s15420_s1 + $0x1be0] sm:$0xff] }
0x15ac   : > { %s11799_s6 = spop %11798 }
0x15ad   : > { %s4944_s7 = smul.f32 0.00048828125, %s11799_s6 }
0x15af   : > { %v4945_v59 = vstv %s4944_s7 }
0x15b0   : > { %v14626_v62 = vsub.f32 %v4930_v22, %v4945_v59  ;;  %v14628_v31 = vsub.f32 %v4931_v6, %v4945_v59  ;;  %v8085_v59 = vld [vmem:[%s15420_s1 + $0x1bd8] sm:$0xff] }
0x15b2   : > { %v4948_v3 = vmul.f32 %v14626_v62, %v14626_v62  ;;  %v4949_v35 = vmul.f32 %v14628_v31, %v14628_v31 }
0x15b4   : > { %v4950_v36 = vadd.f32 %v4949_v35, %v4948_v3  ;;  %v8052_v3 = vld [vmem:[%s15420_s1 + $0x1af0] sm:$0xff] }
0x15b6   : > { %4951 = vadd.xlane.f32.xlu1 %v4950_v36  ;;  %v8084_v36 = vld [vmem:[%s15420_s1 + $0x1bd0] sm:$0xff] }
0x163f   : > { %v4952_v56 = vpop.xlane.xlu1 %4951 }
0x1640   : > { %v4953_v15 = vrot.slane %v4952_v56, 4 }
0x1642   : > { %v4954_v12 = vadd.f32 %v4953_v15, %v4952_v56  ;;  %v8044_v56 = vld [vmem:[%s15420_s1 + $0x1ab0] sm:$0xff] }
0x1643   : > { %v8076_v15 = vld [vmem:[%s15420_s1 + $0x1b90] sm:$0xff] }
0x1644   : > { %v4955_v57 = vrot.slane %v4954_v12, 2 }
0x1646   : > { %v4956_v58 = vadd.f32 %v4955_v57, %v4954_v12  ;;  %v8043_v12 = vld [vmem:[%s15420_s1 + $0x1aa8] sm:$0xff]  ;;  %v8042_v57 = vld [vmem:[%s15420_s1 + $0x1aa0] sm:$0xff] }
0x1648   : > { %v4957_v61 = vrot.slane %v4956_v58, 1 }
0x164a   : > { %v4958_v0 = vadd.f32 %v4957_v61, %v4956_v58  ;;  %v8041_v58 = vld [vmem:[%s15420_s1 + $0x1a98] sm:$0xff] }
0x164b   : > { %v8105_v61 = vld [vmem:[%s15420_s1 + $0x1c78] sm:$0xff] }
0x164c   : > { %11800 = vpush %v4958_v0  ;;  %v8039_v0 = vld [vmem:[%s15420_s1 + $0x1a88] sm:$0xff] }
0x167d   : > { %s11801_s7 = spop %11800 }
0x167e   : > { %s4962_s9 = smul.f32 0.00048828125, %s11801_s7 }
0x1680   : > { %s4963_s10 = sadd.f32 1e-05, %s4962_s9 }
0x1682   : > { %v4964_v17 = vstv %s4963_s10 }
0x1683   : > { %11839 = vrsqrt.f32 %v4964_v17  ;;  %v8098_v17 = vld [vmem:[%s15420_s1 + $0x1c40] sm:$0xff] }
0x1690   : > { %v11840_v18 = vpop.eup %11839 }
0x1691   : > { %11802 = vpush %v11840_v18  ;;  %v8067_v18 = vld [vmem:[%s15420_s1 + $0x1b48] sm:$0xff] }
0x16c2   : > { %s11803_s11 = spop %11802 }
0x16c3   : > { %v4967_v1 = vstv %s11803_s11 }
0x16c4   : > { %v4968_v20 = vmul.f32 %v4967_v1, %v14626_v62  ;;  %v4969_v21 = vmul.f32 %v4967_v1, %v14628_v31  ;;  %v8097_v1 = vld [vmem:[%s15420_s1 + $0x1c38] sm:$0xff] }
0x16c6   : > { %v4977_v6 = vmul.f32 %v7907_v19, %v4968_v20  ;;  %v4978_v22 = vmul.f32 %v7907_v19, %v4969_v21  ;;  %v8066_v19 = vld [vmem:[%s15420_s1 + $0x1b40] sm:$0xff]  ;;  %v8096_v20 = vld [vmem:[%s15420_s1 + $0x1c30] sm:$0xff]  ;;  %v8065_v21 = vld [vmem:[%s15420_s1 + $0x1b38] sm:$0xff] }
0x16c8   : > { %v4986_v24 = vadd.f32 %v7909_v48, %v4977_v6  ;;  %v4987_v14 = vadd.f32 %v7909_v48, %v4978_v22  ;;  %v8095_v48 = vld [vmem:[%s15420_s1 + $0x1c28] sm:$0xff]  ;;  %v8064_v6 = vld [vmem:[%s15420_s1 + $0x1b30] sm:$0xff]  ;;  %v8094_v22 = vld [vmem:[%s15420_s1 + $0x1c20] sm:$0xff] }
0x16ca   : > { %v14744_v53 = vmax.f32 %v4986_v24, 0.0  ;;  %v4989_v25 = vmax.f32 %v4987_v14, 0.0  ;;  %v8063_v24 = vld [vmem:[%s15420_s1 + $0x1b28] sm:$0xff]  ;;  %v8093_v14 = vld [vmem:[%s15420_s1 + $0x1c18] sm:$0xff] }
0x16cc   : > { %4990 = vst [vmem:[#allocation2 + $0x49] sm:$0xff] %v14744_v53  ;;  %4991 = vst [vmem:[#allocation2 + $0x51] sm:$0xff] %v4989_v25  ;;  %11298 = vmatprep.mubr.f32.mxu0 %v14744_v53 }
0x16cd   : > { %11299 = vmatmul.mubr.f32.vlgmr.msra.gmra.mxu0 %v4989_v25  ;;  %v8062_v25 = vld [vmem:[%s15420_s1 + $0x1b20] sm:$0xff] }
0x16ce   : > { %11337 = vmatpush3.msra.mxu0 %v8089_v5  ;;  %11368 = vmatprep.mubr.f32.mxu0 %v5931_v27  ;;  %v8100_v5 = vld [vmem:[%s15420_s1 + $0x1c50] sm:$0xff]  ;;  %v8061_v27 = vld [vmem:[%s15420_s1 + $0x1b18] sm:$0xff] }
0x16cf   : > { %11338 = vmatprep.subr.mxu0 %v8088_v26 }
0x16d0   : > { %11339 = vmatpush3.msra.mxu0 %v8088_v26  ;;  %v8092_v26 = vld [vmem:[%s15420_s1 + $0x1c10] sm:$0xff] }
0x16d1   : > { %11340 = vmatprep.subr.mxu0 %v8087_v9 }
0x16d2   : > { %11341 = vmatpush3.msra.mxu0 %v8087_v9  ;;  %v8091_v9 = vld [vmem:[%s15420_s1 + $0x1c08] sm:$0xff] }
0x16d3   : > { %v14760_v62 = vld [vmem:[#allocation2 + $0x48] sm:$0xff]  ;;  %v14762_v31 = vld [vmem:[#allocation2 + $0x50] sm:$0xff]  ;;  %11342 = vmatprep.subr.mxu0 %v8086_v30 }
0x16d4   : > { %11263 = vmatprep.mubr.f32.mxu1 %v14760_v62  ;;  %11343 = vmatpush3.msra.mxu0 %v8086_v30  ;;  %v14769_v35 = vld [vmem:[#allocation2 + $0x4a] sm:$0xff]  ;;  %v14859_v33 = vld [vmem:[#allocation2 + $0x52] sm:$0xff] }
0x16d5   : > { %11264 = vmatmul.mubr.f32.vlgmr.msra.gmra.mxu1 %v14762_v31  ;;  %11344 = vmatprep.subr.mxu0 %v8085_v59  ;;  %v8060_v30 = vld [vmem:[%s15420_s1 + $0x1b10] sm:$0xff] }
0x16d6   : > { %11302 = vmatpush3.msra.mxu1 %v8053_v46  ;;  %11333 = vmatprep.mubr.f32.mxu1 %v14769_v35  ;;  %v8068_v46 = vld [vmem:[%s15420_s1 + $0x1b50] sm:$0xff] }
0x16d7   : > { %11303 = vmatprep.subr.mxu1 %v8052_v3  ;;  %11345 = vmatpush3.msra.mxu0 %v8085_v59  ;;  %v8090_v59 = vld [vmem:[%s15420_s1 + $0x1c00] sm:$0xff] }
0x16d8   : > { %11304 = vmatpush3.msra.mxu1 %v8052_v3  ;;  %11346 = vmatprep.subr.mxu0 %v8084_v36  ;;  %v8059_v3 = vld [vmem:[%s15420_s1 + $0x1b08] sm:$0xff] }
0x16d9   : > { %11305 = vmatprep.subr.mxu1 %v8051_v37  ;;  %11347 = vmatpush3.msra.mxu0 %v8084_v36  ;;  %v8058_v36 = vld [vmem:[%s15420_s1 + $0x1b00] sm:$0xff] }
0x16da   : > { %11306 = vmatpush3.msra.mxu1 %v8051_v37  ;;  %11348 = vmatprep.subr.mxu0 %v8083_v39  ;;  %v8137_v37 = vld [vmem:[%s15420_s1 + $0x1d78] sm:$0xff] }
0x16db   : > { %11307 = vmatprep.subr.mxu1 %v8050_v40  ;;  %11349 = vmatpush3.msra.mxu0 %v8083_v39  ;;  %v6101_v39 = vld [vmem:[#allocation2 + $0x22] sm:$0xff] }
0x16dc   : > { %11308 = vmatpush3.msra.mxu1 %v8050_v40  ;;  %11350 = vmatprep.subr.mxu0 %v8082_v41  ;;  %v8121_v40 = vld [vmem:[%s15420_s1 + $0x1cf8] sm:$0xff] }
0x16dd   : > { %11309 = vmatprep.subr.mxu1 %v8049_v50  ;;  %11351 = vmatpush3.msra.mxu0 %v8082_v41  ;;  %v5913_v41 = vld [vmem:[#allocation2 + $0x20] sm:$0xff] }
0x16de   : > { %11310 = vmatpush3.msra.mxu1 %v8049_v50  ;;  %11352 = vmatprep.subr.mxu0 %v8081_v38  ;;  %v8120_v50 = vld [vmem:[%s15420_s1 + $0x1cf0] sm:$0xff] }
0x16df   : > { %11311 = vmatprep.subr.mxu1 %v8048_v43  ;;  %11353 = vmatpush3.msra.mxu0 %v8081_v38  ;;  %v6196_v38 = vld [vmem:[#allocation2 + $0x30] sm:$0xff] }
0x16e0   : > { %11312 = vmatpush3.msra.mxu1 %v8048_v43  ;;  %11354 = vmatprep.subr.mxu0 %v8080_v32  ;;  %v8136_v43 = vld [vmem:[%s15420_s1 + $0x1d70] sm:$0xff] }
0x16e1   : > { %11313 = vmatprep.subr.mxu1 %v8047_v44  ;;  %11355 = vmatpush3.msra.mxu0 %v8080_v32  ;;  %v6292_v32 = vld [vmem:[#allocation2 + $0x31] sm:$0xff] }
0x16e2   : > { %11314 = vmatpush3.msra.mxu1 %v8047_v44  ;;  %11356 = vmatprep.subr.mxu0 %v8079_v45  ;;  %v8119_v44 = vld [vmem:[%s15420_s1 + $0x1ce8] sm:$0xff] }
0x16e3   : > { %11315 = vmatprep.subr.mxu1 %v8046_v47  ;;  %11357 = vmatpush3.msra.mxu0 %v8079_v45  ;;  %v8135_v45 = vld [vmem:[%s15420_s1 + $0x1d68] sm:$0xff] }
0x16e4   : > { %11316 = vmatpush3.msra.mxu1 %v8046_v47  ;;  %11358 = vmatprep.subr.mxu0 %v8078_v49  ;;  %v8118_v47 = vld [vmem:[%s15420_s1 + $0x1ce0] sm:$0xff] }
0x16e5   : > { %11317 = vmatprep.subr.mxu1 %v8045_v23  ;;  %11359 = vmatpush3.msra.mxu0 %v8078_v49  ;;  %v8134_v49 = vld [vmem:[%s15420_s1 + $0x1d60] sm:$0xff] }
0x16e6   : > { %11318 = vmatpush3.msra.mxu1 %v8045_v23  ;;  %11360 = vmatprep.subr.mxu0 %v8077_v52  ;;  %v8117_v23 = vld [vmem:[%s15420_s1 + $0x1cd8] sm:$0xff] }
0x16e7   : > { %11319 = vmatprep.subr.mxu1 %v8044_v56  ;;  %11361 = vmatpush3.msra.mxu0 %v8077_v52  ;;  %v8133_v52 = vld [vmem:[%s15420_s1 + $0x1d58] sm:$0xff] }
0x16e8   : > { %11320 = vmatpush3.msra.mxu1 %v8044_v56  ;;  %11362 = vmatprep.subr.mxu0 %v8076_v15  ;;  %v8116_v56 = vld [vmem:[%s15420_s1 + $0x1cd0] sm:$0xff] }
0x16e9   : > { %11321 = vmatprep.subr.mxu1 %v8043_v12  ;;  %11363 = vmatpush3.msra.mxu0 %v8076_v15  ;;  %v8132_v15 = vld [vmem:[%s15420_s1 + $0x1d50] sm:$0xff] }
0x16ea   : > { %11322 = vmatpush3.msra.mxu1 %v8043_v12  ;;  %11364 = vmatprep.subr.mxu0 %v8075_v16  ;;  %v8115_v12 = vld [vmem:[%s15420_s1 + $0x1cc8] sm:$0xff] }
0x16eb   : > { %11323 = vmatprep.subr.mxu1 %v8042_v57  ;;  %11365 = vmatpush3.msra.mxu0 %v8075_v16  ;;  %v8131_v16 = vld [vmem:[%s15420_s1 + $0x1d48] sm:$0xff] }
0x16ec   : > { %11324 = vmatpush3.msra.mxu1 %v8042_v57  ;;  %11366 = vmatprep.subr.mxu0 %v8074_v54  ;;  %v8114_v57 = vld [vmem:[%s15420_s1 + $0x1cc0] sm:$0xff] }
0x16ed   : > { %11325 = vmatprep.subr.mxu1 %v8041_v58  ;;  %11367 = vmatpush3.msra.mxu0 %v8074_v54  ;;  %v8130_v54 = vld [vmem:[%s15420_s1 + $0x1d40] sm:$0xff] }
0x16ee   : > { %11326 = vmatpush3.msra.mxu1 %v8041_v58  ;;  %11369 = vmatmul.mubr.f32.vlgmr.msra.gmra.mxu0 %v5932_v63  ;;  %v8113_v58 = vld [vmem:[%s15420_s1 + $0x1cb8] sm:$0xff]  ;;  %v8128_v63 = vld [vmem:[%s15420_s1 + $0x1d30] sm:$0xff] }
0x16ef   : > { %11327 = vmatprep.subr.mxu1 %v8040_v60  ;;  %11406 = vmatprep.subr.mxu0 %v8105_v61 }
0x16f0   : > { %11328 = vmatpush3.msra.mxu1 %v8040_v60  ;;  %11407 = vmatpush3.msra.mxu0 %v8105_v61  ;;  %v8129_v60 = vld [vmem:[%s15420_s1 + $0x1d38] sm:$0xff]  ;;  %v8112_v61 = vld [vmem:[%s15420_s1 + $0x1cb0] sm:$0xff] }
0x16f1   : > { %11329 = vmatprep.subr.mxu1 %v8039_v0  ;;  %11438 = vmatprep.mubr.f32.mxu0 %v6100_v10  ;;  %v8126_v10 = vld [vmem:[%s15420_s1 + $0x1d20] sm:$0xff] }
0x16f2   : > { %11330 = vmatpush3.msra.mxu1 %v8039_v0  ;;  %11408 = vmatprep.subr.mxu0 %v8104_v2  ;;  %v8111_v0 = vld [vmem:[%s15420_s1 + $0x1ca8] sm:$0xff] }
0x16f3   : > { %11331 = vmatprep.subr.mxu1 %v8038_v4  ;;  %11409 = vmatpush3.msra.mxu0 %v8104_v2  ;;  %v8127_v2 = vld [vmem:[%s15420_s1 + $0x1d28] sm:$0xff] }
0x16f4   : > { %11332 = vmatpush3.msra.mxu1 %v8038_v4  ;;  %11410 = vmatprep.subr.mxu0 %v8103_v7  ;;  %v8110_v4 = vld [vmem:[%s15420_s1 + $0x1ca0] sm:$0xff] }
0x16f5   : > { %11334 = vmatmul.mubr.f32.vlgmr.msra.gmra.mxu1 %v14859_v33  ;;  %11371 = vmatprep.subr.mxu1 %v8073_v11 }
0x16f6   : > { %11372 = vmatpush3.msra.mxu1 %v8073_v11  ;;  %11403 = vmatprep.mubr.f32.mxu1 %v5912_v51  ;;  %v8125_v11 = vld [vmem:[%s15420_s1 + $0x1d18] sm:$0xff]  ;;  %v8124_v51 = vld [vmem:[%s15420_s1 + $0x1d10] sm:$0xff] }
0x16f7   : > { %11373 = vmatprep.subr.mxu1 %v8072_v29  ;;  %11411 = vmatpush3.msra.mxu0 %v8103_v7  ;;  %v8109_v7 = vld [vmem:[%s15420_s1 + $0x1c98] sm:$0xff] }
0x16f8   : > { %11374 = vmatpush3.msra.mxu1 %v8072_v29  ;;  %11412 = vmatprep.subr.mxu0 %v8102_v34  ;;  %v8108_v29 = vld [vmem:[%s15420_s1 + $0x1c90] sm:$0xff] }
0x16f9   : > { %11375 = vmatprep.subr.mxu1 %v8071_v28  ;;  %11413 = vmatpush3.msra.mxu0 %v8102_v34  ;;  %v8107_v34 = vld [vmem:[%s15420_s1 + $0x1c88] sm:$0xff] }
0x16fa   : > { %11376 = vmatpush3.msra.mxu1 %v8071_v28  ;;  %11414 = vmatprep.subr.mxu0 %v8101_v55  ;;  %v8123_v28 = vld [vmem:[%s15420_s1 + $0x1d08] sm:$0xff] }
0x16fb   : > { %11377 = vmatprep.subr.mxu1 %v8070_v8  ;;  %11415 = vmatpush3.msra.mxu0 %v8101_v55  ;;  %v8106_v55 = vld [vmem:[%s15420_s1 + $0x1c80] sm:$0xff] }
0x16fc   : > { %11378 = vmatpush3.msra.mxu1 %v8070_v8  ;;  %11416 = vmatprep.subr.mxu0 %v8100_v5  ;;  %v8122_v8 = vld [vmem:[%s15420_s1 + $0x1d00] sm:$0xff] }
0x16fd   : > { %11379 = vmatprep.subr.mxu1 %v8069_v42  ;;  %11417 = vmatpush3.msra.mxu0 %v8100_v5  ;;  %v8153_v5 = vld [vmem:[%s15420_s1 + $0x1df8] sm:$0xff] }
0x16fe   : > { %11380 = vmatpush3.msra.mxu1 %v8069_v42  ;;  %11418 = vmatprep.subr.mxu0 %v8099_v13  ;;  %v6197_v42 = vld [vmem:[#allocation2 + $0x38] sm:$0xff] }
0x16ff   : > { %11381 = vmatprep.subr.mxu1 %v8068_v46  ;;  %11419 = vmatpush3.msra.mxu0 %v8099_v13  ;;  %v8169_v13 = vld [vmem:[%s15420_s1 + $0x1e78] sm:$0xff] }
0x1700   : > { %11382 = vmatpush3.msra.mxu1 %v8068_v46  ;;  %11420 = vmatprep.subr.mxu0 %v8098_v17  ;;  %v6293_v46 = vld [vmem:[#allocation2 + $0x39] sm:$0xff] }
0x1701   : > { %11383 = vmatprep.subr.mxu1 %v8067_v18  ;;  %11421 = vmatpush3.msra.mxu0 %v8098_v17  ;;  %v8152_v17 = vld [vmem:[%s15420_s1 + $0x1df0] sm:$0xff] }
0x1702   : > { %11384 = vmatpush3.msra.mxu1 %v8067_v18  ;;  %11422 = vmatprep.subr.mxu0 %v8097_v1  ;;  %v6388_v18 = vld [vmem:[#allocation2 + $0x32] sm:$0xff] }
0x1703   : > { %11385 = vmatprep.subr.mxu1 %v8066_v19  ;;  %11423 = vmatpush3.msra.mxu0 %v8097_v1  ;;  %v8168_v1 = vld [vmem:[%s15420_s1 + $0x1e70] sm:$0xff] }
0x1704   : > { %11386 = vmatpush3.msra.mxu1 %v8066_v19  ;;  %11424 = vmatprep.subr.mxu0 %v8096_v20  ;;  %v8151_v19 = vld [vmem:[%s15420_s1 + $0x1de8] sm:$0xff] }
0x1705   : > { %11387 = vmatprep.subr.mxu1 %v8065_v21  ;;  %11425 = vmatpush3.msra.mxu0 %v8096_v20  ;;  %v8167_v20 = vld [vmem:[%s15420_s1 + $0x1e68] sm:$0xff] }
0x1706   : > { %11388 = vmatpush3.msra.mxu1 %v8065_v21  ;;  %11426 = vmatprep.subr.mxu0 %v8095_v48  ;;  %v8150_v21 = vld [vmem:[%s15420_s1 + $0x1de0] sm:$0xff] }
0x1707   : > { %11389 = vmatprep.subr.mxu1 %v8064_v6  ;;  %11427 = vmatpush3.msra.mxu0 %v8095_v48  ;;  %v8166_v48 = vld [vmem:[%s15420_s1 + $0x1e60] sm:$0xff] }
0x1708   : > { %11390 = vmatpush3.msra.mxu1 %v8064_v6  ;;  %11428 = vmatprep.subr.mxu0 %v8094_v22  ;;  %v8165_v6 = vld [vmem:[%s15420_s1 + $0x1e58] sm:$0xff] }
0x1709   : > { %11391 = vmatprep.subr.mxu1 %v8063_v24  ;;  %11429 = vmatpush3.msra.mxu0 %v8094_v22  ;;  %v8148_v22 = vld [vmem:[%s15420_s1 + $0x1dd0] sm:$0xff] }
0x170a   : > { %11392 = vmatpush3.msra.mxu1 %v8063_v24  ;;  %11430 = vmatprep.subr.mxu0 %v8093_v14  ;;  %v8164_v24 = vld [vmem:[%s15420_s1 + $0x1e50] sm:$0xff] }
0x170b   : > { %11393 = vmatprep.subr.mxu1 %v8062_v25  ;;  %11431 = vmatpush3.msra.mxu0 %v8093_v14  ;;  %v8147_v14 = vld [vmem:[%s15420_s1 + $0x1dc8] sm:$0xff] }
0x170c   : > { %11394 = vmatpush3.msra.mxu1 %v8062_v25  ;;  %11432 = vmatprep.subr.mxu0 %v8092_v26  ;;  %v8163_v25 = vld [vmem:[%s15420_s1 + $0x1e48] sm:$0xff] }
0x170d   : > { %11395 = vmatprep.subr.mxu1 %v8061_v27  ;;  %11433 = vmatpush3.msra.mxu0 %v8092_v26  ;;  %v8146_v26 = vld [vmem:[%s15420_s1 + $0x1dc0] sm:$0xff] }
0x170e   : > { %11396 = vmatpush3.msra.mxu1 %v8061_v27  ;;  %11434 = vmatprep.subr.mxu0 %v8091_v9  ;;  %v8162_v27 = vld [vmem:[%s15420_s1 + $0x1e40] sm:$0xff] }
0x170f   : > { %11397 = vmatprep.subr.mxu1 %v8060_v30  ;;  %11435 = vmatpush3.msra.mxu0 %v8091_v9  ;;  %v8145_v9 = vld [vmem:[%s15420_s1 + $0x1db8] sm:$0xff] }
0x1710   : > { %11398 = vmatpush3.msra.mxu1 %v8060_v30  ;;  %11436 = vmatprep.subr.mxu0 %v8090_v59  ;;  %v8161_v30 = vld [vmem:[%s15420_s1 + $0x1e38] sm:$0xff] }
0x1711   : > { %11399 = vmatprep.subr.mxu1 %v8059_v3  ;;  %11437 = vmatpush3.msra.mxu0 %v8090_v59  ;;  %v8144_v59 = vld [vmem:[%s15420_s1 + $0x1db0] sm:$0xff] }
0x1712   : > { %11400 = vmatpush3.msra.mxu1 %v8059_v3  ;;  %11439 = vmatmul.mubr.f32.vlgmr.msra.gmra.mxu0 %v6101_v39  ;;  %v8160_v3 = vld [vmem:[%s15420_s1 + $0x1e30] sm:$0xff]  ;;  %v8142_v39 = vld [vmem:[%s15420_s1 + $0x1da0] sm:$0xff] }
0x1713   : > { %11401 = vmatprep.subr.mxu1 %v8058_v36  ;;  %11476 = vmatprep.subr.mxu0 %v8137_v37 }
0x1714   : > { %11402 = vmatpush3.msra.mxu1 %v8058_v36  ;;  %11477 = vmatpush3.msra.mxu0 %v8137_v37  ;;  %v8143_v36 = vld [vmem:[%s15420_s1 + $0x1da8] sm:$0xff] }
0x1715   : > { %11404 = vmatmul.mubr.f32.vlgmr.msra.gmra.mxu1 %v5913_v41  ;;  %11441 = vmatprep.subr.mxu1 %v8121_v40  ;;  %v8159_v37 = vld [vmem:[%s15420_s1 + $0x1e28] sm:$0xff]  ;;  %v8141_v41 = vld [vmem:[%s15420_s1 + $0x1d98] sm:$0xff] }
0x1716   : > { %11442 = vmatpush3.msra.mxu1 %v8121_v40  ;;  %11473 = vmatprep.mubr.f32.mxu1 %v6196_v38  ;;  %v8158_v40 = vld [vmem:[%s15420_s1 + $0x1e20] sm:$0xff]  ;;  %v8140_v38 = vld [vmem:[%s15420_s1 + $0x1d90] sm:$0xff] }
0x1717   : > { %11508 = vmatprep.mubr.f32.mxu0 %v6292_v32  ;;  %11443 = vmatprep.subr.mxu1 %v8120_v50  ;;  %v8139_v32 = vld [vmem:[%s15420_s1 + $0x1d88] sm:$0xff] }
0x1718   : > { %11478 = vmatprep.subr.mxu0 %v8136_v43  ;;  %11444 = vmatpush3.msra.mxu1 %v8120_v50  ;;  %v8157_v50 = vld [vmem:[%s15420_s1 + $0x1e18] sm:$0xff] }
0x1719   : > { %11479 = vmatpush3.msra.mxu0 %v8136_v43  ;;  %11445 = vmatprep.subr.mxu1 %v8119_v44  ;;  %v8156_v43 = vld [vmem:[%s15420_s1 + $0x1e10] sm:$0xff] }
0x171a   : > { %11480 = vmatprep.subr.mxu0 %v8135_v45  ;;  %11446 = vmatpush3.msra.mxu1 %v8119_v44  ;;  %v8155_v44 = vld [vmem:[%s15420_s1 + $0x1e08] sm:$0xff] }
0x171b   : > { %11481 = vmatpush3.msra.mxu0 %v8135_v45  ;;  %11447 = vmatprep.subr.mxu1 %v8118_v47  ;;  %v8138_v45 = vld [vmem:[%s15420_s1 + $0x1d80] sm:$0xff] }
0x171c   : > { %11482 = vmatprep.subr.mxu0 %v8134_v49  ;;  %11448 = vmatpush3.msra.mxu1 %v8118_v47  ;;  %v8154_v47 = vld [vmem:[%s15420_s1 + $0x1e00] sm:$0xff] }
0x171d   : > { %11483 = vmatpush3.msra.mxu0 %v8134_v49  ;;  %11449 = vmatprep.subr.mxu1 %v8117_v23  ;;  %v8185_v49 = vld [vmem:[%s15420_s1 + $0x1ef8] sm:$0xff] }
0x171e   : > { %11484 = vmatprep.subr.mxu0 %v8133_v52  ;;  %11450 = vmatpush3.msra.mxu1 %v8117_v23  ;;  %v6389_v23 = vld [vmem:[#allocation2 + $0x3a] sm:$0xff] }
0x171f   : > { %11485 = vmatpush3.msra.mxu0 %v8133_v52  ;;  %11451 = vmatprep.subr.mxu1 %v8116_v56  ;;  %v8201_v52 = vld [vmem:[%s15420_s1 + $0x1f78] sm:$0xff] }
0x1720   : > { %11486 = vmatprep.subr.mxu0 %v8132_v15  ;;  %11452 = vmatpush3.msra.mxu1 %v8116_v56  ;;  %v8184_v56 = vld [vmem:[%s15420_s1 + $0x1ef0] sm:$0xff] }
0x1721   : > { %11487 = vmatpush3.msra.mxu0 %v8132_v15  ;;  %11453 = vmatprep.subr.mxu1 %v8115_v12  ;;  %v8200_v15 = vld [vmem:[%s15420_s1 + $0x1f70] sm:$0xff] }
0x1722   : > { %11488 = vmatprep.subr.mxu0 %v8131_v16  ;;  %11454 = vmatpush3.msra.mxu1 %v8115_v12  ;;  %v8183_v12 = vld [vmem:[%s15420_s1 + $0x1ee8] sm:$0xff] }
0x1723   : > { %11489 = vmatpush3.msra.mxu0 %v8131_v16  ;;  %11455 = vmatprep.subr.mxu1 %v8114_v57  ;;  %v8182_v16 = vld [vmem:[%s15420_s1 + $0x1ee0] sm:$0xff] }
0x1724   : > { %11490 = vmatprep.subr.mxu0 %v8130_v54  ;;  %11456 = vmatpush3.msra.mxu1 %v8114_v57  ;;  %v8197_v57 = vld [vmem:[%s15420_s1 + $0x1f58] sm:$0xff] }
0x1725   : > { %11491 = vmatpush3.msra.mxu0 %v8130_v54  ;;  %11457 = vmatprep.subr.mxu1 %v8113_v58  ;;  %v8180_v54 = vld [vmem:[%s15420_s1 + $0x1ed0] sm:$0xff] }
0x1726   : > { %11492 = vmatprep.subr.mxu0 %v8129_v60  ;;  %11458 = vmatpush3.msra.mxu1 %v8113_v58  ;;  %v8196_v58 = vld [vmem:[%s15420_s1 + $0x1f50] sm:$0xff] }
0x1727   : > { %11493 = vmatpush3.msra.mxu0 %v8129_v60  ;;  %11459 = vmatprep.subr.mxu1 %v8112_v61  ;;  %v8179_v60 = vld [vmem:[%s15420_s1 + $0x1ec8] sm:$0xff] }
0x1728   : > { %11494 = vmatprep.subr.mxu0 %v8128_v63  ;;  %11460 = vmatpush3.msra.mxu1 %v8112_v61  ;;  %v8195_v61 = vld [vmem:[%s15420_s1 + $0x1f48] sm:$0xff] }
0x1729   : > { %11495 = vmatpush3.msra.mxu0 %v8128_v63  ;;  %11461 = vmatprep.subr.mxu1 %v8111_v0  ;;  %v8178_v63 = vld [vmem:[%s15420_s1 + $0x1ec0] sm:$0xff] }
0x172a   : > { %11496 = vmatprep.subr.mxu0 %v8127_v2  ;;  %11462 = vmatpush3.msra.mxu1 %v8111_v0  ;;  %v8194_v0 = vld [vmem:[%s15420_s1 + $0x1f40] sm:$0xff] }
0x172b   : > { %11497 = vmatpush3.msra.mxu0 %v8127_v2  ;;  %11463 = vmatprep.subr.mxu1 %v8110_v4  ;;  %v8177_v2 = vld [vmem:[%s15420_s1 + $0x1eb8] sm:$0xff] }
0x172c   : > { %11498 = vmatprep.subr.mxu0 %v8126_v10  ;;  %11464 = vmatpush3.msra.mxu1 %v8110_v4  ;;  %v8193_v4 = vld [vmem:[%s15420_s1 + $0x1f38] sm:$0xff] }
0x172d   : > { %11499 = vmatpush3.msra.mxu0 %v8126_v10  ;;  %11465 = vmatprep.subr.mxu1 %v8109_v7  ;;  %v8176_v10 = vld [vmem:[%s15420_s1 + $0x1eb0] sm:$0xff] }
0x172e   : > { %11500 = vmatprep.subr.mxu0 %v8125_v11  ;;  %11466 = vmatpush3.msra.mxu1 %v8109_v7  ;;  %v8192_v7 = vld [vmem:[%s15420_s1 + $0x1f30] sm:$0xff] }
0x172f   : > { %11501 = vmatpush3.msra.mxu0 %v8125_v11  ;;  %11467 = vmatprep.subr.mxu1 %v8108_v29  ;;  %v8175_v11 = vld [vmem:[%s15420_s1 + $0x1ea8] sm:$0xff] }
0x1730   : > { %11502 = vmatprep.subr.mxu0 %v8124_v51  ;;  %11468 = vmatpush3.msra.mxu1 %v8108_v29  ;;  %v8191_v29 = vld [vmem:[%s15420_s1 + $0x1f28] sm:$0xff] }
0x1731   : > { %11503 = vmatpush3.msra.mxu0 %v8124_v51  ;;  %11469 = vmatprep.subr.mxu1 %v8107_v34  ;;  %v8174_v51 = vld [vmem:[%s15420_s1 + $0x1ea0] sm:$0xff] }
0x1732   : > { %11504 = vmatprep.subr.mxu0 %v8123_v28  ;;  %11470 = vmatpush3.msra.mxu1 %v8107_v34  ;;  %v8190_v34 = vld [vmem:[%s15420_s1 + $0x1f20] sm:$0xff] }
0x1733   : > { %11505 = vmatpush3.msra.mxu0 %v8123_v28  ;;  %11471 = vmatprep.subr.mxu1 %v8106_v55  ;;  %v8173_v28 = vld [vmem:[%s15420_s1 + $0x1e98] sm:$0xff] }
0x1734   : > { %11506 = vmatprep.subr.mxu0 %v8122_v8  ;;  %11472 = vmatpush3.msra.mxu1 %v8106_v55  ;;  %v8189_v55 = vld [vmem:[%s15420_s1 + $0x1f18] sm:$0xff] }
0x1735   : > { %11507 = vmatpush3.msra.mxu0 %v8122_v8  ;;  %11474 = vmatmul.mubr.f32.vlgmr.msra.gmra.mxu1 %v6197_v42  ;;  %v8172_v8 = vld [vmem:[%s15420_s1 + $0x1e90] sm:$0xff]  ;;  %v8171_v42 = vld [vmem:[%s15420_s1 + $0x1e88] sm:$0xff] }
0x1736   : > { %11509 = vmatmul.mubr.f32.vlgmr.msra.gmra.mxu0 %v6293_v46  ;;  %11511 = vmatprep.subr.mxu1 %v8153_v5  ;;  %v8170_v46 = vld [vmem:[%s15420_s1 + $0x1e80] sm:$0xff] }
0x1737   : > { %11546 = vmatprep.subr.mxu0 %v8169_v13  ;;  %11512 = vmatpush3.msra.mxu1 %v8153_v5  ;;  %v8188_v5 = vld [vmem:[%s15420_s1 + $0x1f10] sm:$0xff] }
0x1738   : > { %11543 = vmatprep.mubr.f32.mxu1 %v6388_v18  ;;  %11547 = vmatpush3.msra.mxu0 %v8169_v13  ;;  %v8187_v13 = vld [vmem:[%s15420_s1 + $0x1f08] sm:$0xff]  ;;  %v6581_v18 = vld [vmem:[#allocation2 + $0x51] sm:$0xff] }
0x1739   : > { %11578 = vmatprep.mubr.f32.mxu0 %v14760_v62  ;;  %11513 = vmatprep.subr.mxu1 %v8152_v17  ;;  %v8149_v62 = vld [vmem:[%s15420_s1 + $0x1dd8] sm:$0xff] }
0x173a   : > { %11548 = vmatprep.subr.mxu0 %v8168_v1  ;;  %11514 = vmatpush3.msra.mxu1 %v8152_v17  ;;  %v8186_v17 = vld [vmem:[%s15420_s1 + $0x1f00] sm:$0xff] }
0x173b   : > { %11549 = vmatpush3.msra.mxu0 %v8168_v1  ;;  %11515 = vmatprep.subr.mxu1 %v8151_v19  ;;  %v11055_v1 = vpop.f32.mrf.mxu1 }
0x173c   : > { %11550 = vmatprep.subr.mxu0 %v8167_v20  ;;  %11516 = vmatpush3.msra.mxu1 %v8151_v19 }
0x173d   : > { %11551 = vmatpush3.msra.mxu0 %v8167_v20  ;;  %11517 = vmatprep.subr.mxu1 %v8150_v21  ;;  %v5096_v19 = vpop.f32.mrf.mxu1  ;;  %v11090_v20 = vpop.f32.mrf.mxu0 }
0x173e   : > { %11552 = vmatprep.subr.mxu0 %v8166_v48  ;;  %11518 = vmatpush3.msra.mxu1 %v8150_v21 }
0x173f   : > { %11553 = vmatpush3.msra.mxu0 %v8166_v48  ;;  %11519 = vmatprep.subr.mxu1 %v8149_v62  ;;  %v11125_v21 = vpop.f32.mrf.mxu1  ;;  %v5171_v48 = vpop.f32.mrf.mxu0 }
0x1740   : > { %11554 = vmatprep.subr.mxu0 %v8165_v6  ;;  %11520 = vmatpush3.msra.mxu1 %v8149_v62 }
0x1741   : > { %11555 = vmatpush3.msra.mxu0 %v8165_v6  ;;  %11521 = vmatprep.subr.mxu1 %v8148_v22  ;;  %v5265_v62 = vpop.f32.mrf.mxu1  ;;  %v11160_v6 = vpop.f32.mrf.mxu0 }
0x1742   : > { %11556 = vmatprep.subr.mxu0 %v8164_v24  ;;  %11522 = vmatpush3.msra.mxu1 %v8148_v22  ;;  %v5177_v22 = vadd.f32 %v11090_v20, %v11055_v1 }
0x1743   : > { %11557 = vmatpush3.msra.mxu0 %v8164_v24  ;;  %11523 = vmatprep.subr.mxu1 %v8147_v14  ;;  %v5172_v24 = vadd.f32 %v5171_v48, %v5096_v19 }
0x1744   : > { %11558 = vmatprep.subr.mxu0 %v8163_v25  ;;  %11524 = vmatpush3.msra.mxu1 %v8147_v14  ;;  %v11195_v14 = vpop.f32.mrf.mxu1 }
0x1745   : > { %11559 = vmatpush3.msra.mxu0 %v8163_v25  ;;  %11525 = vmatprep.subr.mxu1 %v8146_v26  ;;  %v5361_v25 = vpop.f32.mrf.mxu0 }
0x1746   : > { %11560 = vmatprep.subr.mxu0 %v8162_v27  ;;  %11526 = vmatpush3.msra.mxu1 %v8146_v26  ;;  %v5275_v26 = vadd.f32 %v11125_v21, %v5177_v22  ;;  %v8226_v21 = vld [vmem:[%s15420_s1 + $0x2040] sm:$0xff]  ;;  %v8224_v22 = vld [vmem:[%s15420_s1 + $0x2030] sm:$0xff] }
0x1747   : > { %11561 = vmatpush3.msra.mxu0 %v8162_v27  ;;  %11527 = vmatprep.subr.mxu1 %v8145_v9  ;;  %v5274_v27 = vadd.f32 %v5265_v62, %v5172_v24  ;;  %v8225_v62 = vld [vmem:[%s15420_s1 + $0x2038] sm:$0xff]  ;;  %v8210_v24 = vld [vmem:[%s15420_s1 + $0x1fc0] sm:$0xff] }
0x1748   : > { %11562 = vmatprep.subr.mxu0 %v8161_v30  ;;  %11528 = vmatpush3.msra.mxu1 %v8145_v9  ;;  %v5457_v9 = vpop.f32.mrf.mxu1 }
0x1749   : > { %11563 = vmatpush3.msra.mxu0 %v8161_v30  ;;  %11529 = vmatprep.subr.mxu1 %v8144_v59  ;;  %v11230_v30 = vpop.f32.mrf.mxu0 }
0x174a   : > { %11564 = vmatprep.subr.mxu0 %v8160_v3  ;;  %11530 = vmatpush3.msra.mxu1 %v8144_v59  ;;  %v5371_v59 = vadd.f32 %v11160_v6, %v5275_v26  ;;  %v8208_v26 = vld [vmem:[%s15420_s1 + $0x1fb0] sm:$0xff] }
0x174b   : > { %11565 = vmatpush3.msra.mxu0 %v8160_v3  ;;  %11531 = vmatprep.subr.mxu1 %v8143_v36  ;;  %v5370_v3 = vadd.f32 %v5361_v25, %v5274_v27  ;;  %v8223_v25 = vld [vmem:[%s15420_s1 + $0x2028] sm:$0xff]  ;;  %v8222_v27 = vld [vmem:[%s15420_s1 + $0x2020] sm:$0xff] }
0x174c   : > { %11566 = vmatprep.subr.mxu0 %v8159_v37  ;;  %11532 = vmatpush3.msra.mxu1 %v8143_v36 }
0x174d   : > { %11567 = vmatpush3.msra.mxu0 %v8159_v37  ;;  %11533 = vmatprep.subr.mxu1 %v8142_v39  ;;  %v5553_v37 = vpop.f32.mrf.mxu0 }
0x174e   : > { %11568 = vmatprep.subr.mxu0 %v8158_v40  ;;  %11534 = vmatpush3.msra.mxu1 %v8142_v39  ;;  %v5466_v39 = vadd.f32 %v5457_v9, %v5370_v3  ;;  %v8221_v9 = vld [vmem:[%s15420_s1 + $0x2018] sm:$0xff]  ;;  %v8206_v3 = vld [vmem:[%s15420_s1 + $0x1fa0] sm:$0xff] }
0x174f   : > { %11569 = vmatpush3.msra.mxu0 %v8158_v40  ;;  %11535 = vmatprep.subr.mxu1 %v8141_v41 }
0x1750   : > { %11570 = vmatprep.subr.mxu0 %v8157_v50  ;;  %11536 = vmatpush3.msra.mxu1 %v8141_v41 }
0x1751   : > { %11571 = vmatpush3.msra.mxu0 %v8157_v50  ;;  %11537 = vmatprep.subr.mxu1 %v8140_v38  ;;  %v5562_v50 = vadd.f32 %v5553_v37, %v5466_v39  ;;  %v8205_v37 = vld [vmem:[%s15420_s1 + $0x1f98] sm:$0xff]  ;;  %v8204_v39 = vld [vmem:[%s15420_s1 + $0x1f90] sm:$0xff] }
0x1752   : > { %11572 = vmatprep.subr.mxu0 %v8156_v43  ;;  %11538 = vmatpush3.msra.mxu1 %v8140_v38 }
0x1753   : > { %11573 = vmatpush3.msra.mxu0 %v8156_v43  ;;  %11539 = vmatprep.subr.mxu1 %v8139_v32 }
0x1754   : > { %11574 = vmatprep.subr.mxu0 %v8155_v44  ;;  %11540 = vmatpush3.msra.mxu1 %v8139_v32 }
0x1755   : > { %11575 = vmatpush3.msra.mxu0 %v8155_v44  ;;  %11541 = vmatprep.subr.mxu1 %v8138_v45 }
0x1756   : > { %11576 = vmatprep.subr.mxu0 %v8154_v47  ;;  %11542 = vmatpush3.msra.mxu1 %v8138_v45 }
0x1757   : > { %11577 = vmatpush3.msra.mxu0 %v8154_v47  ;;  %11544 = vmatmul.mubr.f32.vlgmr.msra.gmra.mxu1 %v6389_v23 }
0x1758   : > { %11579 = vmatmul.mubr.f32.vlgmr.msra.gmra.mxu0 %v14762_v31  ;;  %11581 = vmatprep.subr.mxu1 %v8185_v49  ;;  %v8199_v31 = vld [vmem:[%s15420_s1 + $0x1f68] sm:$0xff] }
0x1759   : > { %11616 = vmatprep.subr.mxu0 %v8201_v52  ;;  %11582 = vmatpush3.msra.mxu1 %v8185_v49 }
0x175a   : > { %11613 = vmatprep.mubr.f32.mxu1 %v14744_v53  ;;  %11617 = vmatpush3.msra.mxu0 %v8201_v52  ;;  %v8198_v53 = vld [vmem:[%s15420_s1 + $0x1f60] sm:$0xff] }
0x175b   : > { %11648 = vmatprep.mubr.f32.mxu0 %v14769_v35  ;;  %11583 = vmatprep.subr.mxu1 %v8184_v56  ;;  %v8181_v35 = vld [vmem:[%s15420_s1 + $0x1ed8] sm:$0xff] }
0x175c   : > { %11618 = vmatprep.subr.mxu0 %v8200_v15  ;;  %11584 = vmatpush3.msra.mxu1 %v8184_v56 }
0x175d   : > { %11619 = vmatpush3.msra.mxu0 %v8200_v15  ;;  %11585 = vmatprep.subr.mxu1 %v8183_v12 }
0x175e   : > { %11620 = vmatprep.subr.mxu0 %v8199_v31  ;;  %11586 = vmatpush3.msra.mxu1 %v8183_v12 }
0x175f   : > { %11621 = vmatpush3.msra.mxu0 %v8199_v31  ;;  %11587 = vmatprep.subr.mxu1 %v8182_v16 }
0x1760   : > { %11622 = vmatprep.subr.mxu0 %v8198_v53  ;;  %11588 = vmatpush3.msra.mxu1 %v8182_v16 }
0x1761   : > { %11623 = vmatpush3.msra.mxu0 %v8198_v53  ;;  %11589 = vmatprep.subr.mxu1 %v8181_v35 }
0x1762   : > { %11624 = vmatprep.subr.mxu0 %v8197_v57  ;;  %11590 = vmatpush3.msra.mxu1 %v8181_v35 }
0x1763   : > { %11625 = vmatpush3.msra.mxu0 %v8197_v57  ;;  %11591 = vmatprep.subr.mxu1 %v8180_v54 }
0x1764   : > { %11626 = vmatprep.subr.mxu0 %v8196_v58  ;;  %11592 = vmatpush3.msra.mxu1 %v8180_v54 }
0x1765   : > { %11627 = vmatpush3.msra.mxu0 %v8196_v58  ;;  %11593 = vmatprep.subr.mxu1 %v8179_v60 }
0x1766   : > { %11628 = vmatprep.subr.mxu0 %v8195_v61  ;;  %11594 = vmatpush3.msra.mxu1 %v8179_v60 }
0x1767   : > { %11629 = vmatpush3.msra.mxu0 %v8195_v61  ;;  %11595 = vmatprep.subr.mxu1 %v8178_v63 }
0x1768   : > { %11630 = vmatprep.subr.mxu0 %v8194_v0  ;;  %11596 = vmatpush3.msra.mxu1 %v8178_v63 }
0x1769   : > { %11631 = vmatpush3.msra.mxu0 %v8194_v0  ;;  %11597 = vmatprep.subr.mxu1 %v8177_v2 }
0x176a   : > { %11632 = vmatprep.subr.mxu0 %v8193_v4  ;;  %11598 = vmatpush3.msra.mxu1 %v8177_v2 }
0x176b   : > { %11633 = vmatpush3.msra.mxu0 %v8193_v4  ;;  %11599 = vmatprep.subr.mxu1 %v8176_v10  ;;  %v8217_v4 = vld [vmem:[%s15420_s1 + $0x1ff8] sm:$0xff] }
0x176c   : > { %11634 = vmatprep.subr.mxu0 %v8192_v7  ;;  %11600 = vmatpush3.msra.mxu1 %v8176_v10  ;;  %v8233_v10 = vld [vmem:[%s15420_s1 + $0x2078] sm:$0xff] }
0x176d   : > { %11635 = vmatpush3.msra.mxu0 %v8192_v7  ;;  %11601 = vmatprep.subr.mxu1 %v8175_v11  ;;  %v8216_v7 = vld [vmem:[%s15420_s1 + $0x1ff0] sm:$0xff] }
0x176e   : > { %11636 = vmatprep.subr.mxu0 %v8191_v29  ;;  %11602 = vmatpush3.msra.mxu1 %v8175_v11  ;;  %v8232_v11 = vld [vmem:[%s15420_s1 + $0x2070] sm:$0xff] }
0x176f   : > { %11637 = vmatpush3.msra.mxu0 %v8191_v29  ;;  %11603 = vmatprep.subr.mxu1 %v8174_v51  ;;  %v8215_v29 = vld [vmem:[%s15420_s1 + $0x1fe8] sm:$0xff] }
0x1770   : > { %11638 = vmatprep.subr.mxu0 %v8190_v34  ;;  %11604 = vmatpush3.msra.mxu1 %v8174_v51  ;;  %v8231_v51 = vld [vmem:[%s15420_s1 + $0x2068] sm:$0xff] }
0x1771   : > { %11639 = vmatpush3.msra.mxu0 %v8190_v34  ;;  %11605 = vmatprep.subr.mxu1 %v8173_v28  ;;  %v8214_v34 = vld [vmem:[%s15420_s1 + $0x1fe0] sm:$0xff] }
0x1772   : > { %11640 = vmatprep.subr.mxu0 %v8189_v55  ;;  %11606 = vmatpush3.msra.mxu1 %v8173_v28  ;;  %v8230_v28 = vld [vmem:[%s15420_s1 + $0x2060] sm:$0xff] }
0x1773   : > { %11641 = vmatpush3.msra.mxu0 %v8189_v55  ;;  %11607 = vmatprep.subr.mxu1 %v8172_v8  ;;  %v8213_v55 = vld [vmem:[%s15420_s1 + $0x1fd8] sm:$0xff] }
0x1774   : > { %11642 = vmatprep.subr.mxu0 %v8188_v5  ;;  %11608 = vmatpush3.msra.mxu1 %v8172_v8  ;;  %v8229_v8 = vld [vmem:[%s15420_s1 + $0x2058] sm:$0xff] }
0x1775   : > { %11643 = vmatpush3.msra.mxu0 %v8188_v5  ;;  %11609 = vmatprep.subr.mxu1 %v8171_v42  ;;  %v8212_v5 = vld [vmem:[%s15420_s1 + $0x1fd0] sm:$0xff] }
0x1776   : > { %11644 = vmatprep.subr.mxu0 %v8187_v13  ;;  %11610 = vmatpush3.msra.mxu1 %v8171_v42  ;;  %v8228_v42 = vld [vmem:[%s15420_s1 + $0x2050] sm:$0xff] }
0x1777   : > { %11645 = vmatpush3.msra.mxu0 %v8187_v13  ;;  %11611 = vmatprep.subr.mxu1 %v8170_v46  ;;  %v8211_v13 = vld [vmem:[%s15420_s1 + $0x1fc8] sm:$0xff] }
0x1778   : > { %11646 = vmatprep.subr.mxu0 %v8186_v17  ;;  %11612 = vmatpush3.msra.mxu1 %v8170_v46  ;;  %v8227_v46 = vld [vmem:[%s15420_s1 + $0x2048] sm:$0xff] }
0x1779   : > { %11647 = vmatpush3.msra.mxu0 %v8186_v17  ;;  %11614 = vmatmul.mubr.f32.vlgmr.msra.gmra.mxu1 %v6581_v18 }
0x177a   : > { %11649 = vmatmul.mubr.f32.vlgmr.msra.gmra.mxu0 %v14859_v33  ;;  %v5467_v33 = vadd.f32 %v11195_v14, %v5371_v59  ;;  %11651 = vmatprep.subr.mxu1 %v8217_v4  ;;  %v8209_v14 = vld [vmem:[%s15420_s1 + $0x1fb8] sm:$0xff]  ;;  %v8220_v59 = vld [vmem:[%s15420_s1 + $0x2010] sm:$0xff] }
0x177b   : > { %11686 = vmatprep.subr.mxu0 %v8233_v10  ;;  %11652 = vmatpush3.msra.mxu1 %v8217_v4  ;;  %v8240_v4 = vld [vmem:[%s15420_s1 + $0x20b0] sm:$0xff] }
0x177c   : > { %v5563_v41 = vadd.f32 %v11230_v30, %v5467_v33  ;;  %11687 = vmatpush3.msra.mxu0 %v8233_v10  ;;  %11653 = vmatprep.subr.mxu1 %v8216_v7  ;;  %v8207_v30 = vld [vmem:[%s15420_s1 + $0x1fa8] sm:$0xff]  ;;  %v8218_v33 = vld [vmem:[%s15420_s1 + $0x2000] sm:$0xff] }
0x177d   : > { %11688 = vmatprep.subr.mxu0 %v8232_v11  ;;  %11654 = vmatpush3.msra.mxu1 %v8216_v7  ;;  %v8239_v10 = vld [vmem:[%s15420_s1 + $0x20a8] sm:$0xff]  ;;  %v8238_v7 = vld [vmem:[%s15420_s1 + $0x20a0] sm:$0xff] }
0x177e   : > { %11689 = vmatpush3.msra.mxu0 %v8232_v11  ;;  %11655 = vmatprep.subr.mxu1 %v8215_v29  ;;  %v8237_v11 = vld [vmem:[%s15420_s1 + $0x2098] sm:$0xff] }
0x177f   : > { %11690 = vmatprep.subr.mxu0 %v8231_v51  ;;  %11656 = vmatpush3.msra.mxu1 %v8215_v29  ;;  %v8236_v29 = vld [vmem:[%s15420_s1 + $0x2090] sm:$0xff] }
0x1780   : > { %11691 = vmatpush3.msra.mxu0 %v8231_v51  ;;  %11657 = vmatprep.subr.mxu1 %v8214_v34  ;;  %v8235_v51 = vld [vmem:[%s15420_s1 + $0x2088] sm:$0xff] }
0x1781   : > { %11692 = vmatprep.subr.mxu0 %v8230_v28  ;;  %11658 = vmatpush3.msra.mxu1 %v8214_v34  ;;  %v8234_v34 = vld [vmem:[%s15420_s1 + $0x2080] sm:$0xff] }
0x1782   : > { %11693 = vmatpush3.msra.mxu0 %v8230_v28  ;;  %11659 = vmatprep.subr.mxu1 %v8213_v55 }
0x1783   : > { %11694 = vmatprep.subr.mxu0 %v8229_v8  ;;  %11660 = vmatpush3.msra.mxu1 %v8213_v55 }
0x1784   : > { %11695 = vmatpush3.msra.mxu0 %v8229_v8  ;;  %11661 = vmatprep.subr.mxu1 %v8212_v5 }
0x1785   : > { %11696 = vmatprep.subr.mxu0 %v8228_v42  ;;  %11662 = vmatpush3.msra.mxu1 %v8212_v5 }
0x1786   : > { %11697 = vmatpush3.msra.mxu0 %v8228_v42  ;;  %11663 = vmatprep.subr.mxu1 %v8211_v13 }
0x1787   : > { %11698 = vmatprep.subr.mxu0 %v8227_v46  ;;  %11664 = vmatpush3.msra.mxu1 %v8211_v13 }
0x1788   : > { %11699 = vmatpush3.msra.mxu0 %v8227_v46  ;;  %11665 = vmatprep.subr.mxu1 %v8210_v24 }
0x1789   : > { %11700 = vmatprep.subr.mxu0 %v8226_v21  ;;  %11666 = vmatpush3.msra.mxu1 %v8210_v24 }
0x178a   : > { %11701 = vmatpush3.msra.mxu0 %v8226_v21  ;;  %11667 = vmatprep.subr.mxu1 %v8209_v14 }
0x178b   : > { %11702 = vmatprep.subr.mxu0 %v8225_v62  ;;  %11668 = vmatpush3.msra.mxu1 %v8209_v14 }
0x178c   : > { %11703 = vmatpush3.msra.mxu0 %v8225_v62  ;;  %11669 = vmatprep.subr.mxu1 %v8208_v26 }
0x178d   : > { %v11300_v38 = vpop.f32.mrf.mxu0  ;;  %11704 = vmatprep.subr.mxu0 %v8224_v22  ;;  %11670 = vmatpush3.msra.mxu1 %v8208_v26 }
0x178e   : > { %11705 = vmatpush3.msra.mxu0 %v8224_v22  ;;  %11671 = vmatprep.subr.mxu1 %v8207_v30 }
0x178f   : > { %v5745_v44 = vpop.f32.mrf.mxu0  ;;  %11706 = vmatprep.subr.mxu0 %v8223_v25  ;;  %11672 = vmatpush3.msra.mxu1 %v8207_v30 }
0x1790   : > { %11707 = vmatpush3.msra.mxu0 %v8223_v25  ;;  %11673 = vmatprep.subr.mxu1 %v8206_v3 }
0x1791   : > { %11708 = vmatprep.subr.mxu0 %v8222_v27  ;;  %11674 = vmatpush3.msra.mxu1 %v8206_v3 }
0x1792   : > { %11709 = vmatpush3.msra.mxu0 %v8222_v27  ;;  %11675 = vmatprep.subr.mxu1 %v8205_v37 }
0x1793   : > { %11710 = vmatprep.subr.mxu0 %v8221_v9  ;;  %11676 = vmatpush3.msra.mxu1 %v8205_v37 }
0x1794   : > { %11711 = vmatpush3.msra.mxu0 %v8221_v9  ;;  %11677 = vmatprep.subr.mxu1 %v8204_v39 }
0x1795   : > { %v11265_v36 = vpop.f32.mrf.mxu1  ;;  %11712 = vmatprep.subr.mxu0 %v8220_v59  ;;  %11678 = vmatpush3.msra.mxu1 %v8204_v39 }
0x1796   : > { %v5659_v43 = vadd.f32 %v11265_v36, %v5563_v41  ;;  %v8219_v36 = vld [vmem:[%s15420_s1 + $0x2008] sm:$0xff]  ;;  %11713 = vmatpush3.msra.mxu0 %v8220_v59  ;;  %v8202_v41 = vld [vmem:[%s15420_s1 + $0x1f80] sm:$0xff] }
0x1797   : > { %v5649_v40 = vpop.f32.mrf.mxu1  ;;  %11714 = vmatprep.subr.mxu0 %v8219_v36 }
0x1798   : > { %v5658_v32 = vadd.f32 %v5649_v40, %v5562_v50  ;;  %v5755_v47 = vadd.f32 %v11300_v38, %v5659_v43  ;;  %11715 = vmatpush3.msra.mxu0 %v8219_v36  ;;  %v8203_v40 = vld [vmem:[%s15420_s1 + $0x1f88] sm:$0xff]  ;;  %v8249_v50 = vld [vmem:[%s15420_s1 + $0x20f8] sm:$0xff] }
0x1799   : > { %11716 = vmatprep.subr.mxu0 %v8218_v33  ;;  %11679 = vmatprep.subr.mxu1 %v8203_v40 }
0x179a   : > { %v5754_v49 = vadd.f32 %v5745_v44, %v5658_v32  ;;  %11717 = vmatpush3.msra.mxu0 %v8218_v33  ;;  %11680 = vmatpush3.msra.mxu1 %v8203_v40  ;;  %v15349_v44 = vld [vmem:[%s15421_s2 + $0x1] ss:$0 sm:$0xff] }
0x179b   : > { %11681 = vmatprep.subr.mxu1 %v8202_v41 }
0x179c   : > { %11682 = vmatpush3.msra.mxu1 %v8202_v41 }
0x179d   : > { %11721 = vmatprep.subr.mxu1 %v8249_v50 }
0x17ae   : > { %v11370_v55 = vpop.f32.mrf.mxu0 }
0x17b0   : > { %v6016_v5 = vpop.f32.mrf.mxu0 }
0x17b5   : > { %v11335_v45 = vpop.f32.mrf.mxu1 }
0x17b6   : > { %v5851_v52 = vadd.f32 %v11335_v45, %v5755_v47 }
0x17b7   : > { %v5841_v23 = vpop.f32.mrf.mxu1 }
0x17b8   : > { %v5850_v56 = vadd.f32 %v5841_v23, %v5754_v49  ;;  %v15356_v49 = vld [vmem:[%s15422_s3 + $0x1] ss:$0 sm:$0xff] }
0x17ba   : > { %v5852_v15 = vadd.f32 %v5851_v52, %v5850_v56 }
0x17bc   : > { %5853 = vadd.xlane.f32.xlu0 %v5852_v15 }
0x17d2   : > { %v11440_v13 = vpop.f32.mrf.mxu0 }
0x17d5   : > { %v11405_v8 = vpop.f32.mrf.mxu1 }
0x17d7   : > { %v6091_v42 = vpop.f32.mrf.mxu1 }
0x17f5   : > { %v11475_v46 = vpop.f32.mrf.mxu1 }
0x1845   : > { %v5854_v12 = vpop.xlane.xlu0 %5853 }
0x1846   : > { %v5855_v31 = vrot.slane %v5854_v12, 4 }
0x1848   : > { %v5856_v16 = vadd.f32 %v5855_v31, %v5854_v12 }
0x184a   : > { %v5857_v53 = vrot.slane %v5856_v16, 2 }
0x184c   : > { %v5858_v35 = vadd.f32 %v5857_v53, %v5856_v16 }
0x184e   : > { %v5859_v57 = vrot.slane %v5858_v35, 1 }
0x1850   : > { %v5860_v54 = vadd.f32 %v5859_v57, %v5858_v35  ;;  %v8248_v35 = vld [vmem:[%s15420_s1 + $0x20f0] sm:$0xff] }
0x1852   : > { %11804 = vpush %v5860_v54  ;;  %v8247_v54 = vld [vmem:[%s15420_s1 + $0x20e8] sm:$0xff] }
0x1883   : > { %s11805_s10 = spop %11804 }
0x1884   : > { %s5864_s11 = smul.f32 0.00048828125, %s11805_s10 }
0x1886   : > { %v5865_v58 = vstv %s5864_s11 }
0x1887   : > { %v15239_v60 = vsub.f32 %v5850_v56, %v5865_v58  ;;  %v15241_v61 = vsub.f32 %v5851_v52, %v5865_v58  ;;  %v8246_v58 = vld [vmem:[%s15420_s1 + $0x20e0] sm:$0xff] }
0x1889   : > { %v5868_v63 = vmul.f32 %v15239_v60, %v15239_v60  ;;  %v5869_v0 = vmul.f32 %v15241_v61, %v15241_v61 }
0x188b   : > { %v5870_v2 = vadd.f32 %v5869_v0, %v5868_v63  ;;  %v8243_v63 = vld [vmem:[%s15420_s1 + $0x20c8] sm:$0xff]  ;;  %v8242_v0 = vld [vmem:[%s15420_s1 + $0x20c0] sm:$0xff] }
0x188d   : > { %5871 = vadd.xlane.f32.xlu1 %v5870_v2  ;;  %v8241_v2 = vld [vmem:[%s15420_s1 + $0x20b8] sm:$0xff] }
0x1916   : > { %v5872_v17 = vpop.xlane.xlu1 %5871 }
0x1917   : > { %v5873_v18 = vrot.slane %v5872_v17, 4 }
0x1919   : > { %v5874_v1 = vadd.f32 %v5873_v18, %v5872_v17  ;;  %v6097_v17 = vadd.f32 %v11405_v8, %v11370_v55  ;;  %v6092_v18 = vadd.f32 %v6091_v42, %v6016_v5 }
0x191b   : > { %v5875_v19 = vrot.slane %v5874_v1, 2 }
0x191d   : > { %v5876_v20 = vadd.f32 %v5875_v19, %v5874_v1  ;;  %v6185_v1 = vpop.f32.mrf.mxu0  ;;  %v6281_v19 = vpop.f32.mrf.mxu1 }
0x191e   : > { %v6194_v21 = vadd.f32 %v6185_v1, %v6092_v18 }
0x191f   : > { %v5877_v48 = vrot.slane %v5876_v20, 1  ;;  %v11545_v62 = vpop.f32.mrf.mxu1 }
0x1920   : > { %v6290_v22 = vadd.f32 %v6281_v19, %v6194_v21 }
0x1921   : > { %v5878_v6 = vadd.f32 %v5877_v48, %v5876_v20  ;;  %v6195_v20 = vadd.f32 %v11440_v13, %v6097_v17  ;;  %v11510_v48 = vpop.f32.mrf.mxu0  ;;  %v6473_v14 = vpop.f32.mrf.mxu1 }
0x1923   : > { %11806 = vpush %v5878_v6  ;;  %v6291_v6 = vadd.f32 %v11475_v46, %v6195_v20  ;;  %v6377_v24 = vpop.f32.mrf.mxu0  ;;  %v11615_v9 = vpop.f32.mrf.mxu1 }
0x1924   : > { %v6386_v26 = vadd.f32 %v6377_v24, %v6290_v22 }
0x1925   : > { %v6387_v25 = vadd.f32 %v11510_v48, %v6291_v6  ;;  %v11580_v27 = vpop.f32.mrf.mxu0  ;;  %v6665_v36 = vpop.f32.mrf.mxu1 }
0x1926   : > { %v6482_v59 = vadd.f32 %v6473_v14, %v6386_v26 }
0x1927   : > { %v6483_v30 = vadd.f32 %v11545_v62, %v6387_v25  ;;  %v6569_v3 = vpop.f32.mrf.mxu0 }
0x1928   : > { %v6578_v33 = vadd.f32 %v6569_v3, %v6482_v59 }
0x1929   : > { %v6579_v37 = vadd.f32 %v11580_v27, %v6483_v30  ;;  %v11650_v39 = vpop.f32.mrf.mxu0 }
0x192b   : > { %v6675_v41 = vadd.f32 %v11615_v9, %v6579_v37 }
0x1954   : > { %s11807_s9 = spop %11806 }
0x1955   : > { %s5882_s10 = smul.f32 0.00048828125, %s11807_s9  ;;  %s197_s9 = scalar_lea.vmem %s15423_s4, %s8256_s8 }
0x1957   : > { %s5883_s11 = sadd.f32 1e-05, %s5882_s10 }
0x1959   : > { %v5884_v38 = vstv %s5883_s11 }
0x195a   : > { %11841 = vrsqrt.f32 %v5884_v38  ;;  %v6761_v38 = vpop.f32.mrf.mxu0 }
0x1967   : > { %v11842_v43 = vpop.eup %11841 }
0x1968   : > { %11808 = vpush %v11842_v43 }
0x1999   : > { %s11809_s12 = spop %11808 }
0x199a   : > { %v5887_v32 = vstv %s11809_s12 }
0x199b   : > { %v5888_v45 = vmul.f32 %v5887_v32, %v15239_v60  ;;  %v5889_v47 = vmul.f32 %v5887_v32, %v15241_v61  ;;  %v8245_v60 = vld [vmem:[%s15420_s1 + $0x20d8] sm:$0xff]  ;;  %v8244_v61 = vld [vmem:[%s15420_s1 + $0x20d0] sm:$0xff]  ;;  %v6771_v32 = vadd.f32 %v11650_v39, %v6675_v41 }
0x199d   : > { %v5897_v23 = vmul.f32 %v15349_v44, %v5888_v45  ;;  %v5898_v52 = vmul.f32 %v15349_v44, %v5889_v47 }
0x199f   : > { %v5906_v56 = vadd.f32 %v15356_v49, %v5897_v23  ;;  %v5907_v15 = vadd.f32 %v15356_v49, %v5898_v52 }
0x19a1   : > { %v5908_v12 = vmax.f32 %v5906_v56, 0.0  ;;  %v5909_v31 = vmax.f32 %v5907_v15, 0.0 }
0x19a3   : > { %5910 = vst [vmem:[#allocation2 + $0x61] sm:$0xff] %v5908_v12  ;;  %5911 = vst [vmem:[#allocation2 + $0x69] sm:$0xff] %v5909_v31  ;;  %11718 = vmatprep.mubr.f32.mxu0 %v5908_v12 }
0x19a4   : > { %11719 = vmatmul.mubr.f32.vlgmr.msra.gmra.mxu0 %v5909_v31 }
0x19aa   : > { %v6772_v16 = vld [vmem:[#allocation2 + $0x60] sm:$0xff]  ;;  %v6773_v53 = vld [vmem:[#allocation2 + $0x68] sm:$0xff] }
0x19ab   : > { %11683 = vmatprep.mubr.f32.mxu1 %v6772_v16  ;;  %v6964_v57 = vld [vmem:[#allocation2 + $0x62] sm:$0xff]  ;;  %v6965_v28 = vld [vmem:[#allocation2 + $0x6a] sm:$0xff] }
0x19ac   : > { %11684 = vmatmul.mubr.f32.vlgmr.msra.gmra.mxu1 %v6773_v53 }
0x19ad   : > { %11722 = vmatpush3.msra.mxu1 %v8249_v50  ;;  %11753 = vmatprep.mubr.f32.mxu1 %v6964_v57  ;;  %v6674_v50 = vadd.f32 %v6665_v36, %v6578_v33 }
0x19ae   : > { %11723 = vmatprep.subr.mxu1 %v8248_v35 }
0x19af   : > { %11724 = vmatpush3.msra.mxu1 %v8248_v35  ;;  %v6770_v45 = vadd.f32 %v6761_v38, %v6674_v50 }
0x19b0   : > { %11725 = vmatprep.subr.mxu1 %v8247_v54 }
0x19b1   : > { %11726 = vmatpush3.msra.mxu1 %v8247_v54 }
0x19b2   : > { %11727 = vmatprep.subr.mxu1 %v8246_v58 }
0x19b3   : > { %11728 = vmatpush3.msra.mxu1 %v8246_v58 }
0x19b4   : > { %11729 = vmatprep.subr.mxu1 %v8245_v60 }
0x19b5   : > { %11730 = vmatpush3.msra.mxu1 %v8245_v60 }
0x19b6   : > { %11731 = vmatprep.subr.mxu1 %v8244_v61 }
0x19b7   : > { %11732 = vmatpush3.msra.mxu1 %v8244_v61 }
0x19b8   : > { %11733 = vmatprep.subr.mxu1 %v8243_v63 }
0x19b9   : > { %11734 = vmatpush3.msra.mxu1 %v8243_v63 }
0x19ba   : > { %11735 = vmatprep.subr.mxu1 %v8242_v0 }
0x19bb   : > { %11736 = vmatpush3.msra.mxu1 %v8242_v0 }
0x19bc   : > { %11737 = vmatprep.subr.mxu1 %v8241_v2 }
0x19bd   : > { %11738 = vmatpush3.msra.mxu1 %v8241_v2 }
0x19be   : > { %11739 = vmatprep.subr.mxu1 %v8240_v4 }
0x19bf   : > { %11740 = vmatpush3.msra.mxu1 %v8240_v4 }
0x19c0   : > { %11741 = vmatprep.subr.mxu1 %v8239_v10 }
0x19c1   : > { %11742 = vmatpush3.msra.mxu1 %v8239_v10 }
0x19c2   : > { %11743 = vmatprep.subr.mxu1 %v8238_v7 }
0x19c3   : > { %11744 = vmatpush3.msra.mxu1 %v8238_v7 }
0x19c4   : > { %11745 = vmatprep.subr.mxu1 %v8237_v11 }
0x19c5   : > { %11746 = vmatpush3.msra.mxu1 %v8237_v11 }
0x19c6   : > { %11747 = vmatprep.subr.mxu1 %v8236_v29 }
0x19c7   : > { %11748 = vmatpush3.msra.mxu1 %v8236_v29 }
0x19c8   : > { %11749 = vmatprep.subr.mxu1 %v8235_v51 }
0x19c9   : > { %11750 = vmatpush3.msra.mxu1 %v8235_v51 }
0x19ca   : > { %11751 = vmatprep.subr.mxu1 %v8234_v34 }
0x19cb   : > { %11752 = vmatpush3.msra.mxu1 %v8234_v34 }
0x19cc   : > { %11754 = vmatmul.mubr.f32.vlgmr.msra.gmra.mxu1 %v6965_v28 }
0x1a64   : > { %v11720_v47 = vpop.f32.mrf.mxu0 }
0x1a66   : > { %v6953_v56 = vpop.f32.mrf.mxu0 }
0x1a6c   : > { %v11685_v40 = vpop.f32.mrf.mxu1 }
0x1a6d   : > { %v6867_v23 = vadd.f32 %v11685_v40, %v6771_v32 }
0x1a6e   : > { %v6857_v43 = vpop.f32.mrf.mxu1 }
0x1a6f   : > { %v6866_v52 = vadd.f32 %v6857_v43, %v6770_v45  ;;  %v6963_v12 = vadd.f32 %v11720_v47, %v6867_v23 }
0x1a71   : > { %v6962_v31 = vadd.f32 %v6953_v56, %v6866_v52 }
0x1a8c   : > { %v11755_v15 = vpop.f32.mrf.mxu1 }
0x1a8d   : > { %v7059_v53 = vadd.f32 %v11755_v15, %v6963_v12 }
0x1a8e   : > { %v7049_v16 = vpop.f32.mrf.mxu1 }
0x1a8f   : > { %v7058_v35 = vadd.f32 %v7049_v16, %v6962_v31 }
0x1a91   : > { %v7060_v57 = vadd.f32 %v7059_v53, %v7058_v35 }
0x1a93   : > { %7061 = vadd.xlane.f32.xlu0 %v7060_v57 }
0x1b1c   : > { %v7062_v54 = vpop.xlane.xlu0 %7061 }
0x1b1d   : > { %v7063_v58 = vrot.slane %v7062_v54, 4 }
0x1b1f   : > { %v7064_v60 = vadd.f32 %v7063_v58, %v7062_v54 }
0x1b21   : > { %v7065_v61 = vrot.slane %v7064_v60, 2 }
0x1b23   : > { %v7066_v63 = vadd.f32 %v7065_v61, %v7064_v60 }
0x1b25   : > { %v7067_v0 = vrot.slane %v7066_v63, 1 }
0x1b27   : > { %v7068_v2 = vadd.f32 %v7067_v0, %v7066_v63 }
0x1b29   : > { %11810 = vpush %v7068_v2 }
0x1b5a   : > { %s11811_s26 = spop %11810 }
0x1b5b   : > { %s7072_s27 = smul.f32 0.00048828125, %s11811_s26 }
0x1b5d   : > { %v7073_v4 = vstv %s7072_s27 }
0x1b5e   : > { %v7074_v10 = vsub.f32 %v7058_v35, %v7073_v4  ;;  %v7075_v7 = vsub.f32 %v7059_v53, %v7073_v4 }
0x1b60   : > { %v7076_v11 = vmul.f32 %v7074_v10, %v7074_v10  ;;  %v7077_v29 = vmul.f32 %v7075_v7, %v7075_v7 }
0x1b62   : > { %v7078_v51 = vadd.f32 %v7077_v29, %v7076_v11 }
0x1b64   : > { %7079 = vadd.xlane.f32.xlu1 %v7078_v51 }
0x1bed   : > { %v7080_v34 = vpop.xlane.xlu1 %7079 }
0x1bee   : > { %v7081_v28 = vrot.slane %v7080_v34, 4 }
0x1bf0   : > { %v7082_v55 = vadd.f32 %v7081_v28, %v7080_v34 }
0x1bf2   : > { %v7083_v8 = vrot.slane %v7082_v55, 2 }
0x1bf4   : > { %v7084_v5 = vadd.f32 %v7083_v8, %v7082_v55 }
0x1bf6   : > { %v7085_v42 = vrot.slane %v7084_v5, 1 }
0x1bf8   : > { %v7086_v13 = vadd.f32 %v7085_v42, %v7084_v5 }
0x1bfa   : > { %11812 = vpush %v7086_v13 }
0x1c2b   : > { %s11813_s28 = spop %11812 }
0x1c2c   : > { %s7090_s29 = smul.f32 0.00048828125, %s11813_s28 }
0x1c2e   : > { %s7091_s30 = sadd.f32 1e-05, %s7090_s29 }
0x1c30   : > { %v7092_v46 = vstv %s7091_s30 }
0x1c31   : > { %11843 = vrsqrt.f32 %v7092_v46 }
0x1c3e   : > { %v11844_v17 = vpop.eup %11843 }
0x1c3f   : > { %11814 = vpush %v11844_v17 }
0x1c70   : > { %s11815_s5 = spop %11814 }
0x1c71   : > { %v7095_v18 = vstv %s11815_s5 }
0x1c72   : > { %v7096_v1 = vmul.f32 %v7095_v18, %v7074_v10  ;;  %v7097_v19 = vmul.f32 %v7095_v18, %v7075_v7 }
0x1c74   : > { %v7105_v20 = vmul.f32 %v15349_v44, %v7096_v1  ;;  %v7106_v21 = vmul.f32 %v15349_v44, %v7097_v19 }
0x1c76   : > { %v7114_v48 = vadd.f32 %v15356_v49, %v7105_v20  ;;  %v7115_v62 = vadd.f32 %v15356_v49, %v7106_v21 }
0x1c78   : > { %v7116_v6 = vmax.f32 %v7114_v48, 0.0  ;;  %v7117_v22 = vmax.f32 %v7115_v62, 0.0 }
0x1c7a   : > { %7118 = vst [vmem:[%s197_s9] sm:$0xff] %v7116_v6  ;;  %7119 = vst [vmem:[%s197_s9 + $0x8] sm:$0xff] %v7117_v22 }
0x1c7b PF: > { %s14_s15 = sadd.s32 1, %s11853_s15  }
0x1c7c   : > { %p11_p4 = scmp.ge.s32.totalorder %s14_s15, 4  }
0x1c7e   :  { %13 = sbr.rel (!%p11_p4) target bundleno = 1 (0x1), region = 137 }

</bundles_post_ra>
